<compile_context>
chip_gen: v7x
topology: tpu7x:2x2x1
jax: 0.10.0
libtpu: 0.0.40
codegen_flags: <defaults>
</compile_context>

<pallas_src>
import functools

import jax
import jax.numpy as jnp
from jax import lax
from jax.experimental import pallas as pl
from jax.experimental.pallas import tpu as pltpu


def _round_up(x, m):
    return (x + m - 1) // m * m


def _vmem_limit_bytes(need):
    try:
        cap = int(pltpu.get_tpu_info().vmem_capacity_bytes)
    except Exception:
        cap = 64 << 20                      # conservative (v7x physical)
    return int(max(16 << 20, min(need + (4 << 20), int(cap * 0.7))))


# ----------------------------- Pallas kernel ------------------------------ #

def _conv_rows_kernel(w_ref, p_ref, x_ref, o_ref, *, stride, kh, kw, ho_n, wo_n,
                      hph, c_out, c_outp, use_ln, use_act, eps):
    """One batch sample of conv + bias (+ LayerNorm) (+ LeakyReLU).

    w_ref : (kh*kw, C_outp, C_inp)      bf16  per-tap weight matrices
    p_ref : (3, C_outp, 1)              f32   [bias, gamma, beta]
    x_ref : (1, s*s*Hph, C_inp, Wph)    bf16  stride-phase-split padded input
    o_ref : (1, Ho, C_outp, Wo)               output rows for this sample
    """
    # resident per-tap weights / per-channel params (tiny -> keep in vregs)
    wts = [w_ref[t] for t in range(kh * kw)]
    bias = p_ref[0]                                      # (C_outp, 1) f32
    if use_ln:
        gamma = p_ref[1]
        beta = p_ref[2]
    inv_c = 1.0 / float(c_out)

    for ho in range(ho_n):
        acc = jnp.zeros((c_outp, wo_n), jnp.float32)
        for di in range(kh):
            for dj in range(kw):
                pidx = (di % stride) * stride + (dj % stride)
                r = pidx * hph + ho + di // stride       # static row index
                c0 = dj // stride                        # static col offset
                row = x_ref[0, r, :, c0:c0 + wo_n]       # (C_inp, Wo) bf16
                acc = acc + jnp.dot(wts[di * kw + dj], row,
                                    preferred_element_type=jnp.float32)
        x = acc + bias
        if use_ln:
            # channels-first LayerNorm over C (sublane axis); padded channel
            # rows are exactly zero, so single-pass sums over the real channel
            # count are exact.
            mu = jnp.sum(x, axis=0, keepdims=True) * inv_c
            ex2 = jnp.sum(x * x, axis=0, keepdims=True) * inv_c
            var = jnp.maximum(ex2 - mu * mu, 0.0)
            x = (x - mu) * lax.rsqrt(var + eps)
            x = x * gamma + beta
        if use_act:
            x = jnp.where(x > 0, x, 0.2 * x)             # LeakyReLU(0.2)
        o_ref[0, ho, :, :] = x.astype(o_ref.dtype)


# ------------------------- stride-phase split (1x) ------------------------- #

def _phase_split_nhcw(a, stride, pad):
    """a: (N, H, C, W) -> (N, s*s*Hph, C, Wph): padded input split into stride
    phases (space-to-depth), stacked along H.  Tap (di, dj) becomes a
    contiguous window of phase (di%s)*s + (dj%s) at offsets (di//s, dj//s)."""
    N, H, C, W = a.shape
    s = stride
    Hp, Wp = H + 2 * pad, W + 2 * pad
    Hp2, Wp2 = _round_up(Hp, s), _round_up(Wp, s)
    ap = jnp.pad(a, ((0, 0), (pad, pad + Hp2 - Hp), (0, 0), (pad, pad + Wp2 - Wp)))
    phases = [ap[:, pi::s, :, pj::s] for pi in range(s) for pj in range(s)]
    xph = jnp.concatenate(phases, axis=1) if len(phases) > 1 else phases[0]
    return xph, (Hp2 // s, Wp2 // s)


# --------------------------- fused conv wrapper ---------------------------- #

def fused_conv2d(a, w, b, *, stride, pad, gamma=None, beta=None,
                 use_ln=False, use_act=False, eps=1e-6, out_dtype=jnp.bfloat16):
    """Conv2d(k=4) (+ channels-first LayerNorm + LeakyReLU) on an (N, H, C, W)
    activation whose trailing channels may be zero padding.  Returns
    (N, Ho, C_outp, Wo) with C_outp = round_up(C_out, 16); the padded output
    channels are exactly zero."""
    N, H, C_arr, W = a.shape
    C_out, C_in, kh, kw = w.shape
    assert C_in <= C_arr
    s = stride
    Ho = (H + 2 * pad - kh) // s + 1
    Wo = (W + 2 * pad - kw) // s + 1

    # ~1x phase-split padded input (replaces the 16x materialized im2col)
    x_ph, (Hph, Wph) = _phase_split_nhcw(a.astype(jnp.bfloat16), s, pad)
    assert Ho - 1 + (kh - 1) // s < Hph and (kw - 1) // s + Wo <= Wph

    # per-tap weight matrices: output channels padded to 16 (bf16 sublanes),
    # input channels zero-padded to the carried activation width.
    C_outp = _round_up(max(C_out, 16), 16)
    wt = jnp.transpose(w, (2, 3, 0, 1)).reshape(kh * kw, C_out, C_in)
    wt = jnp.pad(wt, ((0, 0), (0, C_outp - C_out), (0, C_arr - C_in)))
    wt = wt.astype(jnp.bfloat16)

    def _vec(v, fill):
        v = v if v is not None else jnp.full((C_out,), fill, jnp.float32)
        return jnp.pad(v.astype(jnp.float32), (0, C_outp - C_out))

    prm = jnp.stack([_vec(b, 0.0), _vec(gamma, 1.0), _vec(beta, 0.0)])
    prm = prm.reshape(3, C_outp, 1)

    kernel = functools.partial(
        _conv_rows_kernel, stride=s, kh=kh, kw=kw, ho_n=Ho, wo_n=Wo, hph=Hph,
        c_out=C_out, c_outp=C_outp, use_ln=use_ln, use_act=use_act, eps=eps)

    ssh = int(x_ph.shape[1])
    need = (2 * int(wt.size) * 2 + 2 * int(prm.size) * 4
            + 2 * ssh * C_arr * Wph * 2
            + 2 * Ho * C_outp * Wo * jnp.dtype(out_dtype).itemsize)

    out = pl.pallas_call(
        kernel,
        out_shape=jax.ShapeDtypeStruct((N, Ho, C_outp, Wo), out_dtype),
        grid_spec=pltpu.PrefetchScalarGridSpec(
            num_scalar_prefetch=0,
            grid=(N,),
            in_specs=[
                pl.BlockSpec((kh * kw, C_outp, C_arr), lambda n: (0, 0, 0)),
                pl.BlockSpec((3, C_outp, 1), lambda n: (0, 0, 0)),
                pl.BlockSpec((1, ssh, C_arr, Wph), lambda n: (n, 0, 0, 0)),
            ],
            out_specs=pl.BlockSpec((1, Ho, C_outp, Wo), lambda n: (n, 0, 0, 0)),
        ),
        compiler_params=pltpu.CompilerParams(
            dimension_semantics=("parallel",),
            vmem_limit_bytes=_vmem_limit_bytes(need),
        ),
    )(wt, prm, x_ph)
    return out


# --------------------------- parameter setup ------------------------------ #

def _trunc_normal(key, shape, std=0.02):
    return std * jax.random.truncated_normal(key, -2.0, 2.0, shape, jnp.float32)


def init_discriminator(key, args):
    c_in, ndf, n_layers = args['c_in'], args['ndf'], args['n_down']
    kw = 4
    params = {'encoder': []}
    key, k = jax.random.split(key)
    # first conv: Conv2d(c_in, ndf, 4, stride 2, pad 1) + LeakyReLU
    params['encoder'].append(dict(
        w=_trunc_normal(k, (ndf, c_in, kw, kw)),
        b=jnp.zeros((ndf,), jnp.float32),
        ln=None))
    nf_mult = 1
    for n in range(1, n_layers - 1):
        nf_mult_prev = nf_mult
        nf_mult = min(2 ** n, 8)
        key, k = jax.random.split(key)
        params['encoder'].append(dict(
            w=_trunc_normal(k, (ndf * nf_mult, ndf * nf_mult_prev, kw, kw)),
            b=jnp.zeros((ndf * nf_mult,), jnp.float32),
            ln=dict(gamma=jnp.ones((ndf * nf_mult,), jnp.float32),
                    beta=jnp.zeros((ndf * nf_mult,), jnp.float32))))
    key, k = jax.random.split(key)
    params['conv_out'] = dict(
        w=_trunc_normal(k, (1, ndf * nf_mult, kw, kw)),
        b=jnp.zeros((1,), jnp.float32))
    return params


# ------------------------------- forward ----------------------------------- #

def nlayer_discriminator_forward(params, x, s):
    # NCHW at the module boundary; carry (N, H, C, W) between layers so each
    # kernel's output feeds the next layer's phase split without transposes.
    a = jnp.transpose(x, (0, 2, 1, 3)).astype(jnp.bfloat16)
    c0 = a.shape[2]
    if c0 % 8:                                            # pad input channels
        a = jnp.pad(a, ((0, 0), (0, 0), (0, _round_up(c0, 8) - c0), (0, 0)))
    for layer in params['encoder']:
        ln = layer['ln']
        a = fused_conv2d(a, layer['w'], layer['b'], stride=2, pad=1,
                         gamma=None if ln is None else ln['gamma'],
                         beta=None if ln is None else ln['beta'],
                         use_ln=ln is not None, use_act=True,
                         out_dtype=jnp.bfloat16)
    # TODO(synk): hyperAttnResBlock is not defined in the source module;
    # features pass through unchanged (style vector `s` unused).
    a = fused_conv2d(a, params['conv_out']['w'], params['conv_out']['b'],
                     stride=1, pad=1, use_ln=False, use_act=False,
                     out_dtype=jnp.float32)
    out = a[:, :, :1, :]                                  # drop padded channels
    return jnp.transpose(out, (0, 2, 1, 3))               # NHCW -> NCHW


# ------------------------------ reference ---------------------------------- #

def _ref_conv(x, w, b, stride, pad):
    y = lax.conv_general_dilated(
        x, w, (stride, stride), [(pad, pad), (pad, pad)],
        dimension_numbers=('NCHW', 'OIHW', 'NCHW'))
    return y + b[None, :, None, None]


def _ref_forward(params, x, s):
    for layer in params['encoder']:
        x = _ref_conv(x, layer['w'], layer['b'], 2, 1)
        if layer['ln'] is not None:
            mu = jnp.mean(x, axis=1, keepdims=True)
            var = jnp.mean(jnp.square(x - mu), axis=1, keepdims=True)
            x = (x - mu) * lax.rsqrt(var + 1e-6)
            x = (x * layer['ln']['gamma'][None, :, None, None]
                 + layer['ln']['beta'][None, :, None, None])
        x = jnp.where(x > 0, x, 0.2 * x)
    x = _ref_conv(x, params['conv_out']['w'], params['conv_out']['b'], 1, 1)
    return x


# --------------------------------- main ------------------------------------ #

if __name__ == "__main__":
    args = dict(embed_dim=32, layer_scale_init_value=1e-6, c_in=4, ndf=8,
                n_down=3, n_hyper=1, latent_dim=16)

    key = jax.random.PRNGKey(0)
    kp, kx, ks = jax.random.split(key, 3)
    params = init_discriminator(kp, args)

    x = jax.random.normal(kx, (2, args['c_in'], 16, 16), jnp.float32)  # NCHW
    s = jax.random.normal(ks, (2, args['embed_dim']), jnp.float32)      # style vec

    fwd = jax.jit(nlayer_discriminator_forward)
    out = jax.block_until_ready(fwd(params, x, s))

    ref = jax.block_until_ready(_ref_forward(params, x, s))
    assert out.shape == ref.shape == (2, 1, 3, 3), out.shape
    err = float(jnp.max(jnp.abs(out - ref)))
    assert err < 3e-2, err        # bf16 matmuls + bf16 intermediate activations

    print("KERNEL_OK")
</pallas_src>

<mosaic_0001>
module attributes {stable_mosaic.version = 11 : i64} {
  func.func @_conv_rows_kernel(%arg0: i32, %arg1: memref<16x16x8xbf16, #tpu.memory_space<vmem>>, %arg2: memref<3x16x1xf32, #tpu.memory_space<vmem>>, %arg3: memref<1x36x8x9xbf16, #tpu.memory_space<vmem>>, %arg4: memref<1x8x16x8xbf16, #tpu.memory_space<vmem>>) attributes {dimension_semantics = [#tpu.dimension_semantics<parallel>], iteration_bounds = array<i64: 2>, scalar_prefetch = 0 : i64, scratch_operands = 0 : i64, tpu.core_type = #tpu.core_type<tc>, window_params = [{pipeline_mode = #tpu.pipeline_mode<synchronous>, transform_indices = @transform_0, window_bounds = array<i64: 16, 16, 8>}, {pipeline_mode = #tpu.pipeline_mode<synchronous>, transform_indices = @transform_1, window_bounds = array<i64: 3, 16, 1>}, {transform_indices = @transform_2, window_bounds = array<i64: 1, 36, 8, 9>}, {transform_indices = @transform_3, window_bounds = array<i64: 1, 8, 16, 8>}]} {
    %c0 = arith.constant 0 : index
    %c0_0 = arith.constant 0 : index
    %c0_1 = arith.constant 0 : index
    %0 = vector.load %arg1[%c0, %c0_0, %c0_1] : memref<16x16x8xbf16, #tpu.memory_space<vmem>>, vector<1x16x8xbf16>
    %1 = vector.shape_cast %0 : vector<1x16x8xbf16> to vector<16x8xbf16>
    %c1 = arith.constant 1 : index
    %c0_2 = arith.constant 0 : index
    %c0_3 = arith.constant 0 : index
    %2 = vector.load %arg1[%c1, %c0_2, %c0_3] : memref<16x16x8xbf16, #tpu.memory_space<vmem>>, vector<1x16x8xbf16>
    %3 = vector.shape_cast %2 : vector<1x16x8xbf16> to vector<16x8xbf16>
    %c2 = arith.constant 2 : index
    %c0_4 = arith.constant 0 : index
    %c0_5 = arith.constant 0 : index
    %4 = vector.load %arg1[%c2, %c0_4, %c0_5] : memref<16x16x8xbf16, #tpu.memory_space<vmem>>, vector<1x16x8xbf16>
    %5 = vector.shape_cast %4 : vector<1x16x8xbf16> to vector<16x8xbf16>
    %c3 = arith.constant 3 : index
    %c0_6 = arith.constant 0 : index
    %c0_7 = arith.constant 0 : index
    %6 = vector.load %arg1[%c3, %c0_6, %c0_7] : memref<16x16x8xbf16, #tpu.memory_space<vmem>>, vector<1x16x8xbf16>
    %7 = vector.shape_cast %6 : vector<1x16x8xbf16> to vector<16x8xbf16>
    %c4 = arith.constant 4 : index
    %c0_8 = arith.constant 0 : index
    %c0_9 = arith.constant 0 : index
    %8 = vector.load %arg1[%c4, %c0_8, %c0_9] : memref<16x16x8xbf16, #tpu.memory_space<vmem>>, vector<1x16x8xbf16>
    %9 = vector.shape_cast %8 : vector<1x16x8xbf16> to vector<16x8xbf16>
    %c5 = arith.constant 5 : index
    %c0_10 = arith.constant 0 : index
    %c0_11 = arith.constant 0 : index
    %10 = vector.load %arg1[%c5, %c0_10, %c0_11] : memref<16x16x8xbf16, #tpu.memory_space<vmem>>, vector<1x16x8xbf16>
    %11 = vector.shape_cast %10 : vector<1x16x8xbf16> to vector<16x8xbf16>
    %c6 = arith.constant 6 : index
    %c0_12 = arith.constant 0 : index
    %c0_13 = arith.constant 0 : index
    %12 = vector.load %arg1[%c6, %c0_12, %c0_13] : memref<16x16x8xbf16, #tpu.memory_space<vmem>>, vector<1x16x8xbf16>
    %13 = vector.shape_cast %12 : vector<1x16x8xbf16> to vector<16x8xbf16>
    %c7 = arith.constant 7 : index
    %c0_14 = arith.constant 0 : index
    %c0_15 = arith.constant 0 : index
    %14 = vector.load %arg1[%c7, %c0_14, %c0_15] : memref<16x16x8xbf16, #tpu.memory_space<vmem>>, vector<1x16x8xbf16>
    %15 = vector.shape_cast %14 : vector<1x16x8xbf16> to vector<16x8xbf16>
    %c8 = arith.constant 8 : index
    %c0_16 = arith.constant 0 : index
    %c0_17 = arith.constant 0 : index
    %16 = vector.load %arg1[%c8, %c0_16, %c0_17] : memref<16x16x8xbf16, #tpu.memory_space<vmem>>, vector<1x16x8xbf16>
    %17 = vector.shape_cast %16 : vector<1x16x8xbf16> to vector<16x8xbf16>
    %c9 = arith.constant 9 : index
    %c0_18 = arith.constant 0 : index
    %c0_19 = arith.constant 0 : index
    %18 = vector.load %arg1[%c9, %c0_18, %c0_19] : memref<16x16x8xbf16, #tpu.memory_space<vmem>>, vector<1x16x8xbf16>
    %19 = vector.shape_cast %18 : vector<1x16x8xbf16> to vector<16x8xbf16>
    %c10 = arith.constant 10 : index
    %c0_20 = arith.constant 0 : index
    %c0_21 = arith.constant 0 : index
    %20 = vector.load %arg1[%c10, %c0_20, %c0_21] : memref<16x16x8xbf16, #tpu.memory_space<vmem>>, vector<1x16x8xbf16>
    %21 = vector.shape_cast %20 : vector<1x16x8xbf16> to vector<16x8xbf16>
    %c11 = arith.constant 11 : index
    %c0_22 = arith.constant 0 : index
    %c0_23 = arith.constant 0 : index
    %22 = vector.load %arg1[%c11, %c0_22, %c0_23] : memref<16x16x8xbf16, #tpu.memory_space<vmem>>, vector<1x16x8xbf16>
    %23 = vector.shape_cast %22 : vector<1x16x8xbf16> to vector<16x8xbf16>
    %c12 = arith.constant 12 : index
    %c0_24 = arith.constant 0 : index
    %c0_25 = arith.constant 0 : index
    %24 = vector.load %arg1[%c12, %c0_24, %c0_25] : memref<16x16x8xbf16, #tpu.memory_space<vmem>>, vector<1x16x8xbf16>
    %25 = vector.shape_cast %24 : vector<1x16x8xbf16> to vector<16x8xbf16>
    %c13 = arith.constant 13 : index
    %c0_26 = arith.constant 0 : index
    %c0_27 = arith.constant 0 : index
    %26 = vector.load %arg1[%c13, %c0_26, %c0_27] : memref<16x16x8xbf16, #tpu.memory_space<vmem>>, vector<1x16x8xbf16>
    %27 = vector.shape_cast %26 : vector<1x16x8xbf16> to vector<16x8xbf16>
    %c14 = arith.constant 14 : index
    %c0_28 = arith.constant 0 : index
    %c0_29 = arith.constant 0 : index
    %28 = vector.load %arg1[%c14, %c0_28, %c0_29] : memref<16x16x8xbf16, #tpu.memory_space<vmem>>, vector<1x16x8xbf16>
    %29 = vector.shape_cast %28 : vector<1x16x8xbf16> to vector<16x8xbf16>
    %c15 = arith.constant 15 : index
    %c0_30 = arith.constant 0 : index
    %c0_31 = arith.constant 0 : index
    %30 = vector.load %arg1[%c15, %c0_30, %c0_31] : memref<16x16x8xbf16, #tpu.memory_space<vmem>>, vector<1x16x8xbf16>
    %31 = vector.shape_cast %30 : vector<1x16x8xbf16> to vector<16x8xbf16>
    %c0_32 = arith.constant 0 : index
    %c0_33 = arith.constant 0 : index
    %c0_34 = arith.constant 0 : index
    %32 = vector.load %arg2[%c0_32, %c0_33, %c0_34] : memref<3x16x1xf32, #tpu.memory_space<vmem>>, vector<1x16x1xf32>
    %33 = vector.shape_cast %32 : vector<1x16x1xf32> to vector<16x1xf32>
    %cst = arith.constant 0.000000e+00 : f32
    %34 = vector.broadcast %cst : f32 to vector<16x8xf32>
    %c0_35 = arith.constant 0 : index
    %c0_36 = arith.constant 0 : index
    %c0_37 = arith.constant 0 : index
    %c0_38 = arith.constant 0 : index
    %35 = vector.load %arg3[%c0_35, %c0_36, %c0_37, %c0_38] : memref<1x36x8x9xbf16, #tpu.memory_space<vmem>>, vector<1x1x8x8xbf16>
    %36 = vector.shape_cast %35 : vector<1x1x8x8xbf16> to vector<8x8xbf16>
    %cst_39 = arith.constant dense<0.000000e+00> : vector<16x8xf32>
    %37 = tpu.matmul %1, %36, %cst_39 {dimension_numbers = #tpu.dot_dimension_numbers<[1], [0], [0], [1], [0, 0, 1, 1], [], []>} : vector<16x8xbf16>, vector<8x8xbf16>, vector<16x8xf32> -> vector<16x8xf32>
    %38 = arith.addf %34, %37 : vector<16x8xf32>
    %c0_40 = arith.constant 0 : index
    %c9_41 = arith.constant 9 : index
    %c0_42 = arith.constant 0 : index
    %c0_43 = arith.constant 0 : index
    %39 = vector.load %arg3[%c0_40, %c9_41, %c0_42, %c0_43] : memref<1x36x8x9xbf16, #tpu.memory_space<vmem>>, vector<1x1x8x8xbf16>
    %40 = vector.shape_cast %39 : vector<1x1x8x8xbf16> to vector<8x8xbf16>
    %cst_44 = arith.constant dense<0.000000e+00> : vector<16x8xf32>
    %41 = tpu.matmul %3, %40, %cst_44 {dimension_numbers = #tpu.dot_dimension_numbers<[1], [0], [0], [1], [0, 0, 1, 1], [], []>} : vector<16x8xbf16>, vector<8x8xbf16>, vector<16x8xf32> -> vector<16x8xf32>
    %42 = arith.addf %38, %41 : vector<16x8xf32>
    %c0_45 = arith.constant 0 : index
    %c0_46 = arith.constant 0 : index
    %c0_47 = arith.constant 0 : index
    %c1_48 = arith.constant 1 : index
    %43 = vector.load %arg3[%c0_45, %c0_46, %c0_47, %c1_48] : memref<1x36x8x9xbf16, #tpu.memory_space<vmem>>, vector<1x1x8x8xbf16>
    %44 = vector.shape_cast %43 : vector<1x1x8x8xbf16> to vector<8x8xbf16>
    %cst_49 = arith.constant dense<0.000000e+00> : vector<16x8xf32>
    %45 = tpu.matmul %5, %44, %cst_49 {dimension_numbers = #tpu.dot_dimension_numbers<[1], [0], [0], [1], [0, 0, 1, 1], [], []>} : vector<16x8xbf16>, vector<8x8xbf16>, vector<16x8xf32> -> vector<16x8xf32>
    %46 = arith.addf %42, %45 : vector<16x8xf32>
    %c0_50 = arith.constant 0 : index
    %c9_51 = arith.constant 9 : index
    %c0_52 = arith.constant 0 : index
    %c1_53 = arith.constant 1 : index
    %47 = vector.load %arg3[%c0_50, %c9_51, %c0_52, %c1_53] : memref<1x36x8x9xbf16, #tpu.memory_space<vmem>>, vector<1x1x8x8xbf16>
    %48 = vector.shape_cast %47 : vector<1x1x8x8xbf16> to vector<8x8xbf16>
    %cst_54 = arith.constant dense<0.000000e+00> : vector<16x8xf32>
    %49 = tpu.matmul %7, %48, %cst_54 {dimension_numbers = #tpu.dot_dimension_numbers<[1], [0], [0], [1], [0, 0, 1, 1], [], []>} : vector<16x8xbf16>, vector<8x8xbf16>, vector<16x8xf32> -> vector<16x8xf32>
    %50 = arith.addf %46, %49 : vector<16x8xf32>
    %c0_55 = arith.constant 0 : index
    %c18 = arith.constant 18 : index
    %c0_56 = arith.constant 0 : index
    %c0_57 = arith.constant 0 : index
    %51 = vector.load %arg3[%c0_55, %c18, %c0_56, %c0_57] : memref<1x36x8x9xbf16, #tpu.memory_space<vmem>>, vector<1x1x8x8xbf16>
    %52 = vector.shape_cast %51 : vector<1x1x8x8xbf16> to vector<8x8xbf16>
    %cst_58 = arith.constant dense<0.000000e+00> : vector<16x8xf32>
    %53 = tpu.matmul %9, %52, %cst_58 {dimension_numbers = #tpu.dot_dimension_numbers<[1], [0], [0], [1], [0, 0, 1, 1], [], []>} : vector<16x8xbf16>, vector<8x8xbf16>, vector<16x8xf32> -> vector<16x8xf32>
    %54 = arith.addf %50, %53 : vector<16x8xf32>
    %c0_59 = arith.constant 0 : index
    %c27 = arith.constant 27 : index
    %c0_60 = arith.constant 0 : index
    %c0_61 = arith.constant 0 : index
    %55 = vector.load %arg3[%c0_59, %c27, %c0_60, %c0_61] : memref<1x36x8x9xbf16, #tpu.memory_space<vmem>>, vector<1x1x8x8xbf16>
    %56 = vector.shape_cast %55 : vector<1x1x8x8xbf16> to vector<8x8xbf16>
    %cst_62 = arith.constant dense<0.000000e+00> : vector<16x8xf32>
    %57 = tpu.matmul %11, %56, %cst_62 {dimension_numbers = #tpu.dot_dimension_numbers<[1], [0], [0], [1], [0, 0, 1, 1], [], []>} : vector<16x8xbf16>, vector<8x8xbf16>, vector<16x8xf32> -> vector<16x8xf32>
    %58 = arith.addf %54, %57 : vector<16x8xf32>
    %c0_63 = arith.constant 0 : index
    %c18_64 = arith.constant 18 : index
    %c0_65 = arith.constant 0 : index
    %c1_66 = arith.constant 1 : index
    %59 = vector.load %arg3[%c0_63, %c18_64, %c0_65, %c1_66] : memref<1x36x8x9xbf16, #tpu.memory_space<vmem>>, vector<1x1x8x8xbf16>
    %60 = vector.shape_cast %59 : vector<1x1x8x8xbf16> to vector<8x8xbf16>
    %cst_67 = arith.constant dense<0.000000e+00> : vector<16x8xf32>
    %61 = tpu.matmul %13, %60, %cst_67 {dimension_numbers = #tpu.dot_dimension_numbers<[1], [0], [0], [1], [0, 0, 1, 1], [], []>} : vector<16x8xbf16>, vector<8x8xbf16>, vector<16x8xf32> -> vector<16x8xf32>
    %62 = arith.addf %58, %61 : vector<16x8xf32>
    %c0_68 = arith.constant 0 : index
    %c27_69 = arith.constant 27 : index
    %c0_70 = arith.constant 0 : index
    %c1_71 = arith.constant 1 : index
    %63 = vector.load %arg3[%c0_68, %c27_69, %c0_70, %c1_71] : memref<1x36x8x9xbf16, #tpu.memory_space<vmem>>, vector<1x1x8x8xbf16>
    %64 = vector.shape_cast %63 : vector<1x1x8x8xbf16> to vector<8x8xbf16>
    %cst_72 = arith.constant dense<0.000000e+00> : vector<16x8xf32>
    %65 = tpu.matmul %15, %64, %cst_72 {dimension_numbers = #tpu.dot_dimension_numbers<[1], [0], [0], [1], [0, 0, 1, 1], [], []>} : vector<16x8xbf16>, vector<8x8xbf16>, vector<16x8xf32> -> vector<16x8xf32>
    %66 = arith.addf %62, %65 : vector<16x8xf32>
    %c0_73 = arith.constant 0 : index
    %c1_74 = arith.constant 1 : index
    %c0_75 = arith.constant 0 : index
    %c0_76 = arith.constant 0 : index
    %67 = vector.load %arg3[%c0_73, %c1_74, %c0_75, %c0_76] : memref<1x36x8x9xbf16, #tpu.memory_space<vmem>>, vector<1x1x8x8xbf16>
    %68 = vector.shape_cast %67 : vector<1x1x8x8xbf16> to vector<8x8xbf16>
    %cst_77 = arith.constant dense<0.000000e+00> : vector<16x8xf32>
    %69 = tpu.matmul %17, %68, %cst_77 {dimension_numbers = #tpu.dot_dimension_numbers<[1], [0], [0], [1], [0, 0, 1, 1], [], []>} : vector<16x8xbf16>, vector<8x8xbf16>, vector<16x8xf32> -> vector<16x8xf32>
    %70 = arith.addf %66, %69 : vector<16x8xf32>
    %c0_78 = arith.constant 0 : index
    %c10_79 = arith.constant 10 : index
    %c0_80 = arith.constant 0 : index
    %c0_81 = arith.constant 0 : index
    %71 = vector.load %arg3[%c0_78, %c10_79, %c0_80, %c0_81] : memref<1x36x8x9xbf16, #tpu.memory_space<vmem>>, vector<1x1x8x8xbf16>
    %72 = vector.shape_cast %71 : vector<1x1x8x8xbf16> to vector<8x8xbf16>
    %cst_82 = arith.constant dense<0.000000e+00> : vector<16x8xf32>
    %73 = tpu.matmul %19, %72, %cst_82 {dimension_numbers = #tpu.dot_dimension_numbers<[1], [0], [0], [1], [0, 0, 1, 1], [], []>} : vector<16x8xbf16>, vector<8x8xbf16>, vector<16x8xf32> -> vector<16x8xf32>
    %74 = arith.addf %70, %73 : vector<16x8xf32>
    %c0_83 = arith.constant 0 : index
    %c1_84 = arith.constant 1 : index
    %c0_85 = arith.constant 0 : index
    %c1_86 = arith.constant 1 : index
    %75 = vector.load %arg3[%c0_83, %c1_84, %c0_85, %c1_86] : memref<1x36x8x9xbf16, #tpu.memory_space<vmem>>, vector<1x1x8x8xbf16>
    %76 = vector.shape_cast %75 : vector<1x1x8x8xbf16> to vector<8x8xbf16>
    %cst_87 = arith.constant dense<0.000000e+00> : vector<16x8xf32>
    %77 = tpu.matmul %21, %76, %cst_87 {dimension_numbers = #tpu.dot_dimension_numbers<[1], [0], [0], [1], [0, 0, 1, 1], [], []>} : vector<16x8xbf16>, vector<8x8xbf16>, vector<16x8xf32> -> vector<16x8xf32>
    %78 = arith.addf %74, %77 : vector<16x8xf32>
    %c0_88 = arith.constant 0 : index
    %c10_89 = arith.constant 10 : index
    %c0_90 = arith.constant 0 : index
    %c1_91 = arith.constant 1 : index
    %79 = vector.load %arg3[%c0_88, %c10_89, %c0_90, %c1_91] : memref<1x36x8x9xbf16, #tpu.memory_space<vmem>>, vector<1x1x8x8xbf16>
    %80 = vector.shape_cast %79 : vector<1x1x8x8xbf16> to vector<8x8xbf16>
    %cst_92 = arith.constant dense<0.000000e+00> : vector<16x8xf32>
    %81 = tpu.matmul %23, %80, %cst_92 {dimension_numbers = #tpu.dot_dimension_numbers<[1], [0], [0], [1], [0, 0, 1, 1], [], []>} : vector<16x8xbf16>, vector<8x8xbf16>, vector<16x8xf32> -> vector<16x8xf32>
    %82 = arith.addf %78, %81 : vector<16x8xf32>
    %c0_93 = arith.constant 0 : index
    %c19 = arith.constant 19 : index
    %c0_94 = arith.constant 0 : index
    %c0_95 = arith.constant 0 : index
    %83 = vector.load %arg3[%c0_93, %c19, %c0_94, %c0_95] : memref<1x36x8x9xbf16, #tpu.memory_space<vmem>>, vector<1x1x8x8xbf16>
    %84 = vector.shape_cast %83 : vector<1x1x8x8xbf16> to vector<8x8xbf16>
    %cst_96 = arith.constant dense<0.000000e+00> : vector<16x8xf32>
    %85 = tpu.matmul %25, %84, %cst_96 {dimension_numbers = #tpu.dot_dimension_numbers<[1], [0], [0], [1], [0, 0, 1, 1], [], []>} : vector<16x8xbf16>, vector<8x8xbf16>, vector<16x8xf32> -> vector<16x8xf32>
    %86 = arith.addf %82, %85 : vector<16x8xf32>
    %c0_97 = arith.constant 0 : index
    %c28 = arith.constant 28 : index
    %c0_98 = arith.constant 0 : index
    %c0_99 = arith.constant 0 : index
    %87 = vector.load %arg3[%c0_97, %c28, %c0_98, %c0_99] : memref<1x36x8x9xbf16, #tpu.memory_space<vmem>>, vector<1x1x8x8xbf16>
    %88 = vector.shape_cast %87 : vector<1x1x8x8xbf16> to vector<8x8xbf16>
    %cst_100 = arith.constant dense<0.000000e+00> : vector<16x8xf32>
    %89 = tpu.matmul %27, %88, %cst_100 {dimension_numbers = #tpu.dot_dimension_numbers<[1], [0], [0], [1], [0, 0, 1, 1], [], []>} : vector<16x8xbf16>, vector<8x8xbf16>, vector<16x8xf32> -> vector<16x8xf32>
    %90 = arith.addf %86, %89 : vector<16x8xf32>
    %c0_101 = arith.constant 0 : index
    %c19_102 = arith.constant 19 : index
    %c0_103 = arith.constant 0 : index
    %c1_104 = arith.constant 1 : index
    %91 = vector.load %arg3[%c0_101, %c19_102, %c0_103, %c1_104] : memref<1x36x8x9xbf16, #tpu.memory_space<vmem>>, vector<1x1x8x8xbf16>
    %92 = vector.shape_cast %91 : vector<1x1x8x8xbf16> to vector<8x8xbf16>
    %cst_105 = arith.constant dense<0.000000e+00> : vector<16x8xf32>
    %93 = tpu.matmul %29, %92, %cst_105 {dimension_numbers = #tpu.dot_dimension_numbers<[1], [0], [0], [1], [0, 0, 1, 1], [], []>} : vector<16x8xbf16>, vector<8x8xbf16>, vector<16x8xf32> -> vector<16x8xf32>
    %94 = arith.addf %90, %93 : vector<16x8xf32>
    %c0_106 = arith.constant 0 : index
    %c28_107 = arith.constant 28 : index
    %c0_108 = arith.constant 0 : index
    %c1_109 = arith.constant 1 : index
    %95 = vector.load %arg3[%c0_106, %c28_107, %c0_108, %c1_109] : memref<1x36x8x9xbf16, #tpu.memory_space<vmem>>, vector<1x1x8x8xbf16>
    %96 = vector.shape_cast %95 : vector<1x1x8x8xbf16> to vector<8x8xbf16>
    %cst_110 = arith.constant dense<0.000000e+00> : vector<16x8xf32>
    %97 = tpu.matmul %31, %96, %cst_110 {dimension_numbers = #tpu.dot_dimension_numbers<[1], [0], [0], [1], [0, 0, 1, 1], [], []>} : vector<16x8xbf16>, vector<8x8xbf16>, vector<16x8xf32> -> vector<16x8xf32>
    %98 = arith.addf %94, %97 : vector<16x8xf32>
    %99 = vector.broadcast %33 : vector<16x1xf32> to vector<16x8xf32>
    %100 = arith.addf %98, %99 : vector<16x8xf32>
    %cst_111 = arith.constant 0.000000e+00 : f32
    %101 = vector.broadcast %cst_111 : f32 to vector<16x8xf32>
    %102 = arith.cmpf ogt, %100, %101 : vector<16x8xf32>
    %cst_112 = arith.constant 2.000000e-01 : f32
    %103 = vector.broadcast %cst_112 : f32 to vector<16x8xf32>
    %104 = arith.mulf %103, %100 : vector<16x8xf32>
    %105 = arith.select %102, %100, %104 : vector<16x8xi1>, vector<16x8xf32>
    %106 = arith.truncf %105 : vector<16x8xf32> to vector<16x8xbf16>
    %c0_113 = arith.constant 0 : index
    %c0_114 = arith.constant 0 : index
    %c0_115 = arith.constant 0 : index
    %c0_116 = arith.constant 0 : index
    %107 = vector.load %arg4[%c0_113, %c0_114, %c0_115, %c0_116] : memref<1x8x16x8xbf16, #tpu.memory_space<vmem>>, vector<1x1x16x8xbf16>
    %108 = vector.shape_cast %107 : vector<1x1x16x8xbf16> to vector<16x8xbf16>
    %109 = vector.shape_cast %106 : vector<16x8xbf16> to vector<1x1x16x8xbf16>
    tpu.vector_store %arg4[%c0_113, %c0_114, %c0_115, %c0_116], %109 {strides = array<i32>} : memref<1x8x16x8xbf16, #tpu.memory_space<vmem>>, vector<1x1x16x8xbf16>,
    %cst_117 = arith.constant 0.000000e+00 : f32
    %110 = vector.broadcast %cst_117 : f32 to vector<16x8xf32>
    %c0_118 = arith.constant 0 : index
    %c1_119 = arith.constant 1 : index
    %c0_120 = arith.constant 0 : index
    %c0_121 = arith.constant 0 : index
    %111 = vector.load %arg3[%c0_118, %c1_119, %c0_120, %c0_121] : memref<1x36x8x9xbf16, #tpu.memory_space<vmem>>, vector<1x1x8x8xbf16>
    %112 = vector.shape_cast %111 : vector<1x1x8x8xbf16> to vector<8x8xbf16>
    %cst_122 = arith.constant dense<0.000000e+00> : vector<16x8xf32>
    %113 = tpu.matmul %1, %112, %cst_122 {dimension_numbers = #tpu.dot_dimension_numbers<[1], [0], [0], [1], [0, 0, 1, 1], [], []>} : vector<16x8xbf16>, vector<8x8xbf16>, vector<16x8xf32> -> vector<16x8xf32>
    %114 = arith.addf %110, %113 : vector<16x8xf32>
    %c0_123 = arith.constant 0 : index
    %c10_124 = arith.constant 10 : index
    %c0_125 = arith.constant 0 : index
    %c0_126 = arith.constant 0 : index
    %115 = vector.load %arg3[%c0_123, %c10_124, %c0_125, %c0_126] : memref<1x36x8x9xbf16, #tpu.memory_space<vmem>>, vector<1x1x8x8xbf16>
    %116 = vector.shape_cast %115 : vector<1x1x8x8xbf16> to vector<8x8xbf16>
    %cst_127 = arith.constant dense<0.000000e+00> : vector<16x8xf32>
    %117 = tpu.matmul %3, %116, %cst_127 {dimension_numbers = #tpu.dot_dimension_numbers<[1], [0], [0], [1], [0, 0, 1, 1], [], []>} : vector<16x8xbf16>, vector<8x8xbf16>, vector<16x8xf32> -> vector<16x8xf32>
    %118 = arith.addf %114, %117 : vector<16x8xf32>
    %c0_128 = arith.constant 0 : index
    %c1_129 = arith.constant 1 : index
    %c0_130 = arith.constant 0 : index
    %c1_131 = arith.constant 1 : index
    %119 = vector.load %arg3[%c0_128, %c1_129, %c0_130, %c1_131] : memref<1x36x8x9xbf16, #tpu.memory_space<vmem>>, vector<1x1x8x8xbf16>
    %120 = vector.shape_cast %119 : vector<1x1x8x8xbf16> to vector<8x8xbf16>
    %cst_132 = arith.constant dense<0.000000e+00> : vector<16x8xf32>
    %121 = tpu.matmul %5, %120, %cst_132 {dimension_numbers = #tpu.dot_dimension_numbers<[1], [0], [0], [1], [0, 0, 1, 1], [], []>} : vector<16x8xbf16>, vector<8x8xbf16>, vector<16x8xf32> -> vector<16x8xf32>
    %122 = arith.addf %118, %121 : vector<16x8xf32>
    %c0_133 = arith.constant 0 : index
    %c10_134 = arith.constant 10 : index
    %c0_135 = arith.constant 0 : index
    %c1_136 = arith.constant 1 : index
    %123 = vector.load %arg3[%c0_133, %c10_134, %c0_135, %c1_136] : memref<1x36x8x9xbf16, #tpu.memory_space<vmem>>, vector<1x1x8x8xbf16>
    %124 = vector.shape_cast %123 : vector<1x1x8x8xbf16> to vector<8x8xbf16>
    %cst_137 = arith.constant dense<0.000000e+00> : vector<16x8xf32>
    %125 = tpu.matmul %7, %124, %cst_137 {dimension_numbers = #tpu.dot_dimension_numbers<[1], [0], [0], [1], [0, 0, 1, 1], [], []>} : vector<16x8xbf16>, vector<8x8xbf16>, vector<16x8xf32> -> vector<16x8xf32>
    %126 = arith.addf %122, %125 : vector<16x8xf32>
    %c0_138 = arith.constant 0 : index
    %c19_139 = arith.constant 19 : index
    %c0_140 = arith.constant 0 : index
    %c0_141 = arith.constant 0 : index
    %127 = vector.load %arg3[%c0_138, %c19_139, %c0_140, %c0_141] : memref<1x36x8x9xbf16, #tpu.memory_space<vmem>>, vector<1x1x8x8xbf16>
    %128 = vector.shape_cast %127 : vector<1x1x8x8xbf16> to vector<8x8xbf16>
    %cst_142 = arith.constant dense<0.000000e+00> : vector<16x8xf32>
    %129 = tpu.matmul %9, %128, %cst_142 {dimension_numbers = #tpu.dot_dimension_numbers<[1], [0], [0], [1], [0, 0, 1, 1], [], []>} : vector<16x8xbf16>, vector<8x8xbf16>, vector<16x8xf32> -> vector<16x8xf32>
    %130 = arith.addf %126, %129 : vector<16x8xf32>
    %c0_143 = arith.constant 0 : index
    %c28_144 = arith.constant 28 : index
    %c0_145 = arith.constant 0 : index
    %c0_146 = arith.constant 0 : index
    %131 = vector.load %arg3[%c0_143, %c28_144, %c0_145, %c0_146] : memref<1x36x8x9xbf16, #tpu.memory_space<vmem>>, vector<1x1x8x8xbf16>
    %132 = vector.shape_cast %131 : vector<1x1x8x8xbf16> to vector<8x8xbf16>
    %cst_147 = arith.constant dense<0.000000e+00> : vector<16x8xf32>
    %133 = tpu.matmul %11, %132, %cst_147 {dimension_numbers = #tpu.dot_dimension_numbers<[1], [0], [0], [1], [0, 0, 1, 1], [], []>} : vector<16x8xbf16>, vector<8x8xbf16>, vector<16x8xf32> -> vector<16x8xf32>
    %134 = arith.addf %130, %133 : vector<16x8xf32>
    %c0_148 = arith.constant 0 : index
    %c19_149 = arith.constant 19 : index
    %c0_150 = arith.constant 0 : index
    %c1_151 = arith.constant 1 : index
    %135 = vector.load %arg3[%c0_148, %c19_149, %c0_150, %c1_151] : memref<1x36x8x9xbf16, #tpu.memory_space<vmem>>, vector<1x1x8x8xbf16>
    %136 = vector.shape_cast %135 : vector<1x1x8x8xbf16> to vector<8x8xbf16>
    %cst_152 = arith.constant dense<0.000000e+00> : vector<16x8xf32>
    %137 = tpu.matmul %13, %136, %cst_152 {dimension_numbers = #tpu.dot_dimension_numbers<[1], [0], [0], [1], [0, 0, 1, 1], [], []>} : vector<16x8xbf16>, vector<8x8xbf16>, vector<16x8xf32> -> vector<16x8xf32>
    %138 = arith.addf %134, %137 : vector<16x8xf32>
    %c0_153 = arith.constant 0 : index
    %c28_154 = arith.constant 28 : index
    %c0_155 = arith.constant 0 : index
    %c1_156 = arith.constant 1 : index
    %139 = vector.load %arg3[%c0_153, %c28_154, %c0_155, %c1_156] : memref<1x36x8x9xbf16, #tpu.memory_space<vmem>>, vector<1x1x8x8xbf16>
    %140 = vector.shape_cast %139 : vector<1x1x8x8xbf16> to vector<8x8xbf16>
    %cst_157 = arith.constant dense<0.000000e+00> : vector<16x8xf32>
    %141 = tpu.matmul %15, %140, %cst_157 {dimension_numbers = #tpu.dot_dimension_numbers<[1], [0], [0], [1], [0, 0, 1, 1], [], []>} : vector<16x8xbf16>, vector<8x8xbf16>, vector<16x8xf32> -> vector<16x8xf32>
    %142 = arith.addf %138, %141 : vector<16x8xf32>
    %c0_158 = arith.constant 0 : index
    %c2_159 = arith.constant 2 : index
    %c0_160 = arith.constant 0 : index
    %c0_161 = arith.constant 0 : index
    %143 = vector.load %arg3[%c0_158, %c2_159, %c0_160, %c0_161] : memref<1x36x8x9xbf16, #tpu.memory_space<vmem>>, vector<1x1x8x8xbf16>
    %144 = vector.shape_cast %143 : vector<1x1x8x8xbf16> to vector<8x8xbf16>
    %cst_162 = arith.constant dense<0.000000e+00> : vector<16x8xf32>
    %145 = tpu.matmul %17, %144, %cst_162 {dimension_numbers = #tpu.dot_dimension_numbers<[1], [0], [0], [1], [0, 0, 1, 1], [], []>} : vector<16x8xbf16>, vector<8x8xbf16>, vector<16x8xf32> -> vector<16x8xf32>
    %146 = arith.addf %142, %145 : vector<16x8xf32>
    %c0_163 = arith.constant 0 : index
    %c11_164 = arith.constant 11 : index
    %c0_165 = arith.constant 0 : index
    %c0_166 = arith.constant 0 : index
    %147 = vector.load %arg3[%c0_163, %c11_164, %c0_165, %c0_166] : memref<1x36x8x9xbf16, #tpu.memory_space<vmem>>, vector<1x1x8x8xbf16>
    %148 = vector.shape_cast %147 : vector<1x1x8x8xbf16> to vector<8x8xbf16>
    %cst_167 = arith.constant dense<0.000000e+00> : vector<16x8xf32>
    %149 = tpu.matmul %19, %148, %cst_167 {dimension_numbers = #tpu.dot_dimension_numbers<[1], [0], [0], [1], [0, 0, 1, 1], [], []>} : vector<16x8xbf16>, vector<8x8xbf16>, vector<16x8xf32> -> vector<16x8xf32>
    %150 = arith.addf %146, %149 : vector<16x8xf32>
    %c0_168 = arith.constant 0 : index
    %c2_169 = arith.constant 2 : index
    %c0_170 = arith.constant 0 : index
    %c1_171 = arith.constant 1 : index
    %151 = vector.load %arg3[%c0_168, %c2_169, %c0_170, %c1_171] : memref<1x36x8x9xbf16, #tpu.memory_space<vmem>>, vector<1x1x8x8xbf16>
    %152 = vector.shape_cast %151 : vector<1x1x8x8xbf16> to vector<8x8xbf16>
    %cst_172 = arith.constant dense<0.000000e+00> : vector<16x8xf32>
    %153 = tpu.matmul %21, %152, %cst_172 {dimension_numbers = #tpu.dot_dimension_numbers<[1], [0], [0], [1], [0, 0, 1, 1], [], []>} : vector<16x8xbf16>, vector<8x8xbf16>, vector<16x8xf32> -> vector<16x8xf32>
    %154 = arith.addf %150, %153 : vector<16x8xf32>
    %c0_173 = arith.constant 0 : index
    %c11_174 = arith.constant 11 : index
    %c0_175 = arith.constant 0 : index
    %c1_176 = arith.constant 1 : index
    %155 = vector.load %arg3[%c0_173, %c11_174, %c0_175, %c1_176] : memref<1x36x8x9xbf16, #tpu.memory_space<vmem>>, vector<1x1x8x8xbf16>
    %156 = vector.shape_cast %155 : vector<1x1x8x8xbf16> to vector<8x8xbf16>
    %cst_177 = arith.constant dense<0.000000e+00> : vector<16x8xf32>
    %157 = tpu.matmul %23, %156, %cst_177 {dimension_numbers = #tpu.dot_dimension_numbers<[1], [0], [0], [1], [0, 0, 1, 1], [], []>} : vector<16x8xbf16>, vector<8x8xbf16>, vector<16x8xf32> -> vector<16x8xf32>
    %158 = arith.addf %154, %157 : vector<16x8xf32>
    %c0_178 = arith.constant 0 : index
    %c20 = arith.constant 20 : index
    %c0_179 = arith.constant 0 : index
    %c0_180 = arith.constant 0 : index
    %159 = vector.load %arg3[%c0_178, %c20, %c0_179, %c0_180] : memref<1x36x8x9xbf16, #tpu.memory_space<vmem>>, vector<1x1x8x8xbf16>
    %160 = vector.shape_cast %159 : vector<1x1x8x8xbf16> to vector<8x8xbf16>
    %cst_181 = arith.constant dense<0.000000e+00> : vector<16x8xf32>
    %161 = tpu.matmul %25, %160, %cst_181 {dimension_numbers = #tpu.dot_dimension_numbers<[1], [0], [0], [1], [0, 0, 1, 1], [], []>} : vector<16x8xbf16>, vector<8x8xbf16>, vector<16x8xf32> -> vector<16x8xf32>
    %162 = arith.addf %158, %161 : vector<16x8xf32>
    %c0_182 = arith.constant 0 : index
    %c29 = arith.constant 29 : index
    %c0_183 = arith.constant 0 : index
    %c0_184 = arith.constant 0 : index
    %163 = vector.load %arg3[%c0_182, %c29, %c0_183, %c0_184] : memref<1x36x8x9xbf16, #tpu.memory_space<vmem>>, vector<1x1x8x8xbf16>
    %164 = vector.shape_cast %163 : vector<1x1x8x8xbf16> to vector<8x8xbf16>
    %cst_185 = arith.constant dense<0.000000e+00> : vector<16x8xf32>
    %165 = tpu.matmul %27, %164, %cst_185 {dimension_numbers = #tpu.dot_dimension_numbers<[1], [0], [0], [1], [0, 0, 1, 1], [], []>} : vector<16x8xbf16>, vector<8x8xbf16>, vector<16x8xf32> -> vector<16x8xf32>
    %166 = arith.addf %162, %165 : vector<16x8xf32>
    %c0_186 = arith.constant 0 : index
    %c20_187 = arith.constant 20 : index
    %c0_188 = arith.constant 0 : index
    %c1_189 = arith.constant 1 : index
    %167 = vector.load %arg3[%c0_186, %c20_187, %c0_188, %c1_189] : memref<1x36x8x9xbf16, #tpu.memory_space<vmem>>, vector<1x1x8x8xbf16>
    %168 = vector.shape_cast %167 : vector<1x1x8x8xbf16> to vector<8x8xbf16>
    %cst_190 = arith.constant dense<0.000000e+00> : vector<16x8xf32>
    %169 = tpu.matmul %29, %168, %cst_190 {dimension_numbers = #tpu.dot_dimension_numbers<[1], [0], [0], [1], [0, 0, 1, 1], [], []>} : vector<16x8xbf16>, vector<8x8xbf16>, vector<16x8xf32> -> vector<16x8xf32>
    %170 = arith.addf %166, %169 : vector<16x8xf32>
    %c0_191 = arith.constant 0 : index
    %c29_192 = arith.constant 29 : index
    %c0_193 = arith.constant 0 : index
    %c1_194 = arith.constant 1 : index
    %171 = vector.load %arg3[%c0_191, %c29_192, %c0_193, %c1_194] : memref<1x36x8x9xbf16, #tpu.memory_space<vmem>>, vector<1x1x8x8xbf16>
    %172 = vector.shape_cast %171 : vector<1x1x8x8xbf16> to vector<8x8xbf16>
    %cst_195 = arith.constant dense<0.000000e+00> : vector<16x8xf32>
    %173 = tpu.matmul %31, %172, %cst_195 {dimension_numbers = #tpu.dot_dimension_numbers<[1], [0], [0], [1], [0, 0, 1, 1], [], []>} : vector<16x8xbf16>, vector<8x8xbf16>, vector<16x8xf32> -> vector<16x8xf32>
    %174 = arith.addf %170, %173 : vector<16x8xf32>
    %175 = vector.broadcast %33 : vector<16x1xf32> to vector<16x8xf32>
    %176 = arith.addf %174, %175 : vector<16x8xf32>
    %cst_196 = arith.constant 0.000000e+00 : f32
    %177 = vector.broadcast %cst_196 : f32 to vector<16x8xf32>
    %178 = arith.cmpf ogt, %176, %177 : vector<16x8xf32>
    %cst_197 = arith.constant 2.000000e-01 : f32
    %179 = vector.broadcast %cst_197 : f32 to vector<16x8xf32>
    %180 = arith.mulf %179, %176 : vector<16x8xf32>
    %181 = arith.select %178, %176, %180 : vector<16x8xi1>, vector<16x8xf32>
    %182 = arith.truncf %181 : vector<16x8xf32> to vector<16x8xbf16>
    %c0_198 = arith.constant 0 : index
    %c1_199 = arith.constant 1 : index
    %c0_200 = arith.constant 0 : index
    %c0_201 = arith.constant 0 : index
    %183 = vector.load %arg4[%c0_198, %c1_199, %c0_200, %c0_201] : memref<1x8x16x8xbf16, #tpu.memory_space<vmem>>, vector<1x1x16x8xbf16>
    %184 = vector.shape_cast %183 : vector<1x1x16x8xbf16> to vector<16x8xbf16>
    %185 = vector.shape_cast %182 : vector<16x8xbf16> to vector<1x1x16x8xbf16>
    tpu.vector_store %arg4[%c0_198, %c1_199, %c0_200, %c0_201], %185 {strides = array<i32>} : memref<1x8x16x8xbf16, #tpu.memory_space<vmem>>, vector<1x1x16x8xbf16>,
    %cst_202 = arith.constant 0.000000e+00 : f32
    %186 = vector.broadcast %cst_202 : f32 to vector<16x8xf32>
    %c0_203 = arith.constant 0 : index
    %c2_204 = arith.constant 2 : index
    %c0_205 = arith.constant 0 : index
    %c0_206 = arith.constant 0 : index
    %187 = vector.load %arg3[%c0_203, %c2_204, %c0_205, %c0_206] : memref<1x36x8x9xbf16, #tpu.memory_space<vmem>>, vector<1x1x8x8xbf16>
    %188 = vector.shape_cast %187 : vector<1x1x8x8xbf16> to vector<8x8xbf16>
    %cst_207 = arith.constant dense<0.000000e+00> : vector<16x8xf32>
    %189 = tpu.matmul %1, %188, %cst_207 {dimension_numbers = #tpu.dot_dimension_numbers<[1], [0], [0], [1], [0, 0, 1, 1], [], []>} : vector<16x8xbf16>, vector<8x8xbf16>, vector<16x8xf32> -> vector<16x8xf32>
    %190 = arith.addf %186, %189 : vector<16x8xf32>
    %c0_208 = arith.constant 0 : index
    %c11_209 = arith.constant 11 : index
    %c0_210 = arith.constant 0 : index
    %c0_211 = arith.constant 0 : index
    %191 = vector.load %arg3[%c0_208, %c11_209, %c0_210, %c0_211] : memref<1x36x8x9xbf16, #tpu.memory_space<vmem>>, vector<1x1x8x8xbf16>
    %192 = vector.shape_cast %191 : vector<1x1x8x8xbf16> to vector<8x8xbf16>
    %cst_212 = arith.constant dense<0.000000e+00> : vector<16x8xf32>
    %193 = tpu.matmul %3, %192, %cst_212 {dimension_numbers = #tpu.dot_dimension_numbers<[1], [0], [0], [1], [0, 0, 1, 1], [], []>} : vector<16x8xbf16>, vector<8x8xbf16>, vector<16x8xf32> -> vector<16x8xf32>
    %194 = arith.addf %190, %193 : vector<16x8xf32>
    %c0_213 = arith.constant 0 : index
    %c2_214 = arith.constant 2 : index
    %c0_215 = arith.constant 0 : index
    %c1_216 = arith.constant 1 : index
    %195 = vector.load %arg3[%c0_213, %c2_214, %c0_215, %c1_216] : memref<1x36x8x9xbf16, #tpu.memory_space<vmem>>, vector<1x1x8x8xbf16>
    %196 = vector.shape_cast %195 : vector<1x1x8x8xbf16> to vector<8x8xbf16>
    %cst_217 = arith.constant dense<0.000000e+00> : vector<16x8xf32>
    %197 = tpu.matmul %5, %196, %cst_217 {dimension_numbers = #tpu.dot_dimension_numbers<[1], [0], [0], [1], [0, 0, 1, 1], [], []>} : vector<16x8xbf16>, vector<8x8xbf16>, vector<16x8xf32> -> vector<16x8xf32>
    %198 = arith.addf %194, %197 : vector<16x8xf32>
    %c0_218 = arith.constant 0 : index
    %c11_219 = arith.constant 11 : index
    %c0_220 = arith.constant 0 : index
    %c1_221 = arith.constant 1 : index
    %199 = vector.load %arg3[%c0_218, %c11_219, %c0_220, %c1_221] : memref<1x36x8x9xbf16, #tpu.memory_space<vmem>>, vector<1x1x8x8xbf16>
    %200 = vector.shape_cast %199 : vector<1x1x8x8xbf16> to vector<8x8xbf16>
    %cst_222 = arith.constant dense<0.000000e+00> : vector<16x8xf32>
    %201 = tpu.matmul %7, %200, %cst_222 {dimension_numbers = #tpu.dot_dimension_numbers<[1], [0], [0], [1], [0, 0, 1, 1], [], []>} : vector<16x8xbf16>, vector<8x8xbf16>, vector<16x8xf32> -> vector<16x8xf32>
    %202 = arith.addf %198, %201 : vector<16x8xf32>
    %c0_223 = arith.constant 0 : index
    %c20_224 = arith.constant 20 : index
    %c0_225 = arith.constant 0 : index
    %c0_226 = arith.constant 0 : index
    %203 = vector.load %arg3[%c0_223, %c20_224, %c0_225, %c0_226] : memref<1x36x8x9xbf16, #tpu.memory_space<vmem>>, vector<1x1x8x8xbf16>
    %204 = vector.shape_cast %203 : vector<1x1x8x8xbf16> to vector<8x8xbf16>
    %cst_227 = arith.constant dense<0.000000e+00> : vector<16x8xf32>
    %205 = tpu.matmul %9, %204, %cst_227 {dimension_numbers = #tpu.dot_dimension_numbers<[1], [0], [0], [1], [0, 0, 1, 1], [], []>} : vector<16x8xbf16>, vector<8x8xbf16>, vector<16x8xf32> -> vector<16x8xf32>
    %206 = arith.addf %202, %205 : vector<16x8xf32>
    %c0_228 = arith.constant 0 : index
    %c29_229 = arith.constant 29 : index
    %c0_230 = arith.constant 0 : index
    %c0_231 = arith.constant 0 : index
    %207 = vector.load %arg3[%c0_228, %c29_229, %c0_230, %c0_231] : memref<1x36x8x9xbf16, #tpu.memory_space<vmem>>, vector<1x1x8x8xbf16>
    %208 = vector.shape_cast %207 : vector<1x1x8x8xbf16> to vector<8x8xbf16>
    %cst_232 = arith.constant dense<0.000000e+00> : vector<16x8xf32>
    %209 = tpu.matmul %11, %208, %cst_232 {dimension_numbers = #tpu.dot_dimension_numbers<[1], [0], [0], [1], [0, 0, 1, 1], [], []>} : vector<16x8xbf16>, vector<8x8xbf16>, vector<16x8xf32> -> vector<16x8xf32>
    %210 = arith.addf %206, %209 : vector<16x8xf32>
    %c0_233 = arith.constant 0 : index
    %c20_234 = arith.constant 20 : index
    %c0_235 = arith.constant 0 : index
    %c1_236 = arith.constant 1 : index
    %211 = vector.load %arg3[%c0_233, %c20_234, %c0_235, %c1_236] : memref<1x36x8x9xbf16, #tpu.memory_space<vmem>>, vector<1x1x8x8xbf16>
    %212 = vector.shape_cast %211 : vector<1x1x8x8xbf16> to vector<8x8xbf16>
    %cst_237 = arith.constant dense<0.000000e+00> : vector<16x8xf32>
    %213 = tpu.matmul %13, %212, %cst_237 {dimension_numbers = #tpu.dot_dimension_numbers<[1], [0], [0], [1], [0, 0, 1, 1], [], []>} : vector<16x8xbf16>, vector<8x8xbf16>, vector<16x8xf32> -> vector<16x8xf32>
    %214 = arith.addf %210, %213 : vector<16x8xf32>
    %c0_238 = arith.constant 0 : index
    %c29_239 = arith.constant 29 : index
    %c0_240 = arith.constant 0 : index
    %c1_241 = arith.constant 1 : index
    %215 = vector.load %arg3[%c0_238, %c29_239, %c0_240, %c1_241] : memref<1x36x8x9xbf16, #tpu.memory_space<vmem>>, vector<1x1x8x8xbf16>
    %216 = vector.shape_cast %215 : vector<1x1x8x8xbf16> to vector<8x8xbf16>
    %cst_242 = arith.constant dense<0.000000e+00> : vector<16x8xf32>
    %217 = tpu.matmul %15, %216, %cst_242 {dimension_numbers = #tpu.dot_dimension_numbers<[1], [0], [0], [1], [0, 0, 1, 1], [], []>} : vector<16x8xbf16>, vector<8x8xbf16>, vector<16x8xf32> -> vector<16x8xf32>
    %218 = arith.addf %214, %217 : vector<16x8xf32>
    %c0_243 = arith.constant 0 : index
    %c3_244 = arith.constant 3 : index
    %c0_245 = arith.constant 0 : index
    %c0_246 = arith.constant 0 : index
    %219 = vector.load %arg3[%c0_243, %c3_244, %c0_245, %c0_246] : memref<1x36x8x9xbf16, #tpu.memory_space<vmem>>, vector<1x1x8x8xbf16>
    %220 = vector.shape_cast %219 : vector<1x1x8x8xbf16> to vector<8x8xbf16>
    %cst_247 = arith.constant dense<0.000000e+00> : vector<16x8xf32>
    %221 = tpu.matmul %17, %220, %cst_247 {dimension_numbers = #tpu.dot_dimension_numbers<[1], [0], [0], [1], [0, 0, 1, 1], [], []>} : vector<16x8xbf16>, vector<8x8xbf16>, vector<16x8xf32> -> vector<16x8xf32>
    %222 = arith.addf %218, %221 : vector<16x8xf32>
    %c0_248 = arith.constant 0 : index
    %c12_249 = arith.constant 12 : index
    %c0_250 = arith.constant 0 : index
    %c0_251 = arith.constant 0 : index
    %223 = vector.load %arg3[%c0_248, %c12_249, %c0_250, %c0_251] : memref<1x36x8x9xbf16, #tpu.memory_space<vmem>>, vector<1x1x8x8xbf16>
    %224 = vector.shape_cast %223 : vector<1x1x8x8xbf16> to vector<8x8xbf16>
    %cst_252 = arith.constant dense<0.000000e+00> : vector<16x8xf32>
    %225 = tpu.matmul %19, %224, %cst_252 {dimension_numbers = #tpu.dot_dimension_numbers<[1], [0], [0], [1], [0, 0, 1, 1], [], []>} : vector<16x8xbf16>, vector<8x8xbf16>, vector<16x8xf32> -> vector<16x8xf32>
    %226 = arith.addf %222, %225 : vector<16x8xf32>
    %c0_253 = arith.constant 0 : index
    %c3_254 = arith.constant 3 : index
    %c0_255 = arith.constant 0 : index
    %c1_256 = arith.constant 1 : index
    %227 = vector.load %arg3[%c0_253, %c3_254, %c0_255, %c1_256] : memref<1x36x8x9xbf16, #tpu.memory_space<vmem>>, vector<1x1x8x8xbf16>
    %228 = vector.shape_cast %227 : vector<1x1x8x8xbf16> to vector<8x8xbf16>
    %cst_257 = arith.constant dense<0.000000e+00> : vector<16x8xf32>
    %229 = tpu.matmul %21, %228, %cst_257 {dimension_numbers = #tpu.dot_dimension_numbers<[1], [0], [0], [1], [0, 0, 1, 1], [], []>} : vector<16x8xbf16>, vector<8x8xbf16>, vector<16x8xf32> -> vector<16x8xf32>
    %230 = arith.addf %226, %229 : vector<16x8xf32>
    %c0_258 = arith.constant 0 : index
    %c12_259 = arith.constant 12 : index
    %c0_260 = arith.constant 0 : index
    %c1_261 = arith.constant 1 : index
    %231 = vector.load %arg3[%c0_258, %c12_259, %c0_260, %c1_261] : memref<1x36x8x9xbf16, #tpu.memory_space<vmem>>, vector<1x1x8x8xbf16>
    %232 = vector.shape_cast %231 : vector<1x1x8x8xbf16> to vector<8x8xbf16>
    %cst_262 = arith.constant dense<0.000000e+00> : vector<16x8xf32>
    %233 = tpu.matmul %23, %232, %cst_262 {dimension_numbers = #tpu.dot_dimension_numbers<[1], [0], [0], [1], [0, 0, 1, 1], [], []>} : vector<16x8xbf16>, vector<8x8xbf16>, vector<16x8xf32> -> vector<16x8xf32>
    %234 = arith.addf %230, %233 : vector<16x8xf32>
    %c0_263 = arith.constant 0 : index
    %c21 = arith.constant 21 : index
    %c0_264 = arith.constant 0 : index
    %c0_265 = arith.constant 0 : index
    %235 = vector.load %arg3[%c0_263, %c21, %c0_264, %c0_265] : memref<1x36x8x9xbf16, #tpu.memory_space<vmem>>, vector<1x1x8x8xbf16>
    %236 = vector.shape_cast %235 : vector<1x1x8x8xbf16> to vector<8x8xbf16>
    %cst_266 = arith.constant dense<0.000000e+00> : vector<16x8xf32>
    %237 = tpu.matmul %25, %236, %cst_266 {dimension_numbers = #tpu.dot_dimension_numbers<[1], [0], [0], [1], [0, 0, 1, 1], [], []>} : vector<16x8xbf16>, vector<8x8xbf16>, vector<16x8xf32> -> vector<16x8xf32>
    %238 = arith.addf %234, %237 : vector<16x8xf32>
    %c0_267 = arith.constant 0 : index
    %c30 = arith.constant 30 : index
    %c0_268 = arith.constant 0 : index
    %c0_269 = arith.constant 0 : index
    %239 = vector.load %arg3[%c0_267, %c30, %c0_268, %c0_269] : memref<1x36x8x9xbf16, #tpu.memory_space<vmem>>, vector<1x1x8x8xbf16>
    %240 = vector.shape_cast %239 : vector<1x1x8x8xbf16> to vector<8x8xbf16>
    %cst_270 = arith.constant dense<0.000000e+00> : vector<16x8xf32>
    %241 = tpu.matmul %27, %240, %cst_270 {dimension_numbers = #tpu.dot_dimension_numbers<[1], [0], [0], [1], [0, 0, 1, 1], [], []>} : vector<16x8xbf16>, vector<8x8xbf16>, vector<16x8xf32> -> vector<16x8xf32>
    %242 = arith.addf %238, %241 : vector<16x8xf32>
    %c0_271 = arith.constant 0 : index
    %c21_272 = arith.constant 21 : index
    %c0_273 = arith.constant 0 : index
    %c1_274 = arith.constant 1 : index
    %243 = vector.load %arg3[%c0_271, %c21_272, %c0_273, %c1_274] : memref<1x36x8x9xbf16, #tpu.memory_space<vmem>>, vector<1x1x8x8xbf16>
    %244 = vector.shape_cast %243 : vector<1x1x8x8xbf16> to vector<8x8xbf16>
    %cst_275 = arith.constant dense<0.000000e+00> : vector<16x8xf32>
    %245 = tpu.matmul %29, %244, %cst_275 {dimension_numbers = #tpu.dot_dimension_numbers<[1], [0], [0], [1], [0, 0, 1, 1], [], []>} : vector<16x8xbf16>, vector<8x8xbf16>, vector<16x8xf32> -> vector<16x8xf32>
    %246 = arith.addf %242, %245 : vector<16x8xf32>
    %c0_276 = arith.constant 0 : index
    %c30_277 = arith.constant 30 : index
    %c0_278 = arith.constant 0 : index
    %c1_279 = arith.constant 1 : index
    %247 = vector.load %arg3[%c0_276, %c30_277, %c0_278, %c1_279] : memref<1x36x8x9xbf16, #tpu.memory_space<vmem>>, vector<1x1x8x8xbf16>
    %248 = vector.shape_cast %247 : vector<1x1x8x8xbf16> to vector<8x8xbf16>
    %cst_280 = arith.constant dense<0.000000e+00> : vector<16x8xf32>
    %249 = tpu.matmul %31, %248, %cst_280 {dimension_numbers = #tpu.dot_dimension_numbers<[1], [0], [0], [1], [0, 0, 1, 1], [], []>} : vector<16x8xbf16>, vector<8x8xbf16>, vector<16x8xf32> -> vector<16x8xf32>
    %250 = arith.addf %246, %249 : vector<16x8xf32>
    %251 = vector.broadcast %33 : vector<16x1xf32> to vector<16x8xf32>
    %252 = arith.addf %250, %251 : vector<16x8xf32>
    %cst_281 = arith.constant 0.000000e+00 : f32
    %253 = vector.broadcast %cst_281 : f32 to vector<16x8xf32>
    %254 = arith.cmpf ogt, %252, %253 : vector<16x8xf32>
    %cst_282 = arith.constant 2.000000e-01 : f32
    %255 = vector.broadcast %cst_282 : f32 to vector<16x8xf32>
    %256 = arith.mulf %255, %252 : vector<16x8xf32>
    %257 = arith.select %254, %252, %256 : vector<16x8xi1>, vector<16x8xf32>
    %258 = arith.truncf %257 : vector<16x8xf32> to vector<16x8xbf16>
    %c0_283 = arith.constant 0 : index
    %c2_284 = arith.constant 2 : index
    %c0_285 = arith.constant 0 : index
    %c0_286 = arith.constant 0 : index
    %259 = vector.load %arg4[%c0_283, %c2_284, %c0_285, %c0_286] : memref<1x8x16x8xbf16, #tpu.memory_space<vmem>>, vector<1x1x16x8xbf16>
    %260 = vector.shape_cast %259 : vector<1x1x16x8xbf16> to vector<16x8xbf16>
    %261 = vector.shape_cast %258 : vector<16x8xbf16> to vector<1x1x16x8xbf16>
    tpu.vector_store %arg4[%c0_283, %c2_284, %c0_285, %c0_286], %261 {strides = array<i32>} : memref<1x8x16x8xbf16, #tpu.memory_space<vmem>>, vector<1x1x16x8xbf16>,
    %cst_287 = arith.constant 0.000000e+00 : f32
    %262 = vector.broadcast %cst_287 : f32 to vector<16x8xf32>
    %c0_288 = arith.constant 0 : index
    %c3_289 = arith.constant 3 : index
    %c0_290 = arith.constant 0 : index
    %c0_291 = arith.constant 0 : index
    %263 = vector.load %arg3[%c0_288, %c3_289, %c0_290, %c0_291] : memref<1x36x8x9xbf16, #tpu.memory_space<vmem>>, vector<1x1x8x8xbf16>
    %264 = vector.shape_cast %263 : vector<1x1x8x8xbf16> to vector<8x8xbf16>
    %cst_292 = arith.constant dense<0.000000e+00> : vector<16x8xf32>
    %265 = tpu.matmul %1, %264, %cst_292 {dimension_numbers = #tpu.dot_dimension_numbers<[1], [0], [0], [1], [0, 0, 1, 1], [], []>} : vector<16x8xbf16>, vector<8x8xbf16>, vector<16x8xf32> -> vector<16x8xf32>
    %266 = arith.addf %262, %265 : vector<16x8xf32>
    %c0_293 = arith.constant 0 : index
    %c12_294 = arith.constant 12 : index
    %c0_295 = arith.constant 0 : index
    %c0_296 = arith.constant 0 : index
    %267 = vector.load %arg3[%c0_293, %c12_294, %c0_295, %c0_296] : memref<1x36x8x9xbf16, #tpu.memory_space<vmem>>, vector<1x1x8x8xbf16>
    %268 = vector.shape_cast %267 : vector<1x1x8x8xbf16> to vector<8x8xbf16>
    %cst_297 = arith.constant dense<0.000000e+00> : vector<16x8xf32>
    %269 = tpu.matmul %3, %268, %cst_297 {dimension_numbers = #tpu.dot_dimension_numbers<[1], [0], [0], [1], [0, 0, 1, 1], [], []>} : vector<16x8xbf16>, vector<8x8xbf16>, vector<16x8xf32> -> vector<16x8xf32>
    %270 = arith.addf %266, %269 : vector<16x8xf32>
    %c0_298 = arith.constant 0 : index
    %c3_299 = arith.constant 3 : index
    %c0_300 = arith.constant 0 : index
    %c1_301 = arith.constant 1 : index
    %271 = vector.load %arg3[%c0_298, %c3_299, %c0_300, %c1_301] : memref<1x36x8x9xbf16, #tpu.memory_space<vmem>>, vector<1x1x8x8xbf16>
    %272 = vector.shape_cast %271 : vector<1x1x8x8xbf16> to vector<8x8xbf16>
    %cst_302 = arith.constant dense<0.000000e+00> : vector<16x8xf32>
    %273 = tpu.matmul %5, %272, %cst_302 {dimension_numbers = #tpu.dot_dimension_numbers<[1], [0], [0], [1], [0, 0, 1, 1], [], []>} : vector<16x8xbf16>, vector<8x8xbf16>, vector<16x8xf32> -> vector<16x8xf32>
    %274 = arith.addf %270, %273 : vector<16x8xf32>
    %c0_303 = arith.constant 0 : index
    %c12_304 = arith.constant 12 : index
    %c0_305 = arith.constant 0 : index
    %c1_306 = arith.constant 1 : index
    %275 = vector.load %arg3[%c0_303, %c12_304, %c0_305, %c1_306] : memref<1x36x8x9xbf16, #tpu.memory_space<vmem>>, vector<1x1x8x8xbf16>
    %276 = vector.shape_cast %275 : vector<1x1x8x8xbf16> to vector<8x8xbf16>
    %cst_307 = arith.constant dense<0.000000e+00> : vector<16x8xf32>
    %277 = tpu.matmul %7, %276, %cst_307 {dimension_numbers = #tpu.dot_dimension_numbers<[1], [0], [0], [1], [0, 0, 1, 1], [], []>} : vector<16x8xbf16>, vector<8x8xbf16>, vector<16x8xf32> -> vector<16x8xf32>
    %278 = arith.addf %274, %277 : vector<16x8xf32>
    %c0_308 = arith.constant 0 : index
    %c21_309 = arith.constant 21 : index
    %c0_310 = arith.constant 0 : index
    %c0_311 = arith.constant 0 : index
    %279 = vector.load %arg3[%c0_308, %c21_309, %c0_310, %c0_311] : memref<1x36x8x9xbf16, #tpu.memory_space<vmem>>, vector<1x1x8x8xbf16>
    %280 = vector.shape_cast %279 : vector<1x1x8x8xbf16> to vector<8x8xbf16>
    %cst_312 = arith.constant dense<0.000000e+00> : vector<16x8xf32>
    %281 = tpu.matmul %9, %280, %cst_312 {dimension_numbers = #tpu.dot_dimension_numbers<[1], [0], [0], [1], [0, 0, 1, 1], [], []>} : vector<16x8xbf16>, vector<8x8xbf16>, vector<16x8xf32> -> vector<16x8xf32>
    %282 = arith.addf %278, %281 : vector<16x8xf32>
    %c0_313 = arith.constant 0 : index
    %c30_314 = arith.constant 30 : index
    %c0_315 = arith.constant 0 : index
    %c0_316 = arith.constant 0 : index
    %283 = vector.load %arg3[%c0_313, %c30_314, %c0_315, %c0_316] : memref<1x36x8x9xbf16, #tpu.memory_space<vmem>>, vector<1x1x8x8xbf16>
    %284 = vector.shape_cast %283 : vector<1x1x8x8xbf16> to vector<8x8xbf16>
    %cst_317 = arith.constant dense<0.000000e+00> : vector<16x8xf32>
    %285 = tpu.matmul %11, %284, %cst_317 {dimension_numbers = #tpu.dot_dimension_numbers<[1], [0], [0], [1], [0, 0, 1, 1], [], []>} : vector<16x8xbf16>, vector<8x8xbf16>, vector<16x8xf32> -> vector<16x8xf32>
    %286 = arith.addf %282, %285 : vector<16x8xf32>
    %c0_318 = arith.constant 0 : index
    %c21_319 = arith.constant 21 : index
    %c0_320 = arith.constant 0 : index
    %c1_321 = arith.constant 1 : index
    %287 = vector.load %arg3[%c0_318, %c21_319, %c0_320, %c1_321] : memref<1x36x8x9xbf16, #tpu.memory_space<vmem>>, vector<1x1x8x8xbf16>
    %288 = vector.shape_cast %287 : vector<1x1x8x8xbf16> to vector<8x8xbf16>
    %cst_322 = arith.constant dense<0.000000e+00> : vector<16x8xf32>
    %289 = tpu.matmul %13, %288, %cst_322 {dimension_numbers = #tpu.dot_dimension_numbers<[1], [0], [0], [1], [0, 0, 1, 1], [], []>} : vector<16x8xbf16>, vector<8x8xbf16>, vector<16x8xf32> -> vector<16x8xf32>
    %290 = arith.addf %286, %289 : vector<16x8xf32>
    %c0_323 = arith.constant 0 : index
    %c30_324 = arith.constant 30 : index
    %c0_325 = arith.constant 0 : index
    %c1_326 = arith.constant 1 : index
    %291 = vector.load %arg3[%c0_323, %c30_324, %c0_325, %c1_326] : memref<1x36x8x9xbf16, #tpu.memory_space<vmem>>, vector<1x1x8x8xbf16>
    %292 = vector.shape_cast %291 : vector<1x1x8x8xbf16> to vector<8x8xbf16>
    %cst_327 = arith.constant dense<0.000000e+00> : vector<16x8xf32>
    %293 = tpu.matmul %15, %292, %cst_327 {dimension_numbers = #tpu.dot_dimension_numbers<[1], [0], [0], [1], [0, 0, 1, 1], [], []>} : vector<16x8xbf16>, vector<8x8xbf16>, vector<16x8xf32> -> vector<16x8xf32>
    %294 = arith.addf %290, %293 : vector<16x8xf32>
    %c0_328 = arith.constant 0 : index
    %c4_329 = arith.constant 4 : index
    %c0_330 = arith.constant 0 : index
    %c0_331 = arith.constant 0 : index
    %295 = vector.load %arg3[%c0_328, %c4_329, %c0_330, %c0_331] : memref<1x36x8x9xbf16, #tpu.memory_space<vmem>>, vector<1x1x8x8xbf16>
    %296 = vector.shape_cast %295 : vector<1x1x8x8xbf16> to vector<8x8xbf16>
    %cst_332 = arith.constant dense<0.000000e+00> : vector<16x8xf32>
    %297 = tpu.matmul %17, %296, %cst_332 {dimension_numbers = #tpu.dot_dimension_numbers<[1], [0], [0], [1], [0, 0, 1, 1], [], []>} : vector<16x8xbf16>, vector<8x8xbf16>, vector<16x8xf32> -> vector<16x8xf32>
    %298 = arith.addf %294, %297 : vector<16x8xf32>
    %c0_333 = arith.constant 0 : index
    %c13_334 = arith.constant 13 : index
    %c0_335 = arith.constant 0 : index
    %c0_336 = arith.constant 0 : index
    %299 = vector.load %arg3[%c0_333, %c13_334, %c0_335, %c0_336] : memref<1x36x8x9xbf16, #tpu.memory_space<vmem>>, vector<1x1x8x8xbf16>
    %300 = vector.shape_cast %299 : vector<1x1x8x8xbf16> to vector<8x8xbf16>
    %cst_337 = arith.constant dense<0.000000e+00> : vector<16x8xf32>
    %301 = tpu.matmul %19, %300, %cst_337 {dimension_numbers = #tpu.dot_dimension_numbers<[1], [0], [0], [1], [0, 0, 1, 1], [], []>} : vector<16x8xbf16>, vector<8x8xbf16>, vector<16x8xf32> -> vector<16x8xf32>
    %302 = arith.addf %298, %301 : vector<16x8xf32>
    %c0_338 = arith.constant 0 : index
    %c4_339 = arith.constant 4 : index
    %c0_340 = arith.constant 0 : index
    %c1_341 = arith.constant 1 : index
    %303 = vector.load %arg3[%c0_338, %c4_339, %c0_340, %c1_341] : memref<1x36x8x9xbf16, #tpu.memory_space<vmem>>, vector<1x1x8x8xbf16>
    %304 = vector.shape_cast %303 : vector<1x1x8x8xbf16> to vector<8x8xbf16>
    %cst_342 = arith.constant dense<0.000000e+00> : vector<16x8xf32>
    %305 = tpu.matmul %21, %304, %cst_342 {dimension_numbers = #tpu.dot_dimension_numbers<[1], [0], [0], [1], [0, 0, 1, 1], [], []>} : vector<16x8xbf16>, vector<8x8xbf16>, vector<16x8xf32> -> vector<16x8xf32>
    %306 = arith.addf %302, %305 : vector<16x8xf32>
    %c0_343 = arith.constant 0 : index
    %c13_344 = arith.constant 13 : index
    %c0_345 = arith.constant 0 : index
    %c1_346 = arith.constant 1 : index
    %307 = vector.load %arg3[%c0_343, %c13_344, %c0_345, %c1_346] : memref<1x36x8x9xbf16, #tpu.memory_space<vmem>>, vector<1x1x8x8xbf16>
    %308 = vector.shape_cast %307 : vector<1x1x8x8xbf16> to vector<8x8xbf16>
    %cst_347 = arith.constant dense<0.000000e+00> : vector<16x8xf32>
    %309 = tpu.matmul %23, %308, %cst_347 {dimension_numbers = #tpu.dot_dimension_numbers<[1], [0], [0], [1], [0, 0, 1, 1], [], []>} : vector<16x8xbf16>, vector<8x8xbf16>, vector<16x8xf32> -> vector<16x8xf32>
    %310 = arith.addf %306, %309 : vector<16x8xf32>
    %c0_348 = arith.constant 0 : index
    %c22 = arith.constant 22 : index
    %c0_349 = arith.constant 0 : index
    %c0_350 = arith.constant 0 : index
    %311 = vector.load %arg3[%c0_348, %c22, %c0_349, %c0_350] : memref<1x36x8x9xbf16, #tpu.memory_space<vmem>>, vector<1x1x8x8xbf16>
    %312 = vector.shape_cast %311 : vector<1x1x8x8xbf16> to vector<8x8xbf16>
    %cst_351 = arith.constant dense<0.000000e+00> : vector<16x8xf32>
    %313 = tpu.matmul %25, %312, %cst_351 {dimension_numbers = #tpu.dot_dimension_numbers<[1], [0], [0], [1], [0, 0, 1, 1], [], []>} : vector<16x8xbf16>, vector<8x8xbf16>, vector<16x8xf32> -> vector<16x8xf32>
    %314 = arith.addf %310, %313 : vector<16x8xf32>
    %c0_352 = arith.constant 0 : index
    %c31 = arith.constant 31 : index
    %c0_353 = arith.constant 0 : index
    %c0_354 = arith.constant 0 : index
    %315 = vector.load %arg3[%c0_352, %c31, %c0_353, %c0_354] : memref<1x36x8x9xbf16, #tpu.memory_space<vmem>>, vector<1x1x8x8xbf16>
    %316 = vector.shape_cast %315 : vector<1x1x8x8xbf16> to vector<8x8xbf16>
    %cst_355 = arith.constant dense<0.000000e+00> : vector<16x8xf32>
    %317 = tpu.matmul %27, %316, %cst_355 {dimension_numbers = #tpu.dot_dimension_numbers<[1], [0], [0], [1], [0, 0, 1, 1], [], []>} : vector<16x8xbf16>, vector<8x8xbf16>, vector<16x8xf32> -> vector<16x8xf32>
    %318 = arith.addf %314, %317 : vector<16x8xf32>
    %c0_356 = arith.constant 0 : index
    %c22_357 = arith.constant 22 : index
    %c0_358 = arith.constant 0 : index
    %c1_359 = arith.constant 1 : index
    %319 = vector.load %arg3[%c0_356, %c22_357, %c0_358, %c1_359] : memref<1x36x8x9xbf16, #tpu.memory_space<vmem>>, vector<1x1x8x8xbf16>
    %320 = vector.shape_cast %319 : vector<1x1x8x8xbf16> to vector<8x8xbf16>
    %cst_360 = arith.constant dense<0.000000e+00> : vector<16x8xf32>
    %321 = tpu.matmul %29, %320, %cst_360 {dimension_numbers = #tpu.dot_dimension_numbers<[1], [0], [0], [1], [0, 0, 1, 1], [], []>} : vector<16x8xbf16>, vector<8x8xbf16>, vector<16x8xf32> -> vector<16x8xf32>
    %322 = arith.addf %318, %321 : vector<16x8xf32>
    %c0_361 = arith.constant 0 : index
    %c31_362 = arith.constant 31 : index
    %c0_363 = arith.constant 0 : index
    %c1_364 = arith.constant 1 : index
    %323 = vector.load %arg3[%c0_361, %c31_362, %c0_363, %c1_364] : memref<1x36x8x9xbf16, #tpu.memory_space<vmem>>, vector<1x1x8x8xbf16>
    %324 = vector.shape_cast %323 : vector<1x1x8x8xbf16> to vector<8x8xbf16>
    %cst_365 = arith.constant dense<0.000000e+00> : vector<16x8xf32>
    %325 = tpu.matmul %31, %324, %cst_365 {dimension_numbers = #tpu.dot_dimension_numbers<[1], [0], [0], [1], [0, 0, 1, 1], [], []>} : vector<16x8xbf16>, vector<8x8xbf16>, vector<16x8xf32> -> vector<16x8xf32>
    %326 = arith.addf %322, %325 : vector<16x8xf32>
    %327 = vector.broadcast %33 : vector<16x1xf32> to vector<16x8xf32>
    %328 = arith.addf %326, %327 : vector<16x8xf32>
    %cst_366 = arith.constant 0.000000e+00 : f32
    %329 = vector.broadcast %cst_366 : f32 to vector<16x8xf32>
    %330 = arith.cmpf ogt, %328, %329 : vector<16x8xf32>
    %cst_367 = arith.constant 2.000000e-01 : f32
    %331 = vector.broadcast %cst_367 : f32 to vector<16x8xf32>
    %332 = arith.mulf %331, %328 : vector<16x8xf32>
    %333 = arith.select %330, %328, %332 : vector<16x8xi1>, vector<16x8xf32>
    %334 = arith.truncf %333 : vector<16x8xf32> to vector<16x8xbf16>
    %c0_368 = arith.constant 0 : index
    %c3_369 = arith.constant 3 : index
    %c0_370 = arith.constant 0 : index
    %c0_371 = arith.constant 0 : index
    %335 = vector.load %arg4[%c0_368, %c3_369, %c0_370, %c0_371] : memref<1x8x16x8xbf16, #tpu.memory_space<vmem>>, vector<1x1x16x8xbf16>
    %336 = vector.shape_cast %335 : vector<1x1x16x8xbf16> to vector<16x8xbf16>
    %337 = vector.shape_cast %334 : vector<16x8xbf16> to vector<1x1x16x8xbf16>
    tpu.vector_store %arg4[%c0_368, %c3_369, %c0_370, %c0_371], %337 {strides = array<i32>} : memref<1x8x16x8xbf16, #tpu.memory_space<vmem>>, vector<1x1x16x8xbf16>,
    %cst_372 = arith.constant 0.000000e+00 : f32
    %338 = vector.broadcast %cst_372 : f32 to vector<16x8xf32>
    %c0_373 = arith.constant 0 : index
    %c4_374 = arith.constant 4 : index
    %c0_375 = arith.constant 0 : index
    %c0_376 = arith.constant 0 : index
    %339 = vector.load %arg3[%c0_373, %c4_374, %c0_375, %c0_376] : memref<1x36x8x9xbf16, #tpu.memory_space<vmem>>, vector<1x1x8x8xbf16>
    %340 = vector.shape_cast %339 : vector<1x1x8x8xbf16> to vector<8x8xbf16>
    %cst_377 = arith.constant dense<0.000000e+00> : vector<16x8xf32>
    %341 = tpu.matmul %1, %340, %cst_377 {dimension_numbers = #tpu.dot_dimension_numbers<[1], [0], [0], [1], [0, 0, 1, 1], [], []>} : vector<16x8xbf16>, vector<8x8xbf16>, vector<16x8xf32> -> vector<16x8xf32>
    %342 = arith.addf %338, %341 : vector<16x8xf32>
    %c0_378 = arith.constant 0 : index
    %c13_379 = arith.constant 13 : index
    %c0_380 = arith.constant 0 : index
    %c0_381 = arith.constant 0 : index
    %343 = vector.load %arg3[%c0_378, %c13_379, %c0_380, %c0_381] : memref<1x36x8x9xbf16, #tpu.memory_space<vmem>>, vector<1x1x8x8xbf16>
    %344 = vector.shape_cast %343 : vector<1x1x8x8xbf16> to vector<8x8xbf16>
    %cst_382 = arith.constant dense<0.000000e+00> : vector<16x8xf32>
    %345 = tpu.matmul %3, %344, %cst_382 {dimension_numbers = #tpu.dot_dimension_numbers<[1], [0], [0], [1], [0, 0, 1, 1], [], []>} : vector<16x8xbf16>, vector<8x8xbf16>, vector<16x8xf32> -> vector<16x8xf32>
    %346 = arith.addf %342, %345 : vector<16x8xf32>
    %c0_383 = arith.constant 0 : index
    %c4_384 = arith.constant 4 : index
    %c0_385 = arith.constant 0 : index
    %c1_386 = arith.constant 1 : index
    %347 = vector.load %arg3[%c0_383, %c4_384, %c0_385, %c1_386] : memref<1x36x8x9xbf16, #tpu.memory_space<vmem>>, vector<1x1x8x8xbf16>
    %348 = vector.shape_cast %347 : vector<1x1x8x8xbf16> to vector<8x8xbf16>
    %cst_387 = arith.constant dense<0.000000e+00> : vector<16x8xf32>
    %349 = tpu.matmul %5, %348, %cst_387 {dimension_numbers = #tpu.dot_dimension_numbers<[1], [0], [0], [1], [0, 0, 1, 1], [], []>} : vector<16x8xbf16>, vector<8x8xbf16>, vector<16x8xf32> -> vector<16x8xf32>
    %350 = arith.addf %346, %349 : vector<16x8xf32>
    %c0_388 = arith.constant 0 : index
    %c13_389 = arith.constant 13 : index
    %c0_390 = arith.constant 0 : index
    %c1_391 = arith.constant 1 : index
    %351 = vector.load %arg3[%c0_388, %c13_389, %c0_390, %c1_391] : memref<1x36x8x9xbf16, #tpu.memory_space<vmem>>, vector<1x1x8x8xbf16>
    %352 = vector.shape_cast %351 : vector<1x1x8x8xbf16> to vector<8x8xbf16>
    %cst_392 = arith.constant dense<0.000000e+00> : vector<16x8xf32>
    %353 = tpu.matmul %7, %352, %cst_392 {dimension_numbers = #tpu.dot_dimension_numbers<[1], [0], [0], [1], [0, 0, 1, 1], [], []>} : vector<16x8xbf16>, vector<8x8xbf16>, vector<16x8xf32> -> vector<16x8xf32>
    %354 = arith.addf %350, %353 : vector<16x8xf32>
    %c0_393 = arith.constant 0 : index
    %c22_394 = arith.constant 22 : index
    %c0_395 = arith.constant 0 : index
    %c0_396 = arith.constant 0 : index
    %355 = vector.load %arg3[%c0_393, %c22_394, %c0_395, %c0_396] : memref<1x36x8x9xbf16, #tpu.memory_space<vmem>>, vector<1x1x8x8xbf16>
    %356 = vector.shape_cast %355 : vector<1x1x8x8xbf16> to vector<8x8xbf16>
    %cst_397 = arith.constant dense<0.000000e+00> : vector<16x8xf32>
    %357 = tpu.matmul %9, %356, %cst_397 {dimension_numbers = #tpu.dot_dimension_numbers<[1], [0], [0], [1], [0, 0, 1, 1], [], []>} : vector<16x8xbf16>, vector<8x8xbf16>, vector<16x8xf32> -> vector<16x8xf32>
    %358 = arith.addf %354, %357 : vector<16x8xf32>
    %c0_398 = arith.constant 0 : index
    %c31_399 = arith.constant 31 : index
    %c0_400 = arith.constant 0 : index
    %c0_401 = arith.constant 0 : index
    %359 = vector.load %arg3[%c0_398, %c31_399, %c0_400, %c0_401] : memref<1x36x8x9xbf16, #tpu.memory_space<vmem>>, vector<1x1x8x8xbf16>
    %360 = vector.shape_cast %359 : vector<1x1x8x8xbf16> to vector<8x8xbf16>
    %cst_402 = arith.constant dense<0.000000e+00> : vector<16x8xf32>
    %361 = tpu.matmul %11, %360, %cst_402 {dimension_numbers = #tpu.dot_dimension_numbers<[1], [0], [0], [1], [0, 0, 1, 1], [], []>} : vector<16x8xbf16>, vector<8x8xbf16>, vector<16x8xf32> -> vector<16x8xf32>
    %362 = arith.addf %358, %361 : vector<16x8xf32>
    %c0_403 = arith.constant 0 : index
    %c22_404 = arith.constant 22 : index
    %c0_405 = arith.constant 0 : index
    %c1_406 = arith.constant 1 : index
    %363 = vector.load %arg3[%c0_403, %c22_404, %c0_405, %c1_406] : memref<1x36x8x9xbf16, #tpu.memory_space<vmem>>, vector<1x1x8x8xbf16>
    %364 = vector.shape_cast %363 : vector<1x1x8x8xbf16> to vector<8x8xbf16>
    %cst_407 = arith.constant dense<0.000000e+00> : vector<16x8xf32>
    %365 = tpu.matmul %13, %364, %cst_407 {dimension_numbers = #tpu.dot_dimension_numbers<[1], [0], [0], [1], [0, 0, 1, 1], [], []>} : vector<16x8xbf16>, vector<8x8xbf16>, vector<16x8xf32> -> vector<16x8xf32>
    %366 = arith.addf %362, %365 : vector<16x8xf32>
    %c0_408 = arith.constant 0 : index
    %c31_409 = arith.constant 31 : index
    %c0_410 = arith.constant 0 : index
    %c1_411 = arith.constant 1 : index
    %367 = vector.load %arg3[%c0_408, %c31_409, %c0_410, %c1_411] : memref<1x36x8x9xbf16, #tpu.memory_space<vmem>>, vector<1x1x8x8xbf16>
    %368 = vector.shape_cast %367 : vector<1x1x8x8xbf16> to vector<8x8xbf16>
    %cst_412 = arith.constant dense<0.000000e+00> : vector<16x8xf32>
    %369 = tpu.matmul %15, %368, %cst_412 {dimension_numbers = #tpu.dot_dimension_numbers<[1], [0], [0], [1], [0, 0, 1, 1], [], []>} : vector<16x8xbf16>, vector<8x8xbf16>, vector<16x8xf32> -> vector<16x8xf32>
    %370 = arith.addf %366, %369 : vector<16x8xf32>
    %c0_413 = arith.constant 0 : index
    %c5_414 = arith.constant 5 : index
    %c0_415 = arith.constant 0 : index
    %c0_416 = arith.constant 0 : index
    %371 = vector.load %arg3[%c0_413, %c5_414, %c0_415, %c0_416] : memref<1x36x8x9xbf16, #tpu.memory_space<vmem>>, vector<1x1x8x8xbf16>
    %372 = vector.shape_cast %371 : vector<1x1x8x8xbf16> to vector<8x8xbf16>
    %cst_417 = arith.constant dense<0.000000e+00> : vector<16x8xf32>
    %373 = tpu.matmul %17, %372, %cst_417 {dimension_numbers = #tpu.dot_dimension_numbers<[1], [0], [0], [1], [0, 0, 1, 1], [], []>} : vector<16x8xbf16>, vector<8x8xbf16>, vector<16x8xf32> -> vector<16x8xf32>
    %374 = arith.addf %370, %373 : vector<16x8xf32>
    %c0_418 = arith.constant 0 : index
    %c14_419 = arith.constant 14 : index
    %c0_420 = arith.constant 0 : index
    %c0_421 = arith.constant 0 : index
    %375 = vector.load %arg3[%c0_418, %c14_419, %c0_420, %c0_421] : memref<1x36x8x9xbf16, #tpu.memory_space<vmem>>, vector<1x1x8x8xbf16>
    %376 = vector.shape_cast %375 : vector<1x1x8x8xbf16> to vector<8x8xbf16>
    %cst_422 = arith.constant dense<0.000000e+00> : vector<16x8xf32>
    %377 = tpu.matmul %19, %376, %cst_422 {dimension_numbers = #tpu.dot_dimension_numbers<[1], [0], [0], [1], [0, 0, 1, 1], [], []>} : vector<16x8xbf16>, vector<8x8xbf16>, vector<16x8xf32> -> vector<16x8xf32>
    %378 = arith.addf %374, %377 : vector<16x8xf32>
    %c0_423 = arith.constant 0 : index
    %c5_424 = arith.constant 5 : index
    %c0_425 = arith.constant 0 : index
    %c1_426 = arith.constant 1 : index
    %379 = vector.load %arg3[%c0_423, %c5_424, %c0_425, %c1_426] : memref<1x36x8x9xbf16, #tpu.memory_space<vmem>>, vector<1x1x8x8xbf16>
    %380 = vector.shape_cast %379 : vector<1x1x8x8xbf16> to vector<8x8xbf16>
    %cst_427 = arith.constant dense<0.000000e+00> : vector<16x8xf32>
    %381 = tpu.matmul %21, %380, %cst_427 {dimension_numbers = #tpu.dot_dimension_numbers<[1], [0], [0], [1], [0, 0, 1, 1], [], []>} : vector<16x8xbf16>, vector<8x8xbf16>, vector<16x8xf32> -> vector<16x8xf32>
    %382 = arith.addf %378, %381 : vector<16x8xf32>
    %c0_428 = arith.constant 0 : index
    %c14_429 = arith.constant 14 : index
    %c0_430 = arith.constant 0 : index
    %c1_431 = arith.constant 1 : index
    %383 = vector.load %arg3[%c0_428, %c14_429, %c0_430, %c1_431] : memref<1x36x8x9xbf16, #tpu.memory_space<vmem>>, vector<1x1x8x8xbf16>
    %384 = vector.shape_cast %383 : vector<1x1x8x8xbf16> to vector<8x8xbf16>
    %cst_432 = arith.constant dense<0.000000e+00> : vector<16x8xf32>
    %385 = tpu.matmul %23, %384, %cst_432 {dimension_numbers = #tpu.dot_dimension_numbers<[1], [0], [0], [1], [0, 0, 1, 1], [], []>} : vector<16x8xbf16>, vector<8x8xbf16>, vector<16x8xf32> -> vector<16x8xf32>
    %386 = arith.addf %382, %385 : vector<16x8xf32>
    %c0_433 = arith.constant 0 : index
    %c23 = arith.constant 23 : index
    %c0_434 = arith.constant 0 : index
    %c0_435 = arith.constant 0 : index
    %387 = vector.load %arg3[%c0_433, %c23, %c0_434, %c0_435] : memref<1x36x8x9xbf16, #tpu.memory_space<vmem>>, vector<1x1x8x8xbf16>
    %388 = vector.shape_cast %387 : vector<1x1x8x8xbf16> to vector<8x8xbf16>
    %cst_436 = arith.constant dense<0.000000e+00> : vector<16x8xf32>
    %389 = tpu.matmul %25, %388, %cst_436 {dimension_numbers = #tpu.dot_dimension_numbers<[1], [0], [0], [1], [0, 0, 1, 1], [], []>} : vector<16x8xbf16>, vector<8x8xbf16>, vector<16x8xf32> -> vector<16x8xf32>
    %390 = arith.addf %386, %389 : vector<16x8xf32>
    %c0_437 = arith.constant 0 : index
    %c32 = arith.constant 32 : index
    %c0_438 = arith.constant 0 : index
    %c0_439 = arith.constant 0 : index
    %391 = vector.load %arg3[%c0_437, %c32, %c0_438, %c0_439] : memref<1x36x8x9xbf16, #tpu.memory_space<vmem>>, vector<1x1x8x8xbf16>
    %392 = vector.shape_cast %391 : vector<1x1x8x8xbf16> to vector<8x8xbf16>
    %cst_440 = arith.constant dense<0.000000e+00> : vector<16x8xf32>
    %393 = tpu.matmul %27, %392, %cst_440 {dimension_numbers = #tpu.dot_dimension_numbers<[1], [0], [0], [1], [0, 0, 1, 1], [], []>} : vector<16x8xbf16>, vector<8x8xbf16>, vector<16x8xf32> -> vector<16x8xf32>
    %394 = arith.addf %390, %393 : vector<16x8xf32>
    %c0_441 = arith.constant 0 : index
    %c23_442 = arith.constant 23 : index
    %c0_443 = arith.constant 0 : index
    %c1_444 = arith.constant 1 : index
    %395 = vector.load %arg3[%c0_441, %c23_442, %c0_443, %c1_444] : memref<1x36x8x9xbf16, #tpu.memory_space<vmem>>, vector<1x1x8x8xbf16>
    %396 = vector.shape_cast %395 : vector<1x1x8x8xbf16> to vector<8x8xbf16>
    %cst_445 = arith.constant dense<0.000000e+00> : vector<16x8xf32>
    %397 = tpu.matmul %29, %396, %cst_445 {dimension_numbers = #tpu.dot_dimension_numbers<[1], [0], [0], [1], [0, 0, 1, 1], [], []>} : vector<16x8xbf16>, vector<8x8xbf16>, vector<16x8xf32> -> vector<16x8xf32>
    %398 = arith.addf %394, %397 : vector<16x8xf32>
    %c0_446 = arith.constant 0 : index
    %c32_447 = arith.constant 32 : index
    %c0_448 = arith.constant 0 : index
    %c1_449 = arith.constant 1 : index
    %399 = vector.load %arg3[%c0_446, %c32_447, %c0_448, %c1_449] : memref<1x36x8x9xbf16, #tpu.memory_space<vmem>>, vector<1x1x8x8xbf16>
    %400 = vector.shape_cast %399 : vector<1x1x8x8xbf16> to vector<8x8xbf16>
    %cst_450 = arith.constant dense<0.000000e+00> : vector<16x8xf32>
    %401 = tpu.matmul %31, %400, %cst_450 {dimension_numbers = #tpu.dot_dimension_numbers<[1], [0], [0], [1], [0, 0, 1, 1], [], []>} : vector<16x8xbf16>, vector<8x8xbf16>, vector<16x8xf32> -> vector<16x8xf32>
    %402 = arith.addf %398, %401 : vector<16x8xf32>
    %403 = vector.broadcast %33 : vector<16x1xf32> to vector<16x8xf32>
    %404 = arith.addf %402, %403 : vector<16x8xf32>
    %cst_451 = arith.constant 0.000000e+00 : f32
    %405 = vector.broadcast %cst_451 : f32 to vector<16x8xf32>
    %406 = arith.cmpf ogt, %404, %405 : vector<16x8xf32>
    %cst_452 = arith.constant 2.000000e-01 : f32
    %407 = vector.broadcast %cst_452 : f32 to vector<16x8xf32>
    %408 = arith.mulf %407, %404 : vector<16x8xf32>
    %409 = arith.select %406, %404, %408 : vector<16x8xi1>, vector<16x8xf32>
    %410 = arith.truncf %409 : vector<16x8xf32> to vector<16x8xbf16>
    %c0_453 = arith.constant 0 : index
    %c4_454 = arith.constant 4 : index
    %c0_455 = arith.constant 0 : index
    %c0_456 = arith.constant 0 : index
    %411 = vector.load %arg4[%c0_453, %c4_454, %c0_455, %c0_456] : memref<1x8x16x8xbf16, #tpu.memory_space<vmem>>, vector<1x1x16x8xbf16>
    %412 = vector.shape_cast %411 : vector<1x1x16x8xbf16> to vector<16x8xbf16>
    %413 = vector.shape_cast %410 : vector<16x8xbf16> to vector<1x1x16x8xbf16>
    tpu.vector_store %arg4[%c0_453, %c4_454, %c0_455, %c0_456], %413 {strides = array<i32>} : memref<1x8x16x8xbf16, #tpu.memory_space<vmem>>, vector<1x1x16x8xbf16>,
    %cst_457 = arith.constant 0.000000e+00 : f32
    %414 = vector.broadcast %cst_457 : f32 to vector<16x8xf32>
    %c0_458 = arith.constant 0 : index
    %c5_459 = arith.constant 5 : index
    %c0_460 = arith.constant 0 : index
    %c0_461 = arith.constant 0 : index
    %415 = vector.load %arg3[%c0_458, %c5_459, %c0_460, %c0_461] : memref<1x36x8x9xbf16, #tpu.memory_space<vmem>>, vector<1x1x8x8xbf16>
    %416 = vector.shape_cast %415 : vector<1x1x8x8xbf16> to vector<8x8xbf16>
    %cst_462 = arith.constant dense<0.000000e+00> : vector<16x8xf32>
    %417 = tpu.matmul %1, %416, %cst_462 {dimension_numbers = #tpu.dot_dimension_numbers<[1], [0], [0], [1], [0, 0, 1, 1], [], []>} : vector<16x8xbf16>, vector<8x8xbf16>, vector<16x8xf32> -> vector<16x8xf32>
    %418 = arith.addf %414, %417 : vector<16x8xf32>
    %c0_463 = arith.constant 0 : index
    %c14_464 = arith.constant 14 : index
    %c0_465 = arith.constant 0 : index
    %c0_466 = arith.constant 0 : index
    %419 = vector.load %arg3[%c0_463, %c14_464, %c0_465, %c0_466] : memref<1x36x8x9xbf16, #tpu.memory_space<vmem>>, vector<1x1x8x8xbf16>
    %420 = vector.shape_cast %419 : vector<1x1x8x8xbf16> to vector<8x8xbf16>
    %cst_467 = arith.constant dense<0.000000e+00> : vector<16x8xf32>
    %421 = tpu.matmul %3, %420, %cst_467 {dimension_numbers = #tpu.dot_dimension_numbers<[1], [0], [0], [1], [0, 0, 1, 1], [], []>} : vector<16x8xbf16>, vector<8x8xbf16>, vector<16x8xf32> -> vector<16x8xf32>
    %422 = arith.addf %418, %421 : vector<16x8xf32>
    %c0_468 = arith.constant 0 : index
    %c5_469 = arith.constant 5 : index
    %c0_470 = arith.constant 0 : index
    %c1_471 = arith.constant 1 : index
    %423 = vector.load %arg3[%c0_468, %c5_469, %c0_470, %c1_471] : memref<1x36x8x9xbf16, #tpu.memory_space<vmem>>, vector<1x1x8x8xbf16>
    %424 = vector.shape_cast %423 : vector<1x1x8x8xbf16> to vector<8x8xbf16>
    %cst_472 = arith.constant dense<0.000000e+00> : vector<16x8xf32>
    %425 = tpu.matmul %5, %424, %cst_472 {dimension_numbers = #tpu.dot_dimension_numbers<[1], [0], [0], [1], [0, 0, 1, 1], [], []>} : vector<16x8xbf16>, vector<8x8xbf16>, vector<16x8xf32> -> vector<16x8xf32>
    %426 = arith.addf %422, %425 : vector<16x8xf32>
    %c0_473 = arith.constant 0 : index
    %c14_474 = arith.constant 14 : index
    %c0_475 = arith.constant 0 : index
    %c1_476 = arith.constant 1 : index
    %427 = vector.load %arg3[%c0_473, %c14_474, %c0_475, %c1_476] : memref<1x36x8x9xbf16, #tpu.memory_space<vmem>>, vector<1x1x8x8xbf16>
    %428 = vector.shape_cast %427 : vector<1x1x8x8xbf16> to vector<8x8xbf16>
    %cst_477 = arith.constant dense<0.000000e+00> : vector<16x8xf32>
    %429 = tpu.matmul %7, %428, %cst_477 {dimension_numbers = #tpu.dot_dimension_numbers<[1], [0], [0], [1], [0, 0, 1, 1], [], []>} : vector<16x8xbf16>, vector<8x8xbf16>, vector<16x8xf32> -> vector<16x8xf32>
    %430 = arith.addf %426, %429 : vector<16x8xf32>
    %c0_478 = arith.constant 0 : index
    %c23_479 = arith.constant 23 : index
    %c0_480 = arith.constant 0 : index
    %c0_481 = arith.constant 0 : index
    %431 = vector.load %arg3[%c0_478, %c23_479, %c0_480, %c0_481] : memref<1x36x8x9xbf16, #tpu.memory_space<vmem>>, vector<1x1x8x8xbf16>
    %432 = vector.shape_cast %431 : vector<1x1x8x8xbf16> to vector<8x8xbf16>
    %cst_482 = arith.constant dense<0.000000e+00> : vector<16x8xf32>
    %433 = tpu.matmul %9, %432, %cst_482 {dimension_numbers = #tpu.dot_dimension_numbers<[1], [0], [0], [1], [0, 0, 1, 1], [], []>} : vector<16x8xbf16>, vector<8x8xbf16>, vector<16x8xf32> -> vector<16x8xf32>
    %434 = arith.addf %430, %433 : vector<16x8xf32>
    %c0_483 = arith.constant 0 : index
    %c32_484 = arith.constant 32 : index
    %c0_485 = arith.constant 0 : index
    %c0_486 = arith.constant 0 : index
    %435 = vector.load %arg3[%c0_483, %c32_484, %c0_485, %c0_486] : memref<1x36x8x9xbf16, #tpu.memory_space<vmem>>, vector<1x1x8x8xbf16>
    %436 = vector.shape_cast %435 : vector<1x1x8x8xbf16> to vector<8x8xbf16>
    %cst_487 = arith.constant dense<0.000000e+00> : vector<16x8xf32>
    %437 = tpu.matmul %11, %436, %cst_487 {dimension_numbers = #tpu.dot_dimension_numbers<[1], [0], [0], [1], [0, 0, 1, 1], [], []>} : vector<16x8xbf16>, vector<8x8xbf16>, vector<16x8xf32> -> vector<16x8xf32>
    %438 = arith.addf %434, %437 : vector<16x8xf32>
    %c0_488 = arith.constant 0 : index
    %c23_489 = arith.constant 23 : index
    %c0_490 = arith.constant 0 : index
    %c1_491 = arith.constant 1 : index
    %439 = vector.load %arg3[%c0_488, %c23_489, %c0_490, %c1_491] : memref<1x36x8x9xbf16, #tpu.memory_space<vmem>>, vector<1x1x8x8xbf16>
    %440 = vector.shape_cast %439 : vector<1x1x8x8xbf16> to vector<8x8xbf16>
    %cst_492 = arith.constant dense<0.000000e+00> : vector<16x8xf32>
    %441 = tpu.matmul %13, %440, %cst_492 {dimension_numbers = #tpu.dot_dimension_numbers<[1], [0], [0], [1], [0, 0, 1, 1], [], []>} : vector<16x8xbf16>, vector<8x8xbf16>, vector<16x8xf32> -> vector<16x8xf32>
    %442 = arith.addf %438, %441 : vector<16x8xf32>
    %c0_493 = arith.constant 0 : index
    %c32_494 = arith.constant 32 : index
    %c0_495 = arith.constant 0 : index
    %c1_496 = arith.constant 1 : index
    %443 = vector.load %arg3[%c0_493, %c32_494, %c0_495, %c1_496] : memref<1x36x8x9xbf16, #tpu.memory_space<vmem>>, vector<1x1x8x8xbf16>
    %444 = vector.shape_cast %443 : vector<1x1x8x8xbf16> to vector<8x8xbf16>
    %cst_497 = arith.constant dense<0.000000e+00> : vector<16x8xf32>
    %445 = tpu.matmul %15, %444, %cst_497 {dimension_numbers = #tpu.dot_dimension_numbers<[1], [0], [0], [1], [0, 0, 1, 1], [], []>} : vector<16x8xbf16>, vector<8x8xbf16>, vector<16x8xf32> -> vector<16x8xf32>
    %446 = arith.addf %442, %445 : vector<16x8xf32>
    %c0_498 = arith.constant 0 : index
    %c6_499 = arith.constant 6 : index
    %c0_500 = arith.constant 0 : index
    %c0_501 = arith.constant 0 : index
    %447 = vector.load %arg3[%c0_498, %c6_499, %c0_500, %c0_501] : memref<1x36x8x9xbf16, #tpu.memory_space<vmem>>, vector<1x1x8x8xbf16>
    %448 = vector.shape_cast %447 : vector<1x1x8x8xbf16> to vector<8x8xbf16>
    %cst_502 = arith.constant dense<0.000000e+00> : vector<16x8xf32>
    %449 = tpu.matmul %17, %448, %cst_502 {dimension_numbers = #tpu.dot_dimension_numbers<[1], [0], [0], [1], [0, 0, 1, 1], [], []>} : vector<16x8xbf16>, vector<8x8xbf16>, vector<16x8xf32> -> vector<16x8xf32>
    %450 = arith.addf %446, %449 : vector<16x8xf32>
    %c0_503 = arith.constant 0 : index
    %c15_504 = arith.constant 15 : index
    %c0_505 = arith.constant 0 : index
    %c0_506 = arith.constant 0 : index
    %451 = vector.load %arg3[%c0_503, %c15_504, %c0_505, %c0_506] : memref<1x36x8x9xbf16, #tpu.memory_space<vmem>>, vector<1x1x8x8xbf16>
    %452 = vector.shape_cast %451 : vector<1x1x8x8xbf16> to vector<8x8xbf16>
    %cst_507 = arith.constant dense<0.000000e+00> : vector<16x8xf32>
    %453 = tpu.matmul %19, %452, %cst_507 {dimension_numbers = #tpu.dot_dimension_numbers<[1], [0], [0], [1], [0, 0, 1, 1], [], []>} : vector<16x8xbf16>, vector<8x8xbf16>, vector<16x8xf32> -> vector<16x8xf32>
    %454 = arith.addf %450, %453 : vector<16x8xf32>
    %c0_508 = arith.constant 0 : index
    %c6_509 = arith.constant 6 : index
    %c0_510 = arith.constant 0 : index
    %c1_511 = arith.constant 1 : index
    %455 = vector.load %arg3[%c0_508, %c6_509, %c0_510, %c1_511] : memref<1x36x8x9xbf16, #tpu.memory_space<vmem>>, vector<1x1x8x8xbf16>
    %456 = vector.shape_cast %455 : vector<1x1x8x8xbf16> to vector<8x8xbf16>
    %cst_512 = arith.constant dense<0.000000e+00> : vector<16x8xf32>
    %457 = tpu.matmul %21, %456, %cst_512 {dimension_numbers = #tpu.dot_dimension_numbers<[1], [0], [0], [1], [0, 0, 1, 1], [], []>} : vector<16x8xbf16>, vector<8x8xbf16>, vector<16x8xf32> -> vector<16x8xf32>
    %458 = arith.addf %454, %457 : vector<16x8xf32>
    %c0_513 = arith.constant 0 : index
    %c15_514 = arith.constant 15 : index
    %c0_515 = arith.constant 0 : index
    %c1_516 = arith.constant 1 : index
    %459 = vector.load %arg3[%c0_513, %c15_514, %c0_515, %c1_516] : memref<1x36x8x9xbf16, #tpu.memory_space<vmem>>, vector<1x1x8x8xbf16>
    %460 = vector.shape_cast %459 : vector<1x1x8x8xbf16> to vector<8x8xbf16>
    %cst_517 = arith.constant dense<0.000000e+00> : vector<16x8xf32>
    %461 = tpu.matmul %23, %460, %cst_517 {dimension_numbers = #tpu.dot_dimension_numbers<[1], [0], [0], [1], [0, 0, 1, 1], [], []>} : vector<16x8xbf16>, vector<8x8xbf16>, vector<16x8xf32> -> vector<16x8xf32>
    %462 = arith.addf %458, %461 : vector<16x8xf32>
    %c0_518 = arith.constant 0 : index
    %c24 = arith.constant 24 : index
    %c0_519 = arith.constant 0 : index
    %c0_520 = arith.constant 0 : index
    %463 = vector.load %arg3[%c0_518, %c24, %c0_519, %c0_520] : memref<1x36x8x9xbf16, #tpu.memory_space<vmem>>, vector<1x1x8x8xbf16>
    %464 = vector.shape_cast %463 : vector<1x1x8x8xbf16> to vector<8x8xbf16>
    %cst_521 = arith.constant dense<0.000000e+00> : vector<16x8xf32>
    %465 = tpu.matmul %25, %464, %cst_521 {dimension_numbers = #tpu.dot_dimension_numbers<[1], [0], [0], [1], [0, 0, 1, 1], [], []>} : vector<16x8xbf16>, vector<8x8xbf16>, vector<16x8xf32> -> vector<16x8xf32>
    %466 = arith.addf %462, %465 : vector<16x8xf32>
    %c0_522 = arith.constant 0 : index
    %c33 = arith.constant 33 : index
    %c0_523 = arith.constant 0 : index
    %c0_524 = arith.constant 0 : index
    %467 = vector.load %arg3[%c0_522, %c33, %c0_523, %c0_524] : memref<1x36x8x9xbf16, #tpu.memory_space<vmem>>, vector<1x1x8x8xbf16>
    %468 = vector.shape_cast %467 : vector<1x1x8x8xbf16> to vector<8x8xbf16>
    %cst_525 = arith.constant dense<0.000000e+00> : vector<16x8xf32>
    %469 = tpu.matmul %27, %468, %cst_525 {dimension_numbers = #tpu.dot_dimension_numbers<[1], [0], [0], [1], [0, 0, 1, 1], [], []>} : vector<16x8xbf16>, vector<8x8xbf16>, vector<16x8xf32> -> vector<16x8xf32>
    %470 = arith.addf %466, %469 : vector<16x8xf32>
    %c0_526 = arith.constant 0 : index
    %c24_527 = arith.constant 24 : index
    %c0_528 = arith.constant 0 : index
    %c1_529 = arith.constant 1 : index
    %471 = vector.load %arg3[%c0_526, %c24_527, %c0_528, %c1_529] : memref<1x36x8x9xbf16, #tpu.memory_space<vmem>>, vector<1x1x8x8xbf16>
    %472 = vector.shape_cast %471 : vector<1x1x8x8xbf16> to vector<8x8xbf16>
    %cst_530 = arith.constant dense<0.000000e+00> : vector<16x8xf32>
    %473 = tpu.matmul %29, %472, %cst_530 {dimension_numbers = #tpu.dot_dimension_numbers<[1], [0], [0], [1], [0, 0, 1, 1], [], []>} : vector<16x8xbf16>, vector<8x8xbf16>, vector<16x8xf32> -> vector<16x8xf32>
    %474 = arith.addf %470, %473 : vector<16x8xf32>
    %c0_531 = arith.constant 0 : index
    %c33_532 = arith.constant 33 : index
    %c0_533 = arith.constant 0 : index
    %c1_534 = arith.constant 1 : index
    %475 = vector.load %arg3[%c0_531, %c33_532, %c0_533, %c1_534] : memref<1x36x8x9xbf16, #tpu.memory_space<vmem>>, vector<1x1x8x8xbf16>
    %476 = vector.shape_cast %475 : vector<1x1x8x8xbf16> to vector<8x8xbf16>
    %cst_535 = arith.constant dense<0.000000e+00> : vector<16x8xf32>
    %477 = tpu.matmul %31, %476, %cst_535 {dimension_numbers = #tpu.dot_dimension_numbers<[1], [0], [0], [1], [0, 0, 1, 1], [], []>} : vector<16x8xbf16>, vector<8x8xbf16>, vector<16x8xf32> -> vector<16x8xf32>
    %478 = arith.addf %474, %477 : vector<16x8xf32>
    %479 = vector.broadcast %33 : vector<16x1xf32> to vector<16x8xf32>
    %480 = arith.addf %478, %479 : vector<16x8xf32>
    %cst_536 = arith.constant 0.000000e+00 : f32
    %481 = vector.broadcast %cst_536 : f32 to vector<16x8xf32>
    %482 = arith.cmpf ogt, %480, %481 : vector<16x8xf32>
    %cst_537 = arith.constant 2.000000e-01 : f32
    %483 = vector.broadcast %cst_537 : f32 to vector<16x8xf32>
    %484 = arith.mulf %483, %480 : vector<16x8xf32>
    %485 = arith.select %482, %480, %484 : vector<16x8xi1>, vector<16x8xf32>
    %486 = arith.truncf %485 : vector<16x8xf32> to vector<16x8xbf16>
    %c0_538 = arith.constant 0 : index
    %c5_539 = arith.constant 5 : index
    %c0_540 = arith.constant 0 : index
    %c0_541 = arith.constant 0 : index
    %487 = vector.load %arg4[%c0_538, %c5_539, %c0_540, %c0_541] : memref<1x8x16x8xbf16, #tpu.memory_space<vmem>>, vector<1x1x16x8xbf16>
    %488 = vector.shape_cast %487 : vector<1x1x16x8xbf16> to vector<16x8xbf16>
    %489 = vector.shape_cast %486 : vector<16x8xbf16> to vector<1x1x16x8xbf16>
    tpu.vector_store %arg4[%c0_538, %c5_539, %c0_540, %c0_541], %489 {strides = array<i32>} : memref<1x8x16x8xbf16, #tpu.memory_space<vmem>>, vector<1x1x16x8xbf16>,
    %cst_542 = arith.constant 0.000000e+00 : f32
    %490 = vector.broadcast %cst_542 : f32 to vector<16x8xf32>
    %c0_543 = arith.constant 0 : index
    %c6_544 = arith.constant 6 : index
    %c0_545 = arith.constant 0 : index
    %c0_546 = arith.constant 0 : index
    %491 = vector.load %arg3[%c0_543, %c6_544, %c0_545, %c0_546] : memref<1x36x8x9xbf16, #tpu.memory_space<vmem>>, vector<1x1x8x8xbf16>
    %492 = vector.shape_cast %491 : vector<1x1x8x8xbf16> to vector<8x8xbf16>
    %cst_547 = arith.constant dense<0.000000e+00> : vector<16x8xf32>
    %493 = tpu.matmul %1, %492, %cst_547 {dimension_numbers = #tpu.dot_dimension_numbers<[1], [0], [0], [1], [0, 0, 1, 1], [], []>} : vector<16x8xbf16>, vector<8x8xbf16>, vector<16x8xf32> -> vector<16x8xf32>
    %494 = arith.addf %490, %493 : vector<16x8xf32>
    %c0_548 = arith.constant 0 : index
    %c15_549 = arith.constant 15 : index
    %c0_550 = arith.constant 0 : index
    %c0_551 = arith.constant 0 : index
    %495 = vector.load %arg3[%c0_548, %c15_549, %c0_550, %c0_551] : memref<1x36x8x9xbf16, #tpu.memory_space<vmem>>, vector<1x1x8x8xbf16>
    %496 = vector.shape_cast %495 : vector<1x1x8x8xbf16> to vector<8x8xbf16>
    %cst_552 = arith.constant dense<0.000000e+00> : vector<16x8xf32>
    %497 = tpu.matmul %3, %496, %cst_552 {dimension_numbers = #tpu.dot_dimension_numbers<[1], [0], [0], [1], [0, 0, 1, 1], [], []>} : vector<16x8xbf16>, vector<8x8xbf16>, vector<16x8xf32> -> vector<16x8xf32>
    %498 = arith.addf %494, %497 : vector<16x8xf32>
    %c0_553 = arith.constant 0 : index
    %c6_554 = arith.constant 6 : index
    %c0_555 = arith.constant 0 : index
    %c1_556 = arith.constant 1 : index
    %499 = vector.load %arg3[%c0_553, %c6_554, %c0_555, %c1_556] : memref<1x36x8x9xbf16, #tpu.memory_space<vmem>>, vector<1x1x8x8xbf16>
    %500 = vector.shape_cast %499 : vector<1x1x8x8xbf16> to vector<8x8xbf16>
    %cst_557 = arith.constant dense<0.000000e+00> : vector<16x8xf32>
    %501 = tpu.matmul %5, %500, %cst_557 {dimension_numbers = #tpu.dot_dimension_numbers<[1], [0], [0], [1], [0, 0, 1, 1], [], []>} : vector<16x8xbf16>, vector<8x8xbf16>, vector<16x8xf32> -> vector<16x8xf32>
    %502 = arith.addf %498, %501 : vector<16x8xf32>
    %c0_558 = arith.constant 0 : index
    %c15_559 = arith.constant 15 : index
    %c0_560 = arith.constant 0 : index
    %c1_561 = arith.constant 1 : index
    %503 = vector.load %arg3[%c0_558, %c15_559, %c0_560, %c1_561] : memref<1x36x8x9xbf16, #tpu.memory_space<vmem>>, vector<1x1x8x8xbf16>
    %504 = vector.shape_cast %503 : vector<1x1x8x8xbf16> to vector<8x8xbf16>
    %cst_562 = arith.constant dense<0.000000e+00> : vector<16x8xf32>
    %505 = tpu.matmul %7, %504, %cst_562 {dimension_numbers = #tpu.dot_dimension_numbers<[1], [0], [0], [1], [0, 0, 1, 1], [], []>} : vector<16x8xbf16>, vector<8x8xbf16>, vector<16x8xf32> -> vector<16x8xf32>
    %506 = arith.addf %502, %505 : vector<16x8xf32>
    %c0_563 = arith.constant 0 : index
    %c24_564 = arith.constant 24 : index
    %c0_565 = arith.constant 0 : index
    %c0_566 = arith.constant 0 : index
    %507 = vector.load %arg3[%c0_563, %c24_564, %c0_565, %c0_566] : memref<1x36x8x9xbf16, #tpu.memory_space<vmem>>, vector<1x1x8x8xbf16>
    %508 = vector.shape_cast %507 : vector<1x1x8x8xbf16> to vector<8x8xbf16>
    %cst_567 = arith.constant dense<0.000000e+00> : vector<16x8xf32>
    %509 = tpu.matmul %9, %508, %cst_567 {dimension_numbers = #tpu.dot_dimension_numbers<[1], [0], [0], [1], [0, 0, 1, 1], [], []>} : vector<16x8xbf16>, vector<8x8xbf16>, vector<16x8xf32> -> vector<16x8xf32>
    %510 = arith.addf %506, %509 : vector<16x8xf32>
    %c0_568 = arith.constant 0 : index
    %c33_569 = arith.constant 33 : index
    %c0_570 = arith.constant 0 : index
    %c0_571 = arith.constant 0 : index
    %511 = vector.load %arg3[%c0_568, %c33_569, %c0_570, %c0_571] : memref<1x36x8x9xbf16, #tpu.memory_space<vmem>>, vector<1x1x8x8xbf16>
    %512 = vector.shape_cast %511 : vector<1x1x8x8xbf16> to vector<8x8xbf16>
    %cst_572 = arith.constant dense<0.000000e+00> : vector<16x8xf32>
    %513 = tpu.matmul %11, %512, %cst_572 {dimension_numbers = #tpu.dot_dimension_numbers<[1], [0], [0], [1], [0, 0, 1, 1], [], []>} : vector<16x8xbf16>, vector<8x8xbf16>, vector<16x8xf32> -> vector<16x8xf32>
    %514 = arith.addf %510, %513 : vector<16x8xf32>
    %c0_573 = arith.constant 0 : index
    %c24_574 = arith.constant 24 : index
    %c0_575 = arith.constant 0 : index
    %c1_576 = arith.constant 1 : index
    %515 = vector.load %arg3[%c0_573, %c24_574, %c0_575, %c1_576] : memref<1x36x8x9xbf16, #tpu.memory_space<vmem>>, vector<1x1x8x8xbf16>
    %516 = vector.shape_cast %515 : vector<1x1x8x8xbf16> to vector<8x8xbf16>
    %cst_577 = arith.constant dense<0.000000e+00> : vector<16x8xf32>
    %517 = tpu.matmul %13, %516, %cst_577 {dimension_numbers = #tpu.dot_dimension_numbers<[1], [0], [0], [1], [0, 0, 1, 1], [], []>} : vector<16x8xbf16>, vector<8x8xbf16>, vector<16x8xf32> -> vector<16x8xf32>
    %518 = arith.addf %514, %517 : vector<16x8xf32>
    %c0_578 = arith.constant 0 : index
    %c33_579 = arith.constant 33 : index
    %c0_580 = arith.constant 0 : index
    %c1_581 = arith.constant 1 : index
    %519 = vector.load %arg3[%c0_578, %c33_579, %c0_580, %c1_581] : memref<1x36x8x9xbf16, #tpu.memory_space<vmem>>, vector<1x1x8x8xbf16>
    %520 = vector.shape_cast %519 : vector<1x1x8x8xbf16> to vector<8x8xbf16>
    %cst_582 = arith.constant dense<0.000000e+00> : vector<16x8xf32>
    %521 = tpu.matmul %15, %520, %cst_582 {dimension_numbers = #tpu.dot_dimension_numbers<[1], [0], [0], [1], [0, 0, 1, 1], [], []>} : vector<16x8xbf16>, vector<8x8xbf16>, vector<16x8xf32> -> vector<16x8xf32>
    %522 = arith.addf %518, %521 : vector<16x8xf32>
    %c0_583 = arith.constant 0 : index
    %c7_584 = arith.constant 7 : index
    %c0_585 = arith.constant 0 : index
    %c0_586 = arith.constant 0 : index
    %523 = vector.load %arg3[%c0_583, %c7_584, %c0_585, %c0_586] : memref<1x36x8x9xbf16, #tpu.memory_space<vmem>>, vector<1x1x8x8xbf16>
    %524 = vector.shape_cast %523 : vector<1x1x8x8xbf16> to vector<8x8xbf16>
    %cst_587 = arith.constant dense<0.000000e+00> : vector<16x8xf32>
    %525 = tpu.matmul %17, %524, %cst_587 {dimension_numbers = #tpu.dot_dimension_numbers<[1], [0], [0], [1], [0, 0, 1, 1], [], []>} : vector<16x8xbf16>, vector<8x8xbf16>, vector<16x8xf32> -> vector<16x8xf32>
    %526 = arith.addf %522, %525 : vector<16x8xf32>
    %c0_588 = arith.constant 0 : index
    %c16 = arith.constant 16 : index
    %c0_589 = arith.constant 0 : index
    %c0_590 = arith.constant 0 : index
    %527 = vector.load %arg3[%c0_588, %c16, %c0_589, %c0_590] : memref<1x36x8x9xbf16, #tpu.memory_space<vmem>>, vector<1x1x8x8xbf16>
    %528 = vector.shape_cast %527 : vector<1x1x8x8xbf16> to vector<8x8xbf16>
    %cst_591 = arith.constant dense<0.000000e+00> : vector<16x8xf32>
    %529 = tpu.matmul %19, %528, %cst_591 {dimension_numbers = #tpu.dot_dimension_numbers<[1], [0], [0], [1], [0, 0, 1, 1], [], []>} : vector<16x8xbf16>, vector<8x8xbf16>, vector<16x8xf32> -> vector<16x8xf32>
    %530 = arith.addf %526, %529 : vector<16x8xf32>
    %c0_592 = arith.constant 0 : index
    %c7_593 = arith.constant 7 : index
    %c0_594 = arith.constant 0 : index
    %c1_595 = arith.constant 1 : index
    %531 = vector.load %arg3[%c0_592, %c7_593, %c0_594, %c1_595] : memref<1x36x8x9xbf16, #tpu.memory_space<vmem>>, vector<1x1x8x8xbf16>
    %532 = vector.shape_cast %531 : vector<1x1x8x8xbf16> to vector<8x8xbf16>
    %cst_596 = arith.constant dense<0.000000e+00> : vector<16x8xf32>
    %533 = tpu.matmul %21, %532, %cst_596 {dimension_numbers = #tpu.dot_dimension_numbers<[1], [0], [0], [1], [0, 0, 1, 1], [], []>} : vector<16x8xbf16>, vector<8x8xbf16>, vector<16x8xf32> -> vector<16x8xf32>
    %534 = arith.addf %530, %533 : vector<16x8xf32>
    %c0_597 = arith.constant 0 : index
    %c16_598 = arith.constant 16 : index
    %c0_599 = arith.constant 0 : index
    %c1_600 = arith.constant 1 : index
    %535 = vector.load %arg3[%c0_597, %c16_598, %c0_599, %c1_600] : memref<1x36x8x9xbf16, #tpu.memory_space<vmem>>, vector<1x1x8x8xbf16>
    %536 = vector.shape_cast %535 : vector<1x1x8x8xbf16> to vector<8x8xbf16>
    %cst_601 = arith.constant dense<0.000000e+00> : vector<16x8xf32>
    %537 = tpu.matmul %23, %536, %cst_601 {dimension_numbers = #tpu.dot_dimension_numbers<[1], [0], [0], [1], [0, 0, 1, 1], [], []>} : vector<16x8xbf16>, vector<8x8xbf16>, vector<16x8xf32> -> vector<16x8xf32>
    %538 = arith.addf %534, %537 : vector<16x8xf32>
    %c0_602 = arith.constant 0 : index
    %c25 = arith.constant 25 : index
    %c0_603 = arith.constant 0 : index
    %c0_604 = arith.constant 0 : index
    %539 = vector.load %arg3[%c0_602, %c25, %c0_603, %c0_604] : memref<1x36x8x9xbf16, #tpu.memory_space<vmem>>, vector<1x1x8x8xbf16>
    %540 = vector.shape_cast %539 : vector<1x1x8x8xbf16> to vector<8x8xbf16>
    %cst_605 = arith.constant dense<0.000000e+00> : vector<16x8xf32>
    %541 = tpu.matmul %25, %540, %cst_605 {dimension_numbers = #tpu.dot_dimension_numbers<[1], [0], [0], [1], [0, 0, 1, 1], [], []>} : vector<16x8xbf16>, vector<8x8xbf16>, vector<16x8xf32> -> vector<16x8xf32>
    %542 = arith.addf %538, %541 : vector<16x8xf32>
    %c0_606 = arith.constant 0 : index
    %c34 = arith.constant 34 : index
    %c0_607 = arith.constant 0 : index
    %c0_608 = arith.constant 0 : index
    %543 = vector.load %arg3[%c0_606, %c34, %c0_607, %c0_608] : memref<1x36x8x9xbf16, #tpu.memory_space<vmem>>, vector<1x1x8x8xbf16>
    %544 = vector.shape_cast %543 : vector<1x1x8x8xbf16> to vector<8x8xbf16>
    %cst_609 = arith.constant dense<0.000000e+00> : vector<16x8xf32>
    %545 = tpu.matmul %27, %544, %cst_609 {dimension_numbers = #tpu.dot_dimension_numbers<[1], [0], [0], [1], [0, 0, 1, 1], [], []>} : vector<16x8xbf16>, vector<8x8xbf16>, vector<16x8xf32> -> vector<16x8xf32>
    %546 = arith.addf %542, %545 : vector<16x8xf32>
    %c0_610 = arith.constant 0 : index
    %c25_611 = arith.constant 25 : index
    %c0_612 = arith.constant 0 : index
    %c1_613 = arith.constant 1 : index
    %547 = vector.load %arg3[%c0_610, %c25_611, %c0_612, %c1_613] : memref<1x36x8x9xbf16, #tpu.memory_space<vmem>>, vector<1x1x8x8xbf16>
    %548 = vector.shape_cast %547 : vector<1x1x8x8xbf16> to vector<8x8xbf16>
    %cst_614 = arith.constant dense<0.000000e+00> : vector<16x8xf32>
    %549 = tpu.matmul %29, %548, %cst_614 {dimension_numbers = #tpu.dot_dimension_numbers<[1], [0], [0], [1], [0, 0, 1, 1], [], []>} : vector<16x8xbf16>, vector<8x8xbf16>, vector<16x8xf32> -> vector<16x8xf32>
    %550 = arith.addf %546, %549 : vector<16x8xf32>
    %c0_615 = arith.constant 0 : index
    %c34_616 = arith.constant 34 : index
    %c0_617 = arith.constant 0 : index
    %c1_618 = arith.constant 1 : index
    %551 = vector.load %arg3[%c0_615, %c34_616, %c0_617, %c1_618] : memref<1x36x8x9xbf16, #tpu.memory_space<vmem>>, vector<1x1x8x8xbf16>
    %552 = vector.shape_cast %551 : vector<1x1x8x8xbf16> to vector<8x8xbf16>
    %cst_619 = arith.constant dense<0.000000e+00> : vector<16x8xf32>
    %553 = tpu.matmul %31, %552, %cst_619 {dimension_numbers = #tpu.dot_dimension_numbers<[1], [0], [0], [1], [0, 0, 1, 1], [], []>} : vector<16x8xbf16>, vector<8x8xbf16>, vector<16x8xf32> -> vector<16x8xf32>
    %554 = arith.addf %550, %553 : vector<16x8xf32>
    %555 = vector.broadcast %33 : vector<16x1xf32> to vector<16x8xf32>
    %556 = arith.addf %554, %555 : vector<16x8xf32>
    %cst_620 = arith.constant 0.000000e+00 : f32
    %557 = vector.broadcast %cst_620 : f32 to vector<16x8xf32>
    %558 = arith.cmpf ogt, %556, %557 : vector<16x8xf32>
    %cst_621 = arith.constant 2.000000e-01 : f32
    %559 = vector.broadcast %cst_621 : f32 to vector<16x8xf32>
    %560 = arith.mulf %559, %556 : vector<16x8xf32>
    %561 = arith.select %558, %556, %560 : vector<16x8xi1>, vector<16x8xf32>
    %562 = arith.truncf %561 : vector<16x8xf32> to vector<16x8xbf16>
    %c0_622 = arith.constant 0 : index
    %c6_623 = arith.constant 6 : index
    %c0_624 = arith.constant 0 : index
    %c0_625 = arith.constant 0 : index
    %563 = vector.load %arg4[%c0_622, %c6_623, %c0_624, %c0_625] : memref<1x8x16x8xbf16, #tpu.memory_space<vmem>>, vector<1x1x16x8xbf16>
    %564 = vector.shape_cast %563 : vector<1x1x16x8xbf16> to vector<16x8xbf16>
    %565 = vector.shape_cast %562 : vector<16x8xbf16> to vector<1x1x16x8xbf16>
    tpu.vector_store %arg4[%c0_622, %c6_623, %c0_624, %c0_625], %565 {strides = array<i32>} : memref<1x8x16x8xbf16, #tpu.memory_space<vmem>>, vector<1x1x16x8xbf16>,
    %cst_626 = arith.constant 0.000000e+00 : f32
    %566 = vector.broadcast %cst_626 : f32 to vector<16x8xf32>
    %c0_627 = arith.constant 0 : index
    %c7_628 = arith.constant 7 : index
    %c0_629 = arith.constant 0 : index
    %c0_630 = arith.constant 0 : index
    %567 = vector.load %arg3[%c0_627, %c7_628, %c0_629, %c0_630] : memref<1x36x8x9xbf16, #tpu.memory_space<vmem>>, vector<1x1x8x8xbf16>
    %568 = vector.shape_cast %567 : vector<1x1x8x8xbf16> to vector<8x8xbf16>
    %cst_631 = arith.constant dense<0.000000e+00> : vector<16x8xf32>
    %569 = tpu.matmul %1, %568, %cst_631 {dimension_numbers = #tpu.dot_dimension_numbers<[1], [0], [0], [1], [0, 0, 1, 1], [], []>} : vector<16x8xbf16>, vector<8x8xbf16>, vector<16x8xf32> -> vector<16x8xf32>
    %570 = arith.addf %566, %569 : vector<16x8xf32>
    %c0_632 = arith.constant 0 : index
    %c16_633 = arith.constant 16 : index
    %c0_634 = arith.constant 0 : index
    %c0_635 = arith.constant 0 : index
    %571 = vector.load %arg3[%c0_632, %c16_633, %c0_634, %c0_635] : memref<1x36x8x9xbf16, #tpu.memory_space<vmem>>, vector<1x1x8x8xbf16>
    %572 = vector.shape_cast %571 : vector<1x1x8x8xbf16> to vector<8x8xbf16>
    %cst_636 = arith.constant dense<0.000000e+00> : vector<16x8xf32>
    %573 = tpu.matmul %3, %572, %cst_636 {dimension_numbers = #tpu.dot_dimension_numbers<[1], [0], [0], [1], [0, 0, 1, 1], [], []>} : vector<16x8xbf16>, vector<8x8xbf16>, vector<16x8xf32> -> vector<16x8xf32>
    %574 = arith.addf %570, %573 : vector<16x8xf32>
    %c0_637 = arith.constant 0 : index
    %c7_638 = arith.constant 7 : index
    %c0_639 = arith.constant 0 : index
    %c1_640 = arith.constant 1 : index
    %575 = vector.load %arg3[%c0_637, %c7_638, %c0_639, %c1_640] : memref<1x36x8x9xbf16, #tpu.memory_space<vmem>>, vector<1x1x8x8xbf16>
    %576 = vector.shape_cast %575 : vector<1x1x8x8xbf16> to vector<8x8xbf16>
    %cst_641 = arith.constant dense<0.000000e+00> : vector<16x8xf32>
    %577 = tpu.matmul %5, %576, %cst_641 {dimension_numbers = #tpu.dot_dimension_numbers<[1], [0], [0], [1], [0, 0, 1, 1], [], []>} : vector<16x8xbf16>, vector<8x8xbf16>, vector<16x8xf32> -> vector<16x8xf32>
    %578 = arith.addf %574, %577 : vector<16x8xf32>
    %c0_642 = arith.constant 0 : index
    %c16_643 = arith.constant 16 : index
    %c0_644 = arith.constant 0 : index
    %c1_645 = arith.constant 1 : index
    %579 = vector.load %arg3[%c0_642, %c16_643, %c0_644, %c1_645] : memref<1x36x8x9xbf16, #tpu.memory_space<vmem>>, vector<1x1x8x8xbf16>
    %580 = vector.shape_cast %579 : vector<1x1x8x8xbf16> to vector<8x8xbf16>
    %cst_646 = arith.constant dense<0.000000e+00> : vector<16x8xf32>
    %581 = tpu.matmul %7, %580, %cst_646 {dimension_numbers = #tpu.dot_dimension_numbers<[1], [0], [0], [1], [0, 0, 1, 1], [], []>} : vector<16x8xbf16>, vector<8x8xbf16>, vector<16x8xf32> -> vector<16x8xf32>
    %582 = arith.addf %578, %581 : vector<16x8xf32>
    %c0_647 = arith.constant 0 : index
    %c25_648 = arith.constant 25 : index
    %c0_649 = arith.constant 0 : index
    %c0_650 = arith.constant 0 : index
    %583 = vector.load %arg3[%c0_647, %c25_648, %c0_649, %c0_650] : memref<1x36x8x9xbf16, #tpu.memory_space<vmem>>, vector<1x1x8x8xbf16>
    %584 = vector.shape_cast %583 : vector<1x1x8x8xbf16> to vector<8x8xbf16>
    %cst_651 = arith.constant dense<0.000000e+00> : vector<16x8xf32>
    %585 = tpu.matmul %9, %584, %cst_651 {dimension_numbers = #tpu.dot_dimension_numbers<[1], [0], [0], [1], [0, 0, 1, 1], [], []>} : vector<16x8xbf16>, vector<8x8xbf16>, vector<16x8xf32> -> vector<16x8xf32>
    %586 = arith.addf %582, %585 : vector<16x8xf32>
    %c0_652 = arith.constant 0 : index
    %c34_653 = arith.constant 34 : index
    %c0_654 = arith.constant 0 : index
    %c0_655 = arith.constant 0 : index
    %587 = vector.load %arg3[%c0_652, %c34_653, %c0_654, %c0_655] : memref<1x36x8x9xbf16, #tpu.memory_space<vmem>>, vector<1x1x8x8xbf16>
    %588 = vector.shape_cast %587 : vector<1x1x8x8xbf16> to vector<8x8xbf16>
    %cst_656 = arith.constant dense<0.000000e+00> : vector<16x8xf32>
    %589 = tpu.matmul %11, %588, %cst_656 {dimension_numbers = #tpu.dot_dimension_numbers<[1], [0], [0], [1], [0, 0, 1, 1], [], []>} : vector<16x8xbf16>, vector<8x8xbf16>, vector<16x8xf32> -> vector<16x8xf32>
    %590 = arith.addf %586, %589 : vector<16x8xf32>
    %c0_657 = arith.constant 0 : index
    %c25_658 = arith.constant 25 : index
    %c0_659 = arith.constant 0 : index
    %c1_660 = arith.constant 1 : index
    %591 = vector.load %arg3[%c0_657, %c25_658, %c0_659, %c1_660] : memref<1x36x8x9xbf16, #tpu.memory_space<vmem>>, vector<1x1x8x8xbf16>
    %592 = vector.shape_cast %591 : vector<1x1x8x8xbf16> to vector<8x8xbf16>
    %cst_661 = arith.constant dense<0.000000e+00> : vector<16x8xf32>
    %593 = tpu.matmul %13, %592, %cst_661 {dimension_numbers = #tpu.dot_dimension_numbers<[1], [0], [0], [1], [0, 0, 1, 1], [], []>} : vector<16x8xbf16>, vector<8x8xbf16>, vector<16x8xf32> -> vector<16x8xf32>
    %594 = arith.addf %590, %593 : vector<16x8xf32>
    %c0_662 = arith.constant 0 : index
    %c34_663 = arith.constant 34 : index
    %c0_664 = arith.constant 0 : index
    %c1_665 = arith.constant 1 : index
    %595 = vector.load %arg3[%c0_662, %c34_663, %c0_664, %c1_665] : memref<1x36x8x9xbf16, #tpu.memory_space<vmem>>, vector<1x1x8x8xbf16>
    %596 = vector.shape_cast %595 : vector<1x1x8x8xbf16> to vector<8x8xbf16>
    %cst_666 = arith.constant dense<0.000000e+00> : vector<16x8xf32>
    %597 = tpu.matmul %15, %596, %cst_666 {dimension_numbers = #tpu.dot_dimension_numbers<[1], [0], [0], [1], [0, 0, 1, 1], [], []>} : vector<16x8xbf16>, vector<8x8xbf16>, vector<16x8xf32> -> vector<16x8xf32>
    %598 = arith.addf %594, %597 : vector<16x8xf32>
    %c0_667 = arith.constant 0 : index
    %c8_668 = arith.constant 8 : index
    %c0_669 = arith.constant 0 : index
    %c0_670 = arith.constant 0 : index
    %599 = vector.load %arg3[%c0_667, %c8_668, %c0_669, %c0_670] : memref<1x36x8x9xbf16, #tpu.memory_space<vmem>>, vector<1x1x8x8xbf16>
    %600 = vector.shape_cast %599 : vector<1x1x8x8xbf16> to vector<8x8xbf16>
    %cst_671 = arith.constant dense<0.000000e+00> : vector<16x8xf32>
    %601 = tpu.matmul %17, %600, %cst_671 {dimension_numbers = #tpu.dot_dimension_numbers<[1], [0], [0], [1], [0, 0, 1, 1], [], []>} : vector<16x8xbf16>, vector<8x8xbf16>, vector<16x8xf32> -> vector<16x8xf32>
    %602 = arith.addf %598, %601 : vector<16x8xf32>
    %c0_672 = arith.constant 0 : index
    %c17 = arith.constant 17 : index
    %c0_673 = arith.constant 0 : index
    %c0_674 = arith.constant 0 : index
    %603 = vector.load %arg3[%c0_672, %c17, %c0_673, %c0_674] : memref<1x36x8x9xbf16, #tpu.memory_space<vmem>>, vector<1x1x8x8xbf16>
    %604 = vector.shape_cast %603 : vector<1x1x8x8xbf16> to vector<8x8xbf16>
    %cst_675 = arith.constant dense<0.000000e+00> : vector<16x8xf32>
    %605 = tpu.matmul %19, %604, %cst_675 {dimension_numbers = #tpu.dot_dimension_numbers<[1], [0], [0], [1], [0, 0, 1, 1], [], []>} : vector<16x8xbf16>, vector<8x8xbf16>, vector<16x8xf32> -> vector<16x8xf32>
    %606 = arith.addf %602, %605 : vector<16x8xf32>
    %c0_676 = arith.constant 0 : index
    %c8_677 = arith.constant 8 : index
    %c0_678 = arith.constant 0 : index
    %c1_679 = arith.constant 1 : index
    %607 = vector.load %arg3[%c0_676, %c8_677, %c0_678, %c1_679] : memref<1x36x8x9xbf16, #tpu.memory_space<vmem>>, vector<1x1x8x8xbf16>
    %608 = vector.shape_cast %607 : vector<1x1x8x8xbf16> to vector<8x8xbf16>
    %cst_680 = arith.constant dense<0.000000e+00> : vector<16x8xf32>
    %609 = tpu.matmul %21, %608, %cst_680 {dimension_numbers = #tpu.dot_dimension_numbers<[1], [0], [0], [1], [0, 0, 1, 1], [], []>} : vector<16x8xbf16>, vector<8x8xbf16>, vector<16x8xf32> -> vector<16x8xf32>
    %610 = arith.addf %606, %609 : vector<16x8xf32>
    %c0_681 = arith.constant 0 : index
    %c17_682 = arith.constant 17 : index
    %c0_683 = arith.constant 0 : index
    %c1_684 = arith.constant 1 : index
    %611 = vector.load %arg3[%c0_681, %c17_682, %c0_683, %c1_684] : memref<1x36x8x9xbf16, #tpu.memory_space<vmem>>, vector<1x1x8x8xbf16>
    %612 = vector.shape_cast %611 : vector<1x1x8x8xbf16> to vector<8x8xbf16>
    %cst_685 = arith.constant dense<0.000000e+00> : vector<16x8xf32>
    %613 = tpu.matmul %23, %612, %cst_685 {dimension_numbers = #tpu.dot_dimension_numbers<[1], [0], [0], [1], [0, 0, 1, 1], [], []>} : vector<16x8xbf16>, vector<8x8xbf16>, vector<16x8xf32> -> vector<16x8xf32>
    %614 = arith.addf %610, %613 : vector<16x8xf32>
    %c0_686 = arith.constant 0 : index
    %c26 = arith.constant 26 : index
    %c0_687 = arith.constant 0 : index
    %c0_688 = arith.constant 0 : index
    %615 = vector.load %arg3[%c0_686, %c26, %c0_687, %c0_688] : memref<1x36x8x9xbf16, #tpu.memory_space<vmem>>, vector<1x1x8x8xbf16>
    %616 = vector.shape_cast %615 : vector<1x1x8x8xbf16> to vector<8x8xbf16>
    %cst_689 = arith.constant dense<0.000000e+00> : vector<16x8xf32>
    %617 = tpu.matmul %25, %616, %cst_689 {dimension_numbers = #tpu.dot_dimension_numbers<[1], [0], [0], [1], [0, 0, 1, 1], [], []>} : vector<16x8xbf16>, vector<8x8xbf16>, vector<16x8xf32> -> vector<16x8xf32>
    %618 = arith.addf %614, %617 : vector<16x8xf32>
    %c0_690 = arith.constant 0 : index
    %c35 = arith.constant 35 : index
    %c0_691 = arith.constant 0 : index
    %c0_692 = arith.constant 0 : index
    %619 = vector.load %arg3[%c0_690, %c35, %c0_691, %c0_692] : memref<1x36x8x9xbf16, #tpu.memory_space<vmem>>, vector<1x1x8x8xbf16>
    %620 = vector.shape_cast %619 : vector<1x1x8x8xbf16> to vector<8x8xbf16>
    %cst_693 = arith.constant dense<0.000000e+00> : vector<16x8xf32>
    %621 = tpu.matmul %27, %620, %cst_693 {dimension_numbers = #tpu.dot_dimension_numbers<[1], [0], [0], [1], [0, 0, 1, 1], [], []>} : vector<16x8xbf16>, vector<8x8xbf16>, vector<16x8xf32> -> vector<16x8xf32>
    %622 = arith.addf %618, %621 : vector<16x8xf32>
    %c0_694 = arith.constant 0 : index
    %c26_695 = arith.constant 26 : index
    %c0_696 = arith.constant 0 : index
    %c1_697 = arith.constant 1 : index
    %623 = vector.load %arg3[%c0_694, %c26_695, %c0_696, %c1_697] : memref<1x36x8x9xbf16, #tpu.memory_space<vmem>>, vector<1x1x8x8xbf16>
    %624 = vector.shape_cast %623 : vector<1x1x8x8xbf16> to vector<8x8xbf16>
    %cst_698 = arith.constant dense<0.000000e+00> : vector<16x8xf32>
    %625 = tpu.matmul %29, %624, %cst_698 {dimension_numbers = #tpu.dot_dimension_numbers<[1], [0], [0], [1], [0, 0, 1, 1], [], []>} : vector<16x8xbf16>, vector<8x8xbf16>, vector<16x8xf32> -> vector<16x8xf32>
    %626 = arith.addf %622, %625 : vector<16x8xf32>
    %c0_699 = arith.constant 0 : index
    %c35_700 = arith.constant 35 : index
    %c0_701 = arith.constant 0 : index
    %c1_702 = arith.constant 1 : index
    %627 = vector.load %arg3[%c0_699, %c35_700, %c0_701, %c1_702] : memref<1x36x8x9xbf16, #tpu.memory_space<vmem>>, vector<1x1x8x8xbf16>
    %628 = vector.shape_cast %627 : vector<1x1x8x8xbf16> to vector<8x8xbf16>
    %cst_703 = arith.constant dense<0.000000e+00> : vector<16x8xf32>
    %629 = tpu.matmul %31, %628, %cst_703 {dimension_numbers = #tpu.dot_dimension_numbers<[1], [0], [0], [1], [0, 0, 1, 1], [], []>} : vector<16x8xbf16>, vector<8x8xbf16>, vector<16x8xf32> -> vector<16x8xf32>
    %630 = arith.addf %626, %629 : vector<16x8xf32>
    %631 = vector.broadcast %33 : vector<16x1xf32> to vector<16x8xf32>
    %632 = arith.addf %630, %631 : vector<16x8xf32>
    %cst_704 = arith.constant 0.000000e+00 : f32
    %633 = vector.broadcast %cst_704 : f32 to vector<16x8xf32>
    %634 = arith.cmpf ogt, %632, %633 : vector<16x8xf32>
    %cst_705 = arith.constant 2.000000e-01 : f32
    %635 = vector.broadcast %cst_705 : f32 to vector<16x8xf32>
    %636 = arith.mulf %635, %632 : vector<16x8xf32>
    %637 = arith.select %634, %632, %636 : vector<16x8xi1>, vector<16x8xf32>
    %638 = arith.truncf %637 : vector<16x8xf32> to vector<16x8xbf16>
    %c0_706 = arith.constant 0 : index
    %c7_707 = arith.constant 7 : index
    %c0_708 = arith.constant 0 : index
    %c0_709 = arith.constant 0 : index
    %639 = vector.load %arg4[%c0_706, %c7_707, %c0_708, %c0_709] : memref<1x8x16x8xbf16, #tpu.memory_space<vmem>>, vector<1x1x16x8xbf16>
    %640 = vector.shape_cast %639 : vector<1x1x16x8xbf16> to vector<16x8xbf16>
    %641 = vector.shape_cast %638 : vector<16x8xbf16> to vector<1x1x16x8xbf16>
    tpu.vector_store %arg4[%c0_706, %c7_707, %c0_708, %c0_709], %641 {strides = array<i32>} : memref<1x8x16x8xbf16, #tpu.memory_space<vmem>>, vector<1x1x16x8xbf16>,
    return
  }
  func.func @transform_0(%arg0: i32) -> (i32, i32, i32) {
    %c0_i32 = arith.constant 0 : i32
    %c0_i32_0 = arith.constant 0 : i32
    %c0_i32_1 = arith.constant 0 : i32
    %c0_i32_2 = arith.constant 0 : i32
    return %c0_i32, %c0_i32_0, %c0_i32_1 : i32, i32, i32
  }
  func.func @transform_1(%arg0: i32) -> (i32, i32, i32) {
    %c0_i32 = arith.constant 0 : i32
    %c0_i32_0 = arith.constant 0 : i32
    %c0_i32_1 = arith.constant 0 : i32
    %c0_i32_2 = arith.constant 0 : i32
    return %c0_i32, %c0_i32_0, %c0_i32_1 : i32, i32, i32
  }
  func.func @transform_2(%arg0: i32) -> (i32, i32, i32, i32) {
    %c0_i32 = arith.constant 0 : i32
    %c0_i32_0 = arith.constant 0 : i32
    %c0_i32_1 = arith.constant 0 : i32
    %c0_i32_2 = arith.constant 0 : i32
    return %arg0, %c0_i32, %c0_i32_0, %c0_i32_1 : i32, i32, i32, i32
  }
  func.func @transform_3(%arg0: i32) -> (i32, i32, i32, i32) {
    %c0_i32 = arith.constant 0 : i32
    %c0_i32_0 = arith.constant 0 : i32
    %c0_i32_1 = arith.constant 0 : i32
    %c0_i32_2 = arith.constant 0 : i32
    return %arg0, %c0_i32, %c0_i32_0, %c0_i32_1 : i32, i32, i32, i32
  }
}

module attributes {stable_mosaic.version = 11 : i64} {
  func.func @_conv_rows_kernel(%arg0: i32, %arg1: memref<16x16x16xbf16, #tpu.memory_space<vmem>>, %arg2: memref<3x16x1xf32, #tpu.memory_space<vmem>>, %arg3: memref<1x20x16x5xbf16, #tpu.memory_space<vmem>>, %arg4: memref<1x4x16x4xbf16, #tpu.memory_space<vmem>>) attributes {dimension_semantics = [#tpu.dimension_semantics<parallel>], iteration_bounds = array<i64: 2>, scalar_prefetch = 0 : i64, scratch_operands = 0 : i64, tpu.core_type = #tpu.core_type<tc>, window_params = [{pipeline_mode = #tpu.pipeline_mode<synchronous>, transform_indices = @transform_0, window_bounds = array<i64: 16, 16, 16>}, {pipeline_mode = #tpu.pipeline_mode<synchronous>, transform_indices = @transform_1, window_bounds = array<i64: 3, 16, 1>}, {transform_indices = @transform_2, window_bounds = array<i64: 1, 20, 16, 5>}, {transform_indices = @transform_3, window_bounds = array<i64: 1, 4, 16, 4>}]} {
    %c0 = arith.constant 0 : index
    %c0_0 = arith.constant 0 : index
    %c0_1 = arith.constant 0 : index
    %0 = vector.load %arg1[%c0, %c0_0, %c0_1] : memref<16x16x16xbf16, #tpu.memory_space<vmem>>, vector<1x16x16xbf16>
    %1 = vector.shape_cast %0 : vector<1x16x16xbf16> to vector<16x16xbf16>
    %c1 = arith.constant 1 : index
    %c0_2 = arith.constant 0 : index
    %c0_3 = arith.constant 0 : index
    %2 = vector.load %arg1[%c1, %c0_2, %c0_3] : memref<16x16x16xbf16, #tpu.memory_space<vmem>>, vector<1x16x16xbf16>
    %3 = vector.shape_cast %2 : vector<1x16x16xbf16> to vector<16x16xbf16>
    %c2 = arith.constant 2 : index
    %c0_4 = arith.constant 0 : index
    %c0_5 = arith.constant 0 : index
    %4 = vector.load %arg1[%c2, %c0_4, %c0_5] : memref<16x16x16xbf16, #tpu.memory_space<vmem>>, vector<1x16x16xbf16>
    %5 = vector.shape_cast %4 : vector<1x16x16xbf16> to vector<16x16xbf16>
    %c3 = arith.constant 3 : index
    %c0_6 = arith.constant 0 : index
    %c0_7 = arith.constant 0 : index
    %6 = vector.load %arg1[%c3, %c0_6, %c0_7] : memref<16x16x16xbf16, #tpu.memory_space<vmem>>, vector<1x16x16xbf16>
    %7 = vector.shape_cast %6 : vector<1x16x16xbf16> to vector<16x16xbf16>
    %c4 = arith.constant 4 : index
    %c0_8 = arith.constant 0 : index
    %c0_9 = arith.constant 0 : index
    %8 = vector.load %arg1[%c4, %c0_8, %c0_9] : memref<16x16x16xbf16, #tpu.memory_space<vmem>>, vector<1x16x16xbf16>
    %9 = vector.shape_cast %8 : vector<1x16x16xbf16> to vector<16x16xbf16>
    %c5 = arith.constant 5 : index
    %c0_10 = arith.constant 0 : index
    %c0_11 = arith.constant 0 : index
    %10 = vector.load %arg1[%c5, %c0_10, %c0_11] : memref<16x16x16xbf16, #tpu.memory_space<vmem>>, vector<1x16x16xbf16>
    %11 = vector.shape_cast %10 : vector<1x16x16xbf16> to vector<16x16xbf16>
    %c6 = arith.constant 6 : index
    %c0_12 = arith.constant 0 : index
    %c0_13 = arith.constant 0 : index
    %12 = vector.load %arg1[%c6, %c0_12, %c0_13] : memref<16x16x16xbf16, #tpu.memory_space<vmem>>, vector<1x16x16xbf16>
    %13 = vector.shape_cast %12 : vector<1x16x16xbf16> to vector<16x16xbf16>
    %c7 = arith.constant 7 : index
    %c0_14 = arith.constant 0 : index
    %c0_15 = arith.constant 0 : index
    %14 = vector.load %arg1[%c7, %c0_14, %c0_15] : memref<16x16x16xbf16, #tpu.memory_space<vmem>>, vector<1x16x16xbf16>
    %15 = vector.shape_cast %14 : vector<1x16x16xbf16> to vector<16x16xbf16>
    %c8 = arith.constant 8 : index
    %c0_16 = arith.constant 0 : index
    %c0_17 = arith.constant 0 : index
    %16 = vector.load %arg1[%c8, %c0_16, %c0_17] : memref<16x16x16xbf16, #tpu.memory_space<vmem>>, vector<1x16x16xbf16>
    %17 = vector.shape_cast %16 : vector<1x16x16xbf16> to vector<16x16xbf16>
    %c9 = arith.constant 9 : index
    %c0_18 = arith.constant 0 : index
    %c0_19 = arith.constant 0 : index
    %18 = vector.load %arg1[%c9, %c0_18, %c0_19] : memref<16x16x16xbf16, #tpu.memory_space<vmem>>, vector<1x16x16xbf16>
    %19 = vector.shape_cast %18 : vector<1x16x16xbf16> to vector<16x16xbf16>
    %c10 = arith.constant 10 : index
    %c0_20 = arith.constant 0 : index
    %c0_21 = arith.constant 0 : index
    %20 = vector.load %arg1[%c10, %c0_20, %c0_21] : memref<16x16x16xbf16, #tpu.memory_space<vmem>>, vector<1x16x16xbf16>
    %21 = vector.shape_cast %20 : vector<1x16x16xbf16> to vector<16x16xbf16>
    %c11 = arith.constant 11 : index
    %c0_22 = arith.constant 0 : index
    %c0_23 = arith.constant 0 : index
    %22 = vector.load %arg1[%c11, %c0_22, %c0_23] : memref<16x16x16xbf16, #tpu.memory_space<vmem>>, vector<1x16x16xbf16>
    %23 = vector.shape_cast %22 : vector<1x16x16xbf16> to vector<16x16xbf16>
    %c12 = arith.constant 12 : index
    %c0_24 = arith.constant 0 : index
    %c0_25 = arith.constant 0 : index
    %24 = vector.load %arg1[%c12, %c0_24, %c0_25] : memref<16x16x16xbf16, #tpu.memory_space<vmem>>, vector<1x16x16xbf16>
    %25 = vector.shape_cast %24 : vector<1x16x16xbf16> to vector<16x16xbf16>
    %c13 = arith.constant 13 : index
    %c0_26 = arith.constant 0 : index
    %c0_27 = arith.constant 0 : index
    %26 = vector.load %arg1[%c13, %c0_26, %c0_27] : memref<16x16x16xbf16, #tpu.memory_space<vmem>>, vector<1x16x16xbf16>
    %27 = vector.shape_cast %26 : vector<1x16x16xbf16> to vector<16x16xbf16>
    %c14 = arith.constant 14 : index
    %c0_28 = arith.constant 0 : index
    %c0_29 = arith.constant 0 : index
    %28 = vector.load %arg1[%c14, %c0_28, %c0_29] : memref<16x16x16xbf16, #tpu.memory_space<vmem>>, vector<1x16x16xbf16>
    %29 = vector.shape_cast %28 : vector<1x16x16xbf16> to vector<16x16xbf16>
    %c15 = arith.constant 15 : index
    %c0_30 = arith.constant 0 : index
    %c0_31 = arith.constant 0 : index
    %30 = vector.load %arg1[%c15, %c0_30, %c0_31] : memref<16x16x16xbf16, #tpu.memory_space<vmem>>, vector<1x16x16xbf16>
    %31 = vector.shape_cast %30 : vector<1x16x16xbf16> to vector<16x16xbf16>
    %c0_32 = arith.constant 0 : index
    %c0_33 = arith.constant 0 : index
    %c0_34 = arith.constant 0 : index
    %32 = vector.load %arg2[%c0_32, %c0_33, %c0_34] : memref<3x16x1xf32, #tpu.memory_space<vmem>>, vector<1x16x1xf32>
    %33 = vector.shape_cast %32 : vector<1x16x1xf32> to vector<16x1xf32>
    %c1_35 = arith.constant 1 : index
    %c0_36 = arith.constant 0 : index
    %c0_37 = arith.constant 0 : index
    %34 = vector.load %arg2[%c1_35, %c0_36, %c0_37] : memref<3x16x1xf32, #tpu.memory_space<vmem>>, vector<1x16x1xf32>
    %35 = vector.shape_cast %34 : vector<1x16x1xf32> to vector<16x1xf32>
    %c2_38 = arith.constant 2 : index
    %c0_39 = arith.constant 0 : index
    %c0_40 = arith.constant 0 : index
    %36 = vector.load %arg2[%c2_38, %c0_39, %c0_40] : memref<3x16x1xf32, #tpu.memory_space<vmem>>, vector<1x16x1xf32>
    %37 = vector.shape_cast %36 : vector<1x16x1xf32> to vector<16x1xf32>
    %cst = arith.constant 0.000000e+00 : f32
    %38 = vector.broadcast %cst : f32 to vector<16x4xf32>
    %c0_41 = arith.constant 0 : index
    %c0_42 = arith.constant 0 : index
    %c0_43 = arith.constant 0 : index
    %c0_44 = arith.constant 0 : index
    %39 = vector.load %arg3[%c0_41, %c0_42, %c0_43, %c0_44] : memref<1x20x16x5xbf16, #tpu.memory_space<vmem>>, vector<1x1x16x4xbf16>
    %40 = vector.shape_cast %39 : vector<1x1x16x4xbf16> to vector<16x4xbf16>
    %cst_45 = arith.constant dense<0.000000e+00> : vector<16x4xf32>
    %41 = tpu.matmul %1, %40, %cst_45 {dimension_numbers = #tpu.dot_dimension_numbers<[1], [0], [0], [1], [0, 0, 1, 1], [], []>} : vector<16x16xbf16>, vector<16x4xbf16>, vector<16x4xf32> -> vector<16x4xf32>
    %42 = arith.addf %38, %41 : vector<16x4xf32>
    %c0_46 = arith.constant 0 : index
    %c5_47 = arith.constant 5 : index
    %c0_48 = arith.constant 0 : index
    %c0_49 = arith.constant 0 : index
    %43 = vector.load %arg3[%c0_46, %c5_47, %c0_48, %c0_49] : memref<1x20x16x5xbf16, #tpu.memory_space<vmem>>, vector<1x1x16x4xbf16>
    %44 = vector.shape_cast %43 : vector<1x1x16x4xbf16> to vector<16x4xbf16>
    %cst_50 = arith.constant dense<0.000000e+00> : vector<16x4xf32>
    %45 = tpu.matmul %3, %44, %cst_50 {dimension_numbers = #tpu.dot_dimension_numbers<[1], [0], [0], [1], [0, 0, 1, 1], [], []>} : vector<16x16xbf16>, vector<16x4xbf16>, vector<16x4xf32> -> vector<16x4xf32>
    %46 = arith.addf %42, %45 : vector<16x4xf32>
    %c0_51 = arith.constant 0 : index
    %c0_52 = arith.constant 0 : index
    %c0_53 = arith.constant 0 : index
    %c1_54 = arith.constant 1 : index
    %47 = vector.load %arg3[%c0_51, %c0_52, %c0_53, %c1_54] : memref<1x20x16x5xbf16, #tpu.memory_space<vmem>>, vector<1x1x16x4xbf16>
    %48 = vector.shape_cast %47 : vector<1x1x16x4xbf16> to vector<16x4xbf16>
    %cst_55 = arith.constant dense<0.000000e+00> : vector<16x4xf32>
    %49 = tpu.matmul %5, %48, %cst_55 {dimension_numbers = #tpu.dot_dimension_numbers<[1], [0], [0], [1], [0, 0, 1, 1], [], []>} : vector<16x16xbf16>, vector<16x4xbf16>, vector<16x4xf32> -> vector<16x4xf32>
    %50 = arith.addf %46, %49 : vector<16x4xf32>
    %c0_56 = arith.constant 0 : index
    %c5_57 = arith.constant 5 : index
    %c0_58 = arith.constant 0 : index
    %c1_59 = arith.constant 1 : index
    %51 = vector.load %arg3[%c0_56, %c5_57, %c0_58, %c1_59] : memref<1x20x16x5xbf16, #tpu.memory_space<vmem>>, vector<1x1x16x4xbf16>
    %52 = vector.shape_cast %51 : vector<1x1x16x4xbf16> to vector<16x4xbf16>
    %cst_60 = arith.constant dense<0.000000e+00> : vector<16x4xf32>
    %53 = tpu.matmul %7, %52, %cst_60 {dimension_numbers = #tpu.dot_dimension_numbers<[1], [0], [0], [1], [0, 0, 1, 1], [], []>} : vector<16x16xbf16>, vector<16x4xbf16>, vector<16x4xf32> -> vector<16x4xf32>
    %54 = arith.addf %50, %53 : vector<16x4xf32>
    %c0_61 = arith.constant 0 : index
    %c10_62 = arith.constant 10 : index
    %c0_63 = arith.constant 0 : index
    %c0_64 = arith.constant 0 : index
    %55 = vector.load %arg3[%c0_61, %c10_62, %c0_63, %c0_64] : memref<1x20x16x5xbf16, #tpu.memory_space<vmem>>, vector<1x1x16x4xbf16>
    %56 = vector.shape_cast %55 : vector<1x1x16x4xbf16> to vector<16x4xbf16>
    %cst_65 = arith.constant dense<0.000000e+00> : vector<16x4xf32>
    %57 = tpu.matmul %9, %56, %cst_65 {dimension_numbers = #tpu.dot_dimension_numbers<[1], [0], [0], [1], [0, 0, 1, 1], [], []>} : vector<16x16xbf16>, vector<16x4xbf16>, vector<16x4xf32> -> vector<16x4xf32>
    %58 = arith.addf %54, %57 : vector<16x4xf32>
    %c0_66 = arith.constant 0 : index
    %c15_67 = arith.constant 15 : index
    %c0_68 = arith.constant 0 : index
    %c0_69 = arith.constant 0 : index
    %59 = vector.load %arg3[%c0_66, %c15_67, %c0_68, %c0_69] : memref<1x20x16x5xbf16, #tpu.memory_space<vmem>>, vector<1x1x16x4xbf16>
    %60 = vector.shape_cast %59 : vector<1x1x16x4xbf16> to vector<16x4xbf16>
    %cst_70 = arith.constant dense<0.000000e+00> : vector<16x4xf32>
    %61 = tpu.matmul %11, %60, %cst_70 {dimension_numbers = #tpu.dot_dimension_numbers<[1], [0], [0], [1], [0, 0, 1, 1], [], []>} : vector<16x16xbf16>, vector<16x4xbf16>, vector<16x4xf32> -> vector<16x4xf32>
    %62 = arith.addf %58, %61 : vector<16x4xf32>
    %c0_71 = arith.constant 0 : index
    %c10_72 = arith.constant 10 : index
    %c0_73 = arith.constant 0 : index
    %c1_74 = arith.constant 1 : index
    %63 = vector.load %arg3[%c0_71, %c10_72, %c0_73, %c1_74] : memref<1x20x16x5xbf16, #tpu.memory_space<vmem>>, vector<1x1x16x4xbf16>
    %64 = vector.shape_cast %63 : vector<1x1x16x4xbf16> to vector<16x4xbf16>
    %cst_75 = arith.constant dense<0.000000e+00> : vector<16x4xf32>
    %65 = tpu.matmul %13, %64, %cst_75 {dimension_numbers = #tpu.dot_dimension_numbers<[1], [0], [0], [1], [0, 0, 1, 1], [], []>} : vector<16x16xbf16>, vector<16x4xbf16>, vector<16x4xf32> -> vector<16x4xf32>
    %66 = arith.addf %62, %65 : vector<16x4xf32>
    %c0_76 = arith.constant 0 : index
    %c15_77 = arith.constant 15 : index
    %c0_78 = arith.constant 0 : index
    %c1_79 = arith.constant 1 : index
    %67 = vector.load %arg3[%c0_76, %c15_77, %c0_78, %c1_79] : memref<1x20x16x5xbf16, #tpu.memory_space<vmem>>, vector<1x1x16x4xbf16>
    %68 = vector.shape_cast %67 : vector<1x1x16x4xbf16> to vector<16x4xbf16>
    %cst_80 = arith.constant dense<0.000000e+00> : vector<16x4xf32>
    %69 = tpu.matmul %15, %68, %cst_80 {dimension_numbers = #tpu.dot_dimension_numbers<[1], [0], [0], [1], [0, 0, 1, 1], [], []>} : vector<16x16xbf16>, vector<16x4xbf16>, vector<16x4xf32> -> vector<16x4xf32>
    %70 = arith.addf %66, %69 : vector<16x4xf32>
    %c0_81 = arith.constant 0 : index
    %c1_82 = arith.constant 1 : index
    %c0_83 = arith.constant 0 : index
    %c0_84 = arith.constant 0 : index
    %71 = vector.load %arg3[%c0_81, %c1_82, %c0_83, %c0_84] : memref<1x20x16x5xbf16, #tpu.memory_space<vmem>>, vector<1x1x16x4xbf16>
    %72 = vector.shape_cast %71 : vector<1x1x16x4xbf16> to vector<16x4xbf16>
    %cst_85 = arith.constant dense<0.000000e+00> : vector<16x4xf32>
    %73 = tpu.matmul %17, %72, %cst_85 {dimension_numbers = #tpu.dot_dimension_numbers<[1], [0], [0], [1], [0, 0, 1, 1], [], []>} : vector<16x16xbf16>, vector<16x4xbf16>, vector<16x4xf32> -> vector<16x4xf32>
    %74 = arith.addf %70, %73 : vector<16x4xf32>
    %c0_86 = arith.constant 0 : index
    %c6_87 = arith.constant 6 : index
    %c0_88 = arith.constant 0 : index
    %c0_89 = arith.constant 0 : index
    %75 = vector.load %arg3[%c0_86, %c6_87, %c0_88, %c0_89] : memref<1x20x16x5xbf16, #tpu.memory_space<vmem>>, vector<1x1x16x4xbf16>
    %76 = vector.shape_cast %75 : vector<1x1x16x4xbf16> to vector<16x4xbf16>
    %cst_90 = arith.constant dense<0.000000e+00> : vector<16x4xf32>
    %77 = tpu.matmul %19, %76, %cst_90 {dimension_numbers = #tpu.dot_dimension_numbers<[1], [0], [0], [1], [0, 0, 1, 1], [], []>} : vector<16x16xbf16>, vector<16x4xbf16>, vector<16x4xf32> -> vector<16x4xf32>
    %78 = arith.addf %74, %77 : vector<16x4xf32>
    %c0_91 = arith.constant 0 : index
    %c1_92 = arith.constant 1 : index
    %c0_93 = arith.constant 0 : index
    %c1_94 = arith.constant 1 : index
    %79 = vector.load %arg3[%c0_91, %c1_92, %c0_93, %c1_94] : memref<1x20x16x5xbf16, #tpu.memory_space<vmem>>, vector<1x1x16x4xbf16>
    %80 = vector.shape_cast %79 : vector<1x1x16x4xbf16> to vector<16x4xbf16>
    %cst_95 = arith.constant dense<0.000000e+00> : vector<16x4xf32>
    %81 = tpu.matmul %21, %80, %cst_95 {dimension_numbers = #tpu.dot_dimension_numbers<[1], [0], [0], [1], [0, 0, 1, 1], [], []>} : vector<16x16xbf16>, vector<16x4xbf16>, vector<16x4xf32> -> vector<16x4xf32>
    %82 = arith.addf %78, %81 : vector<16x4xf32>
    %c0_96 = arith.constant 0 : index
    %c6_97 = arith.constant 6 : index
    %c0_98 = arith.constant 0 : index
    %c1_99 = arith.constant 1 : index
    %83 = vector.load %arg3[%c0_96, %c6_97, %c0_98, %c1_99] : memref<1x20x16x5xbf16, #tpu.memory_space<vmem>>, vector<1x1x16x4xbf16>
    %84 = vector.shape_cast %83 : vector<1x1x16x4xbf16> to vector<16x4xbf16>
    %cst_100 = arith.constant dense<0.000000e+00> : vector<16x4xf32>
    %85 = tpu.matmul %23, %84, %cst_100 {dimension_numbers = #tpu.dot_dimension_numbers<[1], [0], [0], [1], [0, 0, 1, 1], [], []>} : vector<16x16xbf16>, vector<16x4xbf16>, vector<16x4xf32> -> vector<16x4xf32>
    %86 = arith.addf %82, %85 : vector<16x4xf32>
    %c0_101 = arith.constant 0 : index
    %c11_102 = arith.constant 11 : index
    %c0_103 = arith.constant 0 : index
    %c0_104 = arith.constant 0 : index
    %87 = vector.load %arg3[%c0_101, %c11_102, %c0_103, %c0_104] : memref<1x20x16x5xbf16, #tpu.memory_space<vmem>>, vector<1x1x16x4xbf16>
    %88 = vector.shape_cast %87 : vector<1x1x16x4xbf16> to vector<16x4xbf16>
    %cst_105 = arith.constant dense<0.000000e+00> : vector<16x4xf32>
    %89 = tpu.matmul %25, %88, %cst_105 {dimension_numbers = #tpu.dot_dimension_numbers<[1], [0], [0], [1], [0, 0, 1, 1], [], []>} : vector<16x16xbf16>, vector<16x4xbf16>, vector<16x4xf32> -> vector<16x4xf32>
    %90 = arith.addf %86, %89 : vector<16x4xf32>
    %c0_106 = arith.constant 0 : index
    %c16 = arith.constant 16 : index
    %c0_107 = arith.constant 0 : index
    %c0_108 = arith.constant 0 : index
    %91 = vector.load %arg3[%c0_106, %c16, %c0_107, %c0_108] : memref<1x20x16x5xbf16, #tpu.memory_space<vmem>>, vector<1x1x16x4xbf16>
    %92 = vector.shape_cast %91 : vector<1x1x16x4xbf16> to vector<16x4xbf16>
    %cst_109 = arith.constant dense<0.000000e+00> : vector<16x4xf32>
    %93 = tpu.matmul %27, %92, %cst_109 {dimension_numbers = #tpu.dot_dimension_numbers<[1], [0], [0], [1], [0, 0, 1, 1], [], []>} : vector<16x16xbf16>, vector<16x4xbf16>, vector<16x4xf32> -> vector<16x4xf32>
    %94 = arith.addf %90, %93 : vector<16x4xf32>
    %c0_110 = arith.constant 0 : index
    %c11_111 = arith.constant 11 : index
    %c0_112 = arith.constant 0 : index
    %c1_113 = arith.constant 1 : index
    %95 = vector.load %arg3[%c0_110, %c11_111, %c0_112, %c1_113] : memref<1x20x16x5xbf16, #tpu.memory_space<vmem>>, vector<1x1x16x4xbf16>
    %96 = vector.shape_cast %95 : vector<1x1x16x4xbf16> to vector<16x4xbf16>
    %cst_114 = arith.constant dense<0.000000e+00> : vector<16x4xf32>
    %97 = tpu.matmul %29, %96, %cst_114 {dimension_numbers = #tpu.dot_dimension_numbers<[1], [0], [0], [1], [0, 0, 1, 1], [], []>} : vector<16x16xbf16>, vector<16x4xbf16>, vector<16x4xf32> -> vector<16x4xf32>
    %98 = arith.addf %94, %97 : vector<16x4xf32>
    %c0_115 = arith.constant 0 : index
    %c16_116 = arith.constant 16 : index
    %c0_117 = arith.constant 0 : index
    %c1_118 = arith.constant 1 : index
    %99 = vector.load %arg3[%c0_115, %c16_116, %c0_117, %c1_118] : memref<1x20x16x5xbf16, #tpu.memory_space<vmem>>, vector<1x1x16x4xbf16>
    %100 = vector.shape_cast %99 : vector<1x1x16x4xbf16> to vector<16x4xbf16>
    %cst_119 = arith.constant dense<0.000000e+00> : vector<16x4xf32>
    %101 = tpu.matmul %31, %100, %cst_119 {dimension_numbers = #tpu.dot_dimension_numbers<[1], [0], [0], [1], [0, 0, 1, 1], [], []>} : vector<16x16xbf16>, vector<16x4xbf16>, vector<16x4xf32> -> vector<16x4xf32>
    %102 = arith.addf %98, %101 : vector<16x4xf32>
    %103 = vector.broadcast %33 : vector<16x1xf32> to vector<16x4xf32>
    %104 = arith.addf %102, %103 : vector<16x4xf32>
    %cst_120 = arith.constant dense<0.000000e+00> : vector<4xf32>
    %105 = vector.multi_reduction <add>, %104, %cst_120 [0] : vector<16x4xf32> to vector<4xf32>
    %106 = vector.shape_cast %105 : vector<4xf32> to vector<1x4xf32>
    %cst_121 = arith.constant 6.250000e-02 : f32
    %107 = vector.broadcast %cst_121 : f32 to vector<1x4xf32>
    %108 = arith.mulf %106, %107 : vector<1x4xf32>
    %109 = arith.mulf %104, %104 : vector<16x4xf32>
    %cst_122 = arith.constant dense<0.000000e+00> : vector<4xf32>
    %110 = vector.multi_reduction <add>, %109, %cst_122 [0] : vector<16x4xf32> to vector<4xf32>
    %111 = vector.shape_cast %110 : vector<4xf32> to vector<1x4xf32>
    %cst_123 = arith.constant 6.250000e-02 : f32
    %112 = vector.broadcast %cst_123 : f32 to vector<1x4xf32>
    %113 = arith.mulf %111, %112 : vector<1x4xf32>
    %114 = arith.mulf %108, %108 : vector<1x4xf32>
    %115 = arith.subf %113, %114 : vector<1x4xf32>
    %cst_124 = arith.constant 0.000000e+00 : f32
    %116 = vector.broadcast %cst_124 : f32 to vector<1x4xf32>
    %117 = arith.maximumf %115, %116 : vector<1x4xf32>
    %118 = vector.broadcast %108 : vector<1x4xf32> to vector<16x4xf32>
    %119 = arith.subf %104, %118 : vector<16x4xf32>
    %cst_125 = arith.constant 9.99999997E-7 : f32
    %120 = vector.broadcast %cst_125 : f32 to vector<1x4xf32>
    %121 = arith.addf %117, %120 : vector<1x4xf32>
    %122 = math.rsqrt %121 : vector<1x4xf32>
    %123 = vector.broadcast %122 : vector<1x4xf32> to vector<16x4xf32>
    %124 = arith.mulf %119, %123 : vector<16x4xf32>
    %125 = vector.broadcast %35 : vector<16x1xf32> to vector<16x4xf32>
    %126 = arith.mulf %124, %125 : vector<16x4xf32>
    %127 = vector.broadcast %37 : vector<16x1xf32> to vector<16x4xf32>
    %128 = arith.addf %126, %127 : vector<16x4xf32>
    %cst_126 = arith.constant 0.000000e+00 : f32
    %129 = vector.broadcast %cst_126 : f32 to vector<16x4xf32>
    %130 = arith.cmpf ogt, %128, %129 : vector<16x4xf32>
    %cst_127 = arith.constant 2.000000e-01 : f32
    %131 = vector.broadcast %cst_127 : f32 to vector<16x4xf32>
    %132 = arith.mulf %131, %128 : vector<16x4xf32>
    %133 = arith.select %130, %128, %132 : vector<16x4xi1>, vector<16x4xf32>
    %134 = arith.truncf %133 : vector<16x4xf32> to vector<16x4xbf16>
    %c0_128 = arith.constant 0 : index
    %c0_129 = arith.constant 0 : index
    %c0_130 = arith.constant 0 : index
    %c0_131 = arith.constant 0 : index
    %135 = vector.load %arg4[%c0_128, %c0_129, %c0_130, %c0_131] : memref<1x4x16x4xbf16, #tpu.memory_space<vmem>>, vector<1x1x16x4xbf16>
    %136 = vector.shape_cast %135 : vector<1x1x16x4xbf16> to vector<16x4xbf16>
    %137 = vector.shape_cast %134 : vector<16x4xbf16> to vector<1x1x16x4xbf16>
    tpu.vector_store %arg4[%c0_128, %c0_129, %c0_130, %c0_131], %137 {strides = array<i32>} : memref<1x4x16x4xbf16, #tpu.memory_space<vmem>>, vector<1x1x16x4xbf16>,
    %cst_132 = arith.constant 0.000000e+00 : f32
    %138 = vector.broadcast %cst_132 : f32 to vector<16x4xf32>
    %c0_133 = arith.constant 0 : index
    %c1_134 = arith.constant 1 : index
    %c0_135 = arith.constant 0 : index
    %c0_136 = arith.constant 0 : index
    %139 = vector.load %arg3[%c0_133, %c1_134, %c0_135, %c0_136] : memref<1x20x16x5xbf16, #tpu.memory_space<vmem>>, vector<1x1x16x4xbf16>
    %140 = vector.shape_cast %139 : vector<1x1x16x4xbf16> to vector<16x4xbf16>
    %cst_137 = arith.constant dense<0.000000e+00> : vector<16x4xf32>
    %141 = tpu.matmul %1, %140, %cst_137 {dimension_numbers = #tpu.dot_dimension_numbers<[1], [0], [0], [1], [0, 0, 1, 1], [], []>} : vector<16x16xbf16>, vector<16x4xbf16>, vector<16x4xf32> -> vector<16x4xf32>
    %142 = arith.addf %138, %141 : vector<16x4xf32>
    %c0_138 = arith.constant 0 : index
    %c6_139 = arith.constant 6 : index
    %c0_140 = arith.constant 0 : index
    %c0_141 = arith.constant 0 : index
    %143 = vector.load %arg3[%c0_138, %c6_139, %c0_140, %c0_141] : memref<1x20x16x5xbf16, #tpu.memory_space<vmem>>, vector<1x1x16x4xbf16>
    %144 = vector.shape_cast %143 : vector<1x1x16x4xbf16> to vector<16x4xbf16>
    %cst_142 = arith.constant dense<0.000000e+00> : vector<16x4xf32>
    %145 = tpu.matmul %3, %144, %cst_142 {dimension_numbers = #tpu.dot_dimension_numbers<[1], [0], [0], [1], [0, 0, 1, 1], [], []>} : vector<16x16xbf16>, vector<16x4xbf16>, vector<16x4xf32> -> vector<16x4xf32>
    %146 = arith.addf %142, %145 : vector<16x4xf32>
    %c0_143 = arith.constant 0 : index
    %c1_144 = arith.constant 1 : index
    %c0_145 = arith.constant 0 : index
    %c1_146 = arith.constant 1 : index
    %147 = vector.load %arg3[%c0_143, %c1_144, %c0_145, %c1_146] : memref<1x20x16x5xbf16, #tpu.memory_space<vmem>>, vector<1x1x16x4xbf16>
    %148 = vector.shape_cast %147 : vector<1x1x16x4xbf16> to vector<16x4xbf16>
    %cst_147 = arith.constant dense<0.000000e+00> : vector<16x4xf32>
    %149 = tpu.matmul %5, %148, %cst_147 {dimension_numbers = #tpu.dot_dimension_numbers<[1], [0], [0], [1], [0, 0, 1, 1], [], []>} : vector<16x16xbf16>, vector<16x4xbf16>, vector<16x4xf32> -> vector<16x4xf32>
    %150 = arith.addf %146, %149 : vector<16x4xf32>
    %c0_148 = arith.constant 0 : index
    %c6_149 = arith.constant 6 : index
    %c0_150 = arith.constant 0 : index
    %c1_151 = arith.constant 1 : index
    %151 = vector.load %arg3[%c0_148, %c6_149, %c0_150, %c1_151] : memref<1x20x16x5xbf16, #tpu.memory_space<vmem>>, vector<1x1x16x4xbf16>
    %152 = vector.shape_cast %151 : vector<1x1x16x4xbf16> to vector<16x4xbf16>
    %cst_152 = arith.constant dense<0.000000e+00> : vector<16x4xf32>
    %153 = tpu.matmul %7, %152, %cst_152 {dimension_numbers = #tpu.dot_dimension_numbers<[1], [0], [0], [1], [0, 0, 1, 1], [], []>} : vector<16x16xbf16>, vector<16x4xbf16>, vector<16x4xf32> -> vector<16x4xf32>
    %154 = arith.addf %150, %153 : vector<16x4xf32>
    %c0_153 = arith.constant 0 : index
    %c11_154 = arith.constant 11 : index
    %c0_155 = arith.constant 0 : index
    %c0_156 = arith.constant 0 : index
    %155 = vector.load %arg3[%c0_153, %c11_154, %c0_155, %c0_156] : memref<1x20x16x5xbf16, #tpu.memory_space<vmem>>, vector<1x1x16x4xbf16>
    %156 = vector.shape_cast %155 : vector<1x1x16x4xbf16> to vector<16x4xbf16>
    %cst_157 = arith.constant dense<0.000000e+00> : vector<16x4xf32>
    %157 = tpu.matmul %9, %156, %cst_157 {dimension_numbers = #tpu.dot_dimension_numbers<[1], [0], [0], [1], [0, 0, 1, 1], [], []>} : vector<16x16xbf16>, vector<16x4xbf16>, vector<16x4xf32> -> vector<16x4xf32>
    %158 = arith.addf %154, %157 : vector<16x4xf32>
    %c0_158 = arith.constant 0 : index
    %c16_159 = arith.constant 16 : index
    %c0_160 = arith.constant 0 : index
    %c0_161 = arith.constant 0 : index
    %159 = vector.load %arg3[%c0_158, %c16_159, %c0_160, %c0_161] : memref<1x20x16x5xbf16, #tpu.memory_space<vmem>>, vector<1x1x16x4xbf16>
    %160 = vector.shape_cast %159 : vector<1x1x16x4xbf16> to vector<16x4xbf16>
    %cst_162 = arith.constant dense<0.000000e+00> : vector<16x4xf32>
    %161 = tpu.matmul %11, %160, %cst_162 {dimension_numbers = #tpu.dot_dimension_numbers<[1], [0], [0], [1], [0, 0, 1, 1], [], []>} : vector<16x16xbf16>, vector<16x4xbf16>, vector<16x4xf32> -> vector<16x4xf32>
    %162 = arith.addf %158, %161 : vector<16x4xf32>
    %c0_163 = arith.constant 0 : index
    %c11_164 = arith.constant 11 : index
    %c0_165 = arith.constant 0 : index
    %c1_166 = arith.constant 1 : index
    %163 = vector.load %arg3[%c0_163, %c11_164, %c0_165, %c1_166] : memref<1x20x16x5xbf16, #tpu.memory_space<vmem>>, vector<1x1x16x4xbf16>
    %164 = vector.shape_cast %163 : vector<1x1x16x4xbf16> to vector<16x4xbf16>
    %cst_167 = arith.constant dense<0.000000e+00> : vector<16x4xf32>
    %165 = tpu.matmul %13, %164, %cst_167 {dimension_numbers = #tpu.dot_dimension_numbers<[1], [0], [0], [1], [0, 0, 1, 1], [], []>} : vector<16x16xbf16>, vector<16x4xbf16>, vector<16x4xf32> -> vector<16x4xf32>
    %166 = arith.addf %162, %165 : vector<16x4xf32>
    %c0_168 = arith.constant 0 : index
    %c16_169 = arith.constant 16 : index
    %c0_170 = arith.constant 0 : index
    %c1_171 = arith.constant 1 : index
    %167 = vector.load %arg3[%c0_168, %c16_169, %c0_170, %c1_171] : memref<1x20x16x5xbf16, #tpu.memory_space<vmem>>, vector<1x1x16x4xbf16>
    %168 = vector.shape_cast %167 : vector<1x1x16x4xbf16> to vector<16x4xbf16>
    %cst_172 = arith.constant dense<0.000000e+00> : vector<16x4xf32>
    %169 = tpu.matmul %15, %168, %cst_172 {dimension_numbers = #tpu.dot_dimension_numbers<[1], [0], [0], [1], [0, 0, 1, 1], [], []>} : vector<16x16xbf16>, vector<16x4xbf16>, vector<16x4xf32> -> vector<16x4xf32>
    %170 = arith.addf %166, %169 : vector<16x4xf32>
    %c0_173 = arith.constant 0 : index
    %c2_174 = arith.constant 2 : index
    %c0_175 = arith.constant 0 : index
    %c0_176 = arith.constant 0 : index
    %171 = vector.load %arg3[%c0_173, %c2_174, %c0_175, %c0_176] : memref<1x20x16x5xbf16, #tpu.memory_space<vmem>>, vector<1x1x16x4xbf16>
    %172 = vector.shape_cast %171 : vector<1x1x16x4xbf16> to vector<16x4xbf16>
    %cst_177 = arith.constant dense<0.000000e+00> : vector<16x4xf32>
    %173 = tpu.matmul %17, %172, %cst_177 {dimension_numbers = #tpu.dot_dimension_numbers<[1], [0], [0], [1], [0, 0, 1, 1], [], []>} : vector<16x16xbf16>, vector<16x4xbf16>, vector<16x4xf32> -> vector<16x4xf32>
    %174 = arith.addf %170, %173 : vector<16x4xf32>
    %c0_178 = arith.constant 0 : index
    %c7_179 = arith.constant 7 : index
    %c0_180 = arith.constant 0 : index
    %c0_181 = arith.constant 0 : index
    %175 = vector.load %arg3[%c0_178, %c7_179, %c0_180, %c0_181] : memref<1x20x16x5xbf16, #tpu.memory_space<vmem>>, vector<1x1x16x4xbf16>
    %176 = vector.shape_cast %175 : vector<1x1x16x4xbf16> to vector<16x4xbf16>
    %cst_182 = arith.constant dense<0.000000e+00> : vector<16x4xf32>
    %177 = tpu.matmul %19, %176, %cst_182 {dimension_numbers = #tpu.dot_dimension_numbers<[1], [0], [0], [1], [0, 0, 1, 1], [], []>} : vector<16x16xbf16>, vector<16x4xbf16>, vector<16x4xf32> -> vector<16x4xf32>
    %178 = arith.addf %174, %177 : vector<16x4xf32>
    %c0_183 = arith.constant 0 : index
    %c2_184 = arith.constant 2 : index
    %c0_185 = arith.constant 0 : index
    %c1_186 = arith.constant 1 : index
    %179 = vector.load %arg3[%c0_183, %c2_184, %c0_185, %c1_186] : memref<1x20x16x5xbf16, #tpu.memory_space<vmem>>, vector<1x1x16x4xbf16>
    %180 = vector.shape_cast %179 : vector<1x1x16x4xbf16> to vector<16x4xbf16>
    %cst_187 = arith.constant dense<0.000000e+00> : vector<16x4xf32>
    %181 = tpu.matmul %21, %180, %cst_187 {dimension_numbers = #tpu.dot_dimension_numbers<[1], [0], [0], [1], [0, 0, 1, 1], [], []>} : vector<16x16xbf16>, vector<16x4xbf16>, vector<16x4xf32> -> vector<16x4xf32>
    %182 = arith.addf %178, %181 : vector<16x4xf32>
    %c0_188 = arith.constant 0 : index
    %c7_189 = arith.constant 7 : index
    %c0_190 = arith.constant 0 : index
    %c1_191 = arith.constant 1 : index
    %183 = vector.load %arg3[%c0_188, %c7_189, %c0_190, %c1_191] : memref<1x20x16x5xbf16, #tpu.memory_space<vmem>>, vector<1x1x16x4xbf16>
    %184 = vector.shape_cast %183 : vector<1x1x16x4xbf16> to vector<16x4xbf16>
    %cst_192 = arith.constant dense<0.000000e+00> : vector<16x4xf32>
    %185 = tpu.matmul %23, %184, %cst_192 {dimension_numbers = #tpu.dot_dimension_numbers<[1], [0], [0], [1], [0, 0, 1, 1], [], []>} : vector<16x16xbf16>, vector<16x4xbf16>, vector<16x4xf32> -> vector<16x4xf32>
    %186 = arith.addf %182, %185 : vector<16x4xf32>
    %c0_193 = arith.constant 0 : index
    %c12_194 = arith.constant 12 : index
    %c0_195 = arith.constant 0 : index
    %c0_196 = arith.constant 0 : index
    %187 = vector.load %arg3[%c0_193, %c12_194, %c0_195, %c0_196] : memref<1x20x16x5xbf16, #tpu.memory_space<vmem>>, vector<1x1x16x4xbf16>
    %188 = vector.shape_cast %187 : vector<1x1x16x4xbf16> to vector<16x4xbf16>
    %cst_197 = arith.constant dense<0.000000e+00> : vector<16x4xf32>
    %189 = tpu.matmul %25, %188, %cst_197 {dimension_numbers = #tpu.dot_dimension_numbers<[1], [0], [0], [1], [0, 0, 1, 1], [], []>} : vector<16x16xbf16>, vector<16x4xbf16>, vector<16x4xf32> -> vector<16x4xf32>
    %190 = arith.addf %186, %189 : vector<16x4xf32>
    %c0_198 = arith.constant 0 : index
    %c17 = arith.constant 17 : index
    %c0_199 = arith.constant 0 : index
    %c0_200 = arith.constant 0 : index
    %191 = vector.load %arg3[%c0_198, %c17, %c0_199, %c0_200] : memref<1x20x16x5xbf16, #tpu.memory_space<vmem>>, vector<1x1x16x4xbf16>
    %192 = vector.shape_cast %191 : vector<1x1x16x4xbf16> to vector<16x4xbf16>
    %cst_201 = arith.constant dense<0.000000e+00> : vector<16x4xf32>
    %193 = tpu.matmul %27, %192, %cst_201 {dimension_numbers = #tpu.dot_dimension_numbers<[1], [0], [0], [1], [0, 0, 1, 1], [], []>} : vector<16x16xbf16>, vector<16x4xbf16>, vector<16x4xf32> -> vector<16x4xf32>
    %194 = arith.addf %190, %193 : vector<16x4xf32>
    %c0_202 = arith.constant 0 : index
    %c12_203 = arith.constant 12 : index
    %c0_204 = arith.constant 0 : index
    %c1_205 = arith.constant 1 : index
    %195 = vector.load %arg3[%c0_202, %c12_203, %c0_204, %c1_205] : memref<1x20x16x5xbf16, #tpu.memory_space<vmem>>, vector<1x1x16x4xbf16>
    %196 = vector.shape_cast %195 : vector<1x1x16x4xbf16> to vector<16x4xbf16>
    %cst_206 = arith.constant dense<0.000000e+00> : vector<16x4xf32>
    %197 = tpu.matmul %29, %196, %cst_206 {dimension_numbers = #tpu.dot_dimension_numbers<[1], [0], [0], [1], [0, 0, 1, 1], [], []>} : vector<16x16xbf16>, vector<16x4xbf16>, vector<16x4xf32> -> vector<16x4xf32>
    %198 = arith.addf %194, %197 : vector<16x4xf32>
    %c0_207 = arith.constant 0 : index
    %c17_208 = arith.constant 17 : index
    %c0_209 = arith.constant 0 : index
    %c1_210 = arith.constant 1 : index
    %199 = vector.load %arg3[%c0_207, %c17_208, %c0_209, %c1_210] : memref<1x20x16x5xbf16, #tpu.memory_space<vmem>>, vector<1x1x16x4xbf16>
    %200 = vector.shape_cast %199 : vector<1x1x16x4xbf16> to vector<16x4xbf16>
    %cst_211 = arith.constant dense<0.000000e+00> : vector<16x4xf32>
    %201 = tpu.matmul %31, %200, %cst_211 {dimension_numbers = #tpu.dot_dimension_numbers<[1], [0], [0], [1], [0, 0, 1, 1], [], []>} : vector<16x16xbf16>, vector<16x4xbf16>, vector<16x4xf32> -> vector<16x4xf32>
    %202 = arith.addf %198, %201 : vector<16x4xf32>
    %203 = vector.broadcast %33 : vector<16x1xf32> to vector<16x4xf32>
    %204 = arith.addf %202, %203 : vector<16x4xf32>
    %cst_212 = arith.constant dense<0.000000e+00> : vector<4xf32>
    %205 = vector.multi_reduction <add>, %204, %cst_212 [0] : vector<16x4xf32> to vector<4xf32>
    %206 = vector.shape_cast %205 : vector<4xf32> to vector<1x4xf32>
    %cst_213 = arith.constant 6.250000e-02 : f32
    %207 = vector.broadcast %cst_213 : f32 to vector<1x4xf32>
    %208 = arith.mulf %206, %207 : vector<1x4xf32>
    %209 = arith.mulf %204, %204 : vector<16x4xf32>
    %cst_214 = arith.constant dense<0.000000e+00> : vector<4xf32>
    %210 = vector.multi_reduction <add>, %209, %cst_214 [0] : vector<16x4xf32> to vector<4xf32>
    %211 = vector.shape_cast %210 : vector<4xf32> to vector<1x4xf32>
    %cst_215 = arith.constant 6.250000e-02 : f32
    %212 = vector.broadcast %cst_215 : f32 to vector<1x4xf32>
    %213 = arith.mulf %211, %212 : vector<1x4xf32>
    %214 = arith.mulf %208, %208 : vector<1x4xf32>
    %215 = arith.subf %213, %214 : vector<1x4xf32>
    %cst_216 = arith.constant 0.000000e+00 : f32
    %216 = vector.broadcast %cst_216 : f32 to vector<1x4xf32>
    %217 = arith.maximumf %215, %216 : vector<1x4xf32>
    %218 = vector.broadcast %208 : vector<1x4xf32> to vector<16x4xf32>
    %219 = arith.subf %204, %218 : vector<16x4xf32>
    %cst_217 = arith.constant 9.99999997E-7 : f32
    %220 = vector.broadcast %cst_217 : f32 to vector<1x4xf32>
    %221 = arith.addf %217, %220 : vector<1x4xf32>
    %222 = math.rsqrt %221 : vector<1x4xf32>
    %223 = vector.broadcast %222 : vector<1x4xf32> to vector<16x4xf32>
    %224 = arith.mulf %219, %223 : vector<16x4xf32>
    %225 = vector.broadcast %35 : vector<16x1xf32> to vector<16x4xf32>
    %226 = arith.mulf %224, %225 : vector<16x4xf32>
    %227 = vector.broadcast %37 : vector<16x1xf32> to vector<16x4xf32>
    %228 = arith.addf %226, %227 : vector<16x4xf32>
    %cst_218 = arith.constant 0.000000e+00 : f32
    %229 = vector.broadcast %cst_218 : f32 to vector<16x4xf32>
    %230 = arith.cmpf ogt, %228, %229 : vector<16x4xf32>
    %cst_219 = arith.constant 2.000000e-01 : f32
    %231 = vector.broadcast %cst_219 : f32 to vector<16x4xf32>
    %232 = arith.mulf %231, %228 : vector<16x4xf32>
    %233 = arith.select %230, %228, %232 : vector<16x4xi1>, vector<16x4xf32>
    %234 = arith.truncf %233 : vector<16x4xf32> to vector<16x4xbf16>
    %c0_220 = arith.constant 0 : index
    %c1_221 = arith.constant 1 : index
    %c0_222 = arith.constant 0 : index
    %c0_223 = arith.constant 0 : index
    %235 = vector.load %arg4[%c0_220, %c1_221, %c0_222, %c0_223] : memref<1x4x16x4xbf16, #tpu.memory_space<vmem>>, vector<1x1x16x4xbf16>
    %236 = vector.shape_cast %235 : vector<1x1x16x4xbf16> to vector<16x4xbf16>
    %237 = vector.shape_cast %234 : vector<16x4xbf16> to vector<1x1x16x4xbf16>
    tpu.vector_store %arg4[%c0_220, %c1_221, %c0_222, %c0_223], %237 {strides = array<i32>} : memref<1x4x16x4xbf16, #tpu.memory_space<vmem>>, vector<1x1x16x4xbf16>,
    %cst_224 = arith.constant 0.000000e+00 : f32
    %238 = vector.broadcast %cst_224 : f32 to vector<16x4xf32>
    %c0_225 = arith.constant 0 : index
    %c2_226 = arith.constant 2 : index
    %c0_227 = arith.constant 0 : index
    %c0_228 = arith.constant 0 : index
    %239 = vector.load %arg3[%c0_225, %c2_226, %c0_227, %c0_228] : memref<1x20x16x5xbf16, #tpu.memory_space<vmem>>, vector<1x1x16x4xbf16>
    %240 = vector.shape_cast %239 : vector<1x1x16x4xbf16> to vector<16x4xbf16>
    %cst_229 = arith.constant dense<0.000000e+00> : vector<16x4xf32>
    %241 = tpu.matmul %1, %240, %cst_229 {dimension_numbers = #tpu.dot_dimension_numbers<[1], [0], [0], [1], [0, 0, 1, 1], [], []>} : vector<16x16xbf16>, vector<16x4xbf16>, vector<16x4xf32> -> vector<16x4xf32>
    %242 = arith.addf %238, %241 : vector<16x4xf32>
    %c0_230 = arith.constant 0 : index
    %c7_231 = arith.constant 7 : index
    %c0_232 = arith.constant 0 : index
    %c0_233 = arith.constant 0 : index
    %243 = vector.load %arg3[%c0_230, %c7_231, %c0_232, %c0_233] : memref<1x20x16x5xbf16, #tpu.memory_space<vmem>>, vector<1x1x16x4xbf16>
    %244 = vector.shape_cast %243 : vector<1x1x16x4xbf16> to vector<16x4xbf16>
    %cst_234 = arith.constant dense<0.000000e+00> : vector<16x4xf32>
    %245 = tpu.matmul %3, %244, %cst_234 {dimension_numbers = #tpu.dot_dimension_numbers<[1], [0], [0], [1], [0, 0, 1, 1], [], []>} : vector<16x16xbf16>, vector<16x4xbf16>, vector<16x4xf32> -> vector<16x4xf32>
    %246 = arith.addf %242, %245 : vector<16x4xf32>
    %c0_235 = arith.constant 0 : index
    %c2_236 = arith.constant 2 : index
    %c0_237 = arith.constant 0 : index
    %c1_238 = arith.constant 1 : index
    %247 = vector.load %arg3[%c0_235, %c2_236, %c0_237, %c1_238] : memref<1x20x16x5xbf16, #tpu.memory_space<vmem>>, vector<1x1x16x4xbf16>
    %248 = vector.shape_cast %247 : vector<1x1x16x4xbf16> to vector<16x4xbf16>
    %cst_239 = arith.constant dense<0.000000e+00> : vector<16x4xf32>
    %249 = tpu.matmul %5, %248, %cst_239 {dimension_numbers = #tpu.dot_dimension_numbers<[1], [0], [0], [1], [0, 0, 1, 1], [], []>} : vector<16x16xbf16>, vector<16x4xbf16>, vector<16x4xf32> -> vector<16x4xf32>
    %250 = arith.addf %246, %249 : vector<16x4xf32>
    %c0_240 = arith.constant 0 : index
    %c7_241 = arith.constant 7 : index
    %c0_242 = arith.constant 0 : index
    %c1_243 = arith.constant 1 : index
    %251 = vector.load %arg3[%c0_240, %c7_241, %c0_242, %c1_243] : memref<1x20x16x5xbf16, #tpu.memory_space<vmem>>, vector<1x1x16x4xbf16>
    %252 = vector.shape_cast %251 : vector<1x1x16x4xbf16> to vector<16x4xbf16>
    %cst_244 = arith.constant dense<0.000000e+00> : vector<16x4xf32>
    %253 = tpu.matmul %7, %252, %cst_244 {dimension_numbers = #tpu.dot_dimension_numbers<[1], [0], [0], [1], [0, 0, 1, 1], [], []>} : vector<16x16xbf16>, vector<16x4xbf16>, vector<16x4xf32> -> vector<16x4xf32>
    %254 = arith.addf %250, %253 : vector<16x4xf32>
    %c0_245 = arith.constant 0 : index
    %c12_246 = arith.constant 12 : index
    %c0_247 = arith.constant 0 : index
    %c0_248 = arith.constant 0 : index
    %255 = vector.load %arg3[%c0_245, %c12_246, %c0_247, %c0_248] : memref<1x20x16x5xbf16, #tpu.memory_space<vmem>>, vector<1x1x16x4xbf16>
    %256 = vector.shape_cast %255 : vector<1x1x16x4xbf16> to vector<16x4xbf16>
    %cst_249 = arith.constant dense<0.000000e+00> : vector<16x4xf32>
    %257 = tpu.matmul %9, %256, %cst_249 {dimension_numbers = #tpu.dot_dimension_numbers<[1], [0], [0], [1], [0, 0, 1, 1], [], []>} : vector<16x16xbf16>, vector<16x4xbf16>, vector<16x4xf32> -> vector<16x4xf32>
    %258 = arith.addf %254, %257 : vector<16x4xf32>
    %c0_250 = arith.constant 0 : index
    %c17_251 = arith.constant 17 : index
    %c0_252 = arith.constant 0 : index
    %c0_253 = arith.constant 0 : index
    %259 = vector.load %arg3[%c0_250, %c17_251, %c0_252, %c0_253] : memref<1x20x16x5xbf16, #tpu.memory_space<vmem>>, vector<1x1x16x4xbf16>
    %260 = vector.shape_cast %259 : vector<1x1x16x4xbf16> to vector<16x4xbf16>
    %cst_254 = arith.constant dense<0.000000e+00> : vector<16x4xf32>
    %261 = tpu.matmul %11, %260, %cst_254 {dimension_numbers = #tpu.dot_dimension_numbers<[1], [0], [0], [1], [0, 0, 1, 1], [], []>} : vector<16x16xbf16>, vector<16x4xbf16>, vector<16x4xf32> -> vector<16x4xf32>
    %262 = arith.addf %258, %261 : vector<16x4xf32>
    %c0_255 = arith.constant 0 : index
    %c12_256 = arith.constant 12 : index
    %c0_257 = arith.constant 0 : index
    %c1_258 = arith.constant 1 : index
    %263 = vector.load %arg3[%c0_255, %c12_256, %c0_257, %c1_258] : memref<1x20x16x5xbf16, #tpu.memory_space<vmem>>, vector<1x1x16x4xbf16>
    %264 = vector.shape_cast %263 : vector<1x1x16x4xbf16> to vector<16x4xbf16>
    %cst_259 = arith.constant dense<0.000000e+00> : vector<16x4xf32>
    %265 = tpu.matmul %13, %264, %cst_259 {dimension_numbers = #tpu.dot_dimension_numbers<[1], [0], [0], [1], [0, 0, 1, 1], [], []>} : vector<16x16xbf16>, vector<16x4xbf16>, vector<16x4xf32> -> vector<16x4xf32>
    %266 = arith.addf %262, %265 : vector<16x4xf32>
    %c0_260 = arith.constant 0 : index
    %c17_261 = arith.constant 17 : index
    %c0_262 = arith.constant 0 : index
    %c1_263 = arith.constant 1 : index
    %267 = vector.load %arg3[%c0_260, %c17_261, %c0_262, %c1_263] : memref<1x20x16x5xbf16, #tpu.memory_space<vmem>>, vector<1x1x16x4xbf16>
    %268 = vector.shape_cast %267 : vector<1x1x16x4xbf16> to vector<16x4xbf16>
    %cst_264 = arith.constant dense<0.000000e+00> : vector<16x4xf32>
    %269 = tpu.matmul %15, %268, %cst_264 {dimension_numbers = #tpu.dot_dimension_numbers<[1], [0], [0], [1], [0, 0, 1, 1], [], []>} : vector<16x16xbf16>, vector<16x4xbf16>, vector<16x4xf32> -> vector<16x4xf32>
    %270 = arith.addf %266, %269 : vector<16x4xf32>
    %c0_265 = arith.constant 0 : index
    %c3_266 = arith.constant 3 : index
    %c0_267 = arith.constant 0 : index
    %c0_268 = arith.constant 0 : index
    %271 = vector.load %arg3[%c0_265, %c3_266, %c0_267, %c0_268] : memref<1x20x16x5xbf16, #tpu.memory_space<vmem>>, vector<1x1x16x4xbf16>
    %272 = vector.shape_cast %271 : vector<1x1x16x4xbf16> to vector<16x4xbf16>
    %cst_269 = arith.constant dense<0.000000e+00> : vector<16x4xf32>
    %273 = tpu.matmul %17, %272, %cst_269 {dimension_numbers = #tpu.dot_dimension_numbers<[1], [0], [0], [1], [0, 0, 1, 1], [], []>} : vector<16x16xbf16>, vector<16x4xbf16>, vector<16x4xf32> -> vector<16x4xf32>
    %274 = arith.addf %270, %273 : vector<16x4xf32>
    %c0_270 = arith.constant 0 : index
    %c8_271 = arith.constant 8 : index
    %c0_272 = arith.constant 0 : index
    %c0_273 = arith.constant 0 : index
    %275 = vector.load %arg3[%c0_270, %c8_271, %c0_272, %c0_273] : memref<1x20x16x5xbf16, #tpu.memory_space<vmem>>, vector<1x1x16x4xbf16>
    %276 = vector.shape_cast %275 : vector<1x1x16x4xbf16> to vector<16x4xbf16>
    %cst_274 = arith.constant dense<0.000000e+00> : vector<16x4xf32>
    %277 = tpu.matmul %19, %276, %cst_274 {dimension_numbers = #tpu.dot_dimension_numbers<[1], [0], [0], [1], [0, 0, 1, 1], [], []>} : vector<16x16xbf16>, vector<16x4xbf16>, vector<16x4xf32> -> vector<16x4xf32>
    %278 = arith.addf %274, %277 : vector<16x4xf32>
    %c0_275 = arith.constant 0 : index
    %c3_276 = arith.constant 3 : index
    %c0_277 = arith.constant 0 : index
    %c1_278 = arith.constant 1 : index
    %279 = vector.load %arg3[%c0_275, %c3_276, %c0_277, %c1_278] : memref<1x20x16x5xbf16, #tpu.memory_space<vmem>>, vector<1x1x16x4xbf16>
    %280 = vector.shape_cast %279 : vector<1x1x16x4xbf16> to vector<16x4xbf16>
    %cst_279 = arith.constant dense<0.000000e+00> : vector<16x4xf32>
    %281 = tpu.matmul %21, %280, %cst_279 {dimension_numbers = #tpu.dot_dimension_numbers<[1], [0], [0], [1], [0, 0, 1, 1], [], []>} : vector<16x16xbf16>, vector<16x4xbf16>, vector<16x4xf32> -> vector<16x4xf32>
    %282 = arith.addf %278, %281 : vector<16x4xf32>
    %c0_280 = arith.constant 0 : index
    %c8_281 = arith.constant 8 : index
    %c0_282 = arith.constant 0 : index
    %c1_283 = arith.constant 1 : index
    %283 = vector.load %arg3[%c0_280, %c8_281, %c0_282, %c1_283] : memref<1x20x16x5xbf16, #tpu.memory_space<vmem>>, vector<1x1x16x4xbf16>
    %284 = vector.shape_cast %283 : vector<1x1x16x4xbf16> to vector<16x4xbf16>
    %cst_284 = arith.constant dense<0.000000e+00> : vector<16x4xf32>
    %285 = tpu.matmul %23, %284, %cst_284 {dimension_numbers = #tpu.dot_dimension_numbers<[1], [0], [0], [1], [0, 0, 1, 1], [], []>} : vector<16x16xbf16>, vector<16x4xbf16>, vector<16x4xf32> -> vector<16x4xf32>
    %286 = arith.addf %282, %285 : vector<16x4xf32>
    %c0_285 = arith.constant 0 : index
    %c13_286 = arith.constant 13 : index
    %c0_287 = arith.constant 0 : index
    %c0_288 = arith.constant 0 : index
    %287 = vector.load %arg3[%c0_285, %c13_286, %c0_287, %c0_288] : memref<1x20x16x5xbf16, #tpu.memory_space<vmem>>, vector<1x1x16x4xbf16>
    %288 = vector.shape_cast %287 : vector<1x1x16x4xbf16> to vector<16x4xbf16>
    %cst_289 = arith.constant dense<0.000000e+00> : vector<16x4xf32>
    %289 = tpu.matmul %25, %288, %cst_289 {dimension_numbers = #tpu.dot_dimension_numbers<[1], [0], [0], [1], [0, 0, 1, 1], [], []>} : vector<16x16xbf16>, vector<16x4xbf16>, vector<16x4xf32> -> vector<16x4xf32>
    %290 = arith.addf %286, %289 : vector<16x4xf32>
    %c0_290 = arith.constant 0 : index
    %c18 = arith.constant 18 : index
    %c0_291 = arith.constant 0 : index
    %c0_292 = arith.constant 0 : index
    %291 = vector.load %arg3[%c0_290, %c18, %c0_291, %c0_292] : memref<1x20x16x5xbf16, #tpu.memory_space<vmem>>, vector<1x1x16x4xbf16>
    %292 = vector.shape_cast %291 : vector<1x1x16x4xbf16> to vector<16x4xbf16>
    %cst_293 = arith.constant dense<0.000000e+00> : vector<16x4xf32>
    %293 = tpu.matmul %27, %292, %cst_293 {dimension_numbers = #tpu.dot_dimension_numbers<[1], [0], [0], [1], [0, 0, 1, 1], [], []>} : vector<16x16xbf16>, vector<16x4xbf16>, vector<16x4xf32> -> vector<16x4xf32>
    %294 = arith.addf %290, %293 : vector<16x4xf32>
    %c0_294 = arith.constant 0 : index
    %c13_295 = arith.constant 13 : index
    %c0_296 = arith.constant 0 : index
    %c1_297 = arith.constant 1 : index
    %295 = vector.load %arg3[%c0_294, %c13_295, %c0_296, %c1_297] : memref<1x20x16x5xbf16, #tpu.memory_space<vmem>>, vector<1x1x16x4xbf16>
    %296 = vector.shape_cast %295 : vector<1x1x16x4xbf16> to vector<16x4xbf16>
    %cst_298 = arith.constant dense<0.000000e+00> : vector<16x4xf32>
    %297 = tpu.matmul %29, %296, %cst_298 {dimension_numbers = #tpu.dot_dimension_numbers<[1], [0], [0], [1], [0, 0, 1, 1], [], []>} : vector<16x16xbf16>, vector<16x4xbf16>, vector<16x4xf32> -> vector<16x4xf32>
    %298 = arith.addf %294, %297 : vector<16x4xf32>
    %c0_299 = arith.constant 0 : index
    %c18_300 = arith.constant 18 : index
    %c0_301 = arith.constant 0 : index
    %c1_302 = arith.constant 1 : index
    %299 = vector.load %arg3[%c0_299, %c18_300, %c0_301, %c1_302] : memref<1x20x16x5xbf16, #tpu.memory_space<vmem>>, vector<1x1x16x4xbf16>
    %300 = vector.shape_cast %299 : vector<1x1x16x4xbf16> to vector<16x4xbf16>
    %cst_303 = arith.constant dense<0.000000e+00> : vector<16x4xf32>
    %301 = tpu.matmul %31, %300, %cst_303 {dimension_numbers = #tpu.dot_dimension_numbers<[1], [0], [0], [1], [0, 0, 1, 1], [], []>} : vector<16x16xbf16>, vector<16x4xbf16>, vector<16x4xf32> -> vector<16x4xf32>
    %302 = arith.addf %298, %301 : vector<16x4xf32>
    %303 = vector.broadcast %33 : vector<16x1xf32> to vector<16x4xf32>
    %304 = arith.addf %302, %303 : vector<16x4xf32>
    %cst_304 = arith.constant dense<0.000000e+00> : vector<4xf32>
    %305 = vector.multi_reduction <add>, %304, %cst_304 [0] : vector<16x4xf32> to vector<4xf32>
    %306 = vector.shape_cast %305 : vector<4xf32> to vector<1x4xf32>
    %cst_305 = arith.constant 6.250000e-02 : f32
    %307 = vector.broadcast %cst_305 : f32 to vector<1x4xf32>
    %308 = arith.mulf %306, %307 : vector<1x4xf32>
    %309 = arith.mulf %304, %304 : vector<16x4xf32>
    %cst_306 = arith.constant dense<0.000000e+00> : vector<4xf32>
    %310 = vector.multi_reduction <add>, %309, %cst_306 [0] : vector<16x4xf32> to vector<4xf32>
    %311 = vector.shape_cast %310 : vector<4xf32> to vector<1x4xf32>
    %cst_307 = arith.constant 6.250000e-02 : f32
    %312 = vector.broadcast %cst_307 : f32 to vector<1x4xf32>
    %313 = arith.mulf %311, %312 : vector<1x4xf32>
    %314 = arith.mulf %308, %308 : vector<1x4xf32>
    %315 = arith.subf %313, %314 : vector<1x4xf32>
    %cst_308 = arith.constant 0.000000e+00 : f32
    %316 = vector.broadcast %cst_308 : f32 to vector<1x4xf32>
    %317 = arith.maximumf %315, %316 : vector<1x4xf32>
    %318 = vector.broadcast %308 : vector<1x4xf32> to vector<16x4xf32>
    %319 = arith.subf %304, %318 : vector<16x4xf32>
    %cst_309 = arith.constant 9.99999997E-7 : f32
    %320 = vector.broadcast %cst_309 : f32 to vector<1x4xf32>
    %321 = arith.addf %317, %320 : vector<1x4xf32>
    %322 = math.rsqrt %321 : vector<1x4xf32>
    %323 = vector.broadcast %322 : vector<1x4xf32> to vector<16x4xf32>
    %324 = arith.mulf %319, %323 : vector<16x4xf32>
    %325 = vector.broadcast %35 : vector<16x1xf32> to vector<16x4xf32>
    %326 = arith.mulf %324, %325 : vector<16x4xf32>
    %327 = vector.broadcast %37 : vector<16x1xf32> to vector<16x4xf32>
    %328 = arith.addf %326, %327 : vector<16x4xf32>
    %cst_310 = arith.constant 0.000000e+00 : f32
    %329 = vector.broadcast %cst_310 : f32 to vector<16x4xf32>
    %330 = arith.cmpf ogt, %328, %329 : vector<16x4xf32>
    %cst_311 = arith.constant 2.000000e-01 : f32
    %331 = vector.broadcast %cst_311 : f32 to vector<16x4xf32>
    %332 = arith.mulf %331, %328 : vector<16x4xf32>
    %333 = arith.select %330, %328, %332 : vector<16x4xi1>, vector<16x4xf32>
    %334 = arith.truncf %333 : vector<16x4xf32> to vector<16x4xbf16>
    %c0_312 = arith.constant 0 : index
    %c2_313 = arith.constant 2 : index
    %c0_314 = arith.constant 0 : index
    %c0_315 = arith.constant 0 : index
    %335 = vector.load %arg4[%c0_312, %c2_313, %c0_314, %c0_315] : memref<1x4x16x4xbf16, #tpu.memory_space<vmem>>, vector<1x1x16x4xbf16>
    %336 = vector.shape_cast %335 : vector<1x1x16x4xbf16> to vector<16x4xbf16>
    %337 = vector.shape_cast %334 : vector<16x4xbf16> to vector<1x1x16x4xbf16>
    tpu.vector_store %arg4[%c0_312, %c2_313, %c0_314, %c0_315], %337 {strides = array<i32>} : memref<1x4x16x4xbf16, #tpu.memory_space<vmem>>, vector<1x1x16x4xbf16>,
    %cst_316 = arith.constant 0.000000e+00 : f32
    %338 = vector.broadcast %cst_316 : f32 to vector<16x4xf32>
    %c0_317 = arith.constant 0 : index
    %c3_318 = arith.constant 3 : index
    %c0_319 = arith.constant 0 : index
    %c0_320 = arith.constant 0 : index
    %339 = vector.load %arg3[%c0_317, %c3_318, %c0_319, %c0_320] : memref<1x20x16x5xbf16, #tpu.memory_space<vmem>>, vector<1x1x16x4xbf16>
    %340 = vector.shape_cast %339 : vector<1x1x16x4xbf16> to vector<16x4xbf16>
    %cst_321 = arith.constant dense<0.000000e+00> : vector<16x4xf32>
    %341 = tpu.matmul %1, %340, %cst_321 {dimension_numbers = #tpu.dot_dimension_numbers<[1], [0], [0], [1], [0, 0, 1, 1], [], []>} : vector<16x16xbf16>, vector<16x4xbf16>, vector<16x4xf32> -> vector<16x4xf32>
    %342 = arith.addf %338, %341 : vector<16x4xf32>
    %c0_322 = arith.constant 0 : index
    %c8_323 = arith.constant 8 : index
    %c0_324 = arith.constant 0 : index
    %c0_325 = arith.constant 0 : index
    %343 = vector.load %arg3[%c0_322, %c8_323, %c0_324, %c0_325] : memref<1x20x16x5xbf16, #tpu.memory_space<vmem>>, vector<1x1x16x4xbf16>
    %344 = vector.shape_cast %343 : vector<1x1x16x4xbf16> to vector<16x4xbf16>
    %cst_326 = arith.constant dense<0.000000e+00> : vector<16x4xf32>
    %345 = tpu.matmul %3, %344, %cst_326 {dimension_numbers = #tpu.dot_dimension_numbers<[1], [0], [0], [1], [0, 0, 1, 1], [], []>} : vector<16x16xbf16>, vector<16x4xbf16>, vector<16x4xf32> -> vector<16x4xf32>
    %346 = arith.addf %342, %345 : vector<16x4xf32>
    %c0_327 = arith.constant 0 : index
    %c3_328 = arith.constant 3 : index
    %c0_329 = arith.constant 0 : index
    %c1_330 = arith.constant 1 : index
    %347 = vector.load %arg3[%c0_327, %c3_328, %c0_329, %c1_330] : memref<1x20x16x5xbf16, #tpu.memory_space<vmem>>, vector<1x1x16x4xbf16>
    %348 = vector.shape_cast %347 : vector<1x1x16x4xbf16> to vector<16x4xbf16>
    %cst_331 = arith.constant dense<0.000000e+00> : vector<16x4xf32>
    %349 = tpu.matmul %5, %348, %cst_331 {dimension_numbers = #tpu.dot_dimension_numbers<[1], [0], [0], [1], [0, 0, 1, 1], [], []>} : vector<16x16xbf16>, vector<16x4xbf16>, vector<16x4xf32> -> vector<16x4xf32>
    %350 = arith.addf %346, %349 : vector<16x4xf32>
    %c0_332 = arith.constant 0 : index
    %c8_333 = arith.constant 8 : index
    %c0_334 = arith.constant 0 : index
    %c1_335 = arith.constant 1 : index
    %351 = vector.load %arg3[%c0_332, %c8_333, %c0_334, %c1_335] : memref<1x20x16x5xbf16, #tpu.memory_space<vmem>>, vector<1x1x16x4xbf16>
    %352 = vector.shape_cast %351 : vector<1x1x16x4xbf16> to vector<16x4xbf16>
    %cst_336 = arith.constant dense<0.000000e+00> : vector<16x4xf32>
    %353 = tpu.matmul %7, %352, %cst_336 {dimension_numbers = #tpu.dot_dimension_numbers<[1], [0], [0], [1], [0, 0, 1, 1], [], []>} : vector<16x16xbf16>, vector<16x4xbf16>, vector<16x4xf32> -> vector<16x4xf32>
    %354 = arith.addf %350, %353 : vector<16x4xf32>
    %c0_337 = arith.constant 0 : index
    %c13_338 = arith.constant 13 : index
    %c0_339 = arith.constant 0 : index
    %c0_340 = arith.constant 0 : index
    %355 = vector.load %arg3[%c0_337, %c13_338, %c0_339, %c0_340] : memref<1x20x16x5xbf16, #tpu.memory_space<vmem>>, vector<1x1x16x4xbf16>
    %356 = vector.shape_cast %355 : vector<1x1x16x4xbf16> to vector<16x4xbf16>
    %cst_341 = arith.constant dense<0.000000e+00> : vector<16x4xf32>
    %357 = tpu.matmul %9, %356, %cst_341 {dimension_numbers = #tpu.dot_dimension_numbers<[1], [0], [0], [1], [0, 0, 1, 1], [], []>} : vector<16x16xbf16>, vector<16x4xbf16>, vector<16x4xf32> -> vector<16x4xf32>
    %358 = arith.addf %354, %357 : vector<16x4xf32>
    %c0_342 = arith.constant 0 : index
    %c18_343 = arith.constant 18 : index
    %c0_344 = arith.constant 0 : index
    %c0_345 = arith.constant 0 : index
    %359 = vector.load %arg3[%c0_342, %c18_343, %c0_344, %c0_345] : memref<1x20x16x5xbf16, #tpu.memory_space<vmem>>, vector<1x1x16x4xbf16>
    %360 = vector.shape_cast %359 : vector<1x1x16x4xbf16> to vector<16x4xbf16>
    %cst_346 = arith.constant dense<0.000000e+00> : vector<16x4xf32>
    %361 = tpu.matmul %11, %360, %cst_346 {dimension_numbers = #tpu.dot_dimension_numbers<[1], [0], [0], [1], [0, 0, 1, 1], [], []>} : vector<16x16xbf16>, vector<16x4xbf16>, vector<16x4xf32> -> vector<16x4xf32>
    %362 = arith.addf %358, %361 : vector<16x4xf32>
    %c0_347 = arith.constant 0 : index
    %c13_348 = arith.constant 13 : index
    %c0_349 = arith.constant 0 : index
    %c1_350 = arith.constant 1 : index
    %363 = vector.load %arg3[%c0_347, %c13_348, %c0_349, %c1_350] : memref<1x20x16x5xbf16, #tpu.memory_space<vmem>>, vector<1x1x16x4xbf16>
    %364 = vector.shape_cast %363 : vector<1x1x16x4xbf16> to vector<16x4xbf16>
    %cst_351 = arith.constant dense<0.000000e+00> : vector<16x4xf32>
    %365 = tpu.matmul %13, %364, %cst_351 {dimension_numbers = #tpu.dot_dimension_numbers<[1], [0], [0], [1], [0, 0, 1, 1], [], []>} : vector<16x16xbf16>, vector<16x4xbf16>, vector<16x4xf32> -> vector<16x4xf32>
    %366 = arith.addf %362, %365 : vector<16x4xf32>
    %c0_352 = arith.constant 0 : index
    %c18_353 = arith.constant 18 : index
    %c0_354 = arith.constant 0 : index
    %c1_355 = arith.constant 1 : index
    %367 = vector.load %arg3[%c0_352, %c18_353, %c0_354, %c1_355] : memref<1x20x16x5xbf16, #tpu.memory_space<vmem>>, vector<1x1x16x4xbf16>
    %368 = vector.shape_cast %367 : vector<1x1x16x4xbf16> to vector<16x4xbf16>
    %cst_356 = arith.constant dense<0.000000e+00> : vector<16x4xf32>
    %369 = tpu.matmul %15, %368, %cst_356 {dimension_numbers = #tpu.dot_dimension_numbers<[1], [0], [0], [1], [0, 0, 1, 1], [], []>} : vector<16x16xbf16>, vector<16x4xbf16>, vector<16x4xf32> -> vector<16x4xf32>
    %370 = arith.addf %366, %369 : vector<16x4xf32>
    %c0_357 = arith.constant 0 : index
    %c4_358 = arith.constant 4 : index
    %c0_359 = arith.constant 0 : index
    %c0_360 = arith.constant 0 : index
    %371 = vector.load %arg3[%c0_357, %c4_358, %c0_359, %c0_360] : memref<1x20x16x5xbf16, #tpu.memory_space<vmem>>, vector<1x1x16x4xbf16>
    %372 = vector.shape_cast %371 : vector<1x1x16x4xbf16> to vector<16x4xbf16>
    %cst_361 = arith.constant dense<0.000000e+00> : vector<16x4xf32>
    %373 = tpu.matmul %17, %372, %cst_361 {dimension_numbers = #tpu.dot_dimension_numbers<[1], [0], [0], [1], [0, 0, 1, 1], [], []>} : vector<16x16xbf16>, vector<16x4xbf16>, vector<16x4xf32> -> vector<16x4xf32>
    %374 = arith.addf %370, %373 : vector<16x4xf32>
    %c0_362 = arith.constant 0 : index
    %c9_363 = arith.constant 9 : index
    %c0_364 = arith.constant 0 : index
    %c0_365 = arith.constant 0 : index
    %375 = vector.load %arg3[%c0_362, %c9_363, %c0_364, %c0_365] : memref<1x20x16x5xbf16, #tpu.memory_space<vmem>>, vector<1x1x16x4xbf16>
    %376 = vector.shape_cast %375 : vector<1x1x16x4xbf16> to vector<16x4xbf16>
    %cst_366 = arith.constant dense<0.000000e+00> : vector<16x4xf32>
    %377 = tpu.matmul %19, %376, %cst_366 {dimension_numbers = #tpu.dot_dimension_numbers<[1], [0], [0], [1], [0, 0, 1, 1], [], []>} : vector<16x16xbf16>, vector<16x4xbf16>, vector<16x4xf32> -> vector<16x4xf32>
    %378 = arith.addf %374, %377 : vector<16x4xf32>
    %c0_367 = arith.constant 0 : index
    %c4_368 = arith.constant 4 : index
    %c0_369 = arith.constant 0 : index
    %c1_370 = arith.constant 1 : index
    %379 = vector.load %arg3[%c0_367, %c4_368, %c0_369, %c1_370] : memref<1x20x16x5xbf16, #tpu.memory_space<vmem>>, vector<1x1x16x4xbf16>
    %380 = vector.shape_cast %379 : vector<1x1x16x4xbf16> to vector<16x4xbf16>
    %cst_371 = arith.constant dense<0.000000e+00> : vector<16x4xf32>
    %381 = tpu.matmul %21, %380, %cst_371 {dimension_numbers = #tpu.dot_dimension_numbers<[1], [0], [0], [1], [0, 0, 1, 1], [], []>} : vector<16x16xbf16>, vector<16x4xbf16>, vector<16x4xf32> -> vector<16x4xf32>
    %382 = arith.addf %378, %381 : vector<16x4xf32>
    %c0_372 = arith.constant 0 : index
    %c9_373 = arith.constant 9 : index
    %c0_374 = arith.constant 0 : index
    %c1_375 = arith.constant 1 : index
    %383 = vector.load %arg3[%c0_372, %c9_373, %c0_374, %c1_375] : memref<1x20x16x5xbf16, #tpu.memory_space<vmem>>, vector<1x1x16x4xbf16>
    %384 = vector.shape_cast %383 : vector<1x1x16x4xbf16> to vector<16x4xbf16>
    %cst_376 = arith.constant dense<0.000000e+00> : vector<16x4xf32>
    %385 = tpu.matmul %23, %384, %cst_376 {dimension_numbers = #tpu.dot_dimension_numbers<[1], [0], [0], [1], [0, 0, 1, 1], [], []>} : vector<16x16xbf16>, vector<16x4xbf16>, vector<16x4xf32> -> vector<16x4xf32>
    %386 = arith.addf %382, %385 : vector<16x4xf32>
    %c0_377 = arith.constant 0 : index
    %c14_378 = arith.constant 14 : index
    %c0_379 = arith.constant 0 : index
    %c0_380 = arith.constant 0 : index
    %387 = vector.load %arg3[%c0_377, %c14_378, %c0_379, %c0_380] : memref<1x20x16x5xbf16, #tpu.memory_space<vmem>>, vector<1x1x16x4xbf16>
    %388 = vector.shape_cast %387 : vector<1x1x16x4xbf16> to vector<16x4xbf16>
    %cst_381 = arith.constant dense<0.000000e+00> : vector<16x4xf32>
    %389 = tpu.matmul %25, %388, %cst_381 {dimension_numbers = #tpu.dot_dimension_numbers<[1], [0], [0], [1], [0, 0, 1, 1], [], []>} : vector<16x16xbf16>, vector<16x4xbf16>, vector<16x4xf32> -> vector<16x4xf32>
    %390 = arith.addf %386, %389 : vector<16x4xf32>
    %c0_382 = arith.constant 0 : index
    %c19 = arith.constant 19 : index
    %c0_383 = arith.constant 0 : index
    %c0_384 = arith.constant 0 : index
    %391 = vector.load %arg3[%c0_382, %c19, %c0_383, %c0_384] : memref<1x20x16x5xbf16, #tpu.memory_space<vmem>>, vector<1x1x16x4xbf16>
    %392 = vector.shape_cast %391 : vector<1x1x16x4xbf16> to vector<16x4xbf16>
    %cst_385 = arith.constant dense<0.000000e+00> : vector<16x4xf32>
    %393 = tpu.matmul %27, %392, %cst_385 {dimension_numbers = #tpu.dot_dimension_numbers<[1], [0], [0], [1], [0, 0, 1, 1], [], []>} : vector<16x16xbf16>, vector<16x4xbf16>, vector<16x4xf32> -> vector<16x4xf32>
    %394 = arith.addf %390, %393 : vector<16x4xf32>
    %c0_386 = arith.constant 0 : index
    %c14_387 = arith.constant 14 : index
    %c0_388 = arith.constant 0 : index
    %c1_389 = arith.constant 1 : index
    %395 = vector.load %arg3[%c0_386, %c14_387, %c0_388, %c1_389] : memref<1x20x16x5xbf16, #tpu.memory_space<vmem>>, vector<1x1x16x4xbf16>
    %396 = vector.shape_cast %395 : vector<1x1x16x4xbf16> to vector<16x4xbf16>
    %cst_390 = arith.constant dense<0.000000e+00> : vector<16x4xf32>
    %397 = tpu.matmul %29, %396, %cst_390 {dimension_numbers = #tpu.dot_dimension_numbers<[1], [0], [0], [1], [0, 0, 1, 1], [], []>} : vector<16x16xbf16>, vector<16x4xbf16>, vector<16x4xf32> -> vector<16x4xf32>
    %398 = arith.addf %394, %397 : vector<16x4xf32>
    %c0_391 = arith.constant 0 : index
    %c19_392 = arith.constant 19 : index
    %c0_393 = arith.constant 0 : index
    %c1_394 = arith.constant 1 : index
    %399 = vector.load %arg3[%c0_391, %c19_392, %c0_393, %c1_394] : memref<1x20x16x5xbf16, #tpu.memory_space<vmem>>, vector<1x1x16x4xbf16>
    %400 = vector.shape_cast %399 : vector<1x1x16x4xbf16> to vector<16x4xbf16>
    %cst_395 = arith.constant dense<0.000000e+00> : vector<16x4xf32>
    %401 = tpu.matmul %31, %400, %cst_395 {dimension_numbers = #tpu.dot_dimension_numbers<[1], [0], [0], [1], [0, 0, 1, 1], [], []>} : vector<16x16xbf16>, vector<16x4xbf16>, vector<16x4xf32> -> vector<16x4xf32>
    %402 = arith.addf %398, %401 : vector<16x4xf32>
    %403 = vector.broadcast %33 : vector<16x1xf32> to vector<16x4xf32>
    %404 = arith.addf %402, %403 : vector<16x4xf32>
    %cst_396 = arith.constant dense<0.000000e+00> : vector<4xf32>
    %405 = vector.multi_reduction <add>, %404, %cst_396 [0] : vector<16x4xf32> to vector<4xf32>
    %406 = vector.shape_cast %405 : vector<4xf32> to vector<1x4xf32>
    %cst_397 = arith.constant 6.250000e-02 : f32
    %407 = vector.broadcast %cst_397 : f32 to vector<1x4xf32>
    %408 = arith.mulf %406, %407 : vector<1x4xf32>
    %409 = arith.mulf %404, %404 : vector<16x4xf32>
    %cst_398 = arith.constant dense<0.000000e+00> : vector<4xf32>
    %410 = vector.multi_reduction <add>, %409, %cst_398 [0] : vector<16x4xf32> to vector<4xf32>
    %411 = vector.shape_cast %410 : vector<4xf32> to vector<1x4xf32>
    %cst_399 = arith.constant 6.250000e-02 : f32
    %412 = vector.broadcast %cst_399 : f32 to vector<1x4xf32>
    %413 = arith.mulf %411, %412 : vector<1x4xf32>
    %414 = arith.mulf %408, %408 : vector<1x4xf32>
    %415 = arith.subf %413, %414 : vector<1x4xf32>
    %cst_400 = arith.constant 0.000000e+00 : f32
    %416 = vector.broadcast %cst_400 : f32 to vector<1x4xf32>
    %417 = arith.maximumf %415, %416 : vector<1x4xf32>
    %418 = vector.broadcast %408 : vector<1x4xf32> to vector<16x4xf32>
    %419 = arith.subf %404, %418 : vector<16x4xf32>
    %cst_401 = arith.constant 9.99999997E-7 : f32
    %420 = vector.broadcast %cst_401 : f32 to vector<1x4xf32>
    %421 = arith.addf %417, %420 : vector<1x4xf32>
    %422 = math.rsqrt %421 : vector<1x4xf32>
    %423 = vector.broadcast %422 : vector<1x4xf32> to vector<16x4xf32>
    %424 = arith.mulf %419, %423 : vector<16x4xf32>
    %425 = vector.broadcast %35 : vector<16x1xf32> to vector<16x4xf32>
    %426 = arith.mulf %424, %425 : vector<16x4xf32>
    %427 = vector.broadcast %37 : vector<16x1xf32> to vector<16x4xf32>
    %428 = arith.addf %426, %427 : vector<16x4xf32>
    %cst_402 = arith.constant 0.000000e+00 : f32
    %429 = vector.broadcast %cst_402 : f32 to vector<16x4xf32>
    %430 = arith.cmpf ogt, %428, %429 : vector<16x4xf32>
    %cst_403 = arith.constant 2.000000e-01 : f32
    %431 = vector.broadcast %cst_403 : f32 to vector<16x4xf32>
    %432 = arith.mulf %431, %428 : vector<16x4xf32>
    %433 = arith.select %430, %428, %432 : vector<16x4xi1>, vector<16x4xf32>
    %434 = arith.truncf %433 : vector<16x4xf32> to vector<16x4xbf16>
    %c0_404 = arith.constant 0 : index
    %c3_405 = arith.constant 3 : index
    %c0_406 = arith.constant 0 : index
    %c0_407 = arith.constant 0 : index
    %435 = vector.load %arg4[%c0_404, %c3_405, %c0_406, %c0_407] : memref<1x4x16x4xbf16, #tpu.memory_space<vmem>>, vector<1x1x16x4xbf16>
    %436 = vector.shape_cast %435 : vector<1x1x16x4xbf16> to vector<16x4xbf16>
    %437 = vector.shape_cast %434 : vector<16x4xbf16> to vector<1x1x16x4xbf16>
    tpu.vector_store %arg4[%c0_404, %c3_405, %c0_406, %c0_407], %437 {strides = array<i32>} : memref<1x4x16x4xbf16, #tpu.memory_space<vmem>>, vector<1x1x16x4xbf16>,
    return
  }
  func.func @transform_0(%arg0: i32) -> (i32, i32, i32) {
    %c0_i32 = arith.constant 0 : i32
    %c0_i32_0 = arith.constant 0 : i32
    %c0_i32_1 = arith.constant 0 : i32
    %c0_i32_2 = arith.constant 0 : i32
    return %c0_i32, %c0_i32_0, %c0_i32_1 : i32, i32, i32
  }
  func.func @transform_1(%arg0: i32) -> (i32, i32, i32) {
    %c0_i32 = arith.constant 0 : i32
    %c0_i32_0 = arith.constant 0 : i32
    %c0_i32_1 = arith.constant 0 : i32
    %c0_i32_2 = arith.constant 0 : i32
    return %c0_i32, %c0_i32_0, %c0_i32_1 : i32, i32, i32
  }
  func.func @transform_2(%arg0: i32) -> (i32, i32, i32, i32) {
    %c0_i32 = arith.constant 0 : i32
    %c0_i32_0 = arith.constant 0 : i32
    %c0_i32_1 = arith.constant 0 : i32
    %c0_i32_2 = arith.constant 0 : i32
    return %arg0, %c0_i32, %c0_i32_0, %c0_i32_1 : i32, i32, i32, i32
  }
  func.func @transform_3(%arg0: i32) -> (i32, i32, i32, i32) {
    %c0_i32 = arith.constant 0 : i32
    %c0_i32_0 = arith.constant 0 : i32
    %c0_i32_1 = arith.constant 0 : i32
    %c0_i32_2 = arith.constant 0 : i32
    return %arg0, %c0_i32, %c0_i32_0, %c0_i32_1 : i32, i32, i32, i32
  }
}

module attributes {stable_mosaic.version = 11 : i64} {
  func.func @_conv_rows_kernel(%arg0: i32, %arg1: memref<16x16x16xbf16, #tpu.memory_space<vmem>>, %arg2: memref<3x16x1xf32, #tpu.memory_space<vmem>>, %arg3: memref<1x6x16x6xbf16, #tpu.memory_space<vmem>>, %arg4: memref<1x3x16x3xf32, #tpu.memory_space<vmem>>) attributes {dimension_semantics = [#tpu.dimension_semantics<parallel>], iteration_bounds = array<i64: 2>, scalar_prefetch = 0 : i64, scratch_operands = 0 : i64, tpu.core_type = #tpu.core_type<tc>, window_params = [{pipeline_mode = #tpu.pipeline_mode<synchronous>, transform_indices = @transform_0, window_bounds = array<i64: 16, 16, 16>}, {pipeline_mode = #tpu.pipeline_mode<synchronous>, transform_indices = @transform_1, window_bounds = array<i64: 3, 16, 1>}, {transform_indices = @transform_2, window_bounds = array<i64: 1, 6, 16, 6>}, {transform_indices = @transform_3, window_bounds = array<i64: 1, 3, 16, 3>}]} {
    %c0 = arith.constant 0 : index
    %c0_0 = arith.constant 0 : index
    %c0_1 = arith.constant 0 : index
    %0 = vector.load %arg1[%c0, %c0_0, %c0_1] : memref<16x16x16xbf16, #tpu.memory_space<vmem>>, vector<1x16x16xbf16>
    %1 = vector.shape_cast %0 : vector<1x16x16xbf16> to vector<16x16xbf16>
    %c1 = arith.constant 1 : index
    %c0_2 = arith.constant 0 : index
    %c0_3 = arith.constant 0 : index
    %2 = vector.load %arg1[%c1, %c0_2, %c0_3] : memref<16x16x16xbf16, #tpu.memory_space<vmem>>, vector<1x16x16xbf16>
    %3 = vector.shape_cast %2 : vector<1x16x16xbf16> to vector<16x16xbf16>
    %c2 = arith.constant 2 : index
    %c0_4 = arith.constant 0 : index
    %c0_5 = arith.constant 0 : index
    %4 = vector.load %arg1[%c2, %c0_4, %c0_5] : memref<16x16x16xbf16, #tpu.memory_space<vmem>>, vector<1x16x16xbf16>
    %5 = vector.shape_cast %4 : vector<1x16x16xbf16> to vector<16x16xbf16>
    %c3 = arith.constant 3 : index
    %c0_6 = arith.constant 0 : index
    %c0_7 = arith.constant 0 : index
    %6 = vector.load %arg1[%c3, %c0_6, %c0_7] : memref<16x16x16xbf16, #tpu.memory_space<vmem>>, vector<1x16x16xbf16>
    %7 = vector.shape_cast %6 : vector<1x16x16xbf16> to vector<16x16xbf16>
    %c4 = arith.constant 4 : index
    %c0_8 = arith.constant 0 : index
    %c0_9 = arith.constant 0 : index
    %8 = vector.load %arg1[%c4, %c0_8, %c0_9] : memref<16x16x16xbf16, #tpu.memory_space<vmem>>, vector<1x16x16xbf16>
    %9 = vector.shape_cast %8 : vector<1x16x16xbf16> to vector<16x16xbf16>
    %c5 = arith.constant 5 : index
    %c0_10 = arith.constant 0 : index
    %c0_11 = arith.constant 0 : index
    %10 = vector.load %arg1[%c5, %c0_10, %c0_11] : memref<16x16x16xbf16, #tpu.memory_space<vmem>>, vector<1x16x16xbf16>
    %11 = vector.shape_cast %10 : vector<1x16x16xbf16> to vector<16x16xbf16>
    %c6 = arith.constant 6 : index
    %c0_12 = arith.constant 0 : index
    %c0_13 = arith.constant 0 : index
    %12 = vector.load %arg1[%c6, %c0_12, %c0_13] : memref<16x16x16xbf16, #tpu.memory_space<vmem>>, vector<1x16x16xbf16>
    %13 = vector.shape_cast %12 : vector<1x16x16xbf16> to vector<16x16xbf16>
    %c7 = arith.constant 7 : index
    %c0_14 = arith.constant 0 : index
    %c0_15 = arith.constant 0 : index
    %14 = vector.load %arg1[%c7, %c0_14, %c0_15] : memref<16x16x16xbf16, #tpu.memory_space<vmem>>, vector<1x16x16xbf16>
    %15 = vector.shape_cast %14 : vector<1x16x16xbf16> to vector<16x16xbf16>
    %c8 = arith.constant 8 : index
    %c0_16 = arith.constant 0 : index
    %c0_17 = arith.constant 0 : index
    %16 = vector.load %arg1[%c8, %c0_16, %c0_17] : memref<16x16x16xbf16, #tpu.memory_space<vmem>>, vector<1x16x16xbf16>
    %17 = vector.shape_cast %16 : vector<1x16x16xbf16> to vector<16x16xbf16>
    %c9 = arith.constant 9 : index
    %c0_18 = arith.constant 0 : index
    %c0_19 = arith.constant 0 : index
    %18 = vector.load %arg1[%c9, %c0_18, %c0_19] : memref<16x16x16xbf16, #tpu.memory_space<vmem>>, vector<1x16x16xbf16>
    %19 = vector.shape_cast %18 : vector<1x16x16xbf16> to vector<16x16xbf16>
    %c10 = arith.constant 10 : index
    %c0_20 = arith.constant 0 : index
    %c0_21 = arith.constant 0 : index
    %20 = vector.load %arg1[%c10, %c0_20, %c0_21] : memref<16x16x16xbf16, #tpu.memory_space<vmem>>, vector<1x16x16xbf16>
    %21 = vector.shape_cast %20 : vector<1x16x16xbf16> to vector<16x16xbf16>
    %c11 = arith.constant 11 : index
    %c0_22 = arith.constant 0 : index
    %c0_23 = arith.constant 0 : index
    %22 = vector.load %arg1[%c11, %c0_22, %c0_23] : memref<16x16x16xbf16, #tpu.memory_space<vmem>>, vector<1x16x16xbf16>
    %23 = vector.shape_cast %22 : vector<1x16x16xbf16> to vector<16x16xbf16>
    %c12 = arith.constant 12 : index
    %c0_24 = arith.constant 0 : index
    %c0_25 = arith.constant 0 : index
    %24 = vector.load %arg1[%c12, %c0_24, %c0_25] : memref<16x16x16xbf16, #tpu.memory_space<vmem>>, vector<1x16x16xbf16>
    %25 = vector.shape_cast %24 : vector<1x16x16xbf16> to vector<16x16xbf16>
    %c13 = arith.constant 13 : index
    %c0_26 = arith.constant 0 : index
    %c0_27 = arith.constant 0 : index
    %26 = vector.load %arg1[%c13, %c0_26, %c0_27] : memref<16x16x16xbf16, #tpu.memory_space<vmem>>, vector<1x16x16xbf16>
    %27 = vector.shape_cast %26 : vector<1x16x16xbf16> to vector<16x16xbf16>
    %c14 = arith.constant 14 : index
    %c0_28 = arith.constant 0 : index
    %c0_29 = arith.constant 0 : index
    %28 = vector.load %arg1[%c14, %c0_28, %c0_29] : memref<16x16x16xbf16, #tpu.memory_space<vmem>>, vector<1x16x16xbf16>
    %29 = vector.shape_cast %28 : vector<1x16x16xbf16> to vector<16x16xbf16>
    %c15 = arith.constant 15 : index
    %c0_30 = arith.constant 0 : index
    %c0_31 = arith.constant 0 : index
    %30 = vector.load %arg1[%c15, %c0_30, %c0_31] : memref<16x16x16xbf16, #tpu.memory_space<vmem>>, vector<1x16x16xbf16>
    %31 = vector.shape_cast %30 : vector<1x16x16xbf16> to vector<16x16xbf16>
    %c0_32 = arith.constant 0 : index
    %c0_33 = arith.constant 0 : index
    %c0_34 = arith.constant 0 : index
    %32 = vector.load %arg2[%c0_32, %c0_33, %c0_34] : memref<3x16x1xf32, #tpu.memory_space<vmem>>, vector<1x16x1xf32>
    %33 = vector.shape_cast %32 : vector<1x16x1xf32> to vector<16x1xf32>
    %cst = arith.constant 0.000000e+00 : f32
    %34 = vector.broadcast %cst : f32 to vector<16x3xf32>
    %c0_35 = arith.constant 0 : index
    %c0_36 = arith.constant 0 : index
    %c0_37 = arith.constant 0 : index
    %c0_38 = arith.constant 0 : index
    %35 = vector.load %arg3[%c0_35, %c0_36, %c0_37, %c0_38] : memref<1x6x16x6xbf16, #tpu.memory_space<vmem>>, vector<1x1x16x3xbf16>
    %36 = vector.shape_cast %35 : vector<1x1x16x3xbf16> to vector<16x3xbf16>
    %cst_39 = arith.constant dense<0.000000e+00> : vector<16x3xf32>
    %37 = tpu.matmul %1, %36, %cst_39 {dimension_numbers = #tpu.dot_dimension_numbers<[1], [0], [0], [1], [0, 0, 1, 1], [], []>} : vector<16x16xbf16>, vector<16x3xbf16>, vector<16x3xf32> -> vector<16x3xf32>
    %38 = arith.addf %34, %37 : vector<16x3xf32>
    %c0_40 = arith.constant 0 : index
    %c0_41 = arith.constant 0 : index
    %c0_42 = arith.constant 0 : index
    %c1_43 = arith.constant 1 : index
    %39 = vector.load %arg3[%c0_40, %c0_41, %c0_42, %c1_43] : memref<1x6x16x6xbf16, #tpu.memory_space<vmem>>, vector<1x1x16x3xbf16>
    %40 = vector.shape_cast %39 : vector<1x1x16x3xbf16> to vector<16x3xbf16>
    %cst_44 = arith.constant dense<0.000000e+00> : vector<16x3xf32>
    %41 = tpu.matmul %3, %40, %cst_44 {dimension_numbers = #tpu.dot_dimension_numbers<[1], [0], [0], [1], [0, 0, 1, 1], [], []>} : vector<16x16xbf16>, vector<16x3xbf16>, vector<16x3xf32> -> vector<16x3xf32>
    %42 = arith.addf %38, %41 : vector<16x3xf32>
    %c0_45 = arith.constant 0 : index
    %c0_46 = arith.constant 0 : index
    %c0_47 = arith.constant 0 : index
    %c2_48 = arith.constant 2 : index
    %43 = vector.load %arg3[%c0_45, %c0_46, %c0_47, %c2_48] : memref<1x6x16x6xbf16, #tpu.memory_space<vmem>>, vector<1x1x16x3xbf16>
    %44 = vector.shape_cast %43 : vector<1x1x16x3xbf16> to vector<16x3xbf16>
    %cst_49 = arith.constant dense<0.000000e+00> : vector<16x3xf32>
    %45 = tpu.matmul %5, %44, %cst_49 {dimension_numbers = #tpu.dot_dimension_numbers<[1], [0], [0], [1], [0, 0, 1, 1], [], []>} : vector<16x16xbf16>, vector<16x3xbf16>, vector<16x3xf32> -> vector<16x3xf32>
    %46 = arith.addf %42, %45 : vector<16x3xf32>
    %c0_50 = arith.constant 0 : index
    %c0_51 = arith.constant 0 : index
    %c0_52 = arith.constant 0 : index
    %c3_53 = arith.constant 3 : index
    %47 = vector.load %arg3[%c0_50, %c0_51, %c0_52, %c3_53] : memref<1x6x16x6xbf16, #tpu.memory_space<vmem>>, vector<1x1x16x3xbf16>
    %48 = vector.shape_cast %47 : vector<1x1x16x3xbf16> to vector<16x3xbf16>
    %cst_54 = arith.constant dense<0.000000e+00> : vector<16x3xf32>
    %49 = tpu.matmul %7, %48, %cst_54 {dimension_numbers = #tpu.dot_dimension_numbers<[1], [0], [0], [1], [0, 0, 1, 1], [], []>} : vector<16x16xbf16>, vector<16x3xbf16>, vector<16x3xf32> -> vector<16x3xf32>
    %50 = arith.addf %46, %49 : vector<16x3xf32>
    %c0_55 = arith.constant 0 : index
    %c1_56 = arith.constant 1 : index
    %c0_57 = arith.constant 0 : index
    %c0_58 = arith.constant 0 : index
    %51 = vector.load %arg3[%c0_55, %c1_56, %c0_57, %c0_58] : memref<1x6x16x6xbf16, #tpu.memory_space<vmem>>, vector<1x1x16x3xbf16>
    %52 = vector.shape_cast %51 : vector<1x1x16x3xbf16> to vector<16x3xbf16>
    %cst_59 = arith.constant dense<0.000000e+00> : vector<16x3xf32>
    %53 = tpu.matmul %9, %52, %cst_59 {dimension_numbers = #tpu.dot_dimension_numbers<[1], [0], [0], [1], [0, 0, 1, 1], [], []>} : vector<16x16xbf16>, vector<16x3xbf16>, vector<16x3xf32> -> vector<16x3xf32>
    %54 = arith.addf %50, %53 : vector<16x3xf32>
    %c0_60 = arith.constant 0 : index
    %c1_61 = arith.constant 1 : index
    %c0_62 = arith.constant 0 : index
    %c1_63 = arith.constant 1 : index
    %55 = vector.load %arg3[%c0_60, %c1_61, %c0_62, %c1_63] : memref<1x6x16x6xbf16, #tpu.memory_space<vmem>>, vector<1x1x16x3xbf16>
    %56 = vector.shape_cast %55 : vector<1x1x16x3xbf16> to vector<16x3xbf16>
    %cst_64 = arith.constant dense<0.000000e+00> : vector<16x3xf32>
    %57 = tpu.matmul %11, %56, %cst_64 {dimension_numbers = #tpu.dot_dimension_numbers<[1], [0], [0], [1], [0, 0, 1, 1], [], []>} : vector<16x16xbf16>, vector<16x3xbf16>, vector<16x3xf32> -> vector<16x3xf32>
    %58 = arith.addf %54, %57 : vector<16x3xf32>
    %c0_65 = arith.constant 0 : index
    %c1_66 = arith.constant 1 : index
    %c0_67 = arith.constant 0 : index
    %c2_68 = arith.constant 2 : index
    %59 = vector.load %arg3[%c0_65, %c1_66, %c0_67, %c2_68] : memref<1x6x16x6xbf16, #tpu.memory_space<vmem>>, vector<1x1x16x3xbf16>
    %60 = vector.shape_cast %59 : vector<1x1x16x3xbf16> to vector<16x3xbf16>
    %cst_69 = arith.constant dense<0.000000e+00> : vector<16x3xf32>
    %61 = tpu.matmul %13, %60, %cst_69 {dimension_numbers = #tpu.dot_dimension_numbers<[1], [0], [0], [1], [0, 0, 1, 1], [], []>} : vector<16x16xbf16>, vector<16x3xbf16>, vector<16x3xf32> -> vector<16x3xf32>
    %62 = arith.addf %58, %61 : vector<16x3xf32>
    %c0_70 = arith.constant 0 : index
    %c1_71 = arith.constant 1 : index
    %c0_72 = arith.constant 0 : index
    %c3_73 = arith.constant 3 : index
    %63 = vector.load %arg3[%c0_70, %c1_71, %c0_72, %c3_73] : memref<1x6x16x6xbf16, #tpu.memory_space<vmem>>, vector<1x1x16x3xbf16>
    %64 = vector.shape_cast %63 : vector<1x1x16x3xbf16> to vector<16x3xbf16>
    %cst_74 = arith.constant dense<0.000000e+00> : vector<16x3xf32>
    %65 = tpu.matmul %15, %64, %cst_74 {dimension_numbers = #tpu.dot_dimension_numbers<[1], [0], [0], [1], [0, 0, 1, 1], [], []>} : vector<16x16xbf16>, vector<16x3xbf16>, vector<16x3xf32> -> vector<16x3xf32>
    %66 = arith.addf %62, %65 : vector<16x3xf32>
    %c0_75 = arith.constant 0 : index
    %c2_76 = arith.constant 2 : index
    %c0_77 = arith.constant 0 : index
    %c0_78 = arith.constant 0 : index
    %67 = vector.load %arg3[%c0_75, %c2_76, %c0_77, %c0_78] : memref<1x6x16x6xbf16, #tpu.memory_space<vmem>>, vector<1x1x16x3xbf16>
    %68 = vector.shape_cast %67 : vector<1x1x16x3xbf16> to vector<16x3xbf16>
    %cst_79 = arith.constant dense<0.000000e+00> : vector<16x3xf32>
    %69 = tpu.matmul %17, %68, %cst_79 {dimension_numbers = #tpu.dot_dimension_numbers<[1], [0], [0], [1], [0, 0, 1, 1], [], []>} : vector<16x16xbf16>, vector<16x3xbf16>, vector<16x3xf32> -> vector<16x3xf32>
    %70 = arith.addf %66, %69 : vector<16x3xf32>
    %c0_80 = arith.constant 0 : index
    %c2_81 = arith.constant 2 : index
    %c0_82 = arith.constant 0 : index
    %c1_83 = arith.constant 1 : index
    %71 = vector.load %arg3[%c0_80, %c2_81, %c0_82, %c1_83] : memref<1x6x16x6xbf16, #tpu.memory_space<vmem>>, vector<1x1x16x3xbf16>
    %72 = vector.shape_cast %71 : vector<1x1x16x3xbf16> to vector<16x3xbf16>
    %cst_84 = arith.constant dense<0.000000e+00> : vector<16x3xf32>
    %73 = tpu.matmul %19, %72, %cst_84 {dimension_numbers = #tpu.dot_dimension_numbers<[1], [0], [0], [1], [0, 0, 1, 1], [], []>} : vector<16x16xbf16>, vector<16x3xbf16>, vector<16x3xf32> -> vector<16x3xf32>
    %74 = arith.addf %70, %73 : vector<16x3xf32>
    %c0_85 = arith.constant 0 : index
    %c2_86 = arith.constant 2 : index
    %c0_87 = arith.constant 0 : index
    %c2_88 = arith.constant 2 : index
    %75 = vector.load %arg3[%c0_85, %c2_86, %c0_87, %c2_88] : memref<1x6x16x6xbf16, #tpu.memory_space<vmem>>, vector<1x1x16x3xbf16>
    %76 = vector.shape_cast %75 : vector<1x1x16x3xbf16> to vector<16x3xbf16>
    %cst_89 = arith.constant dense<0.000000e+00> : vector<16x3xf32>
    %77 = tpu.matmul %21, %76, %cst_89 {dimension_numbers = #tpu.dot_dimension_numbers<[1], [0], [0], [1], [0, 0, 1, 1], [], []>} : vector<16x16xbf16>, vector<16x3xbf16>, vector<16x3xf32> -> vector<16x3xf32>
    %78 = arith.addf %74, %77 : vector<16x3xf32>
    %c0_90 = arith.constant 0 : index
    %c2_91 = arith.constant 2 : index
    %c0_92 = arith.constant 0 : index
    %c3_93 = arith.constant 3 : index
    %79 = vector.load %arg3[%c0_90, %c2_91, %c0_92, %c3_93] : memref<1x6x16x6xbf16, #tpu.memory_space<vmem>>, vector<1x1x16x3xbf16>
    %80 = vector.shape_cast %79 : vector<1x1x16x3xbf16> to vector<16x3xbf16>
    %cst_94 = arith.constant dense<0.000000e+00> : vector<16x3xf32>
    %81 = tpu.matmul %23, %80, %cst_94 {dimension_numbers = #tpu.dot_dimension_numbers<[1], [0], [0], [1], [0, 0, 1, 1], [], []>} : vector<16x16xbf16>, vector<16x3xbf16>, vector<16x3xf32> -> vector<16x3xf32>
    %82 = arith.addf %78, %81 : vector<16x3xf32>
    %c0_95 = arith.constant 0 : index
    %c3_96 = arith.constant 3 : index
    %c0_97 = arith.constant 0 : index
    %c0_98 = arith.constant 0 : index
    %83 = vector.load %arg3[%c0_95, %c3_96, %c0_97, %c0_98] : memref<1x6x16x6xbf16, #tpu.memory_space<vmem>>, vector<1x1x16x3xbf16>
    %84 = vector.shape_cast %83 : vector<1x1x16x3xbf16> to vector<16x3xbf16>
    %cst_99 = arith.constant dense<0.000000e+00> : vector<16x3xf32>
    %85 = tpu.matmul %25, %84, %cst_99 {dimension_numbers = #tpu.dot_dimension_numbers<[1], [0], [0], [1], [0, 0, 1, 1], [], []>} : vector<16x16xbf16>, vector<16x3xbf16>, vector<16x3xf32> -> vector<16x3xf32>
    %86 = arith.addf %82, %85 : vector<16x3xf32>
    %c0_100 = arith.constant 0 : index
    %c3_101 = arith.constant 3 : index
    %c0_102 = arith.constant 0 : index
    %c1_103 = arith.constant 1 : index
    %87 = vector.load %arg3[%c0_100, %c3_101, %c0_102, %c1_103] : memref<1x6x16x6xbf16, #tpu.memory_space<vmem>>, vector<1x1x16x3xbf16>
    %88 = vector.shape_cast %87 : vector<1x1x16x3xbf16> to vector<16x3xbf16>
    %cst_104 = arith.constant dense<0.000000e+00> : vector<16x3xf32>
    %89 = tpu.matmul %27, %88, %cst_104 {dimension_numbers = #tpu.dot_dimension_numbers<[1], [0], [0], [1], [0, 0, 1, 1], [], []>} : vector<16x16xbf16>, vector<16x3xbf16>, vector<16x3xf32> -> vector<16x3xf32>
    %90 = arith.addf %86, %89 : vector<16x3xf32>
    %c0_105 = arith.constant 0 : index
    %c3_106 = arith.constant 3 : index
    %c0_107 = arith.constant 0 : index
    %c2_108 = arith.constant 2 : index
    %91 = vector.load %arg3[%c0_105, %c3_106, %c0_107, %c2_108] : memref<1x6x16x6xbf16, #tpu.memory_space<vmem>>, vector<1x1x16x3xbf16>
    %92 = vector.shape_cast %91 : vector<1x1x16x3xbf16> to vector<16x3xbf16>
    %cst_109 = arith.constant dense<0.000000e+00> : vector<16x3xf32>
    %93 = tpu.matmul %29, %92, %cst_109 {dimension_numbers = #tpu.dot_dimension_numbers<[1], [0], [0], [1], [0, 0, 1, 1], [], []>} : vector<16x16xbf16>, vector<16x3xbf16>, vector<16x3xf32> -> vector<16x3xf32>
    %94 = arith.addf %90, %93 : vector<16x3xf32>
    %c0_110 = arith.constant 0 : index
    %c3_111 = arith.constant 3 : index
    %c0_112 = arith.constant 0 : index
    %c3_113 = arith.constant 3 : index
    %95 = vector.load %arg3[%c0_110, %c3_111, %c0_112, %c3_113] : memref<1x6x16x6xbf16, #tpu.memory_space<vmem>>, vector<1x1x16x3xbf16>
    %96 = vector.shape_cast %95 : vector<1x1x16x3xbf16> to vector<16x3xbf16>
    %cst_114 = arith.constant dense<0.000000e+00> : vector<16x3xf32>
    %97 = tpu.matmul %31, %96, %cst_114 {dimension_numbers = #tpu.dot_dimension_numbers<[1], [0], [0], [1], [0, 0, 1, 1], [], []>} : vector<16x16xbf16>, vector<16x3xbf16>, vector<16x3xf32> -> vector<16x3xf32>
    %98 = arith.addf %94, %97 : vector<16x3xf32>
    %99 = vector.broadcast %33 : vector<16x1xf32> to vector<16x3xf32>
    %100 = arith.addf %98, %99 : vector<16x3xf32>
    %c0_115 = arith.constant 0 : index
    %c0_116 = arith.constant 0 : index
    %c0_117 = arith.constant 0 : index
    %c0_118 = arith.constant 0 : index
    %101 = vector.load %arg4[%c0_115, %c0_116, %c0_117, %c0_118] : memref<1x3x16x3xf32, #tpu.memory_space<vmem>>, vector<1x1x16x3xf32>
    %102 = vector.shape_cast %101 : vector<1x1x16x3xf32> to vector<16x3xf32>
    %103 = vector.shape_cast %100 : vector<16x3xf32> to vector<1x1x16x3xf32>
    tpu.vector_store %arg4[%c0_115, %c0_116, %c0_117, %c0_118], %103 {strides = array<i32>} : memref<1x3x16x3xf32, #tpu.memory_space<vmem>>, vector<1x1x16x3xf32>,
    %cst_119 = arith.constant 0.000000e+00 : f32
    %104 = vector.broadcast %cst_119 : f32 to vector<16x3xf32>
    %c0_120 = arith.constant 0 : index
    %c1_121 = arith.constant 1 : index
    %c0_122 = arith.constant 0 : index
    %c0_123 = arith.constant 0 : index
    %105 = vector.load %arg3[%c0_120, %c1_121, %c0_122, %c0_123] : memref<1x6x16x6xbf16, #tpu.memory_space<vmem>>, vector<1x1x16x3xbf16>
    %106 = vector.shape_cast %105 : vector<1x1x16x3xbf16> to vector<16x3xbf16>
    %cst_124 = arith.constant dense<0.000000e+00> : vector<16x3xf32>
    %107 = tpu.matmul %1, %106, %cst_124 {dimension_numbers = #tpu.dot_dimension_numbers<[1], [0], [0], [1], [0, 0, 1, 1], [], []>} : vector<16x16xbf16>, vector<16x3xbf16>, vector<16x3xf32> -> vector<16x3xf32>
    %108 = arith.addf %104, %107 : vector<16x3xf32>
    %c0_125 = arith.constant 0 : index
    %c1_126 = arith.constant 1 : index
    %c0_127 = arith.constant 0 : index
    %c1_128 = arith.constant 1 : index
    %109 = vector.load %arg3[%c0_125, %c1_126, %c0_127, %c1_128] : memref<1x6x16x6xbf16, #tpu.memory_space<vmem>>, vector<1x1x16x3xbf16>
    %110 = vector.shape_cast %109 : vector<1x1x16x3xbf16> to vector<16x3xbf16>
    %cst_129 = arith.constant dense<0.000000e+00> : vector<16x3xf32>
    %111 = tpu.matmul %3, %110, %cst_129 {dimension_numbers = #tpu.dot_dimension_numbers<[1], [0], [0], [1], [0, 0, 1, 1], [], []>} : vector<16x16xbf16>, vector<16x3xbf16>, vector<16x3xf32> -> vector<16x3xf32>
    %112 = arith.addf %108, %111 : vector<16x3xf32>
    %c0_130 = arith.constant 0 : index
    %c1_131 = arith.constant 1 : index
    %c0_132 = arith.constant 0 : index
    %c2_133 = arith.constant 2 : index
    %113 = vector.load %arg3[%c0_130, %c1_131, %c0_132, %c2_133] : memref<1x6x16x6xbf16, #tpu.memory_space<vmem>>, vector<1x1x16x3xbf16>
    %114 = vector.shape_cast %113 : vector<1x1x16x3xbf16> to vector<16x3xbf16>
    %cst_134 = arith.constant dense<0.000000e+00> : vector<16x3xf32>
    %115 = tpu.matmul %5, %114, %cst_134 {dimension_numbers = #tpu.dot_dimension_numbers<[1], [0], [0], [1], [0, 0, 1, 1], [], []>} : vector<16x16xbf16>, vector<16x3xbf16>, vector<16x3xf32> -> vector<16x3xf32>
    %116 = arith.addf %112, %115 : vector<16x3xf32>
    %c0_135 = arith.constant 0 : index
    %c1_136 = arith.constant 1 : index
    %c0_137 = arith.constant 0 : index
    %c3_138 = arith.constant 3 : index
    %117 = vector.load %arg3[%c0_135, %c1_136, %c0_137, %c3_138] : memref<1x6x16x6xbf16, #tpu.memory_space<vmem>>, vector<1x1x16x3xbf16>
    %118 = vector.shape_cast %117 : vector<1x1x16x3xbf16> to vector<16x3xbf16>
    %cst_139 = arith.constant dense<0.000000e+00> : vector<16x3xf32>
    %119 = tpu.matmul %7, %118, %cst_139 {dimension_numbers = #tpu.dot_dimension_numbers<[1], [0], [0], [1], [0, 0, 1, 1], [], []>} : vector<16x16xbf16>, vector<16x3xbf16>, vector<16x3xf32> -> vector<16x3xf32>
    %120 = arith.addf %116, %119 : vector<16x3xf32>
    %c0_140 = arith.constant 0 : index
    %c2_141 = arith.constant 2 : index
    %c0_142 = arith.constant 0 : index
    %c0_143 = arith.constant 0 : index
    %121 = vector.load %arg3[%c0_140, %c2_141, %c0_142, %c0_143] : memref<1x6x16x6xbf16, #tpu.memory_space<vmem>>, vector<1x1x16x3xbf16>
    %122 = vector.shape_cast %121 : vector<1x1x16x3xbf16> to vector<16x3xbf16>
    %cst_144 = arith.constant dense<0.000000e+00> : vector<16x3xf32>
    %123 = tpu.matmul %9, %122, %cst_144 {dimension_numbers = #tpu.dot_dimension_numbers<[1], [0], [0], [1], [0, 0, 1, 1], [], []>} : vector<16x16xbf16>, vector<16x3xbf16>, vector<16x3xf32> -> vector<16x3xf32>
    %124 = arith.addf %120, %123 : vector<16x3xf32>
    %c0_145 = arith.constant 0 : index
    %c2_146 = arith.constant 2 : index
    %c0_147 = arith.constant 0 : index
    %c1_148 = arith.constant 1 : index
    %125 = vector.load %arg3[%c0_145, %c2_146, %c0_147, %c1_148] : memref<1x6x16x6xbf16, #tpu.memory_space<vmem>>, vector<1x1x16x3xbf16>
    %126 = vector.shape_cast %125 : vector<1x1x16x3xbf16> to vector<16x3xbf16>
    %cst_149 = arith.constant dense<0.000000e+00> : vector<16x3xf32>
    %127 = tpu.matmul %11, %126, %cst_149 {dimension_numbers = #tpu.dot_dimension_numbers<[1], [0], [0], [1], [0, 0, 1, 1], [], []>} : vector<16x16xbf16>, vector<16x3xbf16>, vector<16x3xf32> -> vector<16x3xf32>
    %128 = arith.addf %124, %127 : vector<16x3xf32>
    %c0_150 = arith.constant 0 : index
    %c2_151 = arith.constant 2 : index
    %c0_152 = arith.constant 0 : index
    %c2_153 = arith.constant 2 : index
    %129 = vector.load %arg3[%c0_150, %c2_151, %c0_152, %c2_153] : memref<1x6x16x6xbf16, #tpu.memory_space<vmem>>, vector<1x1x16x3xbf16>
    %130 = vector.shape_cast %129 : vector<1x1x16x3xbf16> to vector<16x3xbf16>
    %cst_154 = arith.constant dense<0.000000e+00> : vector<16x3xf32>
    %131 = tpu.matmul %13, %130, %cst_154 {dimension_numbers = #tpu.dot_dimension_numbers<[1], [0], [0], [1], [0, 0, 1, 1], [], []>} : vector<16x16xbf16>, vector<16x3xbf16>, vector<16x3xf32> -> vector<16x3xf32>
    %132 = arith.addf %128, %131 : vector<16x3xf32>
    %c0_155 = arith.constant 0 : index
    %c2_156 = arith.constant 2 : index
    %c0_157 = arith.constant 0 : index
    %c3_158 = arith.constant 3 : index
    %133 = vector.load %arg3[%c0_155, %c2_156, %c0_157, %c3_158] : memref<1x6x16x6xbf16, #tpu.memory_space<vmem>>, vector<1x1x16x3xbf16>
    %134 = vector.shape_cast %133 : vector<1x1x16x3xbf16> to vector<16x3xbf16>
    %cst_159 = arith.constant dense<0.000000e+00> : vector<16x3xf32>
    %135 = tpu.matmul %15, %134, %cst_159 {dimension_numbers = #tpu.dot_dimension_numbers<[1], [0], [0], [1], [0, 0, 1, 1], [], []>} : vector<16x16xbf16>, vector<16x3xbf16>, vector<16x3xf32> -> vector<16x3xf32>
    %136 = arith.addf %132, %135 : vector<16x3xf32>
    %c0_160 = arith.constant 0 : index
    %c3_161 = arith.constant 3 : index
    %c0_162 = arith.constant 0 : index
    %c0_163 = arith.constant 0 : index
    %137 = vector.load %arg3[%c0_160, %c3_161, %c0_162, %c0_163] : memref<1x6x16x6xbf16, #tpu.memory_space<vmem>>, vector<1x1x16x3xbf16>
    %138 = vector.shape_cast %137 : vector<1x1x16x3xbf16> to vector<16x3xbf16>
    %cst_164 = arith.constant dense<0.000000e+00> : vector<16x3xf32>
    %139 = tpu.matmul %17, %138, %cst_164 {dimension_numbers = #tpu.dot_dimension_numbers<[1], [0], [0], [1], [0, 0, 1, 1], [], []>} : vector<16x16xbf16>, vector<16x3xbf16>, vector<16x3xf32> -> vector<16x3xf32>
    %140 = arith.addf %136, %139 : vector<16x3xf32>
    %c0_165 = arith.constant 0 : index
    %c3_166 = arith.constant 3 : index
    %c0_167 = arith.constant 0 : index
    %c1_168 = arith.constant 1 : index
    %141 = vector.load %arg3[%c0_165, %c3_166, %c0_167, %c1_168] : memref<1x6x16x6xbf16, #tpu.memory_space<vmem>>, vector<1x1x16x3xbf16>
    %142 = vector.shape_cast %141 : vector<1x1x16x3xbf16> to vector<16x3xbf16>
    %cst_169 = arith.constant dense<0.000000e+00> : vector<16x3xf32>
    %143 = tpu.matmul %19, %142, %cst_169 {dimension_numbers = #tpu.dot_dimension_numbers<[1], [0], [0], [1], [0, 0, 1, 1], [], []>} : vector<16x16xbf16>, vector<16x3xbf16>, vector<16x3xf32> -> vector<16x3xf32>
    %144 = arith.addf %140, %143 : vector<16x3xf32>
    %c0_170 = arith.constant 0 : index
    %c3_171 = arith.constant 3 : index
    %c0_172 = arith.constant 0 : index
    %c2_173 = arith.constant 2 : index
    %145 = vector.load %arg3[%c0_170, %c3_171, %c0_172, %c2_173] : memref<1x6x16x6xbf16, #tpu.memory_space<vmem>>, vector<1x1x16x3xbf16>
    %146 = vector.shape_cast %145 : vector<1x1x16x3xbf16> to vector<16x3xbf16>
    %cst_174 = arith.constant dense<0.000000e+00> : vector<16x3xf32>
    %147 = tpu.matmul %21, %146, %cst_174 {dimension_numbers = #tpu.dot_dimension_numbers<[1], [0], [0], [1], [0, 0, 1, 1], [], []>} : vector<16x16xbf16>, vector<16x3xbf16>, vector<16x3xf32> -> vector<16x3xf32>
    %148 = arith.addf %144, %147 : vector<16x3xf32>
    %c0_175 = arith.constant 0 : index
    %c3_176 = arith.constant 3 : index
    %c0_177 = arith.constant 0 : index
    %c3_178 = arith.constant 3 : index
    %149 = vector.load %arg3[%c0_175, %c3_176, %c0_177, %c3_178] : memref<1x6x16x6xbf16, #tpu.memory_space<vmem>>, vector<1x1x16x3xbf16>
    %150 = vector.shape_cast %149 : vector<1x1x16x3xbf16> to vector<16x3xbf16>
    %cst_179 = arith.constant dense<0.000000e+00> : vector<16x3xf32>
    %151 = tpu.matmul %23, %150, %cst_179 {dimension_numbers = #tpu.dot_dimension_numbers<[1], [0], [0], [1], [0, 0, 1, 1], [], []>} : vector<16x16xbf16>, vector<16x3xbf16>, vector<16x3xf32> -> vector<16x3xf32>
    %152 = arith.addf %148, %151 : vector<16x3xf32>
    %c0_180 = arith.constant 0 : index
    %c4_181 = arith.constant 4 : index
    %c0_182 = arith.constant 0 : index
    %c0_183 = arith.constant 0 : index
    %153 = vector.load %arg3[%c0_180, %c4_181, %c0_182, %c0_183] : memref<1x6x16x6xbf16, #tpu.memory_space<vmem>>, vector<1x1x16x3xbf16>
    %154 = vector.shape_cast %153 : vector<1x1x16x3xbf16> to vector<16x3xbf16>
    %cst_184 = arith.constant dense<0.000000e+00> : vector<16x3xf32>
    %155 = tpu.matmul %25, %154, %cst_184 {dimension_numbers = #tpu.dot_dimension_numbers<[1], [0], [0], [1], [0, 0, 1, 1], [], []>} : vector<16x16xbf16>, vector<16x3xbf16>, vector<16x3xf32> -> vector<16x3xf32>
    %156 = arith.addf %152, %155 : vector<16x3xf32>
    %c0_185 = arith.constant 0 : index
    %c4_186 = arith.constant 4 : index
    %c0_187 = arith.constant 0 : index
    %c1_188 = arith.constant 1 : index
    %157 = vector.load %arg3[%c0_185, %c4_186, %c0_187, %c1_188] : memref<1x6x16x6xbf16, #tpu.memory_space<vmem>>, vector<1x1x16x3xbf16>
    %158 = vector.shape_cast %157 : vector<1x1x16x3xbf16> to vector<16x3xbf16>
    %cst_189 = arith.constant dense<0.000000e+00> : vector<16x3xf32>
    %159 = tpu.matmul %27, %158, %cst_189 {dimension_numbers = #tpu.dot_dimension_numbers<[1], [0], [0], [1], [0, 0, 1, 1], [], []>} : vector<16x16xbf16>, vector<16x3xbf16>, vector<16x3xf32> -> vector<16x3xf32>
    %160 = arith.addf %156, %159 : vector<16x3xf32>
    %c0_190 = arith.constant 0 : index
    %c4_191 = arith.constant 4 : index
    %c0_192 = arith.constant 0 : index
    %c2_193 = arith.constant 2 : index
    %161 = vector.load %arg3[%c0_190, %c4_191, %c0_192, %c2_193] : memref<1x6x16x6xbf16, #tpu.memory_space<vmem>>, vector<1x1x16x3xbf16>
    %162 = vector.shape_cast %161 : vector<1x1x16x3xbf16> to vector<16x3xbf16>
    %cst_194 = arith.constant dense<0.000000e+00> : vector<16x3xf32>
    %163 = tpu.matmul %29, %162, %cst_194 {dimension_numbers = #tpu.dot_dimension_numbers<[1], [0], [0], [1], [0, 0, 1, 1], [], []>} : vector<16x16xbf16>, vector<16x3xbf16>, vector<16x3xf32> -> vector<16x3xf32>
    %164 = arith.addf %160, %163 : vector<16x3xf32>
    %c0_195 = arith.constant 0 : index
    %c4_196 = arith.constant 4 : index
    %c0_197 = arith.constant 0 : index
    %c3_198 = arith.constant 3 : index
    %165 = vector.load %arg3[%c0_195, %c4_196, %c0_197, %c3_198] : memref<1x6x16x6xbf16, #tpu.memory_space<vmem>>, vector<1x1x16x3xbf16>
    %166 = vector.shape_cast %165 : vector<1x1x16x3xbf16> to vector<16x3xbf16>
    %cst_199 = arith.constant dense<0.000000e+00> : vector<16x3xf32>
    %167 = tpu.matmul %31, %166, %cst_199 {dimension_numbers = #tpu.dot_dimension_numbers<[1], [0], [0], [1], [0, 0, 1, 1], [], []>} : vector<16x16xbf16>, vector<16x3xbf16>, vector<16x3xf32> -> vector<16x3xf32>
    %168 = arith.addf %164, %167 : vector<16x3xf32>
    %169 = vector.broadcast %33 : vector<16x1xf32> to vector<16x3xf32>
    %170 = arith.addf %168, %169 : vector<16x3xf32>
    %c0_200 = arith.constant 0 : index
    %c1_201 = arith.constant 1 : index
    %c0_202 = arith.constant 0 : index
    %c0_203 = arith.constant 0 : index
    %171 = vector.load %arg4[%c0_200, %c1_201, %c0_202, %c0_203] : memref<1x3x16x3xf32, #tpu.memory_space<vmem>>, vector<1x1x16x3xf32>
    %172 = vector.shape_cast %171 : vector<1x1x16x3xf32> to vector<16x3xf32>
    %173 = vector.shape_cast %170 : vector<16x3xf32> to vector<1x1x16x3xf32>
    tpu.vector_store %arg4[%c0_200, %c1_201, %c0_202, %c0_203], %173 {strides = array<i32>} : memref<1x3x16x3xf32, #tpu.memory_space<vmem>>, vector<1x1x16x3xf32>,
    %cst_204 = arith.constant 0.000000e+00 : f32
    %174 = vector.broadcast %cst_204 : f32 to vector<16x3xf32>
    %c0_205 = arith.constant 0 : index
    %c2_206 = arith.constant 2 : index
    %c0_207 = arith.constant 0 : index
    %c0_208 = arith.constant 0 : index
    %175 = vector.load %arg3[%c0_205, %c2_206, %c0_207, %c0_208] : memref<1x6x16x6xbf16, #tpu.memory_space<vmem>>, vector<1x1x16x3xbf16>
    %176 = vector.shape_cast %175 : vector<1x1x16x3xbf16> to vector<16x3xbf16>
    %cst_209 = arith.constant dense<0.000000e+00> : vector<16x3xf32>
    %177 = tpu.matmul %1, %176, %cst_209 {dimension_numbers = #tpu.dot_dimension_numbers<[1], [0], [0], [1], [0, 0, 1, 1], [], []>} : vector<16x16xbf16>, vector<16x3xbf16>, vector<16x3xf32> -> vector<16x3xf32>
    %178 = arith.addf %174, %177 : vector<16x3xf32>
    %c0_210 = arith.constant 0 : index
    %c2_211 = arith.constant 2 : index
    %c0_212 = arith.constant 0 : index
    %c1_213 = arith.constant 1 : index
    %179 = vector.load %arg3[%c0_210, %c2_211, %c0_212, %c1_213] : memref<1x6x16x6xbf16, #tpu.memory_space<vmem>>, vector<1x1x16x3xbf16>
    %180 = vector.shape_cast %179 : vector<1x1x16x3xbf16> to vector<16x3xbf16>
    %cst_214 = arith.constant dense<0.000000e+00> : vector<16x3xf32>
    %181 = tpu.matmul %3, %180, %cst_214 {dimension_numbers = #tpu.dot_dimension_numbers<[1], [0], [0], [1], [0, 0, 1, 1], [], []>} : vector<16x16xbf16>, vector<16x3xbf16>, vector<16x3xf32> -> vector<16x3xf32>
    %182 = arith.addf %178, %181 : vector<16x3xf32>
    %c0_215 = arith.constant 0 : index
    %c2_216 = arith.constant 2 : index
    %c0_217 = arith.constant 0 : index
    %c2_218 = arith.constant 2 : index
    %183 = vector.load %arg3[%c0_215, %c2_216, %c0_217, %c2_218] : memref<1x6x16x6xbf16, #tpu.memory_space<vmem>>, vector<1x1x16x3xbf16>
    %184 = vector.shape_cast %183 : vector<1x1x16x3xbf16> to vector<16x3xbf16>
    %cst_219 = arith.constant dense<0.000000e+00> : vector<16x3xf32>
    %185 = tpu.matmul %5, %184, %cst_219 {dimension_numbers = #tpu.dot_dimension_numbers<[1], [0], [0], [1], [0, 0, 1, 1], [], []>} : vector<16x16xbf16>, vector<16x3xbf16>, vector<16x3xf32> -> vector<16x3xf32>
    %186 = arith.addf %182, %185 : vector<16x3xf32>
    %c0_220 = arith.constant 0 : index
    %c2_221 = arith.constant 2 : index
    %c0_222 = arith.constant 0 : index
    %c3_223 = arith.constant 3 : index
    %187 = vector.load %arg3[%c0_220, %c2_221, %c0_222, %c3_223] : memref<1x6x16x6xbf16, #tpu.memory_space<vmem>>, vector<1x1x16x3xbf16>
    %188 = vector.shape_cast %187 : vector<1x1x16x3xbf16> to vector<16x3xbf16>
    %cst_224 = arith.constant dense<0.000000e+00> : vector<16x3xf32>
    %189 = tpu.matmul %7, %188, %cst_224 {dimension_numbers = #tpu.dot_dimension_numbers<[1], [0], [0], [1], [0, 0, 1, 1], [], []>} : vector<16x16xbf16>, vector<16x3xbf16>, vector<16x3xf32> -> vector<16x3xf32>
    %190 = arith.addf %186, %189 : vector<16x3xf32>
    %c0_225 = arith.constant 0 : index
    %c3_226 = arith.constant 3 : index
    %c0_227 = arith.constant 0 : index
    %c0_228 = arith.constant 0 : index
    %191 = vector.load %arg3[%c0_225, %c3_226, %c0_227, %c0_228] : memref<1x6x16x6xbf16, #tpu.memory_space<vmem>>, vector<1x1x16x3xbf16>
    %192 = vector.shape_cast %191 : vector<1x1x16x3xbf16> to vector<16x3xbf16>
    %cst_229 = arith.constant dense<0.000000e+00> : vector<16x3xf32>
    %193 = tpu.matmul %9, %192, %cst_229 {dimension_numbers = #tpu.dot_dimension_numbers<[1], [0], [0], [1], [0, 0, 1, 1], [], []>} : vector<16x16xbf16>, vector<16x3xbf16>, vector<16x3xf32> -> vector<16x3xf32>
    %194 = arith.addf %190, %193 : vector<16x3xf32>
    %c0_230 = arith.constant 0 : index
    %c3_231 = arith.constant 3 : index
    %c0_232 = arith.constant 0 : index
    %c1_233 = arith.constant 1 : index
    %195 = vector.load %arg3[%c0_230, %c3_231, %c0_232, %c1_233] : memref<1x6x16x6xbf16, #tpu.memory_space<vmem>>, vector<1x1x16x3xbf16>
    %196 = vector.shape_cast %195 : vector<1x1x16x3xbf16> to vector<16x3xbf16>
    %cst_234 = arith.constant dense<0.000000e+00> : vector<16x3xf32>
    %197 = tpu.matmul %11, %196, %cst_234 {dimension_numbers = #tpu.dot_dimension_numbers<[1], [0], [0], [1], [0, 0, 1, 1], [], []>} : vector<16x16xbf16>, vector<16x3xbf16>, vector<16x3xf32> -> vector<16x3xf32>
    %198 = arith.addf %194, %197 : vector<16x3xf32>
    %c0_235 = arith.constant 0 : index
    %c3_236 = arith.constant 3 : index
    %c0_237 = arith.constant 0 : index
    %c2_238 = arith.constant 2 : index
    %199 = vector.load %arg3[%c0_235, %c3_236, %c0_237, %c2_238] : memref<1x6x16x6xbf16, #tpu.memory_space<vmem>>, vector<1x1x16x3xbf16>
    %200 = vector.shape_cast %199 : vector<1x1x16x3xbf16> to vector<16x3xbf16>
    %cst_239 = arith.constant dense<0.000000e+00> : vector<16x3xf32>
    %201 = tpu.matmul %13, %200, %cst_239 {dimension_numbers = #tpu.dot_dimension_numbers<[1], [0], [0], [1], [0, 0, 1, 1], [], []>} : vector<16x16xbf16>, vector<16x3xbf16>, vector<16x3xf32> -> vector<16x3xf32>
    %202 = arith.addf %198, %201 : vector<16x3xf32>
    %c0_240 = arith.constant 0 : index
    %c3_241 = arith.constant 3 : index
    %c0_242 = arith.constant 0 : index
    %c3_243 = arith.constant 3 : index
    %203 = vector.load %arg3[%c0_240, %c3_241, %c0_242, %c3_243] : memref<1x6x16x6xbf16, #tpu.memory_space<vmem>>, vector<1x1x16x3xbf16>
    %204 = vector.shape_cast %203 : vector<1x1x16x3xbf16> to vector<16x3xbf16>
    %cst_244 = arith.constant dense<0.000000e+00> : vector<16x3xf32>
    %205 = tpu.matmul %15, %204, %cst_244 {dimension_numbers = #tpu.dot_dimension_numbers<[1], [0], [0], [1], [0, 0, 1, 1], [], []>} : vector<16x16xbf16>, vector<16x3xbf16>, vector<16x3xf32> -> vector<16x3xf32>
    %206 = arith.addf %202, %205 : vector<16x3xf32>
    %c0_245 = arith.constant 0 : index
    %c4_246 = arith.constant 4 : index
    %c0_247 = arith.constant 0 : index
    %c0_248 = arith.constant 0 : index
    %207 = vector.load %arg3[%c0_245, %c4_246, %c0_247, %c0_248] : memref<1x6x16x6xbf16, #tpu.memory_space<vmem>>, vector<1x1x16x3xbf16>
    %208 = vector.shape_cast %207 : vector<1x1x16x3xbf16> to vector<16x3xbf16>
    %cst_249 = arith.constant dense<0.000000e+00> : vector<16x3xf32>
    %209 = tpu.matmul %17, %208, %cst_249 {dimension_numbers = #tpu.dot_dimension_numbers<[1], [0], [0], [1], [0, 0, 1, 1], [], []>} : vector<16x16xbf16>, vector<16x3xbf16>, vector<16x3xf32> -> vector<16x3xf32>
    %210 = arith.addf %206, %209 : vector<16x3xf32>
    %c0_250 = arith.constant 0 : index
    %c4_251 = arith.constant 4 : index
    %c0_252 = arith.constant 0 : index
    %c1_253 = arith.constant 1 : index
    %211 = vector.load %arg3[%c0_250, %c4_251, %c0_252, %c1_253] : memref<1x6x16x6xbf16, #tpu.memory_space<vmem>>, vector<1x1x16x3xbf16>
    %212 = vector.shape_cast %211 : vector<1x1x16x3xbf16> to vector<16x3xbf16>
    %cst_254 = arith.constant dense<0.000000e+00> : vector<16x3xf32>
    %213 = tpu.matmul %19, %212, %cst_254 {dimension_numbers = #tpu.dot_dimension_numbers<[1], [0], [0], [1], [0, 0, 1, 1], [], []>} : vector<16x16xbf16>, vector<16x3xbf16>, vector<16x3xf32> -> vector<16x3xf32>
    %214 = arith.addf %210, %213 : vector<16x3xf32>
    %c0_255 = arith.constant 0 : index
    %c4_256 = arith.constant 4 : index
    %c0_257 = arith.constant 0 : index
    %c2_258 = arith.constant 2 : index
    %215 = vector.load %arg3[%c0_255, %c4_256, %c0_257, %c2_258] : memref<1x6x16x6xbf16, #tpu.memory_space<vmem>>, vector<1x1x16x3xbf16>
    %216 = vector.shape_cast %215 : vector<1x1x16x3xbf16> to vector<16x3xbf16>
    %cst_259 = arith.constant dense<0.000000e+00> : vector<16x3xf32>
    %217 = tpu.matmul %21, %216, %cst_259 {dimension_numbers = #tpu.dot_dimension_numbers<[1], [0], [0], [1], [0, 0, 1, 1], [], []>} : vector<16x16xbf16>, vector<16x3xbf16>, vector<16x3xf32> -> vector<16x3xf32>
    %218 = arith.addf %214, %217 : vector<16x3xf32>
    %c0_260 = arith.constant 0 : index
    %c4_261 = arith.constant 4 : index
    %c0_262 = arith.constant 0 : index
    %c3_263 = arith.constant 3 : index
    %219 = vector.load %arg3[%c0_260, %c4_261, %c0_262, %c3_263] : memref<1x6x16x6xbf16, #tpu.memory_space<vmem>>, vector<1x1x16x3xbf16>
    %220 = vector.shape_cast %219 : vector<1x1x16x3xbf16> to vector<16x3xbf16>
    %cst_264 = arith.constant dense<0.000000e+00> : vector<16x3xf32>
    %221 = tpu.matmul %23, %220, %cst_264 {dimension_numbers = #tpu.dot_dimension_numbers<[1], [0], [0], [1], [0, 0, 1, 1], [], []>} : vector<16x16xbf16>, vector<16x3xbf16>, vector<16x3xf32> -> vector<16x3xf32>
    %222 = arith.addf %218, %221 : vector<16x3xf32>
    %c0_265 = arith.constant 0 : index
    %c5_266 = arith.constant 5 : index
    %c0_267 = arith.constant 0 : index
    %c0_268 = arith.constant 0 : index
    %223 = vector.load %arg3[%c0_265, %c5_266, %c0_267, %c0_268] : memref<1x6x16x6xbf16, #tpu.memory_space<vmem>>, vector<1x1x16x3xbf16>
    %224 = vector.shape_cast %223 : vector<1x1x16x3xbf16> to vector<16x3xbf16>
    %cst_269 = arith.constant dense<0.000000e+00> : vector<16x3xf32>
    %225 = tpu.matmul %25, %224, %cst_269 {dimension_numbers = #tpu.dot_dimension_numbers<[1], [0], [0], [1], [0, 0, 1, 1], [], []>} : vector<16x16xbf16>, vector<16x3xbf16>, vector<16x3xf32> -> vector<16x3xf32>
    %226 = arith.addf %222, %225 : vector<16x3xf32>
    %c0_270 = arith.constant 0 : index
    %c5_271 = arith.constant 5 : index
    %c0_272 = arith.constant 0 : index
    %c1_273 = arith.constant 1 : index
    %227 = vector.load %arg3[%c0_270, %c5_271, %c0_272, %c1_273] : memref<1x6x16x6xbf16, #tpu.memory_space<vmem>>, vector<1x1x16x3xbf16>
    %228 = vector.shape_cast %227 : vector<1x1x16x3xbf16> to vector<16x3xbf16>
    %cst_274 = arith.constant dense<0.000000e+00> : vector<16x3xf32>
    %229 = tpu.matmul %27, %228, %cst_274 {dimension_numbers = #tpu.dot_dimension_numbers<[1], [0], [0], [1], [0, 0, 1, 1], [], []>} : vector<16x16xbf16>, vector<16x3xbf16>, vector<16x3xf32> -> vector<16x3xf32>
    %230 = arith.addf %226, %229 : vector<16x3xf32>
    %c0_275 = arith.constant 0 : index
    %c5_276 = arith.constant 5 : index
    %c0_277 = arith.constant 0 : index
    %c2_278 = arith.constant 2 : index
    %231 = vector.load %arg3[%c0_275, %c5_276, %c0_277, %c2_278] : memref<1x6x16x6xbf16, #tpu.memory_space<vmem>>, vector<1x1x16x3xbf16>
    %232 = vector.shape_cast %231 : vector<1x1x16x3xbf16> to vector<16x3xbf16>
    %cst_279 = arith.constant dense<0.000000e+00> : vector<16x3xf32>
    %233 = tpu.matmul %29, %232, %cst_279 {dimension_numbers = #tpu.dot_dimension_numbers<[1], [0], [0], [1], [0, 0, 1, 1], [], []>} : vector<16x16xbf16>, vector<16x3xbf16>, vector<16x3xf32> -> vector<16x3xf32>
    %234 = arith.addf %230, %233 : vector<16x3xf32>
    %c0_280 = arith.constant 0 : index
    %c5_281 = arith.constant 5 : index
    %c0_282 = arith.constant 0 : index
    %c3_283 = arith.constant 3 : index
    %235 = vector.load %arg3[%c0_280, %c5_281, %c0_282, %c3_283] : memref<1x6x16x6xbf16, #tpu.memory_space<vmem>>, vector<1x1x16x3xbf16>
    %236 = vector.shape_cast %235 : vector<1x1x16x3xbf16> to vector<16x3xbf16>
    %cst_284 = arith.constant dense<0.000000e+00> : vector<16x3xf32>
    %237 = tpu.matmul %31, %236, %cst_284 {dimension_numbers = #tpu.dot_dimension_numbers<[1], [0], [0], [1], [0, 0, 1, 1], [], []>} : vector<16x16xbf16>, vector<16x3xbf16>, vector<16x3xf32> -> vector<16x3xf32>
    %238 = arith.addf %234, %237 : vector<16x3xf32>
    %239 = vector.broadcast %33 : vector<16x1xf32> to vector<16x3xf32>
    %240 = arith.addf %238, %239 : vector<16x3xf32>
    %c0_285 = arith.constant 0 : index
    %c2_286 = arith.constant 2 : index
    %c0_287 = arith.constant 0 : index
    %c0_288 = arith.constant 0 : index
    %241 = vector.load %arg4[%c0_285, %c2_286, %c0_287, %c0_288] : memref<1x3x16x3xf32, #tpu.memory_space<vmem>>, vector<1x1x16x3xf32>
    %242 = vector.shape_cast %241 : vector<1x1x16x3xf32> to vector<16x3xf32>
    %243 = vector.shape_cast %240 : vector<16x3xf32> to vector<1x1x16x3xf32>
    tpu.vector_store %arg4[%c0_285, %c2_286, %c0_287, %c0_288], %243 {strides = array<i32>} : memref<1x3x16x3xf32, #tpu.memory_space<vmem>>, vector<1x1x16x3xf32>,
    return
  }
  func.func @transform_0(%arg0: i32) -> (i32, i32, i32) {
    %c0_i32 = arith.constant 0 : i32
    %c0_i32_0 = arith.constant 0 : i32
    %c0_i32_1 = arith.constant 0 : i32
    %c0_i32_2 = arith.constant 0 : i32
    return %c0_i32, %c0_i32_0, %c0_i32_1 : i32, i32, i32
  }
  func.func @transform_1(%arg0: i32) -> (i32, i32, i32) {
    %c0_i32 = arith.constant 0 : i32
    %c0_i32_0 = arith.constant 0 : i32
    %c0_i32_1 = arith.constant 0 : i32
    %c0_i32_2 = arith.constant 0 : i32
    return %c0_i32, %c0_i32_0, %c0_i32_1 : i32, i32, i32
  }
  func.func @transform_2(%arg0: i32) -> (i32, i32, i32, i32) {
    %c0_i32 = arith.constant 0 : i32
    %c0_i32_0 = arith.constant 0 : i32
    %c0_i32_1 = arith.constant 0 : i32
    %c0_i32_2 = arith.constant 0 : i32
    return %arg0, %c0_i32, %c0_i32_0, %c0_i32_1 : i32, i32, i32, i32
  }
  func.func @transform_3(%arg0: i32) -> (i32, i32, i32, i32) {
    %c0_i32 = arith.constant 0 : i32
    %c0_i32_0 = arith.constant 0 : i32
    %c0_i32_1 = arith.constant 0 : i32
    %c0_i32_2 = arith.constant 0 : i32
    return %arg0, %c0_i32, %c0_i32_0, %c0_i32_1 : i32, i32, i32, i32
  }
}

</mosaic_0001>

<bundles_post_ra>
// kernel: nlayer_discriminator_forward.5
= control target key start
LH: loop header
LB: loop body
LE: loop exit
PB: predicated region body
PF: predicated region fallthrough
CT: control target
= control target key end

     0   :  { %s3295_s12 = smov 0   ;;  %s3791_s0 = inlined_call_operand.vmem [shape: bf16[16,16,16], index: 0, kind: input, shape index: {}]   ;;  %s3792_s1 = inlined_call_operand.vmem [shape: f32[3,16,1], index: 1, kind: input, shape index: {}]   ;;  %s3793_s2 = inlined_call_operand.vmem [shape: bf16[2,6,16,6], index: 2, kind: input, shape index: {}]   ;;  %s3794_s3 = inlined_call_operand.vmem [shape: f32[2,3,16,3], index: 3, kind: output, shape index: {}]  }
   0x1 LB: > { %s2691_s13 = sadd.s32 4294967295, %s3267_s12   ;;  %p2695_p0 = scmp.ge.s32.totalorder %s3267_s12, 1  ;;  %s3267_s12 = sphi %s3295_s12, %s13_s12  }
   0x2   : > { %p137_p1 = scmp.lt.s32.totalorder %s3267_s12, 3 }
   0x4   : > { %p138_p2 = pnand %p2695_p0, %p137_p1 }
   0x5   : > { %p161_p3 = scmp.lt.s32.totalorder (!%p138_p2), %s2691_s13, 1  ;;  %v3269_v0 = vmov (!%p138_p2), 0.0   ;;  %vm3270_vm0 = vmmov (!%p138_p2), 0   ;;  %s3271_s18 = smov (!%p138_p2), 127   ;;  %v3328_v3 = vld [vmem:[%s3791_s0] sm:$0xff] (!%p138_p2)   ;;  %vm236_vm1 = vcmask (!%p138_p2), 130048  }
   0x6   : > { %141 = sbr.rel (%p138_p2) target bundleno = 541 (0x21d), region = 32  ;;  %2928 = vmatprep.subr.bf16.mxu0 (!%p138_p2), %v3269_v0  ;;  %2934 = vmatprep.subr.bf16.mxu1 (!%p138_p2), %v3269_v0  ;;  %s3272_s19 = smov (!%p138_p2), 125   ;;  %v3435_v15 = vld [vmem:[%s3791_s0 + $0x8] sm:$0xff] (!%p138_p2)   ;;  %v3440_v17 = vld [vmem:[%s3791_s0 + $0x18] sm:$0xff] (!%p138_p2)   ;;  %v3457_v20 = vld [vmem:[%s3791_s0 + $0x10] sm:$0xff] (!%p138_p2)   ;;  %v3274_v27 = vmov (!%p138_p2), 0  }
   0x7   : > { %2930 = vmatprep.mubr.msk.bf16.mxu0 (!%p138_p2), %vm3270_vm0, %v3269_v0  ;;  %2936 = vmatprep.mubr.msk.bf16.mxu1 (!%p138_p2), %vm3270_vm0, %v3269_v0  ;;  %s3273_s22 = smov (!%p138_p2), 126   ;;  %v3462_v21 = vld [vmem:[%s3791_s0 + $0x28] sm:$0xff] (!%p138_p2)   ;;  %v219_v23 = vld [vmem:[%s3792_s1] sm:$0xff] (!%p138_p2)  ;;  %v3486_v26 = vld [vmem:[%s3791_s0 + $0x38] sm:$0xff] (!%p138_p2)   ;;  %vm1117_vm2 = vcmask (!%p138_p2), 23552  }
   0x8   : > { %v3481_v25 = vld [vmem:[%s3791_s0 + $0x20] sm:$0xff] (!%p138_p2)   ;;  %3231 = vset.pattern.permute.xlu0 (!%p138_p2), %v3274_v27  ;;  %3232 = vset.pattern.permute.xlu1 (!%p138_p2), %v3274_v27  ;;  %v220_v29 = vld [vmem:[%s3792_s1 + $0x8] sm:$0xff] (!%p138_p2)  ;;  %v3504_v30 = vld [vmem:[%s3791_s0 + $0x30] sm:$0xff] (!%p138_p2)  }
   0x9   : > { %v3509_v31 = vld [vmem:[%s3791_s0 + $0x48] sm:$0xff] (!%p138_p2)   ;;  %v3525_v34 = vld [vmem:[%s3791_s0 + $0x40] sm:$0xff] (!%p138_p2)   ;;  %v3530_v35 = vld [vmem:[%s3791_s0 + $0x58] sm:$0xff] (!%p138_p2)  }
   0xa   : > { %v3545_v37 = vld [vmem:[%s3791_s0 + $0x50] sm:$0xff] (!%p138_p2)   ;;  %v3550_v38 = vld [vmem:[%s3791_s0 + $0x68] sm:$0xff] (!%p138_p2)   ;;  %v3566_v40 = vld [vmem:[%s3791_s0 + $0x60] sm:$0xff] (!%p138_p2)  }
   0xb   : > { %v3571_v41 = vld [vmem:[%s3791_s0 + $0x78] sm:$0xff] (!%p138_p2)   ;;  %v3587_v44 = vld [vmem:[%s3791_s0 + $0x70] sm:$0xff] (!%p138_p2)  }
   0xd   : > { %s3796_s13 = smov (!%p161_p3, %s2691_s13), 1 }
   0xe   : > { %s3216_s14 = smul.u32 48, %s3796_s13 }
  0x10   : > { %s3317_s17 = scalar_lea.vmem %s3793_s2, %s3216_s14  ;;  %s3766_s8 = scalar_lea.vmem %s3794_s3, %s3216_s14 }
  0x11   : > { %v3233_v1 = vld [vmem:[%s3317_s17] sm:$0xff]   ;;  %v3321_v2 = vld [vmem:[%s3317_s17 + $0x8] sm:$0xff]   ;;  %v3343_v4 = vld [vmem:[%s3317_s17 + $0x10] sm:$0xff]  }
  0x12   : > { %233 = vrot.lane.b32.xlu0 %v3233_v1, %s3271_s18  ;;  %390 = vrot.lane.b32.xlu1 %v3233_v1, %s3272_s19  ;;  %v3346_v5 = vld [vmem:[%s3317_s17 + $0x18] sm:$0xff]   ;;  %v3361_v6 = vld [vmem:[%s3317_s17 + $0x8] sm:$0xff]  }
  0x13   : > { %2935 = vmatpush3.bf16.msra.mxu1 %v3233_v1  ;;  %v3368_v7 = vld [vmem:[%s3317_s17 + $0x10] sm:$0xff]   ;;  %v3379_v8 = vld [vmem:[%s3317_s17 + $0x18] sm:$0xff]   ;;  %v3386_v9 = vld [vmem:[%s3317_s17 + $0x20] sm:$0xff]  }
  0x14   : > { %2946 = vmatprep.subr.bf16.mxu1 %v3269_v0  ;;  %v3397_v10 = vld [vmem:[%s3317_s17 + $0x10] sm:$0xff]   ;;  %v3404_v11 = vld [vmem:[%s3317_s17 + $0x18] sm:$0xff]   ;;  %v3415_v12 = vld [vmem:[%s3317_s17 + $0x20] sm:$0xff]  }
  0x15   : > { %v3422_v13 = vld [vmem:[%s3317_s17 + $0x28] sm:$0xff]  }
  0x16   : > { %336 = vrot.lane.b32.xlu0 %v3233_v1, %s3273_s22  ;;  %504 = vrot.lane.b32.xlu1 %v3321_v2, %s3271_s18 }
  0x17   : > { %2937 = vmatmul.mubr.msk.bf16.vlgmr.msra.gmra.mrb[0].mxu1 %vm236_vm1, %v3328_v3 }
  0x18   : > { %2948 = vmatprep.mubr.msk.bf16.mxu1 %vm3270_vm0, %v3269_v0 }
  0x1a   : > { %558 = vrot.lane.b32.xlu0 %v3321_v2, %s3273_s22  ;;  %612 = vrot.lane.b32.xlu1 %v3321_v2, %s3272_s19 }
  0x1e   : > { %726 = vrot.lane.b32.xlu0 %v3343_v4, %s3271_s18  ;;  %780 = vrot.lane.b32.xlu1 %v3343_v4, %s3273_s22 }
  0x22   : > { %834 = vrot.lane.b32.xlu0 %v3343_v4, %s3272_s19  ;;  %948 = vrot.lane.b32.xlu1 %v3346_v5, %s3271_s18 }
  0x26   : > { %1002 = vrot.lane.b32.xlu0 %v3346_v5, %s3273_s22  ;;  %1056 = vrot.lane.b32.xlu1 %v3346_v5, %s3272_s19 }
  0x2a   : > { %1127 = vrot.lane.b32.xlu0 %v3361_v6, %s3271_s18  ;;  %1213 = vrot.lane.b32.xlu1 %v3361_v6, %s3273_s22 }
  0x2e   : > { %1259 = vrot.lane.b32.xlu0 %v3361_v6, %s3272_s19  ;;  %1356 = vrot.lane.b32.xlu1 %v3368_v7, %s3271_s18 }
  0x32   : > { %1402 = vrot.lane.b32.xlu0 %v3368_v7, %s3273_s22  ;;  %1448 = vrot.lane.b32.xlu1 %v3368_v7, %s3272_s19 }
  0x36   : > { %1545 = vrot.lane.b32.xlu0 %v3379_v8, %s3271_s18  ;;  %1591 = vrot.lane.b32.xlu1 %v3379_v8, %s3273_s22 }
  0x3a   : > { %1637 = vrot.lane.b32.xlu0 %v3379_v8, %s3272_s19  ;;  %1735 = vrot.lane.b32.xlu1 %v3386_v9, %s3271_s18 }
  0x3e   : > { %1781 = vrot.lane.b32.xlu0 %v3386_v9, %s3273_s22  ;;  %1827 = vrot.lane.b32.xlu1 %v3386_v9, %s3272_s19 }
  0x42   : > { %1885 = vrot.lane.b32.xlu0 %v3397_v10, %s3271_s18  ;;  %1971 = vrot.lane.b32.xlu1 %v3397_v10, %s3273_s22 }
  0x46   : > { %2017 = vrot.lane.b32.xlu0 %v3397_v10, %s3272_s19  ;;  %2114 = vrot.lane.b32.xlu1 %v3404_v11, %s3271_s18 }
  0x4a   : > { %2160 = vrot.lane.b32.xlu0 %v3404_v11, %s3273_s22  ;;  %2206 = vrot.lane.b32.xlu1 %v3404_v11, %s3272_s19 }
  0x4e   : > { %2303 = vrot.lane.b32.xlu0 %v3415_v12, %s3271_s18  ;;  %2349 = vrot.lane.b32.xlu1 %v3415_v12, %s3273_s22 }
  0x52   : > { %2395 = vrot.lane.b32.xlu0 %v3415_v12, %s3272_s19  ;;  %2493 = vrot.lane.b32.xlu1 %v3422_v13, %s3271_s18 }
  0x56   : > { %2539 = vrot.lane.b32.xlu0 %v3422_v13, %s3273_s22  ;;  %2585 = vrot.lane.b32.xlu1 %v3422_v13, %s3272_s19 }
  0x5a   : > { %1107 = vperm.xlu0 %3231, %v219_v23   ;;  %1112 = vperm.xlu1 %3232, %v220_v29  }
  0x84   : > { %v234_v14 = vpop.permute.xlu0 %233  ;;  %v391_v16 = vpop.permute.xlu1 %390 }
  0x85   : > { %2929 = vmatpush3.bf16.msra.mxu0 %v234_v14  ;;  %2947 = vmatpush3.bf16.msra.mxu1 %v391_v16 }
  0x86   : > { %2940 = vmatprep.subr.bf16.mxu0 %v3269_v0  ;;  %2958 = vmatprep.subr.bf16.mxu1 %v3269_v0 }
  0x88   : > { %2931 = vmatmul.mubr.msk.bf16.vlgmr.msra.gmra.mrb[0].mxu0 %vm236_vm1, %v3435_v15  ;;  %v337_v18 = vpop.permute.xlu0 %336  ;;  %2949 = vmatmul.mubr.msk.bf16.vlgmr.msra.gmra.mrb[4].mxu1 %vm236_vm1, %v3440_v17  ;;  %v505_v19 = vpop.permute.xlu1 %504 }
  0x89   : > { %2941 = vmatpush3.bf16.msra.mxu0 %v337_v18  ;;  %2942 = vmatprep.mubr.msk.bf16.mxu0 %vm3270_vm0, %v3269_v0 }
  0x8a   : > { %2952 = vmatprep.subr.bf16.mxu0 %v3269_v0  ;;  %2959 = vmatpush3.bf16.msra.mxu1 %v505_v19 }
  0x8b   : > { %2960 = vmatprep.mubr.msk.bf16.mxu1 %vm3270_vm0, %v3269_v0  ;;  %2970 = vmatprep.subr.bf16.mxu1 %v3269_v0 }
  0x8c   : > { %v613_v22 = vpop.permute.xlu1 %612  ;;  %v559_v24 = vpop.permute.xlu0 %558 }
  0x90   : > { %2943 = vmatmul.mubr.msk.bf16.vlgmr.msra.gmra.mrb[4].mxu0 %vm236_vm1, %v3457_v20  ;;  %2961 = vmatmul.mubr.msk.bf16.vlgmr.msra.gmra.mrb[8].mxu1 %vm236_vm1, %v3462_v21  ;;  %v727_v28 = vpop.permute.xlu0 %726  ;;  %v781_v33 = vpop.permute.xlu1 %780 }
  0x91   : > { %2953 = vmatpush3.bf16.msra.mxu0 %v3321_v2  ;;  %2954 = vmatprep.mubr.msk.bf16.mxu0 %vm3270_vm0, %v3269_v0 }
  0x92   : > { %2964 = vmatprep.subr.bf16.mxu0 %v3269_v0  ;;  %2971 = vmatpush3.bf16.msra.mxu1 %v613_v22 }
  0x93   : > { %2972 = vmatprep.mubr.msk.bf16.mxu1 %vm3270_vm0, %v3269_v0  ;;  %2982 = vmatprep.subr.bf16.mxu1 %v3269_v0 }
  0x94   : > { %v835_v32 = vpop.permute.xlu0 %834  ;;  %v949_v36 = vpop.permute.xlu1 %948 }
  0x98   : > { %2955 = vmatmul.mubr.msk.bf16.vlgmr.msra.gmra.mrb[8].mxu0 %vm236_vm1, %v3481_v25  ;;  %2973 = vmatmul.mubr.msk.bf16.vlgmr.msra.gmra.mrb[12].mxu1 %vm236_vm1, %v3486_v26  ;;  %v1057_v39 = vpop.permute.xlu1 %1056  ;;  %v1003_v42 = vpop.permute.xlu0 %1002 }
  0x99   : > { %2965 = vmatpush3.bf16.msra.mxu0 %v559_v24  ;;  %2966 = vmatprep.mubr.msk.bf16.mxu0 %vm3270_vm0, %v3269_v0 }
  0x9a   : > { %2976 = vmatprep.subr.bf16.mxu0 %v3269_v0  ;;  %2983 = vmatpush3.bf16.msra.mxu1 %v727_v28 }
  0x9b   : > { %2984 = vmatprep.mubr.msk.bf16.mxu1 %vm3270_vm0, %v3269_v0  ;;  %2994 = vmatprep.subr.bf16.mxu1 %v3269_v0 }
  0x9c   : > { %v1128_v43 = vpop.permute.xlu0 %1127  ;;  %v1214_v46 = vpop.permute.xlu1 %1213 }
  0xa0   : > { %2967 = vmatmul.mubr.msk.bf16.vlgmr.msra.gmra.mrb[12].mxu0 %vm236_vm1, %v3504_v30  ;;  %2985 = vmatmul.mubr.msk.bf16.vlgmr.msra.gmra.mrb[16].mxu1 %vm236_vm1, %v3509_v31  ;;  %v1260_v45 = vpop.permute.xlu0 %1259  ;;  %v1357_v47 = vpop.permute.xlu1 %1356 }
  0xa1   : > { %2977 = vmatpush3.bf16.msra.mxu0 %v3343_v4  ;;  %2978 = vmatprep.mubr.msk.bf16.mxu0 %vm3270_vm0, %v3269_v0 }
  0xa2   : > { %2988 = vmatprep.subr.bf16.mxu0 %v3269_v0  ;;  %2995 = vmatpush3.bf16.msra.mxu1 %v835_v32 }
  0xa3   : > { %2996 = vmatprep.mubr.msk.bf16.mxu1 %vm3270_vm0, %v3269_v0  ;;  %3006 = vmatprep.subr.bf16.mxu1 %v3269_v0 }
  0xa4   : > { %v1449_v48 = vpop.permute.xlu1 %1448  ;;  %v1403_v49 = vpop.permute.xlu0 %1402 }
  0xa8   : > { %2979 = vmatmul.mubr.msk.bf16.vlgmr.msra.gmra.mrb[16].mxu0 %vm236_vm1, %v3525_v34  ;;  %2997 = vmatmul.mubr.msk.bf16.vlgmr.msra.gmra.mrb[20].mxu1 %vm236_vm1, %v3530_v35  ;;  %v1546_v50 = vpop.permute.xlu0 %1545  ;;  %v1592_v52 = vpop.permute.xlu1 %1591 }
  0xa9   : > { %2989 = vmatpush3.bf16.msra.mxu0 %v781_v33  ;;  %2990 = vmatprep.mubr.msk.bf16.mxu0 %vm3270_vm0, %v3269_v0 }
  0xaa   : > { %3000 = vmatprep.subr.bf16.mxu0 %v3269_v0  ;;  %3007 = vmatpush3.bf16.msra.mxu1 %v949_v36 }
  0xab   : > { %3008 = vmatprep.mubr.msk.bf16.mxu1 %vm3270_vm0, %v3269_v0  ;;  %3018 = vmatprep.subr.bf16.mxu1 %v3269_v0 }
  0xac   : > { %v1638_v51 = vpop.permute.xlu0 %1637  ;;  %v1736_v53 = vpop.permute.xlu1 %1735 }
  0xb0   : > { %2991 = vmatmul.mubr.msk.bf16.vlgmr.msra.gmra.mrb[20].mxu0 %vm236_vm1, %v3545_v37  ;;  %3009 = vmatmul.mubr.msk.bf16.vlgmr.msra.gmra.mrb[24].mxu1 %vm236_vm1, %v3550_v38  ;;  %v1828_v58 = vpop.permute.xlu1 %1827  ;;  %v1782_v59 = vpop.permute.xlu0 %1781 }
  0xb1   : > { %3001 = vmatpush3.bf16.msra.mxu0 %v3346_v5  ;;  %3002 = vmatprep.mubr.msk.bf16.mxu0 %vm3270_vm0, %v3269_v0 }
  0xb2   : > { %3012 = vmatprep.subr.bf16.mxu0 %v3269_v0  ;;  %3019 = vmatpush3.bf16.msra.mxu1 %v1057_v39 }
  0xb3   : > { %3020 = vmatprep.mubr.msk.bf16.mxu1 %vm3270_vm0, %v3269_v0  ;;  %3030 = vmatprep.subr.bf16.mxu1 %v3269_v0 }
  0xb4   : > { %v1886_v60 = vpop.permute.xlu0 %1885  ;;  %v1972_v62 = vpop.permute.xlu1 %1971 }
  0xb8   : > { %3003 = vmatmul.mubr.msk.bf16.vlgmr.msra.gmra.mrb[24].mxu0 %vm236_vm1, %v3566_v40  ;;  %3021 = vmatmul.mubr.msk.bf16.vlgmr.msra.gmra.mrb[28].mxu1 %vm236_vm1, %v3571_v41  ;;  %v2018_v61 = vpop.permute.xlu0 %2017  ;;  %v2115_v63 = vpop.permute.xlu1 %2114 }
  0xb9   : > { %3013 = vmatpush3.bf16.msra.mxu0 %v1003_v42  ;;  %3014 = vmatprep.mubr.msk.bf16.mxu0 %vm3270_vm0, %v3269_v0 }
  0xba   : > { %3024 = vmatprep.subr.bf16.mxu0 %v3269_v0  ;;  %3031 = vmatpush3.bf16.msra.mxu1 %v3361_v6 }
  0xbb   : > { %3032 = vmatprep.mubr.msk.bf16.mxu1 %vm3270_vm0, %v3269_v0  ;;  %3042 = vmatprep.subr.bf16.mxu1 %v3269_v0 }
  0xbc   : > { %v2207_v1 = vpop.permute.xlu1 %2206  ;;  %v2161_v2 = vpop.permute.xlu0 %2160 }
  0xc0   : > { %3015 = vmatmul.mubr.msk.bf16.vlgmr.msra.gmra.mrb[28].mxu0 %vm236_vm1, %v3587_v44  ;;  %3033 = vmatmul.mubr.msk.bf16.vlgmr.msra.gmra.mrb[32].mxu1 %vm236_vm1, %v3328_v3  ;;  %v2350_v5 = vpop.permute.xlu1 %2349 }
  0xc1   : > { %3025 = vmatpush3.bf16.msra.mxu0 %v1128_v43  ;;  %3026 = vmatprep.mubr.msk.bf16.mxu0 %vm3270_vm0, %v3269_v0 }
  0xc2   : > { %3036 = vmatprep.subr.bf16.mxu0 %v3269_v0  ;;  %3043 = vmatpush3.bf16.msra.mxu1 %v1260_v45 }
  0xc3   : > { %3044 = vmatprep.mubr.msk.bf16.mxu1 %vm3270_vm0, %v3269_v0  ;;  %3054 = vmatprep.subr.bf16.mxu1 %v3269_v0 }
  0xc4   : > { %v2494_v6 = vpop.permute.xlu1 %2493 }
  0xc8   : > { %3027 = vmatmul.mubr.msk.bf16.vlgmr.msra.gmra.mrb[32].mxu0 %vm236_vm1, %v3435_v15  ;;  %3045 = vmatmul.mubr.msk.bf16.vlgmr.msra.gmra.mrb[36].mxu1 %vm236_vm1, %v3440_v17 }
  0xc9   : > { %3037 = vmatpush3.bf16.msra.mxu0 %v1214_v46  ;;  %3038 = vmatprep.mubr.msk.bf16.mxu0 %vm3270_vm0, %v3269_v0 }
  0xca   : > { %3048 = vmatprep.subr.bf16.mxu0 %v3269_v0  ;;  %3055 = vmatpush3.bf16.msra.mxu1 %v1357_v47 }
  0xcb   : > { %3056 = vmatprep.mubr.msk.bf16.mxu1 %vm3270_vm0, %v3269_v0  ;;  %3066 = vmatprep.subr.bf16.mxu1 %v3269_v0 }
  0xd0   : > { %3039 = vmatmul.mubr.msk.bf16.vlgmr.msra.gmra.mrb[36].mxu0 %vm236_vm1, %v3457_v20  ;;  %3057 = vmatmul.mubr.msk.bf16.vlgmr.msra.gmra.mrb[40].mxu1 %vm236_vm1, %v3462_v21 }
  0xd1   : > { %3049 = vmatpush3.bf16.msra.mxu0 %v3368_v7  ;;  %3050 = vmatprep.mubr.msk.bf16.mxu0 %vm3270_vm0, %v3269_v0  ;;  %v2586_v7 = vpop.permute.xlu1 %2585 }
  0xd2   : > { %3060 = vmatprep.subr.bf16.mxu0 %v3269_v0  ;;  %3067 = vmatpush3.bf16.msra.mxu1 %v1449_v48 }
  0xd3   : > { %3068 = vmatprep.mubr.msk.bf16.mxu1 %vm3270_vm0, %v3269_v0  ;;  %3078 = vmatprep.subr.bf16.mxu1 %v3269_v0 }
  0xd8   : > { %3051 = vmatmul.mubr.msk.bf16.vlgmr.msra.gmra.mrb[40].mxu0 %vm236_vm1, %v3481_v25  ;;  %3069 = vmatmul.mubr.msk.bf16.vlgmr.msra.gmra.mrb[44].mxu1 %vm236_vm1, %v3486_v26 }
  0xd9   : > { %3061 = vmatpush3.bf16.msra.mxu0 %v1403_v49  ;;  %3062 = vmatprep.mubr.msk.bf16.mxu0 %vm3270_vm0, %v3269_v0 }
  0xda   : > { %3072 = vmatprep.subr.bf16.mxu0 %v3269_v0  ;;  %3079 = vmatpush3.bf16.msra.mxu1 %v1546_v50 }
  0xdb   : > { %3080 = vmatprep.mubr.msk.bf16.mxu1 %vm3270_vm0, %v3269_v0  ;;  %3090 = vmatprep.subr.bf16.mxu1 %v3269_v0 }
  0xe0   : > { %3063 = vmatmul.mubr.msk.bf16.vlgmr.msra.gmra.mrb[44].mxu0 %vm236_vm1, %v3504_v30  ;;  %3081 = vmatmul.mubr.msk.bf16.vlgmr.msra.gmra.mrb[48].mxu1 %vm236_vm1, %v3509_v31 }
  0xe1   : > { %3073 = vmatpush3.bf16.msra.mxu0 %v3379_v8  ;;  %3074 = vmatprep.mubr.msk.bf16.mxu0 %vm3270_vm0, %v3269_v0 }
  0xe2   : > { %3084 = vmatprep.subr.bf16.mxu0 %v3269_v0  ;;  %3091 = vmatpush3.bf16.msra.mxu1 %v1638_v51 }
  0xe3   : > { %3092 = vmatprep.mubr.msk.bf16.mxu1 %vm3270_vm0, %v3269_v0  ;;  %3102 = vmatprep.subr.bf16.mxu1 %v3269_v0 }
  0xe8   : > { %3075 = vmatmul.mubr.msk.bf16.vlgmr.msra.gmra.mrb[48].mxu0 %vm236_vm1, %v3525_v34  ;;  %3093 = vmatmul.mubr.msk.bf16.vlgmr.msra.gmra.mrb[52].mxu1 %vm236_vm1, %v3530_v35 }
  0xe9   : > { %3085 = vmatpush3.bf16.msra.mxu0 %v1592_v52  ;;  %3086 = vmatprep.mubr.msk.bf16.mxu0 %vm3270_vm0, %v3269_v0 }
  0xea   : > { %3096 = vmatprep.subr.bf16.mxu0 %v3269_v0  ;;  %3103 = vmatpush3.bf16.msra.mxu1 %v1736_v53  ;;  %v3648_v54 = vpop.f32.mrb[0].mxu1 }
  0xeb   : > { %3104 = vmatprep.mubr.msk.bf16.mxu1 %vm3270_vm0, %v3269_v0  ;;  %3114 = vmatprep.subr.bf16.mxu1 %v3269_v0  ;;  %v2938_v55 = vpop.f32.mrb[1].mxu1 }
  0xec   : > { %v3653_v56 = vpop.f32.mrb[2].mxu1 }
  0xed   : > { %v2939_v57 = vpop.f32.mrb[3].mxu1 }
  0xf0   : > { %3087 = vmatmul.mubr.msk.bf16.vlgmr.msra.gmra.mrb[52].mxu0 %vm236_vm1, %v3545_v37  ;;  %3105 = vmatmul.mubr.msk.bf16.vlgmr.msra.gmra.mrb[56].mxu1 %vm236_vm1, %v3550_v38 }
  0xf1   : > { %3097 = vmatpush3.bf16.msra.mxu0 %v3386_v9  ;;  %3098 = vmatprep.mubr.msk.bf16.mxu0 %vm3270_vm0, %v3269_v0 }
  0xf2   : > { %3108 = vmatprep.subr.bf16.mxu0 %v3269_v0  ;;  %3115 = vmatpush3.bf16.msra.mxu1 %v1828_v58 }
  0xf3   : > { %3116 = vmatprep.mubr.msk.bf16.mxu1 %vm3270_vm0, %v3269_v0  ;;  %3126 = vmatprep.subr.bf16.mxu1 %v3269_v0 }
  0xf8   : > { %3099 = vmatmul.mubr.msk.bf16.vlgmr.msra.gmra.mrb[56].mxu0 %vm236_vm1, %v3566_v40  ;;  %3117 = vmatmul.mubr.msk.bf16.vlgmr.msra.gmra.mrb[60].mxu1 %vm236_vm1, %v3571_v41 }
  0xf9   : > { %3109 = vmatpush3.bf16.msra.mxu0 %v1782_v59  ;;  %3110 = vmatprep.mubr.msk.bf16.mxu0 %vm3270_vm0, %v3269_v0 }
  0xfa   : > { %3120 = vmatprep.subr.bf16.mxu0 %v3269_v0  ;;  %3127 = vmatpush3.bf16.msra.mxu1 %v3397_v10 }
  0xfb   : > { %3128 = vmatprep.mubr.msk.bf16.mxu1 %vm3270_vm0, %v3269_v0  ;;  %3138 = vmatprep.subr.bf16.mxu1 %v3269_v0 }
 0x100   : > { %3111 = vmatmul.mubr.msk.bf16.vlgmr.msra.gmra.mrb[60].mxu0 %vm236_vm1, %v3587_v44  ;;  %3129 = vmatmul.mubr.msk.bf16.vlgmr.msra.gmra.mrb[64].mxu1 %vm236_vm1, %v3328_v3  ;;  %v2304_v3 = vpop.permute.xlu0 %2303 }
 0x101   : > { %3121 = vmatpush3.bf16.msra.mxu0 %v1886_v60  ;;  %3122 = vmatprep.mubr.msk.bf16.mxu0 %vm3270_vm0, %v3269_v0 }
 0x102   : > { %3132 = vmatprep.subr.bf16.mxu0 %v3269_v0  ;;  %3139 = vmatpush3.bf16.msra.mxu1 %v2018_v61 }
 0x103   : > { %3140 = vmatprep.mubr.msk.bf16.mxu1 %vm3270_vm0, %v3269_v0  ;;  %3150 = vmatprep.subr.bf16.mxu1 %v3269_v0 }
 0x104   : > { %v2396_v4 = vpop.permute.xlu0 %2395 }
 0x108   : > { %3123 = vmatmul.mubr.msk.bf16.vlgmr.msra.gmra.mrb[64].mxu0 %vm236_vm1, %v3435_v15  ;;  %3141 = vmatmul.mubr.msk.bf16.vlgmr.msra.gmra.mrb[68].mxu1 %vm236_vm1, %v3440_v17  ;;  %v2540_v8 = vpop.permute.xlu0 %2539 }
 0x109   : > { %3133 = vmatpush3.bf16.msra.mxu0 %v1972_v62  ;;  %3134 = vmatprep.mubr.msk.bf16.mxu0 %vm3270_vm0, %v3269_v0 }
 0x10a   : > { %3144 = vmatprep.subr.bf16.mxu0 %v3269_v0  ;;  %3151 = vmatpush3.bf16.msra.mxu1 %v2115_v63 }
 0x10b   : > { %3152 = vmatprep.mubr.msk.bf16.mxu1 %vm3270_vm0, %v3269_v0  ;;  %3162 = vmatprep.subr.bf16.mxu1 %v3269_v0 }
 0x110   : > { %3135 = vmatmul.mubr.msk.bf16.vlgmr.msra.gmra.mrb[68].mxu0 %vm236_vm1, %v3457_v20  ;;  %3153 = vmatmul.mubr.msk.bf16.vlgmr.msra.gmra.mrb[72].mxu1 %vm236_vm1, %v3462_v21 }
 0x111   : > { %3145 = vmatpush3.bf16.msra.mxu0 %v3404_v11  ;;  %3146 = vmatprep.mubr.msk.bf16.mxu0 %vm3270_vm0, %v3269_v0 }
 0x112   : > { %3156 = vmatprep.subr.bf16.mxu0 %v3269_v0  ;;  %3163 = vmatpush3.bf16.msra.mxu1 %v2207_v1 }
 0x113   : > { %3164 = vmatprep.mubr.msk.bf16.mxu1 %vm3270_vm0, %v3269_v0  ;;  %3174 = vmatprep.subr.bf16.mxu1 %v3269_v0 }
 0x118   : > { %3147 = vmatmul.mubr.msk.bf16.vlgmr.msra.gmra.mrb[72].mxu0 %vm236_vm1, %v3481_v25  ;;  %3165 = vmatmul.mubr.msk.bf16.vlgmr.msra.gmra.mrb[76].mxu1 %vm236_vm1, %v3486_v26 }
 0x119   : > { %3157 = vmatpush3.bf16.msra.mxu0 %v2161_v2  ;;  %3158 = vmatprep.mubr.msk.bf16.mxu0 %vm3270_vm0, %v3269_v0 }
 0x11a   : > { %3168 = vmatprep.subr.bf16.mxu0 %v3269_v0  ;;  %3175 = vmatpush3.bf16.msra.mxu1 %v2304_v3 }
 0x11b   : > { %3176 = vmatprep.mubr.msk.bf16.mxu1 %vm3270_vm0, %v3269_v0  ;;  %3186 = vmatprep.subr.bf16.mxu1 %v3269_v0 }
 0x120   : > { %3159 = vmatmul.mubr.msk.bf16.vlgmr.msra.gmra.mrb[76].mxu0 %vm236_vm1, %v3504_v30  ;;  %3177 = vmatmul.mubr.msk.bf16.vlgmr.msra.gmra.mrb[80].mxu1 %vm236_vm1, %v3509_v31 }
 0x121   : > { %3169 = vmatpush3.bf16.msra.mxu0 %v3415_v12  ;;  %3170 = vmatprep.mubr.msk.bf16.mxu0 %vm3270_vm0, %v3269_v0 }
 0x122   : > { %3180 = vmatprep.subr.bf16.mxu0 %v3269_v0  ;;  %3187 = vmatpush3.bf16.msra.mxu1 %v2396_v4 }
 0x123   : > { %3188 = vmatprep.mubr.msk.bf16.mxu1 %vm3270_vm0, %v3269_v0  ;;  %3198 = vmatprep.subr.bf16.mxu1 %v3269_v0 }
 0x128   : > { %3171 = vmatmul.mubr.msk.bf16.vlgmr.msra.gmra.mrb[80].mxu0 %vm236_vm1, %v3525_v34  ;;  %3189 = vmatmul.mubr.msk.bf16.vlgmr.msra.gmra.mrb[84].mxu1 %vm236_vm1, %v3530_v35 }
 0x129   : > { %3181 = vmatpush3.bf16.msra.mxu0 %v2350_v5  ;;  %3182 = vmatprep.mubr.msk.bf16.mxu0 %vm3270_vm0, %v3269_v0 }
 0x12a   : > { %3192 = vmatprep.subr.bf16.mxu0 %v3269_v0  ;;  %3199 = vmatpush3.bf16.msra.mxu1 %v2494_v6 }
 0x12b   : > { %3200 = vmatprep.mubr.msk.bf16.mxu1 %vm3270_vm0, %v3269_v0  ;;  %3210 = vmatprep.subr.bf16.mxu1 %v3269_v0 }
 0x130   : > { %3183 = vmatmul.mubr.msk.bf16.vlgmr.msra.gmra.mrb[84].mxu0 %vm236_vm1, %v3545_v37  ;;  %3201 = vmatmul.mubr.msk.bf16.vlgmr.msra.gmra.mrb[88].mxu1 %vm236_vm1, %v3550_v38 }
 0x131   : > { %3193 = vmatpush3.bf16.msra.mxu0 %v3422_v13  ;;  %3194 = vmatprep.mubr.msk.bf16.mxu0 %vm3270_vm0, %v3269_v0 }
 0x132   : > { %3204 = vmatprep.subr.bf16.mxu0 %v3269_v0  ;;  %3211 = vmatpush3.bf16.msra.mxu1 %v2586_v7 }
 0x133   : > { %3212 = vmatprep.mubr.msk.bf16.mxu1 %vm3270_vm0, %v3269_v0 }
 0x138   : > { %3195 = vmatmul.mubr.msk.bf16.vlgmr.msra.gmra.mrb[88].mxu0 %vm236_vm1, %v3566_v40  ;;  %3213 = vmatmul.mubr.msk.bf16.vlgmr.msra.gmra.mrb[92].mxu1 %vm236_vm1, %v3571_v41 }
 0x139   : > { %3205 = vmatpush3.bf16.msra.mxu0 %v2540_v8  ;;  %3206 = vmatprep.mubr.msk.bf16.mxu0 %vm3270_vm0, %v3269_v0 }
 0x140   : > { %3207 = vmatmul.mubr.msk.bf16.vlgmr.msra.gmra.mrb[92].mxu0 %vm236_vm1, %v3587_v44 }
 0x15b   : > { %v274_v9 = vpop.f32.mrb[0].mxu0  ;;  %v430_v10 = vpop.f32.mrb[4].mxu1 }
 0x15c   : > { %v325_v11 = vadd.f32 %v3648_v54, %v274_v9  ;;  %v2932_v12 = vpop.f32.mrb[1].mxu0  ;;  %v2950_v13 = vpop.f32.mrb[5].mxu1 }
 0x15d   : > { %v277_v14 = vpop.f32.mrb[2].mxu0  ;;  %v433_v15 = vpop.f32.mrb[6].mxu1 }
 0x15e   : > { %v328_v16 = vadd.f32 %v3653_v56, %v277_v14  ;;  %v2933_v17 = vpop.f32.mrb[3].mxu0  ;;  %v2951_v18 = vpop.f32.mrb[7].mxu1 }
 0x163   : > { %v376_v19 = vpop.f32.mrb[4].mxu0  ;;  %v544_v20 = vpop.f32.mrb[8].mxu1 }
 0x164   : > { %v383_v21 = vadd.f32 %v376_v19, %v325_v11  ;;  %v2944_v22 = vpop.f32.mrb[5].mxu0  ;;  %v2962_v0 = vpop.f32.mrb[9].mxu1 }
 0x165   : > { %v379_v23 = vpop.f32.mrb[6].mxu0  ;;  %v547_v24 = vpop.f32.mrb[10].mxu1 }
 0x166   : > { %v437_v25 = vadd.f32 %v430_v10, %v383_v21  ;;  %v384_v26 = vadd.f32 %v379_v23, %v328_v16  ;;  %v2945_v27 = vpop.f32.mrb[7].mxu0  ;;  %v2963_v28 = vpop.f32.mrb[11].mxu1 }
 0x168   : > { %v438_v29 = vadd.f32 %v433_v15, %v384_v26  ;;  %v3759_v26 = vpop.permute.xlu0 %1107 }
 0x16b   : > { %v490_v30 = vpop.f32.mrb[8].mxu0  ;;  %v652_v31 = vpop.f32.mrb[12].mxu1 }
 0x16c   : > { %v497_v32 = vadd.f32 %v490_v30, %v437_v25  ;;  %v2956_v33 = vpop.f32.mrb[9].mxu0  ;;  %v2974_v34 = vpop.f32.mrb[13].mxu1 }
 0x16d   : > { %v493_v35 = vpop.f32.mrb[10].mxu0  ;;  %v655_v36 = vpop.f32.mrb[14].mxu1 }
 0x16e   : > { %v551_v37 = vadd.f32 %v544_v20, %v497_v32  ;;  %v498_v38 = vadd.f32 %v493_v35, %v438_v29  ;;  %v2957_v39 = vpop.f32.mrb[11].mxu0  ;;  %v2975_v40 = vpop.f32.mrb[15].mxu1 }
 0x170   : > { %v552_v41 = vadd.f32 %v547_v24, %v498_v38  ;;  %v3768_v38 = vpop.permute.xlu1 %1112 }
 0x173   : > { %v598_v42 = vpop.f32.mrb[12].mxu0  ;;  %v766_v43 = vpop.f32.mrb[16].mxu1 }
 0x174   : > { %v605_v44 = vadd.f32 %v598_v42, %v551_v37  ;;  %v2968_v45 = vpop.f32.mrb[13].mxu0  ;;  %v2986_v46 = vpop.f32.mrb[17].mxu1 }
 0x175   : > { %v601_v47 = vpop.f32.mrb[14].mxu0  ;;  %v769_v48 = vpop.f32.mrb[18].mxu1 }
 0x176   : > { %v659_v49 = vadd.f32 %v652_v31, %v605_v44  ;;  %v606_v50 = vadd.f32 %v601_v47, %v552_v41  ;;  %v2969_v51 = vpop.f32.mrb[15].mxu0  ;;  %v2987_v52 = vpop.f32.mrb[19].mxu1 }
 0x178   : > { %v660_v53 = vadd.f32 %v655_v36, %v606_v50 }
 0x17b   : > { %v712_v54 = vpop.f32.mrb[16].mxu0  ;;  %v874_v55 = vpop.f32.mrb[20].mxu1 }
 0x17c   : > { %v719_v56 = vadd.f32 %v712_v54, %v659_v49  ;;  %v2980_v57 = vpop.f32.mrb[17].mxu0  ;;  %v2998_v58 = vpop.f32.mrb[21].mxu1 }
 0x17d   : > { %v715_v59 = vpop.f32.mrb[18].mxu0  ;;  %v877_v60 = vpop.f32.mrb[22].mxu1 }
 0x17e   : > { %v773_v61 = vadd.f32 %v766_v43, %v719_v56  ;;  %v720_v62 = vadd.f32 %v715_v59, %v660_v53  ;;  %v2981_v63 = vpop.f32.mrb[19].mxu0  ;;  %v2999_v1 = vpop.f32.mrb[23].mxu1 }
 0x180   : > { %v774_v2 = vadd.f32 %v769_v48, %v720_v62 }
 0x183   : > { %v820_v3 = vpop.f32.mrb[20].mxu0  ;;  %v988_v4 = vpop.f32.mrb[24].mxu1 }
 0x184   : > { %v827_v5 = vadd.f32 %v820_v3, %v773_v61  ;;  %v2992_v6 = vpop.f32.mrb[21].mxu0  ;;  %v3010_v7 = vpop.f32.mrb[25].mxu1 }
 0x185   : > { %v823_v8 = vpop.f32.mrb[22].mxu0  ;;  %v991_v9 = vpop.f32.mrb[26].mxu1 }
 0x186   : > { %v881_v10 = vadd.f32 %v874_v55, %v827_v5  ;;  %v828_v11 = vadd.f32 %v823_v8, %v774_v2  ;;  %v2993_v12 = vpop.f32.mrb[23].mxu0  ;;  %v3011_v13 = vpop.f32.mrb[27].mxu1 }
 0x188   : > { %v882_v14 = vadd.f32 %v877_v60, %v828_v11 }
 0x18b   : > { %v934_v15 = vpop.f32.mrb[24].mxu0  ;;  %v1096_v16 = vpop.f32.mrb[28].mxu1 }
 0x18c   : > { %v941_v17 = vadd.f32 %v934_v15, %v881_v10  ;;  %v3004_v18 = vpop.f32.mrb[25].mxu0  ;;  %v3022_v19 = vpop.f32.mrb[29].mxu1 }
 0x18d   : > { %v937_v20 = vpop.f32.mrb[26].mxu0  ;;  %v1099_v21 = vpop.f32.mrb[30].mxu1 }
 0x18e   : > { %v995_v22 = vadd.f32 %v988_v4, %v941_v17  ;;  %v942_v0 = vadd.f32 %v937_v20, %v882_v14  ;;  %v3005_v23 = vpop.f32.mrb[27].mxu0  ;;  %v3023_v24 = vpop.f32.mrb[31].mxu1 }
 0x190   : > { %v996_v25 = vadd.f32 %v991_v9, %v942_v0 }
 0x193   : > { %v1042_v27 = vpop.f32.mrb[28].mxu0  ;;  %v1206_v28 = vpop.f32.mrb[32].mxu1 }
 0x194   : > { %v1049_v29 = vadd.f32 %v1042_v27, %v995_v22  ;;  %v3016_v30 = vpop.f32.mrb[29].mxu0  ;;  %v3034_v31 = vpop.f32.mrb[33].mxu1 }
 0x195   : > { %v1045_v32 = vpop.f32.mrb[30].mxu0  ;;  %v1209_v33 = vpop.f32.mrb[34].mxu1 }
 0x196   : > { %v1103_v34 = vadd.f32 %v1096_v16, %v1049_v29  ;;  %v1050_v35 = vadd.f32 %v1045_v32, %v996_v25  ;;  %v3017_v36 = vpop.f32.mrb[31].mxu0  ;;  %v3035_v37 = vpop.f32.mrb[35].mxu1 }
 0x198   : > { %v1104_v39 = vadd.f32 %v1099_v21, %v1050_v35  ;;  %v1115_v40 = vadd.f32 %v3759_v26, %v1103_v34 }
 0x19a   : > { %1118 = vst.msk [vmem:[%s3766_s8] sm:$0xff] %vm1117_vm2, %v1115_v40  ;;  %v1116_v41 = vadd.f32 %v3768_v38, %v1104_v39 }
 0x19b   : > { %v1164_v42 = vpop.f32.mrb[32].mxu0  ;;  %v1296_v43 = vpop.f32.mrb[36].mxu1 }
 0x19c   : > { %1119 = vst.msk [vmem:[%s3766_s8 + $0x8] sm:$0xff] %vm1117_vm2, %v1116_v41  ;;  %v1207_v44 = vadd.f32 %v1206_v28, %v1164_v42  ;;  %v3028_v45 = vpop.f32.mrb[33].mxu0  ;;  %v3046_v46 = vpop.f32.mrb[37].mxu1 }
 0x19d   : > { %v1167_v47 = vpop.f32.mrb[34].mxu0  ;;  %v1299_v48 = vpop.f32.mrb[38].mxu1 }
 0x19e   : > { %v1210_v49 = vadd.f32 %v1209_v33, %v1167_v47  ;;  %v3029_v50 = vpop.f32.mrb[35].mxu0  ;;  %v3047_v51 = vpop.f32.mrb[39].mxu1 }
 0x1a3   : > { %v1250_v52 = vpop.f32.mrb[36].mxu0  ;;  %v1393_v53 = vpop.f32.mrb[40].mxu1 }
 0x1a4   : > { %v1257_v54 = vadd.f32 %v1250_v52, %v1207_v44  ;;  %v3040_v55 = vpop.f32.mrb[37].mxu0  ;;  %v3058_v56 = vpop.f32.mrb[41].mxu1 }
 0x1a5   : > { %v1253_v57 = vpop.f32.mrb[38].mxu0  ;;  %v1396_v58 = vpop.f32.mrb[42].mxu1 }
 0x1a6   : > { %v1303_v59 = vadd.f32 %v1296_v43, %v1257_v54  ;;  %v1258_v60 = vadd.f32 %v1253_v57, %v1210_v49  ;;  %v3041_v61 = vpop.f32.mrb[39].mxu0  ;;  %v3059_v62 = vpop.f32.mrb[43].mxu1 }
 0x1a8   : > { %v1304_v63 = vadd.f32 %v1299_v48, %v1258_v60 }
 0x1ab   : > { %v1347_v1 = vpop.f32.mrb[40].mxu0  ;;  %v1485_v2 = vpop.f32.mrb[44].mxu1 }
 0x1ac   : > { %v1354_v3 = vadd.f32 %v1347_v1, %v1303_v59  ;;  %v3052_v4 = vpop.f32.mrb[41].mxu0  ;;  %v3070_v5 = vpop.f32.mrb[45].mxu1 }
 0x1ad   : > { %v1350_v6 = vpop.f32.mrb[42].mxu0  ;;  %v1488_v7 = vpop.f32.mrb[46].mxu1 }
 0x1ae   : > { %v1400_v8 = vadd.f32 %v1393_v53, %v1354_v3  ;;  %v1355_v9 = vadd.f32 %v1350_v6, %v1304_v63  ;;  %v3053_v10 = vpop.f32.mrb[43].mxu0  ;;  %v3071_v11 = vpop.f32.mrb[47].mxu1 }
 0x1b0   : > { %v1401_v12 = vadd.f32 %v1396_v58, %v1355_v9 }
 0x1b3   : > { %v1439_v13 = vpop.f32.mrb[44].mxu0  ;;  %v1582_v14 = vpop.f32.mrb[48].mxu1 }
 0x1b4   : > { %v1446_v15 = vadd.f32 %v1439_v13, %v1400_v8  ;;  %v3064_v16 = vpop.f32.mrb[45].mxu0  ;;  %v3082_v17 = vpop.f32.mrb[49].mxu1 }
 0x1b5   : > { %v1442_v18 = vpop.f32.mrb[46].mxu0  ;;  %v1585_v19 = vpop.f32.mrb[50].mxu1 }
 0x1b6   : > { %v1492_v20 = vadd.f32 %v1485_v2, %v1446_v15  ;;  %v1447_v21 = vadd.f32 %v1442_v18, %v1401_v12  ;;  %v3065_v22 = vpop.f32.mrb[47].mxu0  ;;  %v3083_v0 = vpop.f32.mrb[51].mxu1 }
 0x1b8   : > { %v1493_v23 = vadd.f32 %v1488_v7, %v1447_v21 }
 0x1bb   : > { %v1536_v24 = vpop.f32.mrb[48].mxu0  ;;  %v1674_v25 = vpop.f32.mrb[52].mxu1 }
 0x1bc   : > { %v1543_v27 = vadd.f32 %v1536_v24, %v1492_v20  ;;  %v3076_v28 = vpop.f32.mrb[49].mxu0  ;;  %v3094_v29 = vpop.f32.mrb[53].mxu1 }
 0x1bd   : > { %v1539_v30 = vpop.f32.mrb[50].mxu0  ;;  %v1677_v31 = vpop.f32.mrb[54].mxu1 }
 0x1be   : > { %v1589_v32 = vadd.f32 %v1582_v14, %v1543_v27  ;;  %v1544_v33 = vadd.f32 %v1539_v30, %v1493_v23  ;;  %v3077_v34 = vpop.f32.mrb[51].mxu0  ;;  %v3095_v35 = vpop.f32.mrb[55].mxu1 }
 0x1c0   : > { %v1590_v36 = vadd.f32 %v1585_v19, %v1544_v33 }
 0x1c3   : > { %v1628_v37 = vpop.f32.mrb[52].mxu0  ;;  %v1772_v39 = vpop.f32.mrb[56].mxu1 }
 0x1c4   : > { %v1635_v40 = vadd.f32 %v1628_v37, %v1589_v32  ;;  %v3088_v41 = vpop.f32.mrb[53].mxu0  ;;  %v3106_v42 = vpop.f32.mrb[57].mxu1 }
 0x1c5   : > { %v1631_v43 = vpop.f32.mrb[54].mxu0  ;;  %v1775_v44 = vpop.f32.mrb[58].mxu1 }
 0x1c6   : > { %v1681_v45 = vadd.f32 %v1674_v25, %v1635_v40  ;;  %v1636_v46 = vadd.f32 %v1631_v43, %v1590_v36  ;;  %v3089_v47 = vpop.f32.mrb[55].mxu0  ;;  %v3107_v48 = vpop.f32.mrb[59].mxu1 }
 0x1c8   : > { %v1682_v49 = vadd.f32 %v1677_v31, %v1636_v46 }
 0x1cb   : > { %v1726_v50 = vpop.f32.mrb[56].mxu0  ;;  %v1864_v51 = vpop.f32.mrb[60].mxu1 }
 0x1cc   : > { %v1733_v52 = vadd.f32 %v1726_v50, %v1681_v45  ;;  %v3100_v53 = vpop.f32.mrb[57].mxu0  ;;  %v3118_v54 = vpop.f32.mrb[61].mxu1 }
 0x1cd   : > { %v1729_v55 = vpop.f32.mrb[58].mxu0  ;;  %v1867_v56 = vpop.f32.mrb[62].mxu1 }
 0x1ce   : > { %v1779_v57 = vadd.f32 %v1772_v39, %v1733_v52  ;;  %v1734_v58 = vadd.f32 %v1729_v55, %v1682_v49  ;;  %v3101_v59 = vpop.f32.mrb[59].mxu0  ;;  %v3119_v60 = vpop.f32.mrb[63].mxu1 }
 0x1d0   : > { %v1780_v61 = vadd.f32 %v1775_v44, %v1734_v58 }
 0x1d3   : > { %v1818_v62 = vpop.f32.mrb[60].mxu0  ;;  %v1964_v63 = vpop.f32.mrb[64].mxu1 }
 0x1d4   : > { %v1825_v1 = vadd.f32 %v1818_v62, %v1779_v57  ;;  %v3112_v2 = vpop.f32.mrb[61].mxu0  ;;  %v3130_v3 = vpop.f32.mrb[65].mxu1 }
 0x1d5   : > { %v1821_v4 = vpop.f32.mrb[62].mxu0  ;;  %v1967_v5 = vpop.f32.mrb[66].mxu1 }
 0x1d6   : > { %v1871_v6 = vadd.f32 %v1864_v51, %v1825_v1  ;;  %v1826_v7 = vadd.f32 %v1821_v4, %v1780_v61  ;;  %v3113_v8 = vpop.f32.mrb[63].mxu0  ;;  %v3131_v9 = vpop.f32.mrb[67].mxu1 }
 0x1d8   : > { %v1873_v10 = vadd.f32 %v1871_v6, %v3759_v26  ;;  %v1872_v11 = vadd.f32 %v1867_v56, %v1826_v7 }
 0x1da   : > { %2798 = vst.msk [vmem:[%s3766_s8 + $0x10] sm:$0xff] %vm1117_vm2, %v1873_v10  ;;  %v1874_v12 = vadd.f32 %v1872_v11, %v3768_v38 }
 0x1db   : > { %v1922_v13 = vpop.f32.mrb[64].mxu0  ;;  %v2054_v14 = vpop.f32.mrb[68].mxu1 }
 0x1dc   : > { %2799 = vst.msk [vmem:[%s3766_s8 + $0x18] sm:$0xff] %vm1117_vm2, %v1874_v12  ;;  %v1965_v15 = vadd.f32 %v1964_v63, %v1922_v13  ;;  %v3124_v16 = vpop.f32.mrb[65].mxu0  ;;  %v3142_v17 = vpop.f32.mrb[69].mxu1 }
 0x1dd   : > { %v1925_v18 = vpop.f32.mrb[66].mxu0  ;;  %v2057_v19 = vpop.f32.mrb[70].mxu1 }
 0x1de   : > { %v1968_v20 = vadd.f32 %v1967_v5, %v1925_v18  ;;  %v3125_v21 = vpop.f32.mrb[67].mxu0  ;;  %v3143_v22 = vpop.f32.mrb[71].mxu1 }
 0x1e3   : > { %v2008_v0 = vpop.f32.mrb[68].mxu0  ;;  %v2151_v23 = vpop.f32.mrb[72].mxu1 }
 0x1e4   : > { %v2015_v24 = vadd.f32 %v2008_v0, %v1965_v15  ;;  %v3136_v25 = vpop.f32.mrb[69].mxu0  ;;  %v3154_v27 = vpop.f32.mrb[73].mxu1 }
 0x1e5   : > { %v2011_v28 = vpop.f32.mrb[70].mxu0  ;;  %v2154_v29 = vpop.f32.mrb[74].mxu1 }
 0x1e6   : > { %v2061_v30 = vadd.f32 %v2054_v14, %v2015_v24  ;;  %v2016_v31 = vadd.f32 %v2011_v28, %v1968_v20  ;;  %v3137_v32 = vpop.f32.mrb[71].mxu0  ;;  %v3155_v33 = vpop.f32.mrb[75].mxu1 }
 0x1e8   : > { %v2062_v34 = vadd.f32 %v2057_v19, %v2016_v31 }
 0x1eb   : > { %v2105_v35 = vpop.f32.mrb[72].mxu0  ;;  %v2243_v36 = vpop.f32.mrb[76].mxu1 }
 0x1ec   : > { %v2112_v37 = vadd.f32 %v2105_v35, %v2061_v30  ;;  %v3148_v39 = vpop.f32.mrb[73].mxu0  ;;  %v3166_v40 = vpop.f32.mrb[77].mxu1 }
 0x1ed   : > { %v2108_v41 = vpop.f32.mrb[74].mxu0  ;;  %v2246_v42 = vpop.f32.mrb[78].mxu1 }
 0x1ee   : > { %v2158_v43 = vadd.f32 %v2151_v23, %v2112_v37  ;;  %v2113_v44 = vadd.f32 %v2108_v41, %v2062_v34  ;;  %v3149_v45 = vpop.f32.mrb[75].mxu0  ;;  %v3167_v46 = vpop.f32.mrb[79].mxu1 }
 0x1f0   : > { %v2159_v47 = vadd.f32 %v2154_v29, %v2113_v44 }
 0x1f3   : > { %v2197_v48 = vpop.f32.mrb[76].mxu0  ;;  %v2340_v49 = vpop.f32.mrb[80].mxu1 }
 0x1f4   : > { %v2204_v50 = vadd.f32 %v2197_v48, %v2158_v43  ;;  %v3160_v51 = vpop.f32.mrb[77].mxu0  ;;  %v3178_v52 = vpop.f32.mrb[81].mxu1 }
 0x1f5   : > { %v2200_v53 = vpop.f32.mrb[78].mxu0  ;;  %v2343_v54 = vpop.f32.mrb[82].mxu1 }
 0x1f6   : > { %v2250_v55 = vadd.f32 %v2243_v36, %v2204_v50  ;;  %v2205_v56 = vadd.f32 %v2200_v53, %v2159_v47  ;;  %v3161_v57 = vpop.f32.mrb[79].mxu0  ;;  %v3179_v58 = vpop.f32.mrb[83].mxu1 }
 0x1f8   : > { %v2251_v59 = vadd.f32 %v2246_v42, %v2205_v56 }
 0x1fb   : > { %v2294_v60 = vpop.f32.mrb[80].mxu0  ;;  %v2432_v61 = vpop.f32.mrb[84].mxu1 }
 0x1fc   : > { %v2301_v62 = vadd.f32 %v2294_v60, %v2250_v55  ;;  %v3172_v63 = vpop.f32.mrb[81].mxu0  ;;  %v3190_v1 = vpop.f32.mrb[85].mxu1 }
 0x1fd   : > { %v2297_v2 = vpop.f32.mrb[82].mxu0  ;;  %v2435_v3 = vpop.f32.mrb[86].mxu1 }
 0x1fe   : > { %v2347_v4 = vadd.f32 %v2340_v49, %v2301_v62  ;;  %v2302_v5 = vadd.f32 %v2297_v2, %v2251_v59  ;;  %v3173_v6 = vpop.f32.mrb[83].mxu0  ;;  %v3191_v7 = vpop.f32.mrb[87].mxu1 }
 0x200   : > { %v2348_v8 = vadd.f32 %v2343_v54, %v2302_v5 }
 0x203   : > { %v2386_v9 = vpop.f32.mrb[84].mxu0  ;;  %v2530_v10 = vpop.f32.mrb[88].mxu1 }
 0x204   : > { %v2393_v11 = vadd.f32 %v2386_v9, %v2347_v4  ;;  %v3184_v12 = vpop.f32.mrb[85].mxu0  ;;  %v3202_v13 = vpop.f32.mrb[89].mxu1 }
 0x205   : > { %v2389_v14 = vpop.f32.mrb[86].mxu0  ;;  %v2533_v15 = vpop.f32.mrb[90].mxu1 }
 0x206   : > { %v2439_v16 = vadd.f32 %v2432_v61, %v2393_v11  ;;  %v2394_v17 = vadd.f32 %v2389_v14, %v2348_v8  ;;  %v3185_v18 = vpop.f32.mrb[87].mxu0  ;;  %v3203_v19 = vpop.f32.mrb[91].mxu1 }
 0x208   : > { %v2440_v20 = vadd.f32 %v2435_v3, %v2394_v17 }
 0x20b   : > { %v2484_v21 = vpop.f32.mrb[88].mxu0  ;;  %v2622_v22 = vpop.f32.mrb[92].mxu1 }
 0x20c   : > { %v2491_v0 = vadd.f32 %v2484_v21, %v2439_v16  ;;  %v3196_v23 = vpop.f32.mrb[89].mxu0  ;;  %v3214_v24 = vpop.f32.mrb[93].mxu1 }
 0x20d   : > { %v2487_v25 = vpop.f32.mrb[90].mxu0  ;;  %v2625_v27 = vpop.f32.mrb[94].mxu1 }
 0x20e   : > { %v2537_v28 = vadd.f32 %v2530_v10, %v2491_v0  ;;  %v2492_v29 = vadd.f32 %v2487_v25, %v2440_v20  ;;  %v3197_v30 = vpop.f32.mrb[91].mxu0  ;;  %v3215_v31 = vpop.f32.mrb[95].mxu1 }
 0x210   : > { %v2538_v32 = vadd.f32 %v2533_v15, %v2492_v29 }
 0x213   : > { %v2576_v33 = vpop.f32.mrb[92].mxu0 }
 0x214   : > { %v2583_v34 = vadd.f32 %v2576_v33, %v2537_v28  ;;  %v3208_v35 = vpop.f32.mrb[93].mxu0 }
 0x215   : > { %v2579_v36 = vpop.f32.mrb[94].mxu0 }
 0x216   : > { %v2629_v37 = vadd.f32 %v2622_v22, %v2583_v34  ;;  %v2584_v39 = vadd.f32 %v2579_v36, %v2538_v32  ;;  %v3209_v40 = vpop.f32.mrb[95].mxu0 }
 0x218   : > { %v2631_v41 = vadd.f32 %v2629_v37, %v3759_v26  ;;  %v2630_v42 = vadd.f32 %v2625_v27, %v2584_v39 }
 0x21a   : > { %2828 = vst.msk [vmem:[%s3766_s8 + $0x20] sm:$0xff] %vm1117_vm2, %v2631_v41  ;;  %v2632_v43 = vadd.f32 %v2630_v42, %v3768_v38 }
 0x21c   : > { %2829 = vst.msk [vmem:[%s3766_s8 + $0x28] sm:$0xff] %vm1117_vm2, %v2632_v43 }
 0x21d PF: > { %s13_s12 = sadd.s32 1, %s3267_s12  }
 0x21e   : > { %p10_p4 = scmp.ge.s32.totalorder %s13_s12, 4  }
 0x220   :  { %12 = sbr.rel (!%p10_p4) target bundleno = 1 (0x1), region = 84 }

// kernel: nlayer_discriminator_forward.4
= control target key start
LH: loop header
LB: loop body
LE: loop exit
PB: predicated region body
PF: predicated region fallthrough
CT: control target
= control target key end

     0   :  { %s4621_s12 = smov 0   ;;  %s5358_s0 = inlined_call_operand.vmem [shape: bf16[16,16,16], index: 0, kind: input, shape index: {}]   ;;  %s5359_s1 = inlined_call_operand.vmem [shape: f32[3,16,1], index: 1, kind: input, shape index: {}]   ;;  %s5360_s2 = inlined_call_operand.vmem [shape: bf16[2,20,16,5], index: 2, kind: input, shape index: {}]   ;;  %s5361_s3 = inlined_call_operand.vmem [shape: bf16[2,4,16,4], index: 3, kind: output, shape index: {}]  }
   0x1 LB: > { %s3765_s13 = sadd.s32 4294967295, %s4595_s12   ;;  %p3769_p0 = scmp.ge.s32.totalorder %s4595_s12, 1  ;;  %s4595_s12 = sphi %s4621_s12, %s13_s12  }
   0x2   : > { %p137_p1 = scmp.lt.s32.totalorder %s4595_s12, 3 }
   0x4   : > { %p138_p2 = pnand %p3769_p0, %p137_p1 }
   0x5   : > { %p161_p3 = scmp.lt.s32.totalorder (!%p138_p2), %s3765_s13, 1  ;;  %v4597_v0 = vmov (!%p138_p2), 0.0   ;;  %vm4598_vm0 = vmmov (!%p138_p2), 0   ;;  %v4646_v1 = vld [vmem:[%s5358_s0] sm:$0xff] (!%p138_p2)   ;;  %v4652_v3 = vld [vmem:[%s5358_s0 + $0x8] sm:$0xff] (!%p138_p2)   ;;  %s4599_s22 = smov (!%p138_p2), 127  }
   0x6   : > { %141 = sbr.rel (%p138_p2) target bundleno = 646 (0x286), region = 32  ;;  %4134 = vmatprep.subr.bf16.mxu0 (!%p138_p2), %v4597_v0  ;;  %4136 = vmatprep.mubr.msk.bf16.mxu0 (!%p138_p2), %vm4598_vm0, %v4597_v0  ;;  %vm243_vm1 = vcmask (!%p138_p2), 130048   ;;  %v4815_v35 = vld [vmem:[%s5358_s0 + $0x10] sm:$0xff] (!%p138_p2)   ;;  %v4828_v38 = vld [vmem:[%s5358_s0 + $0x18] sm:$0xff] (!%p138_p2)   ;;  %v4840_v39 = vld [vmem:[%s5358_s0 + $0x20] sm:$0xff] (!%p138_p2)   ;;  %v4600_v45 = vmov (!%p138_p2), 0  }
   0x7   : > { %4140 = vmatprep.subr.bf16.mxu1 (!%p138_p2), %v4597_v0  ;;  %4142 = vmatprep.mubr.msk.bf16.mxu1 (!%p138_p2), %vm4598_vm0, %v4597_v0  ;;  %v4851_v41 = vld [vmem:[%s5358_s0 + $0x28] sm:$0xff] (!%p138_p2)   ;;  %v219_v42 = vld [vmem:[%s5359_s1] sm:$0xff] (!%p138_p2)  ;;  %v4867_v46 = vld [vmem:[%s5358_s0 + $0x30] sm:$0xff] (!%p138_p2)   ;;  %vm1147_vm2 = vcmask (!%p138_p2), 31744   ;;  %vm1217_vm5 = vcmask (!%p138_p2), 27648  }
   0x8   : > { %v220_v43 = vld [vmem:[%s5359_s1 + $0x8] sm:$0xff] (!%p138_p2)  ;;  %4531 = vset.pattern.permute.xlu0 (!%p138_p2), %v4600_v45  ;;  %4532 = vset.pattern.permute.xlu1 (!%p138_p2), %v4600_v45  ;;  %v4877_v47 = vld [vmem:[%s5358_s0 + $0x38] sm:$0xff] (!%p138_p2)   ;;  %v4888_v48 = vld [vmem:[%s5358_s0 + $0x40] sm:$0xff] (!%p138_p2)  }
   0x9   : > { %v4899_v50 = vld [vmem:[%s5358_s0 + $0x48] sm:$0xff] (!%p138_p2)   ;;  %v4909_v52 = vld [vmem:[%s5358_s0 + $0x50] sm:$0xff] (!%p138_p2)   ;;  %v4919_v53 = vld [vmem:[%s5358_s0 + $0x58] sm:$0xff] (!%p138_p2)  }
   0xa   : > { %v4930_v54 = vld [vmem:[%s5358_s0 + $0x60] sm:$0xff] (!%p138_p2)   ;;  %v4941_v56 = vld [vmem:[%s5358_s0 + $0x68] sm:$0xff] (!%p138_p2)   ;;  %v4951_v58 = vld [vmem:[%s5358_s0 + $0x70] sm:$0xff] (!%p138_p2)  }
   0xb   : > { %v4961_v59 = vld [vmem:[%s5358_s0 + $0x78] sm:$0xff] (!%p138_p2)   ;;  %v3803_v60 = vld [vmem:[%s5359_s1 + $0x10] sm:$0xff] (!%p138_p2)  ;;  %v3805_v62 = vld [vmem:[%s5359_s1 + $0x20] sm:$0xff] (!%p138_p2) }
   0xc   : > { %v3804_v61 = vld [vmem:[%s5359_s1 + $0x18] sm:$0xff] (!%p138_p2)  ;;  %v3806_v63 = vld [vmem:[%s5359_s1 + $0x28] sm:$0xff] (!%p138_p2) }
   0xd   : > { %s5363_s13 = smov (!%p161_p3, %s3765_s13), 1 }
   0xe   : > { %s4518_s14 = smul.u32 160, %s5363_s13  ;;  %s3997_s11 = sshll.u32 %s5363_s13, 5 }
   0xf   : > { %s5283_s16 = scalar_lea.vmem %s5361_s3, %s3997_s11 }
  0x10   : > { %s4641_s17 = scalar_lea.vmem %s5360_s2, %s4518_s14 }
  0x11   : > { %v4533_v2 = vld [vmem:[%s4641_s17] sm:$0xff]   ;;  %v4534_v4 = vld [vmem:[%s4641_s17 + $0x28] sm:$0xff]   ;;  %v4657_v5 = vld [vmem:[%s4641_s17 + $0x50] sm:$0xff]  }
  0x12   : > { %348 = vrot.lane.b32.xlu0 %v4533_v2, %s4599_s22  ;;  %4141 = vmatpush3.bf16.msra.mxu1 %v4533_v2  ;;  %v4663_v6 = vld [vmem:[%s4641_s17 + $0x78] sm:$0xff]   ;;  %v4670_v7 = vld [vmem:[%s4641_s17 + $0x8] sm:$0xff]   ;;  %v4681_v8 = vld [vmem:[%s4641_s17 + $0x30] sm:$0xff]  }
  0x13   : > { %4135 = vmatpush3.bf16.msra.mxu0 %v4534_v4  ;;  %4152 = vmatprep.subr.bf16.mxu1 %v4597_v0  ;;  %v4686_v9 = vld [vmem:[%s4641_s17 + $0x58] sm:$0xff]   ;;  %v4691_v10 = vld [vmem:[%s4641_s17 + $0x80] sm:$0xff]   ;;  %v4696_v11 = vld [vmem:[%s4641_s17 + $0x8] sm:$0xff]  }
  0x14   : > { %576 = vrot.lane.b32.xlu1 %v4657_v5, %s4599_s22  ;;  %4146 = vmatprep.subr.bf16.mxu0 %v4597_v0  ;;  %v4701_v12 = vld [vmem:[%s4641_s17 + $0x30] sm:$0xff]   ;;  %v4706_v13 = vld [vmem:[%s4641_s17 + $0x58] sm:$0xff]   ;;  %v4711_v14 = vld [vmem:[%s4641_s17 + $0x80] sm:$0xff]  }
  0x15   : > { %4143 = vmatmul.mubr.msk.bf16.vlgmr.msra.gmra.mrb[0].mxu1 %vm243_vm1, %v4646_v1  ;;  %v4716_v15 = vld [vmem:[%s4641_s17 + $0x10] sm:$0xff]   ;;  %v4721_v16 = vld [vmem:[%s4641_s17 + $0x38] sm:$0xff]   ;;  %v4724_v17 = vld [vmem:[%s4641_s17 + $0x60] sm:$0xff]  }
  0x16   : > { %402 = vrot.lane.b32.xlu0 %v4534_v4, %s4599_s22  ;;  %4137 = vmatmul.mubr.msk.bf16.vlgmr.msra.gmra.mrb[0].mxu0 %vm243_vm1, %v4652_v3  ;;  %v4729_v18 = vld [vmem:[%s4641_s17 + $0x88] sm:$0xff]   ;;  %v4734_v19 = vld [vmem:[%s4641_s17 + $0x10] sm:$0xff]   ;;  %v4741_v20 = vld [vmem:[%s4641_s17 + $0x38] sm:$0xff]  }
  0x17   : > { %4148 = vmatprep.mubr.msk.bf16.mxu0 %vm4598_vm0, %v4597_v0  ;;  %4154 = vmatprep.mubr.msk.bf16.mxu1 %vm4598_vm0, %v4597_v0  ;;  %v4744_v21 = vld [vmem:[%s4641_s17 + $0x60] sm:$0xff]   ;;  %v4751_v22 = vld [vmem:[%s4641_s17 + $0x88] sm:$0xff]   ;;  %v4756_v23 = vld [vmem:[%s4641_s17 + $0x18] sm:$0xff]  }
  0x18   : > { %630 = vrot.lane.b32.xlu1 %v4663_v6, %s4599_s22  ;;  %v4761_v24 = vld [vmem:[%s4641_s17 + $0x40] sm:$0xff]   ;;  %v4768_v25 = vld [vmem:[%s4641_s17 + $0x68] sm:$0xff]   ;;  %v4773_v26 = vld [vmem:[%s4641_s17 + $0x90] sm:$0xff]  }
  0x19   : > { %v4778_v27 = vld [vmem:[%s4641_s17 + $0x18] sm:$0xff]   ;;  %v4783_v28 = vld [vmem:[%s4641_s17 + $0x40] sm:$0xff]   ;;  %v4788_v29 = vld [vmem:[%s4641_s17 + $0x68] sm:$0xff]  }
  0x1a   : > { %804 = vrot.lane.b32.xlu0 %v4670_v7, %s4599_s22  ;;  %v4793_v30 = vld [vmem:[%s4641_s17 + $0x90] sm:$0xff]   ;;  %v4798_v31 = vld [vmem:[%s4641_s17 + $0x20] sm:$0xff]   ;;  %v4803_v32 = vld [vmem:[%s4641_s17 + $0x48] sm:$0xff]  }
  0x1b   : > { %v4808_v33 = vld [vmem:[%s4641_s17 + $0x70] sm:$0xff]   ;;  %v4818_v36 = vld [vmem:[%s4641_s17 + $0x98] sm:$0xff]  }
  0x1c   : > { %858 = vrot.lane.b32.xlu1 %v4681_v8, %s4599_s22 }
  0x1e   : > { %1032 = vrot.lane.b32.xlu0 %v4686_v9, %s4599_s22 }
  0x20   : > { %1086 = vrot.lane.b32.xlu1 %v4691_v10, %s4599_s22 }
  0x22   : > { %1318 = vrot.lane.b32.xlu0 %v4696_v11, %s4599_s22 }
  0x24   : > { %1364 = vrot.lane.b32.xlu1 %v4701_v12, %s4599_s22 }
  0x26   : > { %1512 = vrot.lane.b32.xlu0 %v4706_v13, %s4599_s22 }
  0x28   : > { %1558 = vrot.lane.b32.xlu1 %v4711_v14, %s4599_s22 }
  0x2a   : > { %1708 = vrot.lane.b32.xlu0 %v4716_v15, %s4599_s22 }
  0x2c   : > { %1754 = vrot.lane.b32.xlu1 %v4721_v16, %s4599_s22 }
  0x2e   : > { %1904 = vrot.lane.b32.xlu0 %v4724_v17, %s4599_s22 }
  0x30   : > { %1950 = vrot.lane.b32.xlu1 %v4729_v18, %s4599_s22 }
  0x32   : > { %2148 = vrot.lane.b32.xlu0 %v4734_v19, %s4599_s22 }
  0x34   : > { %2194 = vrot.lane.b32.xlu1 %v4741_v20, %s4599_s22 }
  0x36   : > { %2342 = vrot.lane.b32.xlu0 %v4744_v21, %s4599_s22 }
  0x38   : > { %2388 = vrot.lane.b32.xlu1 %v4751_v22, %s4599_s22 }
  0x3a   : > { %2538 = vrot.lane.b32.xlu0 %v4756_v23, %s4599_s22 }
  0x3c   : > { %2584 = vrot.lane.b32.xlu1 %v4761_v24, %s4599_s22 }
  0x3e   : > { %2734 = vrot.lane.b32.xlu0 %v4768_v25, %s4599_s22 }
  0x40   : > { %2780 = vrot.lane.b32.xlu1 %v4773_v26, %s4599_s22 }
  0x42   : > { %2978 = vrot.lane.b32.xlu0 %v4778_v27, %s4599_s22 }
  0x44   : > { %3024 = vrot.lane.b32.xlu1 %v4783_v28, %s4599_s22 }
  0x46   : > { %3172 = vrot.lane.b32.xlu0 %v4788_v29, %s4599_s22 }
  0x48   : > { %3218 = vrot.lane.b32.xlu1 %v4793_v30, %s4599_s22 }
  0x4a   : > { %3368 = vrot.lane.b32.xlu0 %v4798_v31, %s4599_s22 }
  0x4c   : > { %3414 = vrot.lane.b32.xlu1 %v4803_v32, %s4599_s22 }
  0x4e   : > { %3564 = vrot.lane.b32.xlu0 %v4808_v33, %s4599_s22 }
  0x50   : > { %3610 = vrot.lane.b32.xlu1 %v4818_v36, %s4599_s22 }
  0x52   : > { %1137 = vperm.xlu0 %4531, %v219_v42  }
  0x54   : > { %1142 = vperm.xlu1 %4532, %v220_v43  }
  0x56   : > { %1186 = vperm.xlu0 %4531, %v3804_v61  }
  0x58   : > { %1181 = vperm.xlu1 %4532, %v3803_v60  }
  0x5a   : > { %1198 = vperm.xlu0 %4531, %v3806_v63  }
  0x5c   : > { %1193 = vperm.xlu1 %4532, %v3805_v62  }
  0x84   : > { %v349_v34 = vpop.permute.xlu0 %348 }
  0x85   : > { %4147 = vmatpush3.bf16.msra.mxu0 %v349_v34 }
  0x86   : > { %4158 = vmatprep.subr.bf16.mxu0 %v4597_v0  ;;  %v577_v40 = vpop.permute.xlu1 %576 }
  0x88   : > { %4149 = vmatmul.mubr.msk.bf16.vlgmr.msra.gmra.mrb[4].mxu0 %vm243_vm1, %v4815_v35  ;;  %v403_v37 = vpop.permute.xlu0 %402 }
  0x89   : > { %4153 = vmatpush3.bf16.msra.mxu1 %v403_v37  ;;  %4159 = vmatpush3.bf16.msra.mxu0 %v4657_v5 }
  0x8a   : > { %4160 = vmatprep.mubr.msk.bf16.mxu0 %vm4598_vm0, %v4597_v0  ;;  %4164 = vmatprep.subr.bf16.mxu1 %v4597_v0  ;;  %v631_v44 = vpop.permute.xlu1 %630 }
  0x8b   : > { %4170 = vmatprep.subr.bf16.mxu0 %v4597_v0 }
  0x8c   : > { %4155 = vmatmul.mubr.msk.bf16.vlgmr.msra.gmra.mrb[4].mxu1 %vm243_vm1, %v4828_v38  ;;  %v805_v49 = vpop.permute.xlu0 %804 }
  0x8d   : > { %4165 = vmatpush3.bf16.msra.mxu1 %v4663_v6  ;;  %4166 = vmatprep.mubr.msk.bf16.mxu1 %vm4598_vm0, %v4597_v0 }
  0x8e   : > { %4176 = vmatprep.subr.bf16.mxu1 %v4597_v0  ;;  %v859_v51 = vpop.permute.xlu1 %858 }
  0x90   : > { %4161 = vmatmul.mubr.msk.bf16.vlgmr.msra.gmra.mrb[8].mxu0 %vm243_vm1, %v4840_v39  ;;  %v1033_v55 = vpop.permute.xlu0 %1032 }
  0x91   : > { %4171 = vmatpush3.bf16.msra.mxu0 %v577_v40  ;;  %4172 = vmatprep.mubr.msk.bf16.mxu0 %vm4598_vm0, %v4597_v0 }
  0x92   : > { %4182 = vmatprep.subr.bf16.mxu0 %v4597_v0  ;;  %v1087_v57 = vpop.permute.xlu1 %1086 }
  0x94   : > { %4167 = vmatmul.mubr.msk.bf16.vlgmr.msra.gmra.mrb[8].mxu1 %vm243_vm1, %v4851_v41  ;;  %v1319_v2 = vpop.permute.xlu0 %1318 }
  0x95   : > { %4177 = vmatpush3.bf16.msra.mxu1 %v631_v44  ;;  %4178 = vmatprep.mubr.msk.bf16.mxu1 %vm4598_vm0, %v4597_v0 }
  0x96   : > { %4188 = vmatprep.subr.bf16.mxu1 %v4597_v0  ;;  %v1365_v4 = vpop.permute.xlu1 %1364 }
  0x98   : > { %4173 = vmatmul.mubr.msk.bf16.vlgmr.msra.gmra.mrb[12].mxu0 %vm243_vm1, %v4867_v46  ;;  %v1513_v5 = vpop.permute.xlu0 %1512 }
  0x99   : > { %4183 = vmatpush3.bf16.msra.mxu0 %v4670_v7  ;;  %4184 = vmatprep.mubr.msk.bf16.mxu0 %vm4598_vm0, %v4597_v0 }
  0x9a   : > { %4194 = vmatprep.subr.bf16.mxu0 %v4597_v0  ;;  %v1559_v6 = vpop.permute.xlu1 %1558 }
  0x9c   : > { %4179 = vmatmul.mubr.msk.bf16.vlgmr.msra.gmra.mrb[12].mxu1 %vm243_vm1, %v4877_v47  ;;  %v1709_v7 = vpop.permute.xlu0 %1708 }
  0x9d   : > { %4189 = vmatpush3.bf16.msra.mxu1 %v4681_v8  ;;  %4190 = vmatprep.mubr.msk.bf16.mxu1 %vm4598_vm0, %v4597_v0 }
  0x9e   : > { %4200 = vmatprep.subr.bf16.mxu1 %v4597_v0  ;;  %v1755_v8 = vpop.permute.xlu1 %1754 }
  0xa0   : > { %4185 = vmatmul.mubr.msk.bf16.vlgmr.msra.gmra.mrb[16].mxu0 %vm243_vm1, %v4888_v48 }
  0xa1   : > { %4195 = vmatpush3.bf16.msra.mxu0 %v805_v49  ;;  %4196 = vmatprep.mubr.msk.bf16.mxu0 %vm4598_vm0, %v4597_v0 }
  0xa2   : > { %4206 = vmatprep.subr.bf16.mxu0 %v4597_v0  ;;  %v1951_v40 = vpop.permute.xlu1 %1950 }
  0xa4   : > { %4191 = vmatmul.mubr.msk.bf16.vlgmr.msra.gmra.mrb[16].mxu1 %vm243_vm1, %v4899_v50 }
  0xa5   : > { %4201 = vmatpush3.bf16.msra.mxu1 %v859_v51  ;;  %4202 = vmatprep.mubr.msk.bf16.mxu1 %vm4598_vm0, %v4597_v0 }
  0xa6   : > { %4212 = vmatprep.subr.bf16.mxu1 %v4597_v0 }
  0xa8   : > { %4197 = vmatmul.mubr.msk.bf16.vlgmr.msra.gmra.mrb[20].mxu0 %vm243_vm1, %v4909_v52 }
  0xa9   : > { %4207 = vmatpush3.bf16.msra.mxu0 %v4686_v9  ;;  %4208 = vmatprep.mubr.msk.bf16.mxu0 %vm4598_vm0, %v4597_v0 }
  0xaa   : > { %4218 = vmatprep.subr.bf16.mxu0 %v4597_v0 }
  0xac   : > { %4203 = vmatmul.mubr.msk.bf16.vlgmr.msra.gmra.mrb[20].mxu1 %vm243_vm1, %v4919_v53 }
  0xad   : > { %4213 = vmatpush3.bf16.msra.mxu1 %v4691_v10  ;;  %4214 = vmatprep.mubr.msk.bf16.mxu1 %vm4598_vm0, %v4597_v0 }
  0xae   : > { %4224 = vmatprep.subr.bf16.mxu1 %v4597_v0 }
  0xb0   : > { %4209 = vmatmul.mubr.msk.bf16.vlgmr.msra.gmra.mrb[24].mxu0 %vm243_vm1, %v4930_v54 }
  0xb1   : > { %4219 = vmatpush3.bf16.msra.mxu0 %v1033_v55  ;;  %4220 = vmatprep.mubr.msk.bf16.mxu0 %vm4598_vm0, %v4597_v0 }
  0xb2   : > { %4230 = vmatprep.subr.bf16.mxu0 %v4597_v0 }
  0xb4   : > { %4215 = vmatmul.mubr.msk.bf16.vlgmr.msra.gmra.mrb[24].mxu1 %vm243_vm1, %v4941_v56 }
  0xb5   : > { %4225 = vmatpush3.bf16.msra.mxu1 %v1087_v57  ;;  %4226 = vmatprep.mubr.msk.bf16.mxu1 %vm4598_vm0, %v4597_v0 }
  0xb6   : > { %4236 = vmatprep.subr.bf16.mxu1 %v4597_v0 }
  0xb8   : > { %4221 = vmatmul.mubr.msk.bf16.vlgmr.msra.gmra.mrb[28].mxu0 %vm243_vm1, %v4951_v58 }
  0xb9   : > { %4231 = vmatpush3.bf16.msra.mxu0 %v4701_v12  ;;  %4232 = vmatprep.mubr.msk.bf16.mxu0 %vm4598_vm0, %v4597_v0 }
  0xba   : > { %4242 = vmatprep.subr.bf16.mxu0 %v4597_v0 }
  0xbc   : > { %4227 = vmatmul.mubr.msk.bf16.vlgmr.msra.gmra.mrb[28].mxu1 %vm243_vm1, %v4961_v59 }
  0xbd   : > { %4237 = vmatpush3.bf16.msra.mxu1 %v4696_v11  ;;  %4238 = vmatprep.mubr.msk.bf16.mxu1 %vm4598_vm0, %v4597_v0 }
  0xbe   : > { %4248 = vmatprep.subr.bf16.mxu1 %v4597_v0 }
  0xc0   : > { %4233 = vmatmul.mubr.msk.bf16.vlgmr.msra.gmra.mrb[32].mxu0 %vm243_vm1, %v4652_v3 }
  0xc1   : > { %4243 = vmatpush3.bf16.msra.mxu0 %v1319_v2  ;;  %4244 = vmatprep.mubr.msk.bf16.mxu0 %vm4598_vm0, %v4597_v0 }
  0xc2   : > { %4254 = vmatprep.subr.bf16.mxu0 %v4597_v0 }
  0xc4   : > { %4239 = vmatmul.mubr.msk.bf16.vlgmr.msra.gmra.mrb[32].mxu1 %vm243_vm1, %v4646_v1 }
  0xc5   : > { %4249 = vmatpush3.bf16.msra.mxu1 %v1365_v4  ;;  %4250 = vmatprep.mubr.msk.bf16.mxu1 %vm4598_vm0, %v4597_v0 }
  0xc6   : > { %4260 = vmatprep.subr.bf16.mxu1 %v4597_v0 }
  0xc8   : > { %4245 = vmatmul.mubr.msk.bf16.vlgmr.msra.gmra.mrb[36].mxu0 %vm243_vm1, %v4815_v35 }
  0xc9   : > { %4255 = vmatpush3.bf16.msra.mxu0 %v4706_v13  ;;  %4256 = vmatprep.mubr.msk.bf16.mxu0 %vm4598_vm0, %v4597_v0 }
  0xca   : > { %4266 = vmatprep.subr.bf16.mxu0 %v4597_v0 }
  0xcc   : > { %4251 = vmatmul.mubr.msk.bf16.vlgmr.msra.gmra.mrb[36].mxu1 %vm243_vm1, %v4828_v38 }
  0xcd   : > { %4261 = vmatpush3.bf16.msra.mxu1 %v4711_v14  ;;  %4262 = vmatprep.mubr.msk.bf16.mxu1 %vm4598_vm0, %v4597_v0 }
  0xce   : > { %4272 = vmatprep.subr.bf16.mxu1 %v4597_v0 }
  0xd0   : > { %4257 = vmatmul.mubr.msk.bf16.vlgmr.msra.gmra.mrb[40].mxu0 %vm243_vm1, %v4840_v39 }
  0xd1   : > { %4267 = vmatpush3.bf16.msra.mxu0 %v1513_v5  ;;  %4268 = vmatprep.mubr.msk.bf16.mxu0 %vm4598_vm0, %v4597_v0 }
  0xd2   : > { %4278 = vmatprep.subr.bf16.mxu0 %v4597_v0 }
  0xd4   : > { %4263 = vmatmul.mubr.msk.bf16.vlgmr.msra.gmra.mrb[40].mxu1 %vm243_vm1, %v4851_v41 }
  0xd5   : > { %4273 = vmatpush3.bf16.msra.mxu1 %v1559_v6  ;;  %4274 = vmatprep.mubr.msk.bf16.mxu1 %vm4598_vm0, %v4597_v0 }
  0xd6   : > { %4284 = vmatprep.subr.bf16.mxu1 %v4597_v0 }
  0xd8   : > { %4269 = vmatmul.mubr.msk.bf16.vlgmr.msra.gmra.mrb[44].mxu0 %vm243_vm1, %v4867_v46 }
  0xd9   : > { %4279 = vmatpush3.bf16.msra.mxu0 %v4716_v15  ;;  %4280 = vmatprep.mubr.msk.bf16.mxu0 %vm4598_vm0, %v4597_v0 }
  0xda   : > { %4290 = vmatprep.subr.bf16.mxu0 %v4597_v0 }
  0xdc   : > { %4275 = vmatmul.mubr.msk.bf16.vlgmr.msra.gmra.mrb[44].mxu1 %vm243_vm1, %v4877_v47 }
  0xdd   : > { %4285 = vmatpush3.bf16.msra.mxu1 %v4721_v16  ;;  %4286 = vmatprep.mubr.msk.bf16.mxu1 %vm4598_vm0, %v4597_v0 }
  0xde   : > { %4296 = vmatprep.subr.bf16.mxu1 %v4597_v0 }
  0xe0   : > { %4281 = vmatmul.mubr.msk.bf16.vlgmr.msra.gmra.mrb[48].mxu0 %vm243_vm1, %v4888_v48 }
  0xe1   : > { %4291 = vmatpush3.bf16.msra.mxu0 %v1709_v7  ;;  %4292 = vmatprep.mubr.msk.bf16.mxu0 %vm4598_vm0, %v4597_v0 }
  0xe2   : > { %4302 = vmatprep.subr.bf16.mxu0 %v4597_v0 }
  0xe4   : > { %4287 = vmatmul.mubr.msk.bf16.vlgmr.msra.gmra.mrb[48].mxu1 %vm243_vm1, %v4899_v50 }
  0xe5   : > { %4297 = vmatpush3.bf16.msra.mxu1 %v1755_v8  ;;  %4298 = vmatprep.mubr.msk.bf16.mxu1 %vm4598_vm0, %v4597_v0 }
  0xe6   : > { %4308 = vmatprep.subr.bf16.mxu1 %v4597_v0 }
  0xe8   : > { %4293 = vmatmul.mubr.msk.bf16.vlgmr.msra.gmra.mrb[52].mxu0 %vm243_vm1, %v4909_v52  ;;  %v336_v9 = vpop.f32.mrb[0].mxu1 }
  0xe9   : > { %4303 = vmatpush3.bf16.msra.mxu0 %v4724_v17  ;;  %4304 = vmatprep.mubr.msk.bf16.mxu0 %vm4598_vm0, %v4597_v0  ;;  %v281_v10 = vpop.f32.mrb[0].mxu0  ;;  %v4144_v11 = vpop.f32.mrb[1].mxu1 }
  0xea   : > { %4314 = vmatprep.subr.bf16.mxu0 %v4597_v0  ;;  %v4138_v12 = vpop.f32.mrb[1].mxu0  ;;  %v5045_v13 = vadd.f32 %v336_v9, %v281_v10  ;;  %v339_v14 = vpop.f32.mrb[2].mxu1 }
  0xeb   : > { %v284_v15 = vpop.f32.mrb[2].mxu0  ;;  %v4145_v16 = vpop.f32.mrb[3].mxu1 }
  0xec   : > { %4299 = vmatmul.mubr.msk.bf16.vlgmr.msra.gmra.mrb[52].mxu1 %vm243_vm1, %v4919_v53  ;;  %v4139_v34 = vpop.f32.mrb[3].mxu0  ;;  %v5049_v37 = vadd.f32 %v339_v14, %v284_v15  ;;  %v1905_v17 = vpop.permute.xlu0 %1904 }
  0xed   : > { %4309 = vmatpush3.bf16.msra.mxu1 %v4729_v18  ;;  %4310 = vmatprep.mubr.msk.bf16.mxu1 %vm4598_vm0, %v4597_v0 }
  0xee   : > { %4320 = vmatprep.subr.bf16.mxu1 %v4597_v0 }
  0xf0   : > { %4305 = vmatmul.mubr.msk.bf16.vlgmr.msra.gmra.mrb[56].mxu0 %vm243_vm1, %v4930_v54  ;;  %v2149_v18 = vpop.permute.xlu0 %2148 }
  0xf1   : > { %4315 = vmatpush3.bf16.msra.mxu0 %v1905_v17  ;;  %4316 = vmatprep.mubr.msk.bf16.mxu0 %vm4598_vm0, %v4597_v0 }
  0xf2   : > { %4326 = vmatprep.subr.bf16.mxu0 %v4597_v0 }
  0xf4   : > { %4311 = vmatmul.mubr.msk.bf16.vlgmr.msra.gmra.mrb[56].mxu1 %vm243_vm1, %v4941_v56 }
  0xf5   : > { %4321 = vmatpush3.bf16.msra.mxu1 %v1951_v40  ;;  %4322 = vmatprep.mubr.msk.bf16.mxu1 %vm4598_vm0, %v4597_v0 }
  0xf6   : > { %4332 = vmatprep.subr.bf16.mxu1 %v4597_v0 }
  0xf8   : > { %4317 = vmatmul.mubr.msk.bf16.vlgmr.msra.gmra.mrb[60].mxu0 %vm243_vm1, %v4951_v58 }
  0xf9   : > { %4327 = vmatpush3.bf16.msra.mxu0 %v4741_v20  ;;  %4328 = vmatprep.mubr.msk.bf16.mxu0 %vm4598_vm0, %v4597_v0  ;;  %v2195_v20 = vpop.permute.xlu1 %2194 }
  0xfa   : > { %4338 = vmatprep.subr.bf16.mxu0 %v4597_v0 }
  0xfc   : > { %4323 = vmatmul.mubr.msk.bf16.vlgmr.msra.gmra.mrb[60].mxu1 %vm243_vm1, %v4961_v59 }
  0xfd   : > { %4333 = vmatpush3.bf16.msra.mxu1 %v4734_v19  ;;  %4334 = vmatprep.mubr.msk.bf16.mxu1 %vm4598_vm0, %v4597_v0  ;;  %v2343_v19 = vpop.permute.xlu0 %2342 }
  0xfe   : > { %4344 = vmatprep.subr.bf16.mxu1 %v4597_v0 }
 0x100   : > { %4329 = vmatmul.mubr.msk.bf16.vlgmr.msra.gmra.mrb[64].mxu0 %vm243_vm1, %v4652_v3 }
 0x101   : > { %4339 = vmatpush3.bf16.msra.mxu0 %v2149_v18  ;;  %4340 = vmatprep.mubr.msk.bf16.mxu0 %vm4598_vm0, %v4597_v0 }
 0x102   : > { %4350 = vmatprep.subr.bf16.mxu0 %v4597_v0 }
 0x104   : > { %4335 = vmatmul.mubr.msk.bf16.vlgmr.msra.gmra.mrb[64].mxu1 %vm243_vm1, %v4646_v1 }
 0x105   : > { %4345 = vmatpush3.bf16.msra.mxu1 %v2195_v20  ;;  %4346 = vmatprep.mubr.msk.bf16.mxu1 %vm4598_vm0, %v4597_v0 }
 0x106   : > { %4356 = vmatprep.subr.bf16.mxu1 %v4597_v0 }
 0x108   : > { %4341 = vmatmul.mubr.msk.bf16.vlgmr.msra.gmra.mrb[68].mxu0 %vm243_vm1, %v4815_v35 }
 0x109   : > { %4351 = vmatpush3.bf16.msra.mxu0 %v4744_v21  ;;  %4352 = vmatprep.mubr.msk.bf16.mxu0 %vm4598_vm0, %v4597_v0  ;;  %v2389_v21 = vpop.permute.xlu1 %2388 }
 0x10a   : > { %4362 = vmatprep.subr.bf16.mxu0 %v4597_v0 }
 0x10c   : > { %4347 = vmatmul.mubr.msk.bf16.vlgmr.msra.gmra.mrb[68].mxu1 %vm243_vm1, %v4828_v38 }
 0x10d   : > { %4357 = vmatpush3.bf16.msra.mxu1 %v4751_v22  ;;  %4358 = vmatprep.mubr.msk.bf16.mxu1 %vm4598_vm0, %v4597_v0  ;;  %v2539_v22 = vpop.permute.xlu0 %2538 }
 0x10e   : > { %4368 = vmatprep.subr.bf16.mxu1 %v4597_v0 }
 0x110   : > { %4353 = vmatmul.mubr.msk.bf16.vlgmr.msra.gmra.mrb[72].mxu0 %vm243_vm1, %v4840_v39 }
 0x111   : > { %4363 = vmatpush3.bf16.msra.mxu0 %v2343_v19  ;;  %4364 = vmatprep.mubr.msk.bf16.mxu0 %vm4598_vm0, %v4597_v0 }
 0x112   : > { %4374 = vmatprep.subr.bf16.mxu0 %v4597_v0 }
 0x114   : > { %4359 = vmatmul.mubr.msk.bf16.vlgmr.msra.gmra.mrb[72].mxu1 %vm243_vm1, %v4851_v41 }
 0x115   : > { %4369 = vmatpush3.bf16.msra.mxu1 %v2389_v21  ;;  %4370 = vmatprep.mubr.msk.bf16.mxu1 %vm4598_vm0, %v4597_v0 }
 0x116   : > { %4380 = vmatprep.subr.bf16.mxu1 %v4597_v0 }
 0x118   : > { %4365 = vmatmul.mubr.msk.bf16.vlgmr.msra.gmra.mrb[76].mxu0 %vm243_vm1, %v4867_v46 }
 0x119   : > { %4375 = vmatpush3.bf16.msra.mxu0 %v4756_v23  ;;  %4376 = vmatprep.mubr.msk.bf16.mxu0 %vm4598_vm0, %v4597_v0  ;;  %v2585_v23 = vpop.permute.xlu1 %2584 }
 0x11a   : > { %4386 = vmatprep.subr.bf16.mxu0 %v4597_v0 }
 0x11c   : > { %4371 = vmatmul.mubr.msk.bf16.vlgmr.msra.gmra.mrb[76].mxu1 %vm243_vm1, %v4877_v47 }
 0x11d   : > { %4381 = vmatpush3.bf16.msra.mxu1 %v4761_v24  ;;  %4382 = vmatprep.mubr.msk.bf16.mxu1 %vm4598_vm0, %v4597_v0  ;;  %v2735_v24 = vpop.permute.xlu0 %2734 }
 0x11e   : > { %4392 = vmatprep.subr.bf16.mxu1 %v4597_v0 }
 0x120   : > { %4377 = vmatmul.mubr.msk.bf16.vlgmr.msra.gmra.mrb[80].mxu0 %vm243_vm1, %v4888_v48 }
 0x121   : > { %4387 = vmatpush3.bf16.msra.mxu0 %v2539_v22  ;;  %4388 = vmatprep.mubr.msk.bf16.mxu0 %vm4598_vm0, %v4597_v0 }
 0x122   : > { %4398 = vmatprep.subr.bf16.mxu0 %v4597_v0 }
 0x124   : > { %4383 = vmatmul.mubr.msk.bf16.vlgmr.msra.gmra.mrb[80].mxu1 %vm243_vm1, %v4899_v50 }
 0x125   : > { %4393 = vmatpush3.bf16.msra.mxu1 %v2585_v23  ;;  %4394 = vmatprep.mubr.msk.bf16.mxu1 %vm4598_vm0, %v4597_v0 }
 0x126   : > { %4404 = vmatprep.subr.bf16.mxu1 %v4597_v0 }
 0x128   : > { %4389 = vmatmul.mubr.msk.bf16.vlgmr.msra.gmra.mrb[84].mxu0 %vm243_vm1, %v4909_v52 }
 0x129   : > { %4399 = vmatpush3.bf16.msra.mxu0 %v4768_v25  ;;  %4400 = vmatprep.mubr.msk.bf16.mxu0 %vm4598_vm0, %v4597_v0  ;;  %v2781_v25 = vpop.permute.xlu1 %2780 }
 0x12a   : > { %4410 = vmatprep.subr.bf16.mxu0 %v4597_v0 }
 0x12c   : > { %4395 = vmatmul.mubr.msk.bf16.vlgmr.msra.gmra.mrb[84].mxu1 %vm243_vm1, %v4919_v53 }
 0x12d   : > { %4405 = vmatpush3.bf16.msra.mxu1 %v4773_v26  ;;  %4406 = vmatprep.mubr.msk.bf16.mxu1 %vm4598_vm0, %v4597_v0  ;;  %v2979_v26 = vpop.permute.xlu0 %2978 }
 0x12e   : > { %4416 = vmatprep.subr.bf16.mxu1 %v4597_v0 }
 0x130   : > { %4401 = vmatmul.mubr.msk.bf16.vlgmr.msra.gmra.mrb[88].mxu0 %vm243_vm1, %v4930_v54 }
 0x131   : > { %4411 = vmatpush3.bf16.msra.mxu0 %v2735_v24  ;;  %4412 = vmatprep.mubr.msk.bf16.mxu0 %vm4598_vm0, %v4597_v0 }
 0x132   : > { %4422 = vmatprep.subr.bf16.mxu0 %v4597_v0 }
 0x134   : > { %4407 = vmatmul.mubr.msk.bf16.vlgmr.msra.gmra.mrb[88].mxu1 %vm243_vm1, %v4941_v56 }
 0x135   : > { %4417 = vmatpush3.bf16.msra.mxu1 %v2781_v25  ;;  %4418 = vmatprep.mubr.msk.bf16.mxu1 %vm4598_vm0, %v4597_v0 }
 0x136   : > { %4428 = vmatprep.subr.bf16.mxu1 %v4597_v0 }
 0x138   : > { %4413 = vmatmul.mubr.msk.bf16.vlgmr.msra.gmra.mrb[92].mxu0 %vm243_vm1, %v4951_v58 }
 0x139   : > { %4423 = vmatpush3.bf16.msra.mxu0 %v4783_v28  ;;  %4424 = vmatprep.mubr.msk.bf16.mxu0 %vm4598_vm0, %v4597_v0  ;;  %v3025_v28 = vpop.permute.xlu1 %3024 }
 0x13a   : > { %4434 = vmatprep.subr.bf16.mxu0 %v4597_v0 }
 0x13c   : > { %4419 = vmatmul.mubr.msk.bf16.vlgmr.msra.gmra.mrb[92].mxu1 %vm243_vm1, %v4961_v59 }
 0x13d   : > { %4429 = vmatpush3.bf16.msra.mxu1 %v4778_v27  ;;  %4430 = vmatprep.mubr.msk.bf16.mxu1 %vm4598_vm0, %v4597_v0 }
 0x13e   : > { %4440 = vmatprep.subr.bf16.mxu1 %v4597_v0 }
 0x140   : > { %4425 = vmatmul.mubr.msk.bf16.vlgmr.msra.gmra.mrb[96].mxu0 %vm243_vm1, %v4652_v3  ;;  %v3219_v3 = vpop.permute.xlu1 %3218 }
 0x141   : > { %4435 = vmatpush3.bf16.msra.mxu0 %v2979_v26  ;;  %4436 = vmatprep.mubr.msk.bf16.mxu0 %vm4598_vm0, %v4597_v0 }
 0x142   : > { %4446 = vmatprep.subr.bf16.mxu0 %v4597_v0 }
 0x144   : > { %4431 = vmatmul.mubr.msk.bf16.vlgmr.msra.gmra.mrb[96].mxu1 %vm243_vm1, %v4646_v1  ;;  %v3173_v1 = vpop.permute.xlu0 %3172 }
 0x145   : > { %4441 = vmatpush3.bf16.msra.mxu1 %v3025_v28  ;;  %4442 = vmatprep.mubr.msk.bf16.mxu1 %vm4598_vm0, %v4597_v0 }
 0x146   : > { %4452 = vmatprep.subr.bf16.mxu1 %v4597_v0 }
 0x148   : > { %4437 = vmatmul.mubr.msk.bf16.vlgmr.msra.gmra.mrb[100].mxu0 %vm243_vm1, %v4815_v35 }
 0x149   : > { %4447 = vmatpush3.bf16.msra.mxu0 %v4788_v29  ;;  %4448 = vmatprep.mubr.msk.bf16.mxu0 %vm4598_vm0, %v4597_v0 }
 0x14a   : > { %4458 = vmatprep.subr.bf16.mxu0 %v4597_v0 }
 0x14c   : > { %4443 = vmatmul.mubr.msk.bf16.vlgmr.msra.gmra.mrb[100].mxu1 %vm243_vm1, %v4828_v38 }
 0x14d   : > { %4453 = vmatpush3.bf16.msra.mxu1 %v4793_v30  ;;  %4454 = vmatprep.mubr.msk.bf16.mxu1 %vm4598_vm0, %v4597_v0 }
 0x14e   : > { %4464 = vmatprep.subr.bf16.mxu1 %v4597_v0 }
 0x150   : > { %4449 = vmatmul.mubr.msk.bf16.vlgmr.msra.gmra.mrb[104].mxu0 %vm243_vm1, %v4840_v39  ;;  %v3369_v39 = vpop.permute.xlu0 %3368 }
 0x151   : > { %4459 = vmatpush3.bf16.msra.mxu0 %v3173_v1  ;;  %4460 = vmatprep.mubr.msk.bf16.mxu0 %vm4598_vm0, %v4597_v0 }
 0x152   : > { %4470 = vmatprep.subr.bf16.mxu0 %v4597_v0 }
 0x154   : > { %4455 = vmatmul.mubr.msk.bf16.vlgmr.msra.gmra.mrb[104].mxu1 %vm243_vm1, %v4851_v41  ;;  %v3565_v8 = vpop.permute.xlu0 %3564 }
 0x155   : > { %4465 = vmatpush3.bf16.msra.mxu1 %v3219_v3  ;;  %4466 = vmatprep.mubr.msk.bf16.mxu1 %vm4598_vm0, %v4597_v0 }
 0x156   : > { %4476 = vmatprep.subr.bf16.mxu1 %v4597_v0 }
 0x158   : > { %4461 = vmatmul.mubr.msk.bf16.vlgmr.msra.gmra.mrb[108].mxu0 %vm243_vm1, %v4867_v46  ;;  %v3415_v46 = vpop.permute.xlu1 %3414 }
 0x159   : > { %4471 = vmatpush3.bf16.msra.mxu0 %v4798_v31  ;;  %4472 = vmatprep.mubr.msk.bf16.mxu0 %vm4598_vm0, %v4597_v0 }
 0x15a   : > { %4482 = vmatprep.subr.bf16.mxu0 %v4597_v0 }
 0x15b   : > { %v388_v27 = vpop.f32.mrb[4].mxu0 }
 0x15c   : > { %v395_v29 = vadd.f32 %v388_v27, %v5045_v13  ;;  %v4150_v30 = vpop.f32.mrb[5].mxu0  ;;  %4467 = vmatmul.mubr.msk.bf16.vlgmr.msra.gmra.mrb[108].mxu1 %vm243_vm1, %v4877_v47  ;;  %v3611_v13 = vpop.permute.xlu1 %3610 }
 0x15d   : > { %v391_v35 = vpop.f32.mrb[6].mxu0  ;;  %4477 = vmatpush3.bf16.msra.mxu1 %v4803_v32  ;;  %4478 = vmatprep.mubr.msk.bf16.mxu1 %vm4598_vm0, %v4597_v0 }
 0x15e   : > { %v396_v31 = vadd.f32 %v391_v35, %v5049_v37  ;;  %v4151_v38 = vpop.f32.mrb[7].mxu0  ;;  %4488 = vmatprep.subr.bf16.mxu1 %v4597_v0 }
 0x15f   : > { %v442_v41 = vpop.f32.mrb[4].mxu1 }
 0x160   : > { %v449_v42 = vadd.f32 %v442_v41, %v395_v29  ;;  %v4156_v43 = vpop.f32.mrb[5].mxu1  ;;  %4473 = vmatmul.mubr.msk.bf16.vlgmr.msra.gmra.mrb[112].mxu0 %vm243_vm1, %v4888_v48 }
 0x161   : > { %v445_v44 = vpop.f32.mrb[6].mxu1  ;;  %4483 = vmatpush3.bf16.msra.mxu0 %v3369_v39  ;;  %4484 = vmatprep.mubr.msk.bf16.mxu0 %vm4598_vm0, %v4597_v0 }
 0x162   : > { %v450_v32 = vadd.f32 %v445_v44, %v396_v31  ;;  %v4157_v45 = vpop.f32.mrb[7].mxu1  ;;  %4494 = vmatprep.subr.bf16.mxu0 %v4597_v0 }
 0x163   : > { %v502_v47 = vpop.f32.mrb[8].mxu0 }
 0x164   : > { %v509_v49 = vadd.f32 %v502_v47, %v449_v42  ;;  %v4162_v51 = vpop.f32.mrb[9].mxu0  ;;  %4479 = vmatmul.mubr.msk.bf16.vlgmr.msra.gmra.mrb[112].mxu1 %vm243_vm1, %v4899_v50 }
 0x165   : > { %v505_v55 = vpop.f32.mrb[10].mxu0  ;;  %4489 = vmatpush3.bf16.msra.mxu1 %v3415_v46  ;;  %4490 = vmatprep.mubr.msk.bf16.mxu1 %vm4598_vm0, %v4597_v0 }
 0x166   : > { %v510_v48 = vadd.f32 %v505_v55, %v450_v32  ;;  %v4163_v57 = vpop.f32.mrb[11].mxu0  ;;  %4500 = vmatprep.subr.bf16.mxu1 %v4597_v0 }
 0x167   : > { %v562_v60 = vpop.f32.mrb[8].mxu1  ;;  %v5245_v57 = vpop.permute.xlu0 %1137 }
 0x168   : > { %v569_v61 = vadd.f32 %v562_v60, %v509_v49  ;;  %v4168_v62 = vpop.f32.mrb[9].mxu1  ;;  %4485 = vmatmul.mubr.msk.bf16.vlgmr.msra.gmra.mrb[116].mxu0 %vm243_vm1, %v4909_v52 }
 0x169   : > { %v565_v63 = vpop.f32.mrb[10].mxu1  ;;  %4495 = vmatpush3.bf16.msra.mxu0 %v4808_v33  ;;  %4496 = vmatprep.mubr.msk.bf16.mxu0 %vm4598_vm0, %v4597_v0 }
 0x16a   : > { %v570_v50 = vadd.f32 %v565_v63, %v510_v48  ;;  %v4169_v2 = vpop.f32.mrb[11].mxu1  ;;  %4506 = vmatprep.subr.bf16.mxu0 %v4597_v0  ;;  %v5247_v63 = vpop.permute.xlu1 %1142 }
 0x16b   : > { %v616_v4 = vpop.f32.mrb[12].mxu0 }
 0x16c   : > { %v623_v5 = vadd.f32 %v616_v4, %v569_v61  ;;  %v4174_v6 = vpop.f32.mrb[13].mxu0  ;;  %4491 = vmatmul.mubr.msk.bf16.vlgmr.msra.gmra.mrb[116].mxu1 %vm243_vm1, %v4919_v53 }
 0x16d   : > { %v619_v7 = vpop.f32.mrb[14].mxu0  ;;  %4501 = vmatpush3.bf16.msra.mxu1 %v4818_v36  ;;  %4502 = vmatprep.mubr.msk.bf16.mxu1 %vm4598_vm0, %v4597_v0 }
 0x16e   : > { %v624_v33 = vadd.f32 %v619_v7, %v570_v50  ;;  %v4175_v52 = vpop.f32.mrb[15].mxu0  ;;  %4512 = vmatprep.subr.bf16.mxu1 %v4597_v0 }
 0x16f   : > { %v670_v9 = vpop.f32.mrb[12].mxu1 }
 0x170   : > { %v677_v10 = vadd.f32 %v670_v9, %v623_v5  ;;  %v4180_v11 = vpop.f32.mrb[13].mxu1  ;;  %4497 = vmatmul.mubr.msk.bf16.vlgmr.msra.gmra.mrb[120].mxu0 %vm243_vm1, %v4930_v54 }
 0x171   : > { %v673_v12 = vpop.f32.mrb[14].mxu1  ;;  %4507 = vmatpush3.bf16.msra.mxu0 %v3565_v8  ;;  %4508 = vmatprep.mubr.msk.bf16.mxu0 %vm4598_vm0, %v4597_v0 }
 0x172   : > { %v678_v36 = vadd.f32 %v673_v12, %v624_v33  ;;  %v4181_v53 = vpop.f32.mrb[15].mxu1 }
 0x173   : > { %v730_v14 = vpop.f32.mrb[16].mxu0 }
 0x174   : > { %v737_v15 = vadd.f32 %v730_v14, %v677_v10  ;;  %v4186_v16 = vpop.f32.mrb[17].mxu0  ;;  %4503 = vmatmul.mubr.msk.bf16.vlgmr.msra.gmra.mrb[120].mxu1 %vm243_vm1, %v4941_v56 }
 0x175   : > { %v733_v34 = vpop.f32.mrb[18].mxu0  ;;  %4513 = vmatpush3.bf16.msra.mxu1 %v3611_v13  ;;  %4514 = vmatprep.mubr.msk.bf16.mxu1 %vm4598_vm0, %v4597_v0 }
 0x176   : > { %v738_v54 = vadd.f32 %v733_v34, %v678_v36  ;;  %v4187_v37 = vpop.f32.mrb[19].mxu0 }
 0x177   : > { %v790_v17 = vpop.f32.mrb[16].mxu1 }
 0x178   : > { %v797_v40 = vadd.f32 %v790_v17, %v737_v15  ;;  %v4192_v18 = vpop.f32.mrb[17].mxu1  ;;  %4509 = vmatmul.mubr.msk.bf16.vlgmr.msra.gmra.mrb[124].mxu0 %vm243_vm1, %v4951_v58 }
 0x179   : > { %v793_v20 = vpop.f32.mrb[18].mxu1 }
 0x17a   : > { %v798_v19 = vadd.f32 %v793_v20, %v738_v54  ;;  %v4193_v21 = vpop.f32.mrb[19].mxu1 }
 0x17b   : > { %v844_v22 = vpop.f32.mrb[20].mxu0 }
 0x17c   : > { %v851_v23 = vadd.f32 %v844_v22, %v797_v40  ;;  %v4198_v24 = vpop.f32.mrb[21].mxu0  ;;  %4515 = vmatmul.mubr.msk.bf16.vlgmr.msra.gmra.mrb[124].mxu1 %vm243_vm1, %v4961_v59 }
 0x17d   : > { %v847_v56 = vpop.f32.mrb[22].mxu0 }
 0x17e   : > { %v852_v25 = vadd.f32 %v847_v56, %v798_v19  ;;  %v4199_v0 = vpop.f32.mrb[23].mxu0 }
 0x17f   : > { %v898_v26 = vpop.f32.mrb[20].mxu1 }
 0x180   : > { %v905_v28 = vadd.f32 %v898_v26, %v851_v23  ;;  %v4204_v1 = vpop.f32.mrb[21].mxu1 }
 0x181   : > { %v901_v3 = vpop.f32.mrb[22].mxu1 }
 0x182   : > { %v906_v27 = vadd.f32 %v901_v3, %v852_v25  ;;  %v4205_v29 = vpop.f32.mrb[23].mxu1 }
 0x183   : > { %v958_v30 = vpop.f32.mrb[24].mxu0 }
 0x184   : > { %v965_v58 = vadd.f32 %v958_v30, %v905_v28  ;;  %v4210_v35 = vpop.f32.mrb[25].mxu0 }
 0x185   : > { %v961_v31 = vpop.f32.mrb[26].mxu0 }
 0x186   : > { %v966_v38 = vadd.f32 %v961_v31, %v906_v27  ;;  %v4211_v39 = vpop.f32.mrb[27].mxu0 }
 0x187   : > { %v1018_v41 = vpop.f32.mrb[24].mxu1 }
 0x188   : > { %v1025_v42 = vadd.f32 %v1018_v41, %v965_v58  ;;  %v4216_v43 = vpop.f32.mrb[25].mxu1 }
 0x189   : > { %v1021_v44 = vpop.f32.mrb[26].mxu1 }
 0x18a   : > { %v1026_v59 = vadd.f32 %v1021_v44, %v966_v38  ;;  %v4217_v32 = vpop.f32.mrb[27].mxu1 }
 0x18b   : > { %v1072_v45 = vpop.f32.mrb[28].mxu0 }
 0x18c   : > { %v1079_v46 = vadd.f32 %v1072_v45, %v1025_v42  ;;  %v4222_v47 = vpop.f32.mrb[29].mxu0 }
 0x18d   : > { %v1075_v49 = vpop.f32.mrb[30].mxu0 }
 0x18e   : > { %v1080_v51 = vadd.f32 %v1075_v49, %v1026_v59  ;;  %v4223_v55 = vpop.f32.mrb[31].mxu0 }
 0x18f   : > { %v1126_v48 = vpop.f32.mrb[28].mxu1 }
 0x190   : > { %v1133_v60 = vadd.f32 %v1126_v48, %v1079_v46  ;;  %v4228_v61 = vpop.f32.mrb[29].mxu1 }
 0x191   : > { %v1129_v62 = vpop.f32.mrb[30].mxu1 }
 0x192   : > { %v5250_v50 = vadd.f32 %v5245_v57, %v1133_v60  ;;  %v1134_v2 = vadd.f32 %v1129_v62, %v1080_v51  ;;  %v4229_v4 = vpop.f32.mrb[31].mxu1 }
 0x193   : > { %v1264_v5 = vpop.f32.mrb[32].mxu0 }
 0x194   : > { %v1158_v6 = vmul.f32 %v5250_v50, %v5250_v50  ;;  %v5255_v7 = vadd.f32 %v5247_v63, %v1134_v2  ;;  %v4234_v33 = vpop.f32.mrb[33].mxu0  ;;  %v1148_v8 = vsel %vm1147_vm2, %v5250_v50, 0.0 }
 0x195   : > { %v1267_v52 = vpop.f32.mrb[34].mxu0 }
 0x196   : > { %v1149_v9 = vsel %vm1147_vm2, %v5255_v7, 0.0  ;;  %v1159_v10 = vmul.f32 %v5255_v7, %v5255_v7  ;;  %v4235_v11 = vpop.f32.mrb[35].mxu0  ;;  %v1160_v53 = vsel %vm1147_vm2, %v1158_v6, 0.0 }
 0x197   : > { %v1150_v12 = vadd.f32 %v1149_v9, %v1148_v8  ;;  %v1311_v36 = vpop.f32.mrb[32].mxu1 }
 0x198   : > { %v1161_v13 = vsel %vm1147_vm2, %v1159_v10, 0.0  ;;  %v1312_v14 = vadd.f32 %v1311_v36, %v1264_v5  ;;  %v4240_v15 = vpop.f32.mrb[33].mxu1 }
 0x199   : > { %v1151_v16 = vrot.slane %v1150_v12, 4  ;;  %v1162_v34 = vadd.f32 %v1161_v13, %v1160_v53  ;;  %v1314_v54 = vpop.f32.mrb[34].mxu1 }
 0x19a   : > { %v1315_v37 = vadd.f32 %v1314_v54, %v1267_v52  ;;  %v4241_v17 = vpop.f32.mrb[35].mxu1 }
 0x19b   : > { %v1152_v40 = vadd.f32 %v1151_v16, %v1150_v12  ;;  %v1163_v18 = vrot.slane %v1162_v34, 4  ;;  %v1355_v20 = vpop.f32.mrb[36].mxu0 }
 0x19c   : > { %v1362_v19 = vadd.f32 %v1355_v20, %v1312_v14  ;;  %v4246_v21 = vpop.f32.mrb[37].mxu0 }
 0x19d   : > { %v1153_v22 = vrot.slane %v1152_v40, 2  ;;  %v1164_v23 = vadd.f32 %v1163_v18, %v1162_v34  ;;  %v1358_v24 = vpop.f32.mrb[38].mxu0  ;;  %v5267_v34 = vpop.permute.xlu1 %1181 }
 0x19e   : > { %v1363_v56 = vadd.f32 %v1358_v24, %v1315_v37  ;;  %v4247_v25 = vpop.f32.mrb[39].mxu0  ;;  %v5269_v37 = vpop.permute.xlu0 %1186 }
 0x19f   : > { %v1154_v0 = vadd.f32 %v1153_v22, %v1152_v40  ;;  %v1165_v26 = vrot.slane %v1164_v23, 2  ;;  %v1401_v28 = vpop.f32.mrb[36].mxu1 }
 0x1a0   : > { %v1408_v1 = vadd.f32 %v1401_v28, %v1362_v19  ;;  %v4252_v3 = vpop.f32.mrb[37].mxu1 }
 0x1a1   : > { %v1166_v27 = vadd.f32 %v1165_v26, %v1164_v23  ;;  %v1404_v29 = vpop.f32.mrb[38].mxu1  ;;  %v1155_v30 = vrot.slane %v1154_v0, 1 }
 0x1a2   : > { %v1409_v58 = vadd.f32 %v1404_v29, %v1363_v56  ;;  %v4253_v35 = vpop.f32.mrb[39].mxu1  ;;  %v5271_v56 = vpop.permute.xlu1 %1193 }
 0x1a3   : > { %v1167_v31 = vrot.slane %v1166_v27, 1  ;;  %v1452_v38 = vpop.f32.mrb[40].mxu0  ;;  %v1156_v39 = vadd.f32 %v1155_v30, %v1154_v0  ;;  %v5273_v28 = vpop.permute.xlu0 %1198 }
 0x1a4   : > { %v1459_v41 = vadd.f32 %v1452_v38, %v1408_v1  ;;  %v4258_v42 = vpop.f32.mrb[41].mxu0 }
 0x1a5   : > { %v1168_v43 = vadd.f32 %v1167_v31, %v1166_v27  ;;  %v1455_v44 = vpop.f32.mrb[42].mxu0  ;;  %v1157_v59 = vmul.f32 0.0625, %v1156_v39 }
 0x1a6   : > { %v1460_v32 = vadd.f32 %v1455_v44, %v1409_v58  ;;  %v4259_v45 = vpop.f32.mrb[43].mxu0 }
 0x1a7   : > { %v1169_v46 = vmul.f32 0.0625, %v1168_v43  ;;  %v1503_v47 = vpop.f32.mrb[40].mxu1  ;;  %v1170_v49 = vmul.f32 %v1157_v59, %v1157_v59  ;;  %v1173_v51 = vsub.f32 %v5250_v50, %v1157_v59  ;;  %v1174_v55 = vsub.f32 %v5255_v7, %v1157_v59 }
 0x1a8   : > { %v1510_v48 = vadd.f32 %v1503_v47, %v1459_v41  ;;  %v4264_v60 = vpop.f32.mrb[41].mxu1 }
 0x1a9   : > { %v1506_v61 = vpop.f32.mrb[42].mxu1  ;;  %v1171_v62 = vsub.f32 %v1169_v46, %v1170_v49 }
 0x1aa   : > { %v1511_v2 = vadd.f32 %v1506_v61, %v1460_v32  ;;  %v4265_v4 = vpop.f32.mrb[43].mxu1 }
 0x1ab   : > { %v1549_v5 = vpop.f32.mrb[44].mxu0  ;;  %v1172_v6 = vmax.f32 %v1171_v62, 0.0 }
 0x1ac   : > { %v1556_v33 = vadd.f32 %v1549_v5, %v1510_v48  ;;  %v4270_v52 = vpop.f32.mrb[45].mxu0 }
 0x1ad   : > { %v1552_v8 = vpop.f32.mrb[46].mxu0  ;;  %v1175_v9 = vadd.f32 1e-06, %v1172_v6 }
 0x1ae   : > { %v1557_v10 = vadd.f32 %v1552_v8, %v1511_v2  ;;  %v4271_v11 = vpop.f32.mrb[47].mxu0 }
 0x1af   : > { %v1595_v12 = vpop.f32.mrb[44].mxu1  ;;  %4581 = vrsqrt.f32 %v1175_v9 }
 0x1b0   : > { %v1602_v36 = vadd.f32 %v1595_v12, %v1556_v33  ;;  %v4276_v50 = vpop.f32.mrb[45].mxu1 }
 0x1b1   : > { %v1598_v53 = vpop.f32.mrb[46].mxu1 }
 0x1b2   : > { %v1603_v7 = vadd.f32 %v1598_v53, %v1557_v10  ;;  %v4277_v13 = vpop.f32.mrb[47].mxu1 }
 0x1b3   : > { %v1647_v14 = vpop.f32.mrb[48].mxu0 }
 0x1b4   : > { %v1654_v15 = vadd.f32 %v1647_v14, %v1602_v36  ;;  %v4282_v16 = vpop.f32.mrb[49].mxu0 }
 0x1b5   : > { %v1650_v54 = vpop.f32.mrb[50].mxu0 }
 0x1b6   : > { %v1655_v17 = vadd.f32 %v1650_v54, %v1603_v7  ;;  %v4283_v40 = vpop.f32.mrb[51].mxu0 }
 0x1b7   : > { %v1699_v18 = vpop.f32.mrb[48].mxu1 }
 0x1b8   : > { %v1706_v20 = vadd.f32 %v1699_v18, %v1654_v15  ;;  %v4288_v19 = vpop.f32.mrb[49].mxu1 }
 0x1b9   : > { %v4582_v21 = vpop.eup %4581  ;;  %v1702_v22 = vpop.f32.mrb[50].mxu1 }
 0x1ba   : > { %v1707_v23 = vadd.f32 %v1702_v22, %v1655_v17  ;;  %v4289_v24 = vpop.f32.mrb[51].mxu1  ;;  %v1177_v25 = vmul.f32 %v4582_v21, %v1173_v51  ;;  %v1178_v0 = vmul.f32 %v4582_v21, %v1174_v55 }
 0x1bb   : > { %v1745_v26 = vpop.f32.mrb[52].mxu0 }
 0x1bc   : > { %v1752_v1 = vadd.f32 %v1745_v26, %v1706_v20  ;;  %v4294_v3 = vpop.f32.mrb[53].mxu0  ;;  %v1189_v27 = vmul.f32 %v5267_v34, %v1177_v25  ;;  %v1190_v29 = vmul.f32 %v5269_v37, %v1178_v0 }
 0x1bd   : > { %v1748_v30 = vpop.f32.mrb[54].mxu0 }
 0x1be   : > { %v1201_v58 = vadd.f32 %v5271_v56, %v1189_v27  ;;  %v1753_v35 = vadd.f32 %v1748_v30, %v1707_v23  ;;  %v1202_v31 = vadd.f32 %v5273_v28, %v1190_v29  ;;  %v4295_v38 = vpop.f32.mrb[55].mxu0 }
 0x1bf   : > { %v1791_v39 = vpop.f32.mrb[52].mxu1 }
 0x1c0   : > { %vm1203_vm3 = vcmp.gt.f32.partialorder %v1201_v58, 0.0  ;;  %v1205_v41 = vmul.f32 0.2, %v1201_v58  ;;  %vm1204_vm4 = vcmp.gt.f32.partialorder %v1202_v31, 0.0  ;;  %v1206_v42 = vmul.f32 0.2, %v1202_v31 }
 0x1c1   : > { %v1798_v43 = vadd.f32 %v1791_v39, %v1752_v1  ;;  %v4300_v44 = vpop.f32.mrb[53].mxu1 }
 0x1c2   : > { %v1207_v59 = vsel %vm1203_vm3, %v1201_v58, %v1205_v41  ;;  %v1208_v32 = vsel %vm1204_vm4, %v1202_v31, %v1206_v42  ;;  %v1794_v45 = vpop.f32.mrb[54].mxu1 }
 0x1c3   : > { %v3998_v46 = vpack.c.bf16 %v1207_v59, %v1207_v59  ;;  %v3999_v47 = vpack.c.bf16 %v1208_v32, %v1208_v32  ;;  %v1799_v49 = vadd.f32 %v1794_v45, %v1753_v35  ;;  %v1843_v51 = vpop.f32.mrb[56].mxu0  ;;  %v4301_v55 = vpop.f32.mrb[55].mxu1 }
 0x1c4   : > { %v1850_v48 = vadd.f32 %v1843_v51, %v1798_v43  ;;  %v4306_v60 = vpop.f32.mrb[57].mxu0 }
 0x1c5   : > { %1218 = vst.msk [vmem:[%s5283_s16] sm:$0xf] %vm1217_vm5, %v3998_v46  ;;  %1219 = vst.msk [vmem:[%s5283_s16 + $0x4] sm:$0xf] %vm1217_vm5, %v3999_v47  ;;  %v1846_v61 = vpop.f32.mrb[58].mxu0 }
 0x1c6   : > { %v1851_v62 = vadd.f32 %v1846_v61, %v1799_v49  ;;  %v4307_v2 = vpop.f32.mrb[59].mxu0 }
 0x1c7   : > { %v1895_v4 = vpop.f32.mrb[56].mxu1 }
 0x1c8   : > { %v1902_v5 = vadd.f32 %v1895_v4, %v1850_v48  ;;  %v4312_v6 = vpop.f32.mrb[57].mxu1 }
 0x1c9   : > { %v1898_v33 = vpop.f32.mrb[58].mxu1 }
 0x1ca   : > { %v1903_v52 = vadd.f32 %v1898_v33, %v1851_v62  ;;  %v4313_v8 = vpop.f32.mrb[59].mxu1 }
 0x1cb   : > { %v1941_v9 = vpop.f32.mrb[60].mxu0 }
 0x1cc   : > { %v1948_v10 = vadd.f32 %v1941_v9, %v1902_v5  ;;  %v4318_v11 = vpop.f32.mrb[61].mxu0 }
 0x1cd   : > { %v1944_v12 = vpop.f32.mrb[62].mxu0 }
 0x1ce   : > { %v1949_v36 = vadd.f32 %v1944_v12, %v1903_v52  ;;  %v4319_v50 = vpop.f32.mrb[63].mxu0 }
 0x1cf   : > { %v1987_v53 = vpop.f32.mrb[60].mxu1 }
 0x1d0   : > { %v1994_v7 = vadd.f32 %v1987_v53, %v1948_v10  ;;  %v4324_v13 = vpop.f32.mrb[61].mxu1 }
 0x1d1   : > { %v1990_v14 = vpop.f32.mrb[62].mxu1 }
 0x1d2   : > { %v5290_v15 = vadd.f32 %v1994_v7, %v5245_v57  ;;  %v1995_v16 = vadd.f32 %v1990_v14, %v1949_v36  ;;  %v4325_v54 = vpop.f32.mrb[63].mxu1 }
 0x1d3   : > { %v2094_v17 = vpop.f32.mrb[64].mxu0 }
 0x1d4   : > { %v2008_v40 = vmul.f32 %v5290_v15, %v5290_v15  ;;  %v5295_v18 = vadd.f32 %v1995_v16, %v5247_v63  ;;  %v4330_v20 = vpop.f32.mrb[65].mxu0  ;;  %v1998_v21 = vsel %vm1147_vm2, %v5290_v15, 0.0 }
 0x1d5   : > { %v2097_v19 = vpop.f32.mrb[66].mxu0 }
 0x1d6   : > { %v1999_v22 = vsel %vm1147_vm2, %v5295_v18, 0.0  ;;  %v2009_v23 = vmul.f32 %v5295_v18, %v5295_v18  ;;  %v4331_v24 = vpop.f32.mrb[67].mxu0  ;;  %v2010_v26 = vsel %vm1147_vm2, %v2008_v40, 0.0 }
 0x1d7   : > { %v2000_v25 = vadd.f32 %v1999_v22, %v1998_v21  ;;  %v2141_v0 = vpop.f32.mrb[64].mxu1 }
 0x1d8   : > { %v2011_v1 = vsel %vm1147_vm2, %v2009_v23, 0.0  ;;  %v2142_v3 = vadd.f32 %v2141_v0, %v2094_v17  ;;  %v4336_v27 = vpop.f32.mrb[65].mxu1 }
 0x1d9   : > { %v2001_v29 = vrot.slane %v2000_v25, 4  ;;  %v2012_v30 = vadd.f32 %v2011_v1, %v2010_v26  ;;  %v2144_v58 = vpop.f32.mrb[66].mxu1 }
 0x1da   : > { %v2145_v35 = vadd.f32 %v2144_v58, %v2097_v19  ;;  %v4337_v31 = vpop.f32.mrb[67].mxu1 }
 0x1db   : > { %v2002_v38 = vadd.f32 %v2001_v29, %v2000_v25  ;;  %v2013_v39 = vrot.slane %v2012_v30, 4  ;;  %v2185_v41 = vpop.f32.mrb[68].mxu0 }
 0x1dc   : > { %v2192_v42 = vadd.f32 %v2185_v41, %v2142_v3  ;;  %v4342_v43 = vpop.f32.mrb[69].mxu0 }
 0x1dd   : > { %v2003_v44 = vrot.slane %v2002_v38, 2  ;;  %v2014_v59 = vadd.f32 %v2013_v39, %v2012_v30  ;;  %v2188_v32 = vpop.f32.mrb[70].mxu0 }
 0x1de   : > { %v2193_v45 = vadd.f32 %v2188_v32, %v2145_v35  ;;  %v4343_v46 = vpop.f32.mrb[71].mxu0 }
 0x1df   : > { %v2004_v47 = vadd.f32 %v2003_v44, %v2002_v38  ;;  %v2015_v49 = vrot.slane %v2014_v59, 2  ;;  %v2231_v51 = vpop.f32.mrb[68].mxu1 }
 0x1e0   : > { %v2238_v55 = vadd.f32 %v2231_v51, %v2192_v42  ;;  %v4348_v48 = vpop.f32.mrb[69].mxu1 }
 0x1e1   : > { %v2005_v60 = vrot.slane %v2004_v47, 1  ;;  %v2016_v61 = vadd.f32 %v2015_v49, %v2014_v59  ;;  %v2234_v62 = vpop.f32.mrb[70].mxu1 }
 0x1e2   : > { %v2239_v2 = vadd.f32 %v2234_v62, %v2193_v45  ;;  %v4349_v4 = vpop.f32.mrb[71].mxu1 }
 0x1e3   : > { %v2006_v5 = vadd.f32 %v2005_v60, %v2004_v47  ;;  %v2017_v6 = vrot.slane %v2016_v61, 1  ;;  %v2282_v33 = vpop.f32.mrb[72].mxu0 }
 0x1e4   : > { %v2289_v52 = vadd.f32 %v2282_v33, %v2238_v55  ;;  %v4354_v8 = vpop.f32.mrb[73].mxu0 }
 0x1e5   : > { %v2007_v9 = vmul.f32 0.0625, %v2006_v5  ;;  %v2018_v10 = vadd.f32 %v2017_v6, %v2016_v61  ;;  %v2285_v11 = vpop.f32.mrb[74].mxu0 }
 0x1e6   : > { %v2290_v12 = vadd.f32 %v2285_v11, %v2239_v2  ;;  %v4355_v36 = vpop.f32.mrb[75].mxu0 }
 0x1e7   : > { %v2019_v50 = vmul.f32 0.0625, %v2018_v10  ;;  %v2020_v53 = vmul.f32 %v2007_v9, %v2007_v9  ;;  %v2023_v7 = vsub.f32 %v5290_v15, %v2007_v9  ;;  %v2024_v13 = vsub.f32 %v5295_v18, %v2007_v9  ;;  %v2333_v14 = vpop.f32.mrb[72].mxu1 }
 0x1e8   : > { %v2340_v16 = vadd.f32 %v2333_v14, %v2289_v52  ;;  %v4360_v54 = vpop.f32.mrb[73].mxu1 }
 0x1e9   : > { %v2021_v17 = vsub.f32 %v2019_v50, %v2020_v53  ;;  %v2336_v40 = vpop.f32.mrb[74].mxu1 }
 0x1ea   : > { %v2341_v20 = vadd.f32 %v2336_v40, %v2290_v12  ;;  %v4361_v19 = vpop.f32.mrb[75].mxu1 }
 0x1eb   : > { %v2022_v21 = vmax.f32 %v2021_v17, 0.0  ;;  %v2379_v22 = vpop.f32.mrb[76].mxu0 }
 0x1ec   : > { %v2386_v23 = vadd.f32 %v2379_v22, %v2340_v16  ;;  %v4366_v24 = vpop.f32.mrb[77].mxu0 }
 0x1ed   : > { %v2025_v25 = vadd.f32 1e-06, %v2022_v21  ;;  %v2382_v0 = vpop.f32.mrb[78].mxu0 }
 0x1ee   : > { %v2387_v26 = vadd.f32 %v2382_v0, %v2341_v20  ;;  %v4367_v1 = vpop.f32.mrb[79].mxu0 }
 0x1ef   : > { %4583 = vrsqrt.f32 %v2025_v25  ;;  %v2425_v3 = vpop.f32.mrb[76].mxu1 }
 0x1f0   : > { %v2432_v15 = vadd.f32 %v2425_v3, %v2386_v23  ;;  %v4372_v27 = vpop.f32.mrb[77].mxu1 }
 0x1f1   : > { %v2428_v18 = vpop.f32.mrb[78].mxu1 }
 0x1f2   : > { %v2433_v29 = vadd.f32 %v2428_v18, %v2387_v26  ;;  %v4373_v30 = vpop.f32.mrb[79].mxu1 }
 0x1f3   : > { %v2477_v58 = vpop.f32.mrb[80].mxu0 }
 0x1f4   : > { %v2484_v35 = vadd.f32 %v2477_v58, %v2432_v15  ;;  %v4378_v31 = vpop.f32.mrb[81].mxu0 }
 0x1f5   : > { %v2480_v38 = vpop.f32.mrb[82].mxu0 }
 0x1f6   : > { %v2485_v39 = vadd.f32 %v2480_v38, %v2433_v29  ;;  %v4379_v41 = vpop.f32.mrb[83].mxu0 }
 0x1f7   : > { %v2529_v42 = vpop.f32.mrb[80].mxu1 }
 0x1f8   : > { %v2536_v43 = vadd.f32 %v2529_v42, %v2484_v35  ;;  %v4384_v44 = vpop.f32.mrb[81].mxu1 }
 0x1f9   : > { %v4584_v59 = vpop.eup %4583  ;;  %v2532_v32 = vpop.f32.mrb[82].mxu1 }
 0x1fa   : > { %v2027_v45 = vmul.f32 %v4584_v59, %v2023_v7  ;;  %v2028_v46 = vmul.f32 %v4584_v59, %v2024_v13  ;;  %v2537_v47 = vadd.f32 %v2532_v32, %v2485_v39  ;;  %v4385_v49 = vpop.f32.mrb[83].mxu1 }
 0x1fb   : > { %v2575_v51 = vpop.f32.mrb[84].mxu0 }
 0x1fc   : > { %v2029_v55 = vmul.f32 %v2027_v45, %v5267_v34  ;;  %v2030_v48 = vmul.f32 %v2028_v46, %v5269_v37  ;;  %v2582_v60 = vadd.f32 %v2575_v51, %v2536_v43  ;;  %v4390_v61 = vpop.f32.mrb[85].mxu0 }
 0x1fd   : > { %v2578_v62 = vpop.f32.mrb[86].mxu0 }
 0x1fe   : > { %v2031_v2 = vadd.f32 %v2029_v55, %v5271_v56  ;;  %v2032_v4 = vadd.f32 %v2030_v48, %v5273_v28  ;;  %v2583_v5 = vadd.f32 %v2578_v62, %v2537_v47  ;;  %v4391_v6 = vpop.f32.mrb[87].mxu0 }
 0x1ff   : > { %v2621_v33 = vpop.f32.mrb[84].mxu1 }
 0x200   : > { %vm2033_vm6 = vcmp.gt.f32.partialorder %v2031_v2, 0.0  ;;  %vm2034_vm7 = vcmp.gt.f32.partialorder %v2032_v4, 0.0  ;;  %v2035_v52 = vmul.f32 0.2, %v2031_v2  ;;  %v2036_v8 = vmul.f32 0.2, %v2032_v4 }
 0x201   : > { %v2628_v9 = vadd.f32 %v2621_v33, %v2582_v60  ;;  %v4396_v10 = vpop.f32.mrb[85].mxu1 }
 0x202   : > { %v2037_v11 = vsel %vm2033_vm6, %v2031_v2, %v2035_v52  ;;  %v2038_v12 = vsel %vm2034_vm7, %v2032_v4, %v2036_v8  ;;  %v2624_v36 = vpop.f32.mrb[86].mxu1 }
 0x203   : > { %v4000_v50 = vpack.c.bf16 %v2037_v11, %v2037_v11  ;;  %v4001_v53 = vpack.c.bf16 %v2038_v12, %v2038_v12  ;;  %v2629_v7 = vadd.f32 %v2624_v36, %v2583_v5  ;;  %v2673_v13 = vpop.f32.mrb[88].mxu0  ;;  %v4397_v14 = vpop.f32.mrb[87].mxu1 }
 0x204   : > { %v2680_v16 = vadd.f32 %v2673_v13, %v2628_v9  ;;  %v4402_v54 = vpop.f32.mrb[89].mxu0 }
 0x205   : > { %3905 = vst.msk [vmem:[%s5283_s16 + $0x8] sm:$0xf] %vm1217_vm5, %v4000_v50  ;;  %3906 = vst.msk [vmem:[%s5283_s16 + $0xc] sm:$0xf] %vm1217_vm5, %v4001_v53  ;;  %v2676_v17 = vpop.f32.mrb[90].mxu0 }
 0x206   : > { %v2681_v40 = vadd.f32 %v2676_v17, %v2629_v7  ;;  %v4403_v20 = vpop.f32.mrb[91].mxu0 }
 0x207   : > { %v2725_v19 = vpop.f32.mrb[88].mxu1 }
 0x208   : > { %v2732_v21 = vadd.f32 %v2725_v19, %v2680_v16  ;;  %v4408_v22 = vpop.f32.mrb[89].mxu1 }
 0x209   : > { %v2728_v23 = vpop.f32.mrb[90].mxu1 }
 0x20a   : > { %v2733_v24 = vadd.f32 %v2728_v23, %v2681_v40  ;;  %v4409_v25 = vpop.f32.mrb[91].mxu1 }
 0x20b   : > { %v2771_v0 = vpop.f32.mrb[92].mxu0 }
 0x20c   : > { %v2778_v26 = vadd.f32 %v2771_v0, %v2732_v21  ;;  %v4414_v1 = vpop.f32.mrb[93].mxu0 }
 0x20d   : > { %v2774_v3 = vpop.f32.mrb[94].mxu0 }
 0x20e   : > { %v2779_v15 = vadd.f32 %v2774_v3, %v2733_v24  ;;  %v4415_v27 = vpop.f32.mrb[95].mxu0 }
 0x20f   : > { %v2817_v18 = vpop.f32.mrb[92].mxu1 }
 0x210   : > { %v2824_v29 = vadd.f32 %v2817_v18, %v2778_v26  ;;  %v4420_v30 = vpop.f32.mrb[93].mxu1 }
 0x211   : > { %v2820_v58 = vpop.f32.mrb[94].mxu1 }
 0x212   : > { %v5316_v35 = vadd.f32 %v2824_v29, %v5245_v57  ;;  %v2825_v31 = vadd.f32 %v2820_v58, %v2779_v15  ;;  %v4421_v38 = vpop.f32.mrb[95].mxu1 }
 0x213   : > { %v2924_v39 = vpop.f32.mrb[96].mxu0 }
 0x214   : > { %v2838_v41 = vmul.f32 %v5316_v35, %v5316_v35  ;;  %v5321_v42 = vadd.f32 %v2825_v31, %v5247_v63  ;;  %v4426_v43 = vpop.f32.mrb[97].mxu0  ;;  %v2828_v59 = vsel %vm1147_vm2, %v5316_v35, 0.0 }
 0x215   : > { %v2927_v44 = vpop.f32.mrb[98].mxu0 }
 0x216   : > { %v2829_v32 = vsel %vm1147_vm2, %v5321_v42, 0.0  ;;  %v2839_v45 = vmul.f32 %v5321_v42, %v5321_v42  ;;  %v4427_v46 = vpop.f32.mrb[99].mxu0  ;;  %v2840_v51 = vsel %vm1147_vm2, %v2838_v41, 0.0 }
 0x217   : > { %v2830_v47 = vadd.f32 %v2829_v32, %v2828_v59  ;;  %v2971_v49 = vpop.f32.mrb[96].mxu1 }
 0x218   : > { %v2841_v55 = vsel %vm1147_vm2, %v2839_v45, 0.0  ;;  %v2972_v48 = vadd.f32 %v2971_v49, %v2924_v39  ;;  %v4432_v60 = vpop.f32.mrb[97].mxu1 }
 0x219   : > { %v2831_v61 = vrot.slane %v2830_v47, 4  ;;  %v2842_v62 = vadd.f32 %v2841_v55, %v2840_v51  ;;  %v2974_v2 = vpop.f32.mrb[98].mxu1 }
 0x21a   : > { %v2975_v4 = vadd.f32 %v2974_v2, %v2927_v44  ;;  %v4433_v5 = vpop.f32.mrb[99].mxu1 }
 0x21b   : > { %v2832_v6 = vadd.f32 %v2831_v61, %v2830_v47  ;;  %v2843_v33 = vrot.slane %v2842_v62, 4  ;;  %v3015_v52 = vpop.f32.mrb[100].mxu0 }
 0x21c   : > { %v3022_v8 = vadd.f32 %v3015_v52, %v2972_v48  ;;  %v4438_v9 = vpop.f32.mrb[101].mxu0 }
 0x21d   : > { %v2833_v10 = vrot.slane %v2832_v6, 2  ;;  %v2844_v11 = vadd.f32 %v2843_v33, %v2842_v62  ;;  %v3018_v12 = vpop.f32.mrb[102].mxu0 }
 0x21e   : > { %v3023_v36 = vadd.f32 %v3018_v12, %v2975_v4  ;;  %v4439_v50 = vpop.f32.mrb[103].mxu0 }
 0x21f   : > { %v2834_v53 = vadd.f32 %v2833_v10, %v2832_v6  ;;  %v2845_v7 = vrot.slane %v2844_v11, 2  ;;  %v3061_v13 = vpop.f32.mrb[100].mxu1 }
 0x220   : > { %v3068_v14 = vadd.f32 %v3061_v13, %v3022_v8  ;;  %v4444_v16 = vpop.f32.mrb[101].mxu1 }
 0x221   : > { %v2835_v54 = vrot.slane %v2834_v53, 1  ;;  %v2846_v17 = vadd.f32 %v2845_v7, %v2844_v11  ;;  %v3064_v40 = vpop.f32.mrb[102].mxu1 }
 0x222   : > { %v3069_v20 = vadd.f32 %v3064_v40, %v3023_v36  ;;  %v4445_v19 = vpop.f32.mrb[103].mxu1 }
 0x223   : > { %v2836_v21 = vadd.f32 %v2835_v54, %v2834_v53  ;;  %v2847_v22 = vrot.slane %v2846_v17, 1  ;;  %v3112_v23 = vpop.f32.mrb[104].mxu0 }
 0x224   : > { %v3119_v24 = vadd.f32 %v3112_v23, %v3068_v14  ;;  %v4450_v25 = vpop.f32.mrb[105].mxu0 }
 0x225   : > { %v2837_v0 = vmul.f32 0.0625, %v2836_v21  ;;  %v2848_v26 = vadd.f32 %v2847_v22, %v2846_v17  ;;  %v3115_v1 = vpop.f32.mrb[106].mxu0 }
 0x226   : > { %v3120_v3 = vadd.f32 %v3115_v1, %v3069_v20  ;;  %v4451_v15 = vpop.f32.mrb[107].mxu0 }
 0x227   : > { %v2849_v27 = vmul.f32 0.0625, %v2848_v26  ;;  %v2850_v18 = vmul.f32 %v2837_v0, %v2837_v0  ;;  %v2853_v29 = vsub.f32 %v5316_v35, %v2837_v0  ;;  %v2854_v30 = vsub.f32 %v5321_v42, %v2837_v0  ;;  %v3163_v58 = vpop.f32.mrb[104].mxu1 }
 0x228   : > { %v3170_v31 = vadd.f32 %v3163_v58, %v3119_v24  ;;  %v4456_v38 = vpop.f32.mrb[105].mxu1 }
 0x229   : > { %v2851_v39 = vsub.f32 %v2849_v27, %v2850_v18  ;;  %v3166_v41 = vpop.f32.mrb[106].mxu1 }
 0x22a   : > { %v3171_v43 = vadd.f32 %v3166_v41, %v3120_v3  ;;  %v4457_v44 = vpop.f32.mrb[107].mxu1 }
 0x22b   : > { %v2852_v59 = vmax.f32 %v2851_v39, 0.0  ;;  %v3209_v32 = vpop.f32.mrb[108].mxu0 }
 0x22c   : > { %v3216_v45 = vadd.f32 %v3209_v32, %v3170_v31  ;;  %v4462_v46 = vpop.f32.mrb[109].mxu0 }
 0x22d   : > { %v2855_v47 = vadd.f32 1e-06, %v2852_v59  ;;  %v3212_v49 = vpop.f32.mrb[110].mxu0 }
 0x22e   : > { %v3217_v51 = vadd.f32 %v3212_v49, %v3171_v43  ;;  %v4463_v55 = vpop.f32.mrb[111].mxu0 }
 0x22f   : > { %4585 = vrsqrt.f32 %v2855_v47  ;;  %v3255_v48 = vpop.f32.mrb[108].mxu1 }
 0x230   : > { %v3262_v35 = vadd.f32 %v3255_v48, %v3216_v45  ;;  %v4468_v60 = vpop.f32.mrb[109].mxu1 }
 0x231   : > { %v3258_v42 = vpop.f32.mrb[110].mxu1 }
 0x232   : > { %v3263_v61 = vadd.f32 %v3258_v42, %v3217_v51  ;;  %v4469_v62 = vpop.f32.mrb[111].mxu1 }
 0x233   : > { %v3307_v2 = vpop.f32.mrb[112].mxu0 }
 0x234   : > { %v3314_v4 = vadd.f32 %v3307_v2, %v3262_v35  ;;  %v4474_v5 = vpop.f32.mrb[113].mxu0 }
 0x235   : > { %v3310_v6 = vpop.f32.mrb[114].mxu0 }
 0x236   : > { %v3315_v33 = vadd.f32 %v3310_v6, %v3263_v61  ;;  %v4475_v52 = vpop.f32.mrb[115].mxu0 }
 0x237   : > { %v3359_v8 = vpop.f32.mrb[112].mxu1 }
 0x238   : > { %v3366_v9 = vadd.f32 %v3359_v8, %v3314_v4  ;;  %v4480_v10 = vpop.f32.mrb[113].mxu1 }
 0x239   : > { %v4586_v11 = vpop.eup %4585  ;;  %v3362_v12 = vpop.f32.mrb[114].mxu1 }
 0x23a   : > { %v2857_v36 = vmul.f32 %v4586_v11, %v2853_v29  ;;  %v2858_v50 = vmul.f32 %v4586_v11, %v2854_v30  ;;  %v3367_v53 = vadd.f32 %v3362_v12, %v3315_v33  ;;  %v4481_v7 = vpop.f32.mrb[115].mxu1 }
 0x23b   : > { %v3405_v13 = vpop.f32.mrb[116].mxu0 }
 0x23c   : > { %v2859_v14 = vmul.f32 %v2857_v36, %v5267_v34  ;;  %v2860_v16 = vmul.f32 %v2858_v50, %v5269_v37  ;;  %v3412_v54 = vadd.f32 %v3405_v13, %v3366_v9  ;;  %v4486_v17 = vpop.f32.mrb[117].mxu0 }
 0x23d   : > { %v3408_v40 = vpop.f32.mrb[118].mxu0 }
 0x23e   : > { %v2861_v20 = vadd.f32 %v2859_v14, %v5271_v56  ;;  %v2862_v19 = vadd.f32 %v2860_v16, %v5273_v28  ;;  %v3413_v21 = vadd.f32 %v3408_v40, %v3367_v53  ;;  %v4487_v22 = vpop.f32.mrb[119].mxu0 }
 0x23f   : > { %v3451_v23 = vpop.f32.mrb[116].mxu1 }
 0x240   : > { %vm2863_vm8 = vcmp.gt.f32.partialorder %v2861_v20, 0.0  ;;  %vm2864_vm9 = vcmp.gt.f32.partialorder %v2862_v19, 0.0  ;;  %v2865_v24 = vmul.f32 0.2, %v2861_v20  ;;  %v2866_v25 = vmul.f32 0.2, %v2862_v19 }
 0x241   : > { %v3458_v0 = vadd.f32 %v3451_v23, %v3412_v54  ;;  %v4492_v26 = vpop.f32.mrb[117].mxu1 }
 0x242   : > { %v2867_v1 = vsel %vm2863_vm8, %v2861_v20, %v2865_v24  ;;  %v2868_v3 = vsel %vm2864_vm9, %v2862_v19, %v2866_v25  ;;  %v3454_v15 = vpop.f32.mrb[118].mxu1 }
 0x243   : > { %v4002_v27 = vpack.c.bf16 %v2867_v1, %v2867_v1  ;;  %v4003_v18 = vpack.c.bf16 %v2868_v3, %v2868_v3  ;;  %v3459_v29 = vadd.f32 %v3454_v15, %v3413_v21  ;;  %v3503_v30 = vpop.f32.mrb[120].mxu0  ;;  %v4493_v58 = vpop.f32.mrb[119].mxu1 }
 0x244   : > { %v3510_v31 = vadd.f32 %v3503_v30, %v3458_v0  ;;  %v4498_v38 = vpop.f32.mrb[121].mxu0 }
 0x245   : > { %3949 = vst.msk [vmem:[%s5283_s16 + $0x10] sm:$0xf] %vm1217_vm5, %v4002_v27  ;;  %3950 = vst.msk [vmem:[%s5283_s16 + $0x14] sm:$0xf] %vm1217_vm5, %v4003_v18  ;;  %v3506_v39 = vpop.f32.mrb[122].mxu0 }
 0x246   : > { %v3511_v41 = vadd.f32 %v3506_v39, %v3459_v29  ;;  %v4499_v43 = vpop.f32.mrb[123].mxu0 }
 0x247   : > { %v3555_v44 = vpop.f32.mrb[120].mxu1 }
 0x248   : > { %v3562_v59 = vadd.f32 %v3555_v44, %v3510_v31  ;;  %v4504_v32 = vpop.f32.mrb[121].mxu1 }
 0x249   : > { %v3558_v45 = vpop.f32.mrb[122].mxu1 }
 0x24a   : > { %v3563_v46 = vadd.f32 %v3558_v45, %v3511_v41  ;;  %v4505_v47 = vpop.f32.mrb[123].mxu1 }
 0x24b   : > { %v3601_v49 = vpop.f32.mrb[124].mxu0 }
 0x24c   : > { %v3608_v51 = vadd.f32 %v3601_v49, %v3562_v59  ;;  %v4510_v55 = vpop.f32.mrb[125].mxu0 }
 0x24d   : > { %v3604_v48 = vpop.f32.mrb[126].mxu0 }
 0x24e   : > { %v3609_v35 = vadd.f32 %v3604_v48, %v3563_v46  ;;  %v4511_v60 = vpop.f32.mrb[127].mxu0 }
 0x24f   : > { %v3647_v42 = vpop.f32.mrb[124].mxu1 }
 0x250   : > { %v3654_v61 = vadd.f32 %v3647_v42, %v3608_v51  ;;  %v4516_v62 = vpop.f32.mrb[125].mxu1 }
 0x251   : > { %v3650_v2 = vpop.f32.mrb[126].mxu1 }
 0x252   : > { %v3656_v4 = vadd.f32 %v3654_v61, %v5245_v57  ;;  %v3655_v5 = vadd.f32 %v3650_v2, %v3609_v35  ;;  %v4517_v6 = vpop.f32.mrb[127].mxu1 }
 0x254   : > { %v3668_v33 = vmul.f32 %v3656_v4, %v3656_v4  ;;  %v3657_v52 = vadd.f32 %v3655_v5, %v5247_v63  ;;  %v3658_v8 = vsel %vm1147_vm2, %v3656_v4, 0.0 }
 0x256   : > { %v3659_v9 = vsel %vm1147_vm2, %v3657_v52, 0.0  ;;  %v3669_v10 = vmul.f32 %v3657_v52, %v3657_v52  ;;  %v3670_v12 = vsel %vm1147_vm2, %v3668_v33, 0.0 }
 0x257   : > { %v3660_v11 = vadd.f32 %v3659_v9, %v3658_v8 }
 0x258   : > { %v3671_v36 = vsel %vm1147_vm2, %v3669_v10, 0.0 }
 0x259   : > { %v3661_v50 = vrot.slane %v3660_v11, 4  ;;  %v3672_v53 = vadd.f32 %v3671_v36, %v3670_v12 }
 0x25b   : > { %v3662_v7 = vadd.f32 %v3661_v50, %v3660_v11  ;;  %v3673_v13 = vrot.slane %v3672_v53, 4 }
 0x25d   : > { %v3663_v57 = vrot.slane %v3662_v7, 2  ;;  %v3674_v14 = vadd.f32 %v3673_v13, %v3672_v53 }
 0x25f   : > { %v3664_v16 = vadd.f32 %v3663_v57, %v3662_v7  ;;  %v3675_v54 = vrot.slane %v3674_v14, 2 }
 0x261   : > { %v3665_v17 = vrot.slane %v3664_v16, 1  ;;  %v3676_v63 = vadd.f32 %v3675_v54, %v3674_v14 }
 0x263   : > { %v3666_v40 = vadd.f32 %v3665_v17, %v3664_v16  ;;  %v3677_v20 = vrot.slane %v3676_v63, 1 }
 0x265   : > { %v3667_v19 = vmul.f32 0.0625, %v3666_v40  ;;  %v3678_v21 = vadd.f32 %v3677_v20, %v3676_v63 }
 0x267   : > { %v3679_v22 = vmul.f32 0.0625, %v3678_v21  ;;  %v3680_v23 = vmul.f32 %v3667_v19, %v3667_v19  ;;  %v3683_v24 = vsub.f32 %v3656_v4, %v3667_v19  ;;  %v3684_v25 = vsub.f32 %v3657_v52, %v3667_v19 }
 0x269   : > { %v3681_v0 = vsub.f32 %v3679_v22, %v3680_v23 }
 0x26b   : > { %v3682_v26 = vmax.f32 %v3681_v0, 0.0 }
 0x26d   : > { %v3685_v1 = vadd.f32 1e-06, %v3682_v26 }
 0x26f   : > { %4587 = vrsqrt.f32 %v3685_v1 }
 0x279   : > { %v4588_v3 = vpop.eup %4587 }
 0x27a   : > { %v3687_v15 = vmul.f32 %v4588_v3, %v3683_v24  ;;  %v3688_v27 = vmul.f32 %v4588_v3, %v3684_v25 }
 0x27c   : > { %v3689_v18 = vmul.f32 %v3687_v15, %v5267_v34  ;;  %v3690_v29 = vmul.f32 %v3688_v27, %v5269_v37 }
 0x27e   : > { %v3691_v30 = vadd.f32 %v3689_v18, %v5271_v56  ;;  %v3692_v58 = vadd.f32 %v3690_v29, %v5273_v28 }
 0x280   : > { %vm3693_vm10 = vcmp.gt.f32.partialorder %v3691_v30, 0.0  ;;  %vm3694_vm11 = vcmp.gt.f32.partialorder %v3692_v58, 0.0  ;;  %v3695_v31 = vmul.f32 0.2, %v3691_v30  ;;  %v3696_v38 = vmul.f32 0.2, %v3692_v58 }
 0x282   : > { %v3697_v39 = vsel %vm3693_vm10, %v3691_v30, %v3695_v31  ;;  %v3698_v41 = vsel %vm3694_vm11, %v3692_v58, %v3696_v38 }
 0x283   : > { %v4004_v43 = vpack.c.bf16 %v3697_v39, %v3697_v39  ;;  %v4005_v44 = vpack.c.bf16 %v3698_v41, %v3698_v41 }
 0x285   : > { %3993 = vst.msk [vmem:[%s5283_s16 + $0x18] sm:$0xf] %vm1217_vm5, %v4004_v43  ;;  %3994 = vst.msk [vmem:[%s5283_s16 + $0x1c] sm:$0xf] %vm1217_vm5, %v4005_v44 }
 0x286 PF: > { %s13_s12 = sadd.s32 1, %s4595_s12  }
 0x287   : > { %p10_p4 = scmp.ge.s32.totalorder %s13_s12, 4  }
 0x289   :  { %12 = sbr.rel (!%p10_p4) target bundleno = 1 (0x1), region = 101 }

// kernel: nlayer_discriminator_forward.3
= control target key start
LH: loop header
LB: loop body
LE: loop exit
PB: predicated region body
PF: predicated region fallthrough
CT: control target
= control target key end

     0   :  { %s8411_s12 = smov 0   ;;  %s9883_s0 = inlined_call_operand.vmem [shape: bf16[16,16,8], index: 0, kind: input, shape index: {}]   ;;  %s9884_s1 = inlined_call_operand.vmem [shape: f32[3,16,1], index: 1, kind: input, shape index: {}]   ;;  %s9885_s2 = inlined_call_operand.vmem [shape: bf16[2,36,8,9], index: 2, kind: input, shape index: {}]   ;;  %s9886_s3 = inlined_call_operand.vmem [shape: bf16[2,8,16,8], index: 3, kind: output, shape index: {}]  }
   0x1 LB: > { %s6843_s13 = sadd.s32 4294967295, %s8385_s12   ;;  %p6847_p0 = scmp.ge.s32.totalorder %s8385_s12, 1  ;;  %s8385_s12 = sphi %s8411_s12, %s13_s12  }
   0x2   : > { %p137_p1 = scmp.lt.s32.totalorder %s8385_s12, 3 }
   0x4   : > { %p138_p2 = pnand %p6847_p0, %p137_p1 }
   0x5   : > { %p161_p3 = scmp.lt.s32.totalorder (!%p138_p2), %s6843_s13, 1  ;;  %v8387_v0 = vmov (!%p138_p2), 0.0   ;;  %vm8388_vm0 = vmmov (!%p138_p2), 0   ;;  %vm233_vm1 = vcmask (!%p138_p2), 1043456   ;;  %s8389_s18 = smov (!%p138_p2), 127   ;;  %v8457_v12 = vld [vmem:[%s9883_s0 + $0x8] sm:$0xff] (!%p138_p2)  }
   0x6   : > { %141 = sbr.rel (%p138_p2) target bundleno = 863 (0x35f), region = 32  ;;  %7457 = vmatprep.subr.bf16.mxu0 (!%p138_p2), %v8387_v0  ;;  %7459 = vmatprep.mubr.msk.bf16.mxu0 (!%p138_p2), %vm8388_vm0, %v8387_v0  ;;  %vm229_vm2 = vcmask (!%p138_p2), 64512   ;;  %v8463_v14 = vld [vmem:[%s9883_s0] sm:$0xff] (!%p138_p2)   ;;  %vm1164_vm4 = vcmask (!%p138_p2), 60416  }
   0x7   : > { %7463 = vmatprep.subr.bf16.mxu1 (!%p138_p2), %v8387_v0  ;;  %7465 = vmatprep.mubr.msk.bf16.mxu1 (!%p138_p2), %vm8388_vm0, %v8387_v0 }
   0xd   : > { %s9888_s13 = smov (!%p161_p3, %s6843_s13), 1 }
   0xe   : > { %s8225_s14 = smul.u32 144, %s9888_s13  ;;  %s7184_s8 = sshll.u32 %s9888_s13, 6 }
   0xf   : > { %s9339_s13 = scalar_lea.vmem %s9886_s3, %s7184_s8 }
  0x10   : > { %s8431_s17 = scalar_lea.vmem %s9885_s2, %s8225_s14 }
  0x11   : > { %v221_v1 = vld [vmem:[%s8431_s17] sm:$0xf]  ;;  %v6881_v2 = vld [vmem:[%s8431_s17 + $0x24] sm:$0xf]  ;;  %v8436_v3 = vld [vmem:[%s8431_s17 + $0x48] sm:$0xf] }
  0x12   : > { %v6887_v4 = vcombine.low %v221_v1, %v221_v1  ;;  %v6899_v5 = vcombine.low %v8436_v3, %v8436_v3  ;;  %v8441_v6 = vld [vmem:[%s8431_s17 + $0x6c] sm:$0xf]  ;;  %v6890_v7 = vcombine.low %v6881_v2, %v6881_v2  ;;  %v235_v9 = vsel %vm233_vm1, %v6881_v2, 0  ;;  %v8449_v10 = vld [vmem:[%s8431_s17 + $0x4] sm:$0xf] }
  0x13   : > { %v6902_v8 = vcombine.low %v8441_v6, %v8441_v6  ;;  %v8452_v11 = vld [vmem:[%s8431_s17 + $0x28] sm:$0xf]  ;;  %7458 = vmatpush3.bf16.msra.mxu0 %v235_v9  ;;  %v287_v13 = vsel %vm233_vm1, %v221_v1, 0  ;;  %v8467_v15 = vld [vmem:[%s8431_s17 + $0x4c] sm:$0xf]  ;;  %v6911_v16 = vcombine.low %v8449_v10, %v8449_v10 }
  0x14   : > { %338 = vrot.lane.b32.xlu0 %v6887_v4, %s8389_s18  ;;  %568 = vrot.lane.b32.xlu1 %v6899_v5, %s8389_s18  ;;  %v6914_v17 = vcombine.low %v8452_v11, %v8452_v11  ;;  %v8476_v18 = vld [vmem:[%s8431_s17 + $0x70] sm:$0xf]  ;;  %v8486_v19 = vld [vmem:[%s8431_s17 + $0x4] sm:$0xf]  ;;  %v6923_v21 = vcombine.low %v8467_v15, %v8467_v15 }
  0x15   : > { %7469 = vmatprep.subr.bf16.mxu0 %v8387_v0  ;;  %7464 = vmatpush3.bf16.msra.mxu1 %v287_v13  ;;  %v8489_v20 = vld [vmem:[%s8431_s17 + $0x28] sm:$0xf]  ;;  %v6926_v22 = vcombine.low %v8476_v18, %v8476_v18  ;;  %v6934_v23 = vcombine.low %v8486_v19, %v8486_v19  ;;  %v8506_v25 = vld [vmem:[%s8431_s17 + $0x4c] sm:$0xf]  ;;  %v8509_v26 = vld [vmem:[%s8431_s17 + $0x70] sm:$0xf] }
  0x16   : > { %7460 = vmatmul.mubr.msk.bf16.vlgmr.msra.gmra.mrb[0].mxu0 %vm229_vm2, %v8457_v12  ;;  %7475 = vmatprep.subr.bf16.mxu1 %v8387_v0  ;;  %v6936_v24 = vcombine.low %v8489_v20, %v8489_v20  ;;  %v6942_v27 = vcombine.low %v8506_v25, %v8506_v25  ;;  %v6944_v28 = vcombine.low %v8509_v26, %v8509_v26  ;;  %v8518_v29 = vld [vmem:[%s8431_s17 + $0x8] sm:$0xf]  ;;  %v8521_v30 = vld [vmem:[%s8431_s17 + $0x2c] sm:$0xf]  ;;  %v8530_v33 = vld [vmem:[%s8431_s17 + $0x50] sm:$0xf] }
  0x17   : > { %7471 = vmatprep.mubr.msk.bf16.mxu0 %vm8388_vm0, %v8387_v0  ;;  %v6950_v31 = vcombine.low %v8518_v29, %v8518_v29  ;;  %v6952_v32 = vcombine.low %v8521_v30, %v8521_v30  ;;  %v8533_v34 = vld [vmem:[%s8431_s17 + $0x74] sm:$0xf]  ;;  %v6958_v35 = vcombine.low %v8530_v33, %v8530_v33  ;;  %v8542_v37 = vld [vmem:[%s8431_s17 + $0x8] sm:$0xf]  ;;  %v8545_v38 = vld [vmem:[%s8431_s17 + $0x2c] sm:$0xf] }
  0x18   : > { %397 = vrot.lane.b32.xlu0 %v6890_v7, %s8389_s18  ;;  %627 = vrot.lane.b32.xlu1 %v6902_v8, %s8389_s18  ;;  %v6960_v36 = vcombine.low %v8533_v34, %v8533_v34  ;;  %v6970_v39 = vcombine.low %v8542_v37, %v8542_v37  ;;  %v6972_v40 = vcombine.low %v8545_v38, %v8545_v38  ;;  %v8554_v41 = vld [vmem:[%s8431_s17 + $0x50] sm:$0xf]  ;;  %v8557_v42 = vld [vmem:[%s8431_s17 + $0x74] sm:$0xf] }
  0x19   : > { %7466 = vmatmul.mubr.msk.bf16.vlgmr.msra.gmra.mrb[0].mxu1 %vm229_vm2, %v8463_v14  ;;  %v6978_v43 = vcombine.low %v8554_v41, %v8554_v41  ;;  %v6980_v44 = vcombine.low %v8557_v42, %v8557_v42  ;;  %v8566_v45 = vld [vmem:[%s8431_s17 + $0xc] sm:$0xf]  ;;  %v8569_v46 = vld [vmem:[%s8431_s17 + $0x30] sm:$0xf]  ;;  %v8580_v49 = vld [vmem:[%s8431_s17 + $0x54] sm:$0xf] }
  0x1a   : > { %7477 = vmatprep.mubr.msk.bf16.mxu1 %vm8388_vm0, %v8387_v0  ;;  %v6986_v47 = vcombine.low %v8566_v45, %v8566_v45  ;;  %v6988_v48 = vcombine.low %v8569_v46, %v8569_v46  ;;  %v6994_v50 = vcombine.low %v8580_v49, %v8580_v49  ;;  %v8585_v51 = vld [vmem:[%s8431_s17 + $0x78] sm:$0xf]  ;;  %v8592_v53 = vld [vmem:[%s8431_s17 + $0xc] sm:$0xf]  ;;  %v8597_v55 = vld [vmem:[%s8431_s17 + $0x30] sm:$0xf] }
  0x1b   : > { %v6996_v52 = vcombine.low %v8585_v51, %v8585_v51  ;;  %v7006_v54 = vcombine.low %v8592_v53, %v8592_v53  ;;  %v7008_v56 = vcombine.low %v8597_v55, %v8597_v55  ;;  %v8604_v57 = vld [vmem:[%s8431_s17 + $0x54] sm:$0xf]  ;;  %v8609_v59 = vld [vmem:[%s8431_s17 + $0x78] sm:$0xf]  ;;  %v8616_v61 = vld [vmem:[%s8431_s17 + $0x10] sm:$0xf] }
  0x1c   : > { %798 = vrot.lane.b32.xlu0 %v6911_v16, %s8389_s18  ;;  %857 = vrot.lane.b32.xlu1 %v6914_v17, %s8389_s18  ;;  %v7014_v58 = vcombine.low %v8604_v57, %v8604_v57  ;;  %v7016_v60 = vcombine.low %v8609_v59, %v8609_v59  ;;  %v7022_v62 = vcombine.low %v8616_v61, %v8616_v61  ;;  %v8621_v63 = vld [vmem:[%s8431_s17 + $0x34] sm:$0xf]  ;;  %v8628_v2 = vld [vmem:[%s8431_s17 + $0x58] sm:$0xf] }
  0x1d   : > { %v7024_v1 = vcombine.low %v8621_v63, %v8621_v63  ;;  %v7030_v4 = vcombine.low %v8628_v2, %v8628_v2  ;;  %v8633_v5 = vld [vmem:[%s8431_s17 + $0x7c] sm:$0xf]  ;;  %v7038_v8 = vld [vmem:[%s8431_s17 + $0x10] sm:$0xf]  ;;  %v7039_v13 = vld [vmem:[%s8431_s17 + $0x34] sm:$0xf] }
  0x1e   : > { %v7032_v7 = vcombine.low %v8633_v5, %v8633_v5  ;;  %v7042_v9 = vcombine.low %v7038_v8, %v7038_v8  ;;  %v7044_v16 = vcombine.low %v7039_v13, %v7039_v13  ;;  %v7046_v17 = vld [vmem:[%s8431_s17 + $0x58] sm:$0xf] }
  0x20   : > { %1028 = vrot.lane.b32.xlu0 %v6923_v21, %s8389_s18  ;;  %1087 = vrot.lane.b32.xlu1 %v6926_v22, %s8389_s18  ;;  %v7050_v21 = vcombine.low %v7046_v17, %v7046_v17  ;;  %v7048_v22 = vld [vmem:[%s8431_s17 + $0x7c] sm:$0xf] }
  0x24   : > { %1260 = vrot.lane.b32.xlu0 %v6934_v23, %s8389_s18  ;;  %1311 = vrot.lane.b32.xlu1 %v6936_v24, %s8389_s18  ;;  %v7052_v23 = vcombine.low %v7048_v22, %v7048_v22  ;;  %v7054_v24 = vld [vmem:[%s8431_s17 + $0x14] sm:$0xf] }
  0x28   : > { %1456 = vrot.lane.b32.xlu0 %v6942_v27, %s8389_s18  ;;  %1507 = vrot.lane.b32.xlu1 %v6944_v28, %s8389_s18  ;;  %v7058_v27 = vcombine.low %v7054_v24, %v7054_v24  ;;  %v7056_v28 = vld [vmem:[%s8431_s17 + $0x38] sm:$0xf] }
  0x2c   : > { %1654 = vrot.lane.b32.xlu0 %v6950_v31, %s8389_s18  ;;  %1705 = vrot.lane.b32.xlu1 %v6952_v32, %s8389_s18  ;;  %v7060_v31 = vcombine.low %v7056_v28, %v7056_v28  ;;  %v7062_v32 = vld [vmem:[%s8431_s17 + $0x5c] sm:$0xf] }
  0x30   : > { %1852 = vrot.lane.b32.xlu0 %v6958_v35, %s8389_s18  ;;  %1903 = vrot.lane.b32.xlu1 %v6960_v36, %s8389_s18  ;;  %v7066_v35 = vcombine.low %v7062_v32, %v7062_v32  ;;  %v7064_v36 = vld [vmem:[%s8431_s17 + $0x80] sm:$0xf] }
  0x34   : > { %2063 = vrot.lane.b32.xlu0 %v6970_v39, %s8389_s18  ;;  %2114 = vrot.lane.b32.xlu1 %v6972_v40, %s8389_s18  ;;  %v7068_v39 = vcombine.low %v7064_v36, %v7064_v36  ;;  %v7074_v40 = vld [vmem:[%s8431_s17 + $0x14] sm:$0xf] }
  0x38   : > { %2259 = vrot.lane.b32.xlu0 %v6978_v43, %s8389_s18  ;;  %2310 = vrot.lane.b32.xlu1 %v6980_v44, %s8389_s18  ;;  %v7078_v43 = vcombine.low %v7074_v40, %v7074_v40  ;;  %v7075_v44 = vld [vmem:[%s8431_s17 + $0x38] sm:$0xf] }
  0x3c   : > { %2457 = vrot.lane.b32.xlu0 %v6986_v47, %s8389_s18  ;;  %2508 = vrot.lane.b32.xlu1 %v6988_v48, %s8389_s18  ;;  %v7080_v47 = vcombine.low %v7075_v44, %v7075_v44  ;;  %v7082_v48 = vld [vmem:[%s8431_s17 + $0x5c] sm:$0xf] }
  0x40   : > { %2655 = vrot.lane.b32.xlu0 %v6994_v50, %s8389_s18  ;;  %2706 = vrot.lane.b32.xlu1 %v6996_v52, %s8389_s18  ;;  %v7086_v50 = vcombine.low %v7082_v48, %v7082_v48  ;;  %v7084_v52 = vld [vmem:[%s8431_s17 + $0x80] sm:$0xf] }
  0x44   : > { %2866 = vrot.lane.b32.xlu0 %v7006_v54, %s8389_s18  ;;  %2917 = vrot.lane.b32.xlu1 %v7008_v56, %s8389_s18  ;;  %v7088_v54 = vcombine.low %v7084_v52, %v7084_v52  ;;  %v7090_v56 = vld [vmem:[%s8431_s17 + $0x18] sm:$0xf]  ;;  %v7154_v52 = vld [vmem:[%s8431_s17 + $0x64] sm:$0xf] }
  0x48   : > { %3062 = vrot.lane.b32.xlu0 %v7014_v58, %s8389_s18  ;;  %3113 = vrot.lane.b32.xlu1 %v7016_v60, %s8389_s18  ;;  %v7094_v58 = vcombine.low %v7090_v56, %v7090_v56  ;;  %v7092_v60 = vld [vmem:[%s8431_s17 + $0x3c] sm:$0xf]  ;;  %v8696_v56 = vld [vmem:[%s9883_s0 + $0x10] sm:$0xff]  }
  0x4c   : > { %3260 = vrot.lane.b32.xlu0 %v7022_v62, %s8389_s18  ;;  %3311 = vrot.lane.b32.xlu1 %v7024_v1, %s8389_s18  ;;  %v7096_v62 = vcombine.low %v7092_v60, %v7092_v60  ;;  %v7098_v1 = vld [vmem:[%s8431_s17 + $0x60] sm:$0xf]  ;;  %v7156_v60 = vld [vmem:[%s8431_s17 + $0x88] sm:$0xf] }
  0x50   : > { %3458 = vrot.lane.b32.xlu0 %v7030_v4, %s8389_s18  ;;  %3509 = vrot.lane.b32.xlu1 %v7032_v7, %s8389_s18  ;;  %v7102_v4 = vcombine.low %v7098_v1, %v7098_v1  ;;  %v7100_v7 = vld [vmem:[%s8431_s17 + $0x84] sm:$0xf]  ;;  %v459_v1 = vsel %vm233_vm1, %v8436_v3, 0 }
  0x51   : > { %v7104_v8 = vcombine.low %v7100_v7, %v7100_v7  ;;  %v7162_v7 = vld [vmem:[%s8431_s17 + $0x20] sm:$0xf]  ;;  %v7164_v3 = vld [vmem:[%s8431_s17 + $0x44] sm:$0xf] }
  0x54   : > { %3669 = vrot.lane.b32.xlu0 %v7042_v9, %s8389_s18  ;;  %3720 = vrot.lane.b32.xlu1 %v7044_v16, %s8389_s18  ;;  %v7110_v9 = vld [vmem:[%s8431_s17 + $0x18] sm:$0xf]  ;;  %v7111_v16 = vld [vmem:[%s8431_s17 + $0x3c] sm:$0xf] }
  0x55   : > { %v7114_v13 = vcombine.low %v7110_v9, %v7110_v9  ;;  %v7116_v17 = vcombine.low %v7111_v16, %v7111_v16  ;;  %v8711_v9 = vld [vmem:[%s9883_s0 + $0x18] sm:$0xff]  }
  0x58   : > { %3865 = vrot.lane.b32.xlu0 %v7050_v21, %s8389_s18  ;;  %3916 = vrot.lane.b32.xlu1 %v7052_v23, %s8389_s18  ;;  %v7118_v21 = vld [vmem:[%s8431_s17 + $0x60] sm:$0xf]  ;;  %v7120_v23 = vld [vmem:[%s8431_s17 + $0x84] sm:$0xf] }
  0x59   : > { %v7122_v22 = vcombine.low %v7118_v21, %v7118_v21  ;;  %v7124_v24 = vcombine.low %v7120_v23, %v7120_v23  ;;  %v515_v21 = vsel %vm233_vm1, %v8441_v6, 0  ;;  %v8727_v23 = vld [vmem:[%s9883_s0 + $0x20] sm:$0xff]  }
  0x5c   : > { %4063 = vrot.lane.b32.xlu0 %v7058_v27, %s8389_s18  ;;  %4114 = vrot.lane.b32.xlu1 %v7060_v31, %s8389_s18  ;;  %v7126_v27 = vld [vmem:[%s8431_s17 + $0x1c] sm:$0xf]  ;;  %v7128_v31 = vld [vmem:[%s8431_s17 + $0x40] sm:$0xf] }
  0x5d   : > { %v7130_v28 = vcombine.low %v7126_v27, %v7126_v27  ;;  %v7132_v32 = vcombine.low %v7128_v31, %v7128_v31  ;;  %v7172_v27 = vld [vmem:[%s8431_s17 + $0x8c] sm:$0xf] }
  0x5e   : > { %v7176_v6 = vcombine.low %v7172_v27, %v7172_v27 }
  0x60   : > { %4261 = vrot.lane.b32.xlu0 %v7066_v35, %s8389_s18  ;;  %4312 = vrot.lane.b32.xlu1 %v7068_v39, %s8389_s18  ;;  %v7134_v35 = vld [vmem:[%s8431_s17 + $0x64] sm:$0xf]  ;;  %v7136_v39 = vld [vmem:[%s8431_s17 + $0x88] sm:$0xf] }
  0x61   : > { %v7138_v36 = vcombine.low %v7134_v35, %v7134_v35  ;;  %v7140_v40 = vcombine.low %v7136_v39, %v7136_v39  ;;  %v219_v35 = vld [vmem:[%s9884_s1] sm:$0xff] }
  0x64   : > { %4472 = vrot.lane.b32.xlu0 %v7078_v43, %s8389_s18  ;;  %4523 = vrot.lane.b32.xlu1 %v7080_v47, %s8389_s18  ;;  %v7146_v43 = vld [vmem:[%s8431_s17 + $0x1c] sm:$0xf]  ;;  %v7147_v47 = vld [vmem:[%s8431_s17 + $0x40] sm:$0xf] }
  0x65   : > { %v7150_v44 = vcombine.low %v7146_v43, %v7146_v43  ;;  %v7152_v48 = vcombine.low %v7147_v47, %v7147_v47  ;;  %v8759_v43 = vld [vmem:[%s9883_s0 + $0x30] sm:$0xff]   ;;  %v8771_v47 = vld [vmem:[%s9883_s0 + $0x38] sm:$0xff]  }
  0x68   : > { %4668 = vrot.lane.b32.xlu0 %v7086_v50, %s8389_s18  ;;  %4719 = vrot.lane.b32.xlu1 %v7088_v54, %s8389_s18 }
  0x6c   : > { %4866 = vrot.lane.b32.xlu0 %v7094_v58, %s8389_s18  ;;  %4917 = vrot.lane.b32.xlu1 %v7096_v62, %s8389_s18  ;;  %v7158_v58 = vcombine.low %v7154_v52, %v7154_v52  ;;  %v7160_v62 = vcombine.low %v7156_v60, %v7156_v60  ;;  %v8805_v60 = vld [vmem:[%s9883_s0 + $0x50] sm:$0xff]  }
  0x70   : > { %5064 = vrot.lane.b32.xlu0 %v7102_v4, %s8389_s18  ;;  %5115 = vrot.lane.b32.xlu1 %v7104_v8, %s8389_s18 }
  0x74   : > { %5275 = vrot.lane.b32.xlu0 %v7114_v13, %s8389_s18  ;;  %5326 = vrot.lane.b32.xlu1 %v7116_v17, %s8389_s18  ;;  %v7166_v13 = vcombine.low %v7162_v7, %v7162_v7  ;;  %v7168_v17 = vcombine.low %v7164_v3, %v7164_v3  ;;  %v8829_v7 = vld [vmem:[%s9883_s0 + $0x60] sm:$0xff]  }
  0x78   : > { %5471 = vrot.lane.b32.xlu0 %v7122_v22, %s8389_s18  ;;  %5522 = vrot.lane.b32.xlu1 %v7124_v24, %s8389_s18  ;;  %v7170_v22 = vld [vmem:[%s8431_s17 + $0x68] sm:$0xf] }
  0x79   : > { %v7174_v24 = vcombine.low %v7170_v22, %v7170_v22  ;;  %v1214_v22 = vsel %vm233_vm1, %v8486_v19, 0 }
  0x7c   : > { %5669 = vrot.lane.b32.xlu0 %v7130_v28, %s8389_s18  ;;  %5720 = vrot.lane.b32.xlu1 %v7132_v32, %s8389_s18  ;;  %v8741_v32 = vld [vmem:[%s9883_s0 + $0x28] sm:$0xff]  }
  0x80   : > { %5867 = vrot.lane.b32.xlu0 %v7138_v36, %s8389_s18  ;;  %5918 = vrot.lane.b32.xlu1 %v7140_v40, %s8389_s18  ;;  %v220_v36 = vld [vmem:[%s9884_s1 + $0x8] sm:$0xff]  ;;  %v8390_v40 = vmov 0  }
  0x81   : > { %8238 = vset.pattern.permute.xlu0 %v8390_v40  ;;  %8239 = vset.pattern.permute.xlu1 %v8390_v40 }
  0x84   : > { %6078 = vrot.lane.b32.xlu0 %v7150_v44, %s8389_s18  ;;  %6129 = vrot.lane.b32.xlu1 %v7152_v48, %s8389_s18  ;;  %v689_v44 = vsel %vm233_vm1, %v8449_v10, 0  ;;  %v745_v48 = vsel %vm233_vm1, %v8452_v11, 0 }
  0x86   : > { %v339_v50 = vpop.permute.xlu0 %338  ;;  %v569_v16 = vpop.permute.xlu1 %568 }
  0x87   : > { %v344_v54 = vsel %vm233_vm1, %v339_v50, 0  ;;  %v574_v28 = vsel %vm233_vm1, %v569_v16, 0  ;;  %v8783_v50 = vld [vmem:[%s9883_s0 + $0x40] sm:$0xff]   ;;  %v8851_v16 = vld [vmem:[%s9883_s0 + $0x70] sm:$0xff]  }
  0x88   : > { %7470 = vmatpush3.bf16.msra.mxu0 %v344_v54  ;;  %6274 = vrot.lane.b32.xlu0 %v7158_v58, %s8389_s18  ;;  %v8794_v54 = vld [vmem:[%s9883_s0 + $0x48] sm:$0xff]  }
  0x89   : > { %7481 = vmatprep.subr.bf16.mxu0 %v8387_v0  ;;  %6325 = vrot.lane.b32.xlu1 %v7160_v62, %s8389_s18  ;;  %v919_v62 = vsel %vm233_vm1, %v8467_v15, 0 }
  0x8a   : > { %v398_v4 = vpop.permute.xlu0 %397  ;;  %v628_v31 = vpop.permute.xlu1 %627 }
  0x8b   : > { %v403_v8 = vsel %vm233_vm1, %v398_v4, 0  ;;  %7472 = vmatmul.mubr.msk.bf16.vlgmr.msra.gmra.mrb[4].mxu0 %vm229_vm2, %v8696_v56  ;;  %v633_v39 = vsel %vm233_vm1, %v628_v31, 0  ;;  %v975_v4 = vsel %vm233_vm1, %v8476_v18, 0 }
  0x8c   : > { %7476 = vmatpush3.bf16.msra.mxu1 %v403_v8  ;;  %7482 = vmatpush3.bf16.msra.mxu0 %v459_v1  ;;  %v8817_v1 = vld [vmem:[%s9883_s0 + $0x58] sm:$0xff]  }
  0x8d   : > { %7483 = vmatprep.mubr.msk.bf16.mxu0 %vm8388_vm0, %v8387_v0  ;;  %7487 = vmatprep.subr.bf16.mxu1 %v8387_v0 }
  0x8e   : > { %7493 = vmatprep.subr.bf16.mxu0 %v8387_v0  ;;  %6472 = vrot.lane.b32.xlu0 %v7166_v13, %s8389_s18  ;;  %v799_v10 = vpop.permute.xlu0 %798  ;;  %v858_v11 = vpop.permute.xlu1 %857  ;;  %v8840_v13 = vld [vmem:[%s9883_s0 + $0x68] sm:$0xff]  }
  0x8f   : > { %7478 = vmatmul.mubr.msk.bf16.vlgmr.msra.gmra.mrb[4].mxu1 %vm229_vm2, %v8711_v9  ;;  %6523 = vrot.lane.b32.xlu1 %v7168_v17, %s8389_s18  ;;  %v804_v52 = vsel %vm233_vm1, %v799_v10, 0  ;;  %v863_v58 = vsel %vm233_vm1, %v858_v11, 0  ;;  %v1170_v17 = vsel %vm233_vm1, %v8489_v20, 0  ;;  %v1804_v11 = vsel %vm233_vm1, %v8533_v34, 0 }
  0x90   : > { %7488 = vmatpush3.bf16.msra.mxu1 %v515_v21  ;;  %7489 = vmatprep.mubr.msk.bf16.mxu1 %vm8388_vm0, %v8387_v0  ;;  %v8863_v21 = vld [vmem:[%s9883_s0 + $0x78] sm:$0xff]  }
  0x91   : > { %7499 = vmatprep.subr.bf16.mxu1 %v8387_v0 }
  0x92   : > { %6670 = vrot.lane.b32.xlu0 %v7174_v24, %s8389_s18  ;;  %v1029_v15 = vpop.permute.xlu0 %1028  ;;  %v1088_v18 = vpop.permute.xlu1 %1087 }
  0x93   : > { %7484 = vmatmul.mubr.msk.bf16.vlgmr.msra.gmra.mrb[8].mxu0 %vm229_vm2, %v8727_v23  ;;  %6721 = vrot.lane.b32.xlu1 %v7176_v6, %s8389_s18  ;;  %v1034_v8 = vsel %vm233_vm1, %v1029_v15, 0  ;;  %v1093_v3 = vsel %vm233_vm1, %v1088_v18, 0  ;;  %v1361_v6 = vsel %vm233_vm1, %v8506_v25, 0 }
  0x94   : > { %7494 = vmatpush3.bf16.msra.mxu0 %v574_v28  ;;  %7495 = vmatprep.mubr.msk.bf16.mxu0 %vm8388_vm0, %v8387_v0  ;;  %v1408_v28 = vsel %vm233_vm1, %v8509_v26, 0 }
  0x95   : > { %7505 = vmatprep.subr.bf16.mxu0 %v8387_v0 }
  0x96   : > { %1140 = vperm.xlu0 %8238, %v219_v35   ;;  %v1261_v20 = vpop.permute.xlu0 %1260  ;;  %v1312_v27 = vpop.permute.xlu1 %1311 }
  0x97   : > { %7490 = vmatmul.mubr.msk.bf16.vlgmr.msra.gmra.mrb[8].mxu1 %vm229_vm2, %v8741_v32  ;;  %1145 = vperm.xlu1 %8239, %v220_v36   ;;  %v1263_v24 = vsel %vm233_vm1, %v1261_v20, 0  ;;  %v1314_v19 = vsel %vm233_vm1, %v1312_v27, 0  ;;  %v1558_v36 = vsel %vm233_vm1, %v8518_v29, 0  ;;  %v2017_v27 = vsel %vm233_vm1, %v8542_v37, 0 }
  0x98   : > { %7500 = vmatpush3.bf16.msra.mxu1 %v633_v39  ;;  %7501 = vmatprep.mubr.msk.bf16.mxu1 %vm8388_vm0, %v8387_v0  ;;  %v1606_v39 = vsel %vm233_vm1, %v8521_v30, 0 }
  0x99   : > { %7511 = vmatprep.subr.bf16.mxu1 %v8387_v0 }
  0x9a   : > { %v1457_v31 = vpop.permute.xlu0 %1456  ;;  %v1508_v35 = vpop.permute.xlu1 %1507 }
  0x9b   : > { %7496 = vmatmul.mubr.msk.bf16.vlgmr.msra.gmra.mrb[12].mxu0 %vm229_vm2, %v8759_v43  ;;  %v1459_v25 = vsel %vm233_vm1, %v1457_v31, 0  ;;  %v1510_v26 = vsel %vm233_vm1, %v1508_v35, 0 }
  0x9c   : > { %7506 = vmatpush3.bf16.msra.mxu0 %v689_v44  ;;  %7507 = vmatprep.mubr.msk.bf16.mxu0 %vm8388_vm0, %v8387_v0 }
  0x9d   : > { %7517 = vmatprep.subr.bf16.mxu0 %v8387_v0 }
  0x9e   : > { %v1655_v40 = vpop.permute.xlu0 %1654  ;;  %v1706_v44 = vpop.permute.xlu1 %1705 }
  0x9f   : > { %7502 = vmatmul.mubr.msk.bf16.vlgmr.msra.gmra.mrb[12].mxu1 %vm229_vm2, %v8771_v47  ;;  %v1657_v29 = vsel %vm233_vm1, %v1655_v40, 0  ;;  %v1708_v30 = vsel %vm233_vm1, %v1706_v44, 0  ;;  %v2409_v44 = vsel %vm233_vm1, %v8569_v46, 0 }
  0xa0   : > { %7512 = vmatpush3.bf16.msra.mxu1 %v745_v48  ;;  %7513 = vmatprep.mubr.msk.bf16.mxu1 %vm8388_vm0, %v8387_v0  ;;  %v1756_v48 = vsel %vm233_vm1, %v8530_v33, 0 }
  0xa1   : > { %7523 = vmatprep.subr.bf16.mxu1 %v8387_v0 }
  0xa2   : > { %v1853_v10 = vpop.permute.xlu0 %1852 }
  0xa3   : > { %7508 = vmatmul.mubr.msk.bf16.vlgmr.msra.gmra.mrb[16].mxu0 %vm229_vm2, %v8783_v50 }
  0xa4   : > { %7518 = vmatpush3.bf16.msra.mxu0 %v804_v52  ;;  %7519 = vmatprep.mubr.msk.bf16.mxu0 %vm8388_vm0, %v8387_v0 }
  0xa5   : > { %7529 = vmatprep.subr.bf16.mxu0 %v8387_v0 }
  0xa7   : > { %7514 = vmatmul.mubr.msk.bf16.vlgmr.msra.gmra.mrb[16].mxu1 %vm229_vm2, %v8794_v54 }
  0xa8   : > { %7524 = vmatpush3.bf16.msra.mxu1 %v863_v58  ;;  %7525 = vmatprep.mubr.msk.bf16.mxu1 %vm8388_vm0, %v8387_v0 }
  0xa9   : > { %7535 = vmatprep.subr.bf16.mxu1 %v8387_v0 }
  0xab   : > { %7520 = vmatmul.mubr.msk.bf16.vlgmr.msra.gmra.mrb[20].mxu0 %vm229_vm2, %v8805_v60 }
  0xac   : > { %7530 = vmatpush3.bf16.msra.mxu0 %v919_v62  ;;  %7531 = vmatprep.mubr.msk.bf16.mxu0 %vm8388_vm0, %v8387_v0 }
  0xad   : > { %7541 = vmatprep.subr.bf16.mxu0 %v8387_v0 }
  0xaf   : > { %7526 = vmatmul.mubr.msk.bf16.vlgmr.msra.gmra.mrb[20].mxu1 %vm229_vm2, %v8817_v1 }
  0xb0   : > { %7536 = vmatpush3.bf16.msra.mxu1 %v975_v4  ;;  %7537 = vmatprep.mubr.msk.bf16.mxu1 %vm8388_vm0, %v8387_v0 }
  0xb1   : > { %7547 = vmatprep.subr.bf16.mxu1 %v8387_v0 }
  0xb3   : > { %7532 = vmatmul.mubr.msk.bf16.vlgmr.msra.gmra.mrb[24].mxu0 %vm229_vm2, %v8829_v7 }
  0xb4   : > { %7542 = vmatpush3.bf16.msra.mxu0 %v1034_v8  ;;  %7543 = vmatprep.mubr.msk.bf16.mxu0 %vm8388_vm0, %v8387_v0 }
  0xb5   : > { %7553 = vmatprep.subr.bf16.mxu0 %v8387_v0 }
  0xb7   : > { %7538 = vmatmul.mubr.msk.bf16.vlgmr.msra.gmra.mrb[24].mxu1 %vm229_vm2, %v8840_v13 }
  0xb8   : > { %7548 = vmatpush3.bf16.msra.mxu1 %v1093_v3  ;;  %7549 = vmatprep.mubr.msk.bf16.mxu1 %vm8388_vm0, %v8387_v0 }
  0xb9   : > { %7559 = vmatprep.subr.bf16.mxu1 %v8387_v0 }
  0xbb   : > { %7544 = vmatmul.mubr.msk.bf16.vlgmr.msra.gmra.mrb[28].mxu0 %vm229_vm2, %v8851_v16 }
  0xbc   : > { %7554 = vmatpush3.bf16.msra.mxu0 %v1170_v17  ;;  %7555 = vmatprep.mubr.msk.bf16.mxu0 %vm8388_vm0, %v8387_v0  ;;  %v1855_v17 = vsel %vm233_vm1, %v1853_v10, 0 }
  0xbd   : > { %7565 = vmatprep.subr.bf16.mxu0 %v8387_v0 }
  0xbf   : > { %7550 = vmatmul.mubr.msk.bf16.vlgmr.msra.gmra.mrb[28].mxu1 %vm229_vm2, %v8863_v21 }
  0xc0   : > { %7560 = vmatpush3.bf16.msra.mxu1 %v1214_v22  ;;  %7561 = vmatprep.mubr.msk.bf16.mxu1 %vm8388_vm0, %v8387_v0  ;;  %v1904_v22 = vpop.permute.xlu1 %1903 }
  0xc1   : > { %7571 = vmatprep.subr.bf16.mxu1 %v8387_v0  ;;  %v1906_v20 = vsel %vm233_vm1, %v1904_v22, 0  ;;  %v2820_v22 = vsel %vm233_vm1, %v8592_v53, 0  ;;  %v9117_v53 = vld [vmem:[%s9883_s0 + $0x8] sm:$0xff]  }
  0xc3   : > { %7556 = vmatmul.mubr.msk.bf16.vlgmr.msra.gmra.mrb[32].mxu0 %vm229_vm2, %v8457_v12 }
  0xc4   : > { %7566 = vmatpush3.bf16.msra.mxu0 %v1263_v24  ;;  %7567 = vmatprep.mubr.msk.bf16.mxu0 %vm8388_vm0, %v8387_v0  ;;  %v1973_v24 = vsel %vm233_vm1, %v8545_v38, 0 }
  0xc5   : > { %7577 = vmatprep.subr.bf16.mxu0 %v8387_v0 }
  0xc7   : > { %7562 = vmatmul.mubr.msk.bf16.vlgmr.msra.gmra.mrb[32].mxu1 %vm229_vm2, %v8463_v14 }
  0xc8   : > { %7572 = vmatpush3.bf16.msra.mxu1 %v1314_v19  ;;  %7573 = vmatprep.mubr.msk.bf16.mxu1 %vm8388_vm0, %v8387_v0  ;;  %v2064_v19 = vpop.permute.xlu0 %2063 }
  0xc9   : > { %7583 = vmatprep.subr.bf16.mxu1 %v8387_v0  ;;  %v2066_v38 = vsel %vm233_vm1, %v2064_v19, 0 }
  0xcb   : > { %7568 = vmatmul.mubr.msk.bf16.vlgmr.msra.gmra.mrb[36].mxu0 %vm229_vm2, %v8696_v56 }
  0xcc   : > { %7578 = vmatpush3.bf16.msra.mxu0 %v1361_v6  ;;  %7579 = vmatprep.mubr.msk.bf16.mxu0 %vm8388_vm0, %v8387_v0  ;;  %v2115_v6 = vpop.permute.xlu1 %2114 }
  0xcd   : > { %7589 = vmatprep.subr.bf16.mxu0 %v8387_v0  ;;  %v2117_v37 = vsel %vm233_vm1, %v2115_v6, 0  ;;  %v9133_v6 = vld [vmem:[%s9883_s0] sm:$0xff]  }
  0xcf   : > { %7574 = vmatmul.mubr.msk.bf16.vlgmr.msra.gmra.mrb[36].mxu1 %vm229_vm2, %v8711_v9 }
  0xd0   : > { %7584 = vmatpush3.bf16.msra.mxu1 %v1408_v28  ;;  %7585 = vmatprep.mubr.msk.bf16.mxu1 %vm8388_vm0, %v8387_v0  ;;  %v2164_v28 = vsel %vm233_vm1, %v8554_v41, 0  ;;  %v2311_v41 = vpop.permute.xlu1 %2310 }
  0xd1   : > { %7595 = vmatprep.subr.bf16.mxu1 %v8387_v0  ;;  %v2313_v35 = vsel %vm233_vm1, %v2311_v41, 0 }
  0xd3   : > { %7580 = vmatmul.mubr.msk.bf16.vlgmr.msra.gmra.mrb[40].mxu0 %vm229_vm2, %v8727_v23 }
  0xd4   : > { %7590 = vmatpush3.bf16.msra.mxu0 %v1459_v25  ;;  %7591 = vmatprep.mubr.msk.bf16.mxu0 %vm8388_vm0, %v8387_v0 }
  0xd5   : > { %7601 = vmatprep.subr.bf16.mxu0 %v8387_v0 }
  0xd7   : > { %7586 = vmatmul.mubr.msk.bf16.vlgmr.msra.gmra.mrb[40].mxu1 %vm229_vm2, %v8741_v32 }
  0xd8   : > { %7596 = vmatpush3.bf16.msra.mxu1 %v1510_v26  ;;  %7597 = vmatprep.mubr.msk.bf16.mxu1 %vm8388_vm0, %v8387_v0 }
  0xd9   : > { %7607 = vmatprep.subr.bf16.mxu1 %v8387_v0 }
  0xdb   : > { %7592 = vmatmul.mubr.msk.bf16.vlgmr.msra.gmra.mrb[44].mxu0 %vm229_vm2, %v8759_v43 }
  0xdc   : > { %7602 = vmatpush3.bf16.msra.mxu0 %v1558_v36  ;;  %7603 = vmatprep.mubr.msk.bf16.mxu0 %vm8388_vm0, %v8387_v0 }
  0xdd   : > { %7613 = vmatprep.subr.bf16.mxu0 %v8387_v0 }
  0xdf   : > { %7598 = vmatmul.mubr.msk.bf16.vlgmr.msra.gmra.mrb[44].mxu1 %vm229_vm2, %v8771_v47 }
  0xe0   : > { %7608 = vmatpush3.bf16.msra.mxu1 %v1606_v39  ;;  %7609 = vmatprep.mubr.msk.bf16.mxu1 %vm8388_vm0, %v8387_v0  ;;  %v2361_v39 = vsel %vm233_vm1, %v8566_v45, 0 }
  0xe1   : > { %7619 = vmatprep.subr.bf16.mxu1 %v8387_v0 }
  0xe3   : > { %7604 = vmatmul.mubr.msk.bf16.vlgmr.msra.gmra.mrb[48].mxu0 %vm229_vm2, %v8783_v50 }
  0xe4   : > { %7614 = vmatpush3.bf16.msra.mxu0 %v1657_v29  ;;  %7615 = vmatprep.mubr.msk.bf16.mxu0 %vm8388_vm0, %v8387_v0 }
  0xe5   : > { %7625 = vmatprep.subr.bf16.mxu0 %v8387_v0 }
  0xe7   : > { %7610 = vmatmul.mubr.msk.bf16.vlgmr.msra.gmra.mrb[48].mxu1 %vm229_vm2, %v8794_v54 }
  0xe8   : > { %7620 = vmatpush3.bf16.msra.mxu1 %v1708_v30  ;;  %7621 = vmatprep.mubr.msk.bf16.mxu1 %vm8388_vm0, %v8387_v0 }
  0xe9   : > { %7631 = vmatprep.subr.bf16.mxu1 %v8387_v0  ;;  %v271_v52 = vpop.f32.mrb[0].mxu0 }
  0xea   : > { %v7461_v58 = vpop.f32.mrb[1].mxu0 }
  0xeb   : > { %7616 = vmatmul.mubr.msk.bf16.vlgmr.msra.gmra.mrb[52].mxu0 %vm229_vm2, %v8805_v60  ;;  %v274_v33 = vpop.f32.mrb[2].mxu0 }
  0xec   : > { %7626 = vmatpush3.bf16.msra.mxu0 %v1756_v48  ;;  %7627 = vmatprep.mubr.msk.bf16.mxu0 %vm8388_vm0, %v8387_v0  ;;  %v323_v62 = vpop.f32.mrb[0].mxu1  ;;  %v7462_v8 = vpop.f32.mrb[3].mxu0 }
  0xed   : > { %7637 = vmatprep.subr.bf16.mxu0 %v8387_v0  ;;  %v8948_v4 = vadd.f32 %v323_v62, %v271_v52  ;;  %v7467_v15 = vpop.f32.mrb[1].mxu1  ;;  %v2607_v62 = vsel %vm233_vm1, %v8585_v51, 0 }
  0xee   : > { %v326_v18 = vpop.f32.mrb[2].mxu1 }
  0xef   : > { %7622 = vmatmul.mubr.msk.bf16.vlgmr.msra.gmra.mrb[52].mxu1 %vm229_vm2, %v8817_v1  ;;  %v8954_v3 = vadd.f32 %v326_v18, %v274_v33  ;;  %v7468_v34 = vpop.f32.mrb[3].mxu1 }
  0xf0   : > { %7632 = vmatpush3.bf16.msra.mxu1 %v1804_v11  ;;  %7633 = vmatprep.mubr.msk.bf16.mxu1 %vm8388_vm0, %v8387_v0  ;;  %v2559_v11 = vsel %vm233_vm1, %v8580_v49, 0  ;;  %v2776_v34 = vsel %vm233_vm1, %v8597_v55, 0 }
  0xf1   : > { %7643 = vmatprep.subr.bf16.mxu1 %v8387_v0 }
  0xf3   : > { %7628 = vmatmul.mubr.msk.bf16.vlgmr.msra.gmra.mrb[56].mxu0 %vm229_vm2, %v8829_v7 }
  0xf4   : > { %7638 = vmatpush3.bf16.msra.mxu0 %v1855_v17  ;;  %7639 = vmatprep.mubr.msk.bf16.mxu0 %vm8388_vm0, %v8387_v0 }
  0xf5   : > { %7649 = vmatprep.subr.bf16.mxu0 %v8387_v0 }
  0xf7   : > { %7634 = vmatmul.mubr.msk.bf16.vlgmr.msra.gmra.mrb[56].mxu1 %vm229_vm2, %v8840_v13 }
  0xf8   : > { %7644 = vmatpush3.bf16.msra.mxu1 %v1906_v20  ;;  %7645 = vmatprep.mubr.msk.bf16.mxu1 %vm8388_vm0, %v8387_v0 }
  0xf9   : > { %7655 = vmatprep.subr.bf16.mxu1 %v8387_v0 }
  0xfb   : > { %7640 = vmatmul.mubr.msk.bf16.vlgmr.msra.gmra.mrb[60].mxu0 %vm229_vm2, %v8851_v16 }
  0xfc   : > { %7650 = vmatpush3.bf16.msra.mxu0 %v1973_v24  ;;  %7651 = vmatprep.mubr.msk.bf16.mxu0 %vm8388_vm0, %v8387_v0 }
  0xfd   : > { %7661 = vmatprep.subr.bf16.mxu0 %v8387_v0 }
  0xff   : > { %7646 = vmatmul.mubr.msk.bf16.vlgmr.msra.gmra.mrb[60].mxu1 %vm229_vm2, %v8863_v21 }
 0x100   : > { %7656 = vmatpush3.bf16.msra.mxu1 %v2017_v27  ;;  %7657 = vmatprep.mubr.msk.bf16.mxu1 %vm8388_vm0, %v8387_v0 }
 0x101   : > { %7667 = vmatprep.subr.bf16.mxu1 %v8387_v0 }
 0x103   : > { %7652 = vmatmul.mubr.msk.bf16.vlgmr.msra.gmra.mrb[64].mxu0 %vm229_vm2, %v8457_v12  ;;  %v2211_v12 = vsel %vm233_vm1, %v8557_v42, 0  ;;  %v2509_v42 = vpop.permute.xlu1 %2508 }
 0x104   : > { %7662 = vmatpush3.bf16.msra.mxu0 %v2066_v38  ;;  %7663 = vmatprep.mubr.msk.bf16.mxu0 %vm8388_vm0, %v8387_v0  ;;  %v2511_v46 = vsel %vm233_vm1, %v2509_v42, 0 }
 0x105   : > { %7673 = vmatprep.subr.bf16.mxu0 %v8387_v0 }
 0x107   : > { %7658 = vmatmul.mubr.msk.bf16.vlgmr.msra.gmra.mrb[64].mxu1 %vm229_vm2, %v8463_v14  ;;  %v2260_v14 = vpop.permute.xlu0 %2259  ;;  %v2707_v36 = vpop.permute.xlu1 %2706 }
 0x108   : > { %7668 = vmatpush3.bf16.msra.mxu1 %v2117_v37  ;;  %7669 = vmatprep.mubr.msk.bf16.mxu1 %vm8388_vm0, %v8387_v0  ;;  %v2262_v31 = vsel %vm233_vm1, %v2260_v14, 0  ;;  %v2709_v8 = vsel %vm233_vm1, %v2707_v36, 0  ;;  %v2967_v37 = vsel %vm233_vm1, %v8604_v57, 0  ;;  %v3014_v14 = vsel %vm233_vm1, %v8609_v59, 0 }
 0x109   : > { %7679 = vmatprep.subr.bf16.mxu1 %v8387_v0  ;;  %v3212_v36 = vsel %vm233_vm1, %v8621_v63, 0 }
 0x10b   : > { %7664 = vmatmul.mubr.msk.bf16.vlgmr.msra.gmra.mrb[68].mxu0 %vm229_vm2, %v8696_v56  ;;  %v2458_v25 = vpop.permute.xlu0 %2457  ;;  %v9027_v29 = vpop.permute.xlu1 %2917 }
 0x10c   : > { %7674 = vmatpush3.bf16.msra.mxu0 %v2164_v28  ;;  %7675 = vmatprep.mubr.msk.bf16.mxu0 %vm8388_vm0, %v8387_v0  ;;  %v2460_v30 = vsel %vm233_vm1, %v2458_v25, 0  ;;  %v2920_v19 = vsel %vm233_vm1, %v9027_v29, 0 }
 0x10d   : > { %7685 = vmatprep.subr.bf16.mxu0 %v8387_v0 }
 0x10f   : > { %7670 = vmatmul.mubr.msk.bf16.vlgmr.msra.gmra.mrb[68].mxu1 %vm229_vm2, %v8711_v9  ;;  %v2656_v26 = vpop.permute.xlu0 %2655  ;;  %v9040_v48 = vpop.permute.xlu1 %3113 }
 0x110   : > { %7680 = vmatpush3.bf16.msra.mxu1 %v2211_v12  ;;  %7681 = vmatprep.mubr.msk.bf16.mxu1 %vm8388_vm0, %v8387_v0  ;;  %v2658_v49 = vsel %vm233_vm1, %v2656_v26, 0  ;;  %v3116_v59 = vsel %vm233_vm1, %v9040_v48, 0 }
 0x111   : > { %7691 = vmatprep.subr.bf16.mxu1 %v8387_v0 }
 0x113   : > { %7676 = vmatmul.mubr.msk.bf16.vlgmr.msra.gmra.mrb[72].mxu0 %vm229_vm2, %v8727_v23  ;;  %v2867_v40 = vpop.permute.xlu0 %2866  ;;  %v9054_v52 = vpop.permute.xlu1 %3311 }
 0x114   : > { %7686 = vmatpush3.bf16.msra.mxu0 %v2262_v31  ;;  %7687 = vmatprep.mubr.msk.bf16.mxu0 %vm8388_vm0, %v8387_v0  ;;  %v2869_v24 = vsel %vm233_vm1, %v2867_v40, 0 }
 0x115   : > { %7697 = vmatprep.subr.bf16.mxu0 %v8387_v0 }
 0x117   : > { %7682 = vmatmul.mubr.msk.bf16.vlgmr.msra.gmra.mrb[72].mxu1 %vm229_vm2, %v8741_v32  ;;  %v9036_v45 = vpop.permute.xlu0 %3062  ;;  %v9068_v33 = vpop.permute.xlu1 %3509 }
 0x118   : > { %7692 = vmatpush3.bf16.msra.mxu1 %v2313_v35  ;;  %7693 = vmatprep.mubr.msk.bf16.mxu1 %vm8388_vm0, %v8387_v0  ;;  %v3065_v41 = vsel %vm233_vm1, %v9036_v45, 0  ;;  %v3164_v35 = vsel %vm233_vm1, %v8616_v61, 0 }
 0x119   : > { %7703 = vmatprep.subr.bf16.mxu1 %v8387_v0 }
 0x11b   : > { %7688 = vmatmul.mubr.msk.bf16.vlgmr.msra.gmra.mrb[76].mxu0 %vm229_vm2, %v8759_v43  ;;  %v9048_v10 = vpop.permute.xlu0 %3260  ;;  %v9082_v51 = vpop.permute.xlu1 %3720 }
 0x11c   : > { %7698 = vmatpush3.bf16.msra.mxu0 %v2361_v39  ;;  %7699 = vmatprep.mubr.msk.bf16.mxu0 %vm8388_vm0, %v8387_v0  ;;  %v3263_v45 = vsel %vm233_vm1, %v9048_v10, 0 }
 0x11d   : > { %7709 = vmatprep.subr.bf16.mxu0 %v8387_v0 }
 0x11f   : > { %7694 = vmatmul.mubr.msk.bf16.vlgmr.msra.gmra.mrb[76].mxu1 %vm229_vm2, %v8771_v47  ;;  %v9063_v58 = vpop.permute.xlu0 %3458  ;;  %v9095_v17 = vpop.permute.xlu1 %3916 }
 0x120   : > { %7704 = vmatpush3.bf16.msra.mxu1 %v2409_v44  ;;  %7705 = vmatprep.mubr.msk.bf16.mxu1 %vm8388_vm0, %v8387_v0 }
 0x121   : > { %7715 = vmatprep.subr.bf16.mxu1 %v8387_v0 }
 0x123   : > { %7700 = vmatmul.mubr.msk.bf16.vlgmr.msra.gmra.mrb[80].mxu0 %vm229_vm2, %v8783_v50  ;;  %v9076_v15 = vpop.permute.xlu0 %3669  ;;  %v9110_v55 = vpop.permute.xlu1 %4114 }
 0x124   : > { %7710 = vmatpush3.bf16.msra.mxu0 %v2460_v30  ;;  %7711 = vmatprep.mubr.msk.bf16.mxu0 %vm8388_vm0, %v8387_v0 }
 0x125   : > { %7721 = vmatprep.subr.bf16.mxu0 %v8387_v0 }
 0x127   : > { %7706 = vmatmul.mubr.msk.bf16.vlgmr.msra.gmra.mrb[80].mxu1 %vm229_vm2, %v8794_v54  ;;  %v9090_v18 = vpop.permute.xlu0 %3865  ;;  %v9128_v38 = vpop.permute.xlu1 %4312 }
 0x128   : > { %7716 = vmatpush3.bf16.msra.mxu1 %v2511_v46  ;;  %7717 = vmatprep.mubr.msk.bf16.mxu1 %vm8388_vm0, %v8387_v0 }
 0x129   : > { %7727 = vmatprep.subr.bf16.mxu1 %v8387_v0 }
 0x12b   : > { %7712 = vmatmul.mubr.msk.bf16.vlgmr.msra.gmra.mrb[84].mxu0 %vm229_vm2, %v8805_v60  ;;  %v9104_v20 = vpop.permute.xlu0 %4063  ;;  %v9148_v12 = vpop.permute.xlu1 %4523 }
 0x12c   : > { %7722 = vmatpush3.bf16.msra.mxu0 %v2559_v11  ;;  %7723 = vmatprep.mubr.msk.bf16.mxu0 %vm8388_vm0, %v8387_v0 }
 0x12d   : > { %7733 = vmatprep.subr.bf16.mxu0 %v8387_v0 }
 0x12f   : > { %7718 = vmatmul.mubr.msk.bf16.vlgmr.msra.gmra.mrb[84].mxu1 %vm229_vm2, %v8817_v1  ;;  %v9123_v27 = vpop.permute.xlu0 %4261  ;;  %v9162_v31 = vpop.permute.xlu1 %4719 }
 0x130   : > { %7728 = vmatpush3.bf16.msra.mxu1 %v2607_v62  ;;  %7729 = vmatprep.mubr.msk.bf16.mxu1 %vm8388_vm0, %v8387_v0 }
 0x131   : > { %7739 = vmatprep.subr.bf16.mxu1 %v8387_v0 }
 0x133   : > { %7724 = vmatmul.mubr.msk.bf16.vlgmr.msra.gmra.mrb[88].mxu0 %vm229_vm2, %v8829_v7  ;;  %v9142_v28 = vpop.permute.xlu0 %4472  ;;  %v9177_v42 = vpop.permute.xlu1 %4917 }
 0x134   : > { %7734 = vmatpush3.bf16.msra.mxu0 %v2658_v49  ;;  %7735 = vmatprep.mubr.msk.bf16.mxu0 %vm8388_vm0, %v8387_v0 }
 0x135   : > { %7745 = vmatprep.subr.bf16.mxu0 %v8387_v0 }
 0x137   : > { %7730 = vmatmul.mubr.msk.bf16.vlgmr.msra.gmra.mrb[88].mxu1 %vm229_vm2, %v8840_v13  ;;  %v9157_v57 = vpop.permute.xlu0 %4668  ;;  %v9191_v40 = vpop.permute.xlu1 %5115 }
 0x138   : > { %7740 = vmatpush3.bf16.msra.mxu1 %v2709_v8  ;;  %7741 = vmatprep.mubr.msk.bf16.mxu1 %vm8388_vm0, %v8387_v0 }
 0x139   : > { %7751 = vmatprep.subr.bf16.mxu1 %v8387_v0 }
 0x13b   : > { %7736 = vmatmul.mubr.msk.bf16.vlgmr.msra.gmra.mrb[92].mxu0 %vm229_vm2, %v8851_v16  ;;  %v9171_v25 = vpop.permute.xlu0 %4866  ;;  %v9208_v62 = vpop.permute.xlu1 %5326 }
 0x13c   : > { %7746 = vmatpush3.bf16.msra.mxu0 %v2776_v34  ;;  %7747 = vmatprep.mubr.msk.bf16.mxu0 %vm8388_vm0, %v8387_v0 }
 0x13d   : > { %7757 = vmatprep.subr.bf16.mxu0 %v8387_v0 }
 0x13f   : > { %7742 = vmatmul.mubr.msk.bf16.vlgmr.msra.gmra.mrb[92].mxu1 %vm229_vm2, %v8863_v21  ;;  %v9186_v26 = vpop.permute.xlu0 %5064 }
 0x140   : > { %7752 = vmatpush3.bf16.msra.mxu1 %v2820_v22  ;;  %7753 = vmatprep.mubr.msk.bf16.mxu1 %vm8388_vm0, %v8387_v0 }
 0x141   : > { %7763 = vmatprep.subr.bf16.mxu1 %v8387_v0 }
 0x143   : > { %7748 = vmatmul.mubr.msk.bf16.vlgmr.msra.gmra.mrb[96].mxu0 %vm229_vm2, %v9117_v53  ;;  %v9202_v46 = vpop.permute.xlu0 %5275 }
 0x144   : > { %7758 = vmatpush3.bf16.msra.mxu0 %v2869_v24  ;;  %7759 = vmatprep.mubr.msk.bf16.mxu0 %vm8388_vm0, %v8387_v0 }
 0x145   : > { %7769 = vmatprep.subr.bf16.mxu0 %v8387_v0 }
 0x147   : > { %7754 = vmatmul.mubr.msk.bf16.vlgmr.msra.gmra.mrb[96].mxu1 %vm229_vm2, %v9133_v6  ;;  %v9217_v24 = vpop.permute.xlu0 %5471 }
 0x148   : > { %7764 = vmatpush3.bf16.msra.mxu1 %v2920_v19  ;;  %7765 = vmatprep.mubr.msk.bf16.mxu1 %vm8388_vm0, %v8387_v0 }
 0x149   : > { %7775 = vmatprep.subr.bf16.mxu1 %v8387_v0 }
 0x14b   : > { %7760 = vmatmul.mubr.msk.bf16.vlgmr.msra.gmra.mrb[100].mxu0 %vm229_vm2, %v8696_v56 }
 0x14c   : > { %7770 = vmatpush3.bf16.msra.mxu0 %v2967_v37  ;;  %7771 = vmatprep.mubr.msk.bf16.mxu0 %vm8388_vm0, %v8387_v0 }
 0x14d   : > { %7781 = vmatprep.subr.bf16.mxu0 %v8387_v0 }
 0x14f   : > { %7766 = vmatmul.mubr.msk.bf16.vlgmr.msra.gmra.mrb[100].mxu1 %vm229_vm2, %v8711_v9 }
 0x150   : > { %7776 = vmatpush3.bf16.msra.mxu1 %v3014_v14  ;;  %7777 = vmatprep.mubr.msk.bf16.mxu1 %vm8388_vm0, %v8387_v0 }
 0x151   : > { %7787 = vmatprep.subr.bf16.mxu1 %v8387_v0 }
 0x153   : > { %7772 = vmatmul.mubr.msk.bf16.vlgmr.msra.gmra.mrb[104].mxu0 %vm229_vm2, %v8727_v23 }
 0x154   : > { %7782 = vmatpush3.bf16.msra.mxu0 %v3065_v41  ;;  %7783 = vmatprep.mubr.msk.bf16.mxu0 %vm8388_vm0, %v8387_v0  ;;  %v9222_v41 = vpop.permute.xlu1 %5522 }
 0x155   : > { %7793 = vmatprep.subr.bf16.mxu0 %v8387_v0 }
 0x157   : > { %7778 = vmatmul.mubr.msk.bf16.vlgmr.msra.gmra.mrb[104].mxu1 %vm229_vm2, %v8741_v32 }
 0x158   : > { %7788 = vmatpush3.bf16.msra.mxu1 %v3116_v59  ;;  %7789 = vmatprep.mubr.msk.bf16.mxu1 %vm8388_vm0, %v8387_v0 }
 0x159   : > { %7799 = vmatprep.subr.bf16.mxu1 %v8387_v0 }
 0x15b   : > { %7784 = vmatmul.mubr.msk.bf16.vlgmr.msra.gmra.mrb[108].mxu0 %vm229_vm2, %v8759_v43 }
 0x15c   : > { %7794 = vmatpush3.bf16.msra.mxu0 %v3164_v35  ;;  %7795 = vmatprep.mubr.msk.bf16.mxu0 %vm8388_vm0, %v8387_v0 }
 0x15d   : > { %7805 = vmatprep.subr.bf16.mxu0 %v8387_v0 }
 0x15e   : > { %v380_v39 = vpop.f32.mrb[4].mxu0 }
 0x15f   : > { %v387_v61 = vadd.f32 %v380_v39, %v8948_v4  ;;  %v7473_v29 = vpop.f32.mrb[5].mxu0  ;;  %7790 = vmatmul.mubr.msk.bf16.vlgmr.msra.gmra.mrb[108].mxu1 %vm229_vm2, %v8771_v47 }
 0x160   : > { %v383_v44 = vpop.f32.mrb[6].mxu0  ;;  %7800 = vmatpush3.bf16.msra.mxu1 %v3212_v36  ;;  %7801 = vmatprep.mubr.msk.bf16.mxu1 %vm8388_vm0, %v8387_v0  ;;  %v9231_v29 = vpop.permute.xlu0 %5669 }
 0x161   : > { %v388_v63 = vadd.f32 %v383_v44, %v8954_v3  ;;  %v7474_v30 = vpop.f32.mrb[7].mxu0  ;;  %7811 = vmatprep.subr.bf16.mxu1 %v8387_v0  ;;  %v3314_v3 = vsel %vm233_vm1, %v9054_v52, 0  ;;  %v3362_v52 = vsel %vm233_vm1, %v8628_v2, 0  ;;  %v3410_v2 = vsel %vm233_vm1, %v8633_v5, 0 }
 0x162   : > { %v439_v48 = vpop.f32.mrb[4].mxu1  ;;  %v3461_v5 = vsel %vm233_vm1, %v9063_v58, 0  ;;  %v3512_v58 = vsel %vm233_vm1, %v9068_v33, 0 }
 0x163   : > { %v446_v4 = vadd.f32 %v439_v48, %v387_v61  ;;  %v7479_v11 = vpop.f32.mrb[5].mxu1  ;;  %7796 = vmatmul.mubr.msk.bf16.vlgmr.msra.gmra.mrb[112].mxu0 %vm229_vm2, %v8783_v50 }
 0x164   : > { %v442_v47 = vpop.f32.mrb[6].mxu1  ;;  %7806 = vmatpush3.bf16.msra.mxu0 %v3263_v45  ;;  %7807 = vmatprep.mubr.msk.bf16.mxu0 %vm8388_vm0, %v8387_v0 }
 0x165   : > { %v447_v10 = vadd.f32 %v442_v47, %v388_v63  ;;  %v7480_v49 = vpop.f32.mrb[7].mxu1  ;;  %7817 = vmatprep.subr.bf16.mxu0 %v8387_v0  ;;  %v9237_v63 = vpop.permute.xlu1 %5720 }
 0x166   : > { %v495_v8 = vpop.f32.mrb[8].mxu0 }
 0x167   : > { %v502_v34 = vadd.f32 %v495_v8, %v446_v4  ;;  %v7485_v22 = vpop.f32.mrb[9].mxu0  ;;  %7802 = vmatmul.mubr.msk.bf16.vlgmr.msra.gmra.mrb[112].mxu1 %vm229_vm2, %v8794_v54 }
 0x168   : > { %v498_v50 = vpop.f32.mrb[10].mxu0  ;;  %7812 = vmatpush3.bf16.msra.mxu1 %v3314_v3  ;;  %7813 = vmatprep.mubr.msk.bf16.mxu1 %vm8388_vm0, %v8387_v0  ;;  %v9246_v3 = vpop.permute.xlu0 %5867 }
 0x169   : > { %v503_v19 = vadd.f32 %v498_v50, %v447_v10  ;;  %v7486_v37 = vpop.f32.mrb[11].mxu0  ;;  %7823 = vmatprep.subr.bf16.mxu1 %v8387_v0 }
 0x16a   : > { %v551_v14 = vpop.f32.mrb[8].mxu1  ;;  %v8322_v37 = vld [vmem:[%s8431_s17 + $0x34] sm:$0xf] }
 0x16b   : > { %v558_v59 = vadd.f32 %v551_v14, %v502_v34  ;;  %v7491_v35 = vpop.f32.mrb[9].mxu1  ;;  %7808 = vmatmul.mubr.msk.bf16.vlgmr.msra.gmra.mrb[116].mxu0 %vm229_vm2, %v8805_v60  ;;  %v9251_v34 = vpop.permute.xlu1 %5918 }
 0x16c   : > { %v554_v54 = vpop.f32.mrb[10].mxu1  ;;  %7818 = vmatpush3.bf16.msra.mxu0 %v3362_v52  ;;  %7819 = vmatprep.mubr.msk.bf16.mxu0 %vm8388_vm0, %v8387_v0  ;;  %v3579_v52 = vsel %vm233_vm1, %v8322_v37, 0 }
 0x16d   : > { %v559_v36 = vadd.f32 %v554_v54, %v503_v19  ;;  %v7492_v39 = vpop.f32.mrb[11].mxu1  ;;  %7829 = vmatprep.subr.bf16.mxu0 %v8387_v0 }
 0x16e   : > { %v610_v61 = vpop.f32.mrb[12].mxu0 }
 0x16f   : > { %v617_v44 = vadd.f32 %v610_v61, %v558_v59  ;;  %v7497_v45 = vpop.f32.mrb[13].mxu0  ;;  %7814 = vmatmul.mubr.msk.bf16.vlgmr.msra.gmra.mrb[116].mxu1 %vm229_vm2, %v8817_v1  ;;  %v9260_v59 = vpop.permute.xlu0 %6078  ;;  %v8323_v61 = vld [vmem:[%s8431_s17 + $0x10] sm:$0xf] }
 0x170   : > { %v613_v60 = vpop.f32.mrb[14].mxu0  ;;  %7824 = vmatpush3.bf16.msra.mxu1 %v3410_v2  ;;  %7825 = vmatprep.mubr.msk.bf16.mxu1 %vm8388_vm0, %v8387_v0 }
 0x171   : > { %v618_v30 = vadd.f32 %v613_v60, %v559_v36  ;;  %v7498_v48 = vpop.f32.mrb[15].mxu0  ;;  %7835 = vmatprep.subr.bf16.mxu1 %v8387_v0  ;;  %v9266_v36 = vpop.permute.xlu1 %6129 }
 0x172   : > { %v669_v4 = vpop.f32.mrb[12].mxu1  ;;  %v3672_v48 = vsel %vm233_vm1, %v9076_v15, 0  ;;  %v3723_v15 = vsel %vm233_vm1, %v9082_v51, 0 }
 0x173   : > { %v676_v11 = vadd.f32 %v669_v4, %v617_v44  ;;  %v7503_v47 = vpop.f32.mrb[13].mxu1  ;;  %7820 = vmatmul.mubr.msk.bf16.vlgmr.msra.gmra.mrb[120].mxu0 %vm229_vm2, %v8829_v7  ;;  %v3623_v44 = vsel %vm233_vm1, %v8323_v61, 0 }
 0x174   : > { %v672_v1 = vpop.f32.mrb[14].mxu1  ;;  %7830 = vmatpush3.bf16.msra.mxu0 %v3461_v5  ;;  %7831 = vmatprep.mubr.msk.bf16.mxu0 %vm8388_vm0, %v8387_v0 }
 0x175   : > { %v677_v10 = vadd.f32 %v672_v1, %v618_v30  ;;  %v7504_v49 = vpop.f32.mrb[15].mxu1  ;;  %7841 = vmatprep.subr.bf16.mxu0 %v8387_v0  ;;  %v9275_v30 = vpop.permute.xlu0 %6274 }
 0x176   : > { %v725_v8 = vpop.f32.mrb[16].mxu0  ;;  %v9280_v1 = vpop.permute.xlu1 %6325 }
 0x177   : > { %v732_v22 = vadd.f32 %v725_v8, %v676_v11  ;;  %v7509_v7 = vpop.f32.mrb[17].mxu0  ;;  %7826 = vmatmul.mubr.msk.bf16.vlgmr.msra.gmra.mrb[120].mxu1 %vm229_vm2, %v8840_v13 }
 0x178   : > { %v728_v50 = vpop.f32.mrb[18].mxu0  ;;  %7836 = vmatpush3.bf16.msra.mxu1 %v3512_v58  ;;  %7837 = vmatprep.mubr.msk.bf16.mxu1 %vm8388_vm0, %v8387_v0 }
 0x179   : > { %v733_v19 = vadd.f32 %v728_v50, %v677_v10  ;;  %v7510_v33 = vpop.f32.mrb[19].mxu0  ;;  %7847 = vmatprep.subr.bf16.mxu1 %v8387_v0  ;;  %v9289_v7 = vpop.permute.xlu0 %6472 }
 0x17a   : > { %v781_v14 = vpop.f32.mrb[16].mxu1  ;;  %v9293_v37 = vpop.permute.xlu1 %6523 }
 0x17b   : > { %v788_v35 = vadd.f32 %v781_v14, %v732_v22  ;;  %v7515_v54 = vpop.f32.mrb[17].mxu1  ;;  %7832 = vmatmul.mubr.msk.bf16.vlgmr.msra.gmra.mrb[124].mxu0 %vm229_vm2, %v8851_v16  ;;  %v8324_v14 = vld [vmem:[%s8431_s17 + $0x58] sm:$0xf] }
 0x17c   : > { %v784_v13 = vpop.f32.mrb[18].mxu1  ;;  %7842 = vmatpush3.bf16.msra.mxu0 %v3579_v52  ;;  %7843 = vmatprep.mubr.msk.bf16.mxu0 %vm8388_vm0, %v8387_v0 }
 0x17d   : > { %v789_v39 = vadd.f32 %v784_v13, %v733_v19  ;;  %v7516_v2 = vpop.f32.mrb[19].mxu1  ;;  %7853 = vmatprep.subr.bf16.mxu0 %v8387_v0  ;;  %v9302_v61 = vpop.permute.xlu0 %6670 }
 0x17e   : > { %v840_v45 = vpop.f32.mrb[20].mxu0 }
 0x17f   : > { %v847_v60 = vadd.f32 %v840_v45, %v788_v35  ;;  %v7521_v5 = vpop.f32.mrb[21].mxu0  ;;  %7838 = vmatmul.mubr.msk.bf16.vlgmr.msra.gmra.mrb[124].mxu1 %vm229_vm2, %v8863_v21  ;;  %v3770_v35 = vsel %vm233_vm1, %v8324_v14, 0 }
 0x180   : > { %v843_v16 = vpop.f32.mrb[22].mxu0  ;;  %7848 = vmatpush3.bf16.msra.mxu1 %v3623_v44  ;;  %7849 = vmatprep.mubr.msk.bf16.mxu1 %vm8388_vm0, %v8387_v0 }
 0x181   : > { %v848_v4 = vadd.f32 %v843_v16, %v789_v39  ;;  %v7522_v11 = vpop.f32.mrb[23].mxu0  ;;  %7859 = vmatprep.subr.bf16.mxu1 %v8387_v0 }
 0x182   : > { %v899_v47 = vpop.f32.mrb[20].mxu1 }
 0x183   : > { %v906_v58 = vadd.f32 %v899_v47, %v847_v60  ;;  %v7527_v10 = vpop.f32.mrb[21].mxu1  ;;  %7844 = vmatmul.mubr.msk.bf16.vlgmr.msra.gmra.mrb[128].mxu0 %vm229_vm2, %v9117_v53  ;;  %v8325_v60 = vld [vmem:[%s8431_s17 + $0x7c] sm:$0xf]  ;;  %v3868_v47 = vsel %vm233_vm1, %v9090_v18, 0  ;;  %v3919_v18 = vsel %vm233_vm1, %v9095_v17, 0 }
 0x184   : > { %v902_v21 = vpop.f32.mrb[22].mxu1  ;;  %7854 = vmatpush3.bf16.msra.mxu0 %v3672_v48  ;;  %7855 = vmatprep.mubr.msk.bf16.mxu0 %vm8388_vm0, %v8387_v0  ;;  %v3817_v5 = vsel %vm233_vm1, %v8325_v60, 0  ;;  %v9309_v48 = vpop.permute.xlu1 %6721 }
 0x185   : > { %v907_v49 = vadd.f32 %v902_v21, %v848_v4  ;;  %v7528_v8 = vpop.f32.mrb[23].mxu1  ;;  %7865 = vmatprep.subr.bf16.mxu0 %v8387_v0 }
 0x186   : > { %v955_v22 = vpop.f32.mrb[24].mxu0 }
 0x187   : > { %v962_v50 = vadd.f32 %v955_v22, %v906_v58  ;;  %v7533_v19 = vpop.f32.mrb[25].mxu0  ;;  %7850 = vmatmul.mubr.msk.bf16.vlgmr.msra.gmra.mrb[128].mxu1 %vm229_vm2, %v9133_v6 }
 0x188   : > { %v958_v33 = vpop.f32.mrb[26].mxu0  ;;  %7860 = vmatpush3.bf16.msra.mxu1 %v3723_v15  ;;  %7861 = vmatprep.mubr.msk.bf16.mxu1 %vm8388_vm0, %v8387_v0  ;;  %v9318_v15 = vpop.permute.xlu0 %1140 }
 0x189   : > { %v963_v51 = vadd.f32 %v958_v33, %v907_v49  ;;  %v7534_v52 = vpop.f32.mrb[27].mxu0  ;;  %7871 = vmatprep.subr.bf16.mxu1 %v8387_v0  ;;  %v9322_v22 = vpop.permute.xlu1 %1145 }
 0x18a   : > { %v1011_v54 = vpop.f32.mrb[24].mxu1 }
 0x18b   : > { %v1018_v13 = vadd.f32 %v1011_v54, %v962_v50  ;;  %v7539_v39 = vpop.f32.mrb[25].mxu1  ;;  %7856 = vmatmul.mubr.msk.bf16.vlgmr.msra.gmra.mrb[132].mxu0 %vm229_vm2, %v8696_v56 }
 0x18c   : > { %v1014_v2 = vpop.f32.mrb[26].mxu1  ;;  %7866 = vmatpush3.bf16.msra.mxu0 %v3770_v35  ;;  %7867 = vmatprep.mubr.msk.bf16.mxu0 %vm8388_vm0, %v8387_v0  ;;  %v8326_v39 = vld [vmem:[%s8431_s17 + $0x14] sm:$0xf] }
 0x18d   : > { %v1019_v44 = vadd.f32 %v1014_v2, %v963_v51  ;;  %v7540_v45 = vpop.f32.mrb[27].mxu1  ;;  %7877 = vmatprep.subr.bf16.mxu0 %v8387_v0 }
 0x18e   : > { %v1070_v16 = vpop.f32.mrb[28].mxu0 }
 0x18f   : > { %v1077_v4 = vadd.f32 %v1070_v16, %v1018_v13  ;;  %v7545_v11 = vpop.f32.mrb[29].mxu0  ;;  %7862 = vmatmul.mubr.msk.bf16.vlgmr.msra.gmra.mrb[132].mxu1 %vm229_vm2, %v8711_v9 }
 0x190   : > { %v1073_v56 = vpop.f32.mrb[30].mxu0  ;;  %7872 = vmatpush3.bf16.msra.mxu1 %v3817_v5  ;;  %7873 = vmatprep.mubr.msk.bf16.mxu1 %vm8388_vm0, %v8387_v0 }
 0x191   : > { %v1078_v58 = vadd.f32 %v1073_v56, %v1019_v44  ;;  %v7546_v10 = vpop.f32.mrb[31].mxu0  ;;  %7883 = vmatprep.subr.bf16.mxu1 %v8387_v0 }
 0x192   : > { %v1129_v21 = vpop.f32.mrb[28].mxu1 }
 0x193   : > { %v1136_v49 = vadd.f32 %v1129_v21, %v1077_v4  ;;  %v7551_v8 = vpop.f32.mrb[29].mxu1  ;;  %7868 = vmatmul.mubr.msk.bf16.vlgmr.msra.gmra.mrb[136].mxu0 %vm229_vm2, %v8727_v23 }
 0x194   : > { %v1132_v9 = vpop.f32.mrb[30].mxu1  ;;  %7878 = vmatpush3.bf16.msra.mxu0 %v3868_v47  ;;  %7879 = vmatprep.mubr.msk.bf16.mxu0 %vm8388_vm0, %v8387_v0  ;;  %v8327_v47 = vld [vmem:[%s8431_s17 + $0x38] sm:$0xf] }
 0x195   : > { %v1148_v50 = vadd.f32 %v9318_v15, %v1136_v49  ;;  %v1137_v19 = vadd.f32 %v1132_v9, %v1078_v58  ;;  %v7552_v33 = vpop.f32.mrb[31].mxu1  ;;  %7889 = vmatprep.subr.bf16.mxu0 %v8387_v0  ;;  %v4015_v58 = vsel %vm233_vm1, %v8327_v47, 0  ;;  %v9358_v49 = vld [vmem:[%s9883_s0 + $0x38] sm:$0xff]   ;;  %v4066_v9 = vsel %vm233_vm1, %v9104_v20, 0 }
 0x196   : > { %v1206_v51 = vpop.f32.mrb[32].mxu0  ;;  %v4117_v20 = vsel %vm233_vm1, %v9110_v55, 0 }
 0x197   : > { %vm1150_vm3 = vcmp.gt.f32.partialorder %v1148_v50, 0.0  ;;  %v1152_v23 = vmul.f32 0.2, %v1148_v50  ;;  %v1149_v52 = vadd.f32 %v9322_v22, %v1137_v19  ;;  %7874 = vmatmul.mubr.msk.bf16.vlgmr.msra.gmra.mrb[136].mxu1 %vm229_vm2, %v8741_v32  ;;  %v7557_v14 = vpop.f32.mrb[33].mxu0  ;;  %v3967_v32 = vsel %vm233_vm1, %v8326_v39, 0  ;;  %v9382_v39 = vld [vmem:[%s9883_s0 + $0x48] sm:$0xff]  }
 0x198   : > { %v1209_v35 = vpop.f32.mrb[34].mxu0  ;;  %7884 = vmatpush3.bf16.msra.mxu1 %v3919_v18  ;;  %7885 = vmatprep.mubr.msk.bf16.mxu1 %vm8388_vm0, %v8387_v0 }
 0x199   : > { %v1154_v17 = vsel %vm1150_vm3, %v1148_v50, %v1152_v23  ;;  %vm1151_vm5 = vcmp.gt.f32.partialorder %v1149_v52, 0.0  ;;  %v1153_v54 = vmul.f32 0.2, %v1149_v52  ;;  %v7558_v13 = vpop.f32.mrb[35].mxu0  ;;  %7895 = vmatprep.subr.bf16.mxu1 %v8387_v0  ;;  %v9370_v23 = vld [vmem:[%s9883_s0 + $0x40] sm:$0xff]  }
 0x19a   : > { %v7185_v2 = vpack.c.bf16 %v1154_v17, %v1154_v17  ;;  %v1250_v44 = vpop.f32.mrb[32].mxu1 }
 0x19b   : > { %v1155_v45 = vsel %vm1151_vm5, %v1149_v52, %v1153_v54  ;;  %v1251_v60 = vadd.f32 %v1250_v44, %v1206_v51  ;;  %7880 = vmatmul.mubr.msk.bf16.vlgmr.msra.gmra.mrb[140].mxu0 %vm229_vm2, %v8759_v43  ;;  %v7563_v5 = vpop.f32.mrb[33].mxu1  ;;  %v8331_v44 = vld [vmem:[%s8431_s17 + $0x5c] sm:$0xf] }
 0x19c   : > { %1165 = vst.msk [vmem:[%s9339_s13] sm:$0xf] %vm1164_vm4, %v7185_v2  ;;  %v7186_v16 = vpack.c.bf16 %v1155_v45, %v1155_v45  ;;  %v1253_v4 = vpop.f32.mrb[34].mxu1  ;;  %7890 = vmatpush3.bf16.msra.mxu0 %v3967_v32  ;;  %7891 = vmatprep.mubr.msk.bf16.mxu0 %vm8388_vm0, %v8387_v0  ;;  %v4165_v45 = vsel %vm233_vm1, %v8331_v44, 0 }
 0x19d   : > { %v1254_v11 = vadd.f32 %v1253_v4, %v1209_v35  ;;  %v7564_v56 = vpop.f32.mrb[35].mxu1  ;;  %7901 = vmatprep.subr.bf16.mxu0 %v8387_v0  ;;  %v9394_v4 = vld [vmem:[%s9883_s0 + $0x50] sm:$0xff]  }
 0x19e   : > { %1166 = vst.msk [vmem:[%s9339_s13 + $0x4] sm:$0xf] %vm1164_vm4, %v7186_v16  ;;  %v1299_v10 = vpop.f32.mrb[36].mxu0 }
 0x19f   : > { %v1306_v43 = vadd.f32 %v1299_v10, %v1251_v60  ;;  %v7569_v21 = vpop.f32.mrb[37].mxu0  ;;  %7886 = vmatmul.mubr.msk.bf16.vlgmr.msra.gmra.mrb[140].mxu1 %vm229_vm2, %v9358_v49 }
 0x1a0   : > { %v1302_v8 = vpop.f32.mrb[38].mxu0  ;;  %7896 = vmatpush3.bf16.msra.mxu1 %v4015_v58  ;;  %7897 = vmatprep.mubr.msk.bf16.mxu1 %vm8388_vm0, %v8387_v0  ;;  %v8333_v58 = vld [vmem:[%s8431_s17 + $0x80] sm:$0xf] }
 0x1a1   : > { %v1307_v18 = vadd.f32 %v1302_v8, %v1254_v11  ;;  %v7570_v50 = vpop.f32.mrb[39].mxu0  ;;  %7907 = vmatprep.subr.bf16.mxu1 %v8387_v0  ;;  %v4213_v10 = vsel %vm233_vm1, %v8333_v58, 0 }
 0x1a2   : > { %v1350_v19 = vpop.f32.mrb[36].mxu1  ;;  %v4264_v50 = vsel %vm233_vm1, %v9123_v27, 0  ;;  %v4315_v27 = vsel %vm233_vm1, %v9128_v38, 0 }
 0x1a3   : > { %v1357_v33 = vadd.f32 %v1350_v19, %v1306_v43  ;;  %v7575_v51 = vpop.f32.mrb[37].mxu1  ;;  %7892 = vmatmul.mubr.msk.bf16.vlgmr.msra.gmra.mrb[144].mxu0 %vm229_vm2, %v9370_v23 }
 0x1a4   : > { %v1353_v52 = vpop.f32.mrb[38].mxu1  ;;  %7902 = vmatpush3.bf16.msra.mxu0 %v4066_v9  ;;  %7903 = vmatprep.mubr.msk.bf16.mxu0 %vm8388_vm0, %v8387_v0  ;;  %v9406_v9 = vld [vmem:[%s9883_s0 + $0x58] sm:$0xff]  }
 0x1a5   : > { %v1358_v14 = vadd.f32 %v1353_v52, %v1307_v18  ;;  %v7576_v35 = vpop.f32.mrb[39].mxu1  ;;  %7913 = vmatprep.subr.bf16.mxu0 %v8387_v0 }
 0x1a6   : > { %v1397_v17 = vpop.f32.mrb[40].mxu0 }
 0x1a7   : > { %v1404_v54 = vadd.f32 %v1397_v17, %v1357_v33  ;;  %v7581_v13 = vpop.f32.mrb[41].mxu0  ;;  %7898 = vmatmul.mubr.msk.bf16.vlgmr.msra.gmra.mrb[144].mxu1 %vm229_vm2, %v9382_v39 }
 0x1a8   : > { %v1400_v32 = vpop.f32.mrb[42].mxu0  ;;  %7908 = vmatpush3.bf16.msra.mxu1 %v4117_v20  ;;  %7909 = vmatprep.mubr.msk.bf16.mxu1 %vm8388_vm0, %v8387_v0 }
 0x1a9   : > { %v1405_v55 = vadd.f32 %v1400_v32, %v1358_v14  ;;  %v7582_v2 = vpop.f32.mrb[43].mxu0  ;;  %7919 = vmatprep.subr.bf16.mxu1 %v8387_v0  ;;  %v9418_v14 = vld [vmem:[%s9883_s0 + $0x60] sm:$0xff]  }
 0x1aa   : > { %v1444_v60 = vpop.f32.mrb[40].mxu1  ;;  %v9430_v2 = vld [vmem:[%s9883_s0 + $0x68] sm:$0xff]  }
 0x1ab   : > { %v1451_v5 = vadd.f32 %v1444_v60, %v1404_v54  ;;  %v7587_v16 = vpop.f32.mrb[41].mxu1  ;;  %7904 = vmatmul.mubr.msk.bf16.vlgmr.msra.gmra.mrb[148].mxu0 %vm229_vm2, %v9394_v4  ;;  %v8337_v60 = vld [vmem:[%s8431_s17 + $0x38] sm:$0xf] }
 0x1ac   : > { %v1447_v11 = vpop.f32.mrb[42].mxu1  ;;  %7914 = vmatpush3.bf16.msra.mxu0 %v4165_v45  ;;  %7915 = vmatprep.mubr.msk.bf16.mxu0 %vm8388_vm0, %v8387_v0 }
 0x1ad   : > { %v1452_v56 = vadd.f32 %v1447_v11, %v1405_v55  ;;  %v7588_v47 = vpop.f32.mrb[43].mxu1  ;;  %7925 = vmatprep.subr.bf16.mxu0 %v8387_v0 }
 0x1ae   : > { %v1495_v43 = vpop.f32.mrb[44].mxu0  ;;  %v9442_v47 = vld [vmem:[%s9883_s0 + $0x70] sm:$0xff]  }
 0x1af   : > { %v1502_v21 = vadd.f32 %v1495_v43, %v1451_v5  ;;  %v7593_v8 = vpop.f32.mrb[45].mxu0  ;;  %7910 = vmatmul.mubr.msk.bf16.vlgmr.msra.gmra.mrb[148].mxu1 %vm229_vm2, %v9406_v9  ;;  %v4382_v5 = vsel %vm233_vm1, %v8337_v60, 0 }
 0x1b0   : > { %v1498_v18 = vpop.f32.mrb[46].mxu0  ;;  %7920 = vmatpush3.bf16.msra.mxu1 %v4213_v10  ;;  %7921 = vmatprep.mubr.msk.bf16.mxu1 %vm8388_vm0, %v8387_v0 }
 0x1b1   : > { %v1503_v19 = vadd.f32 %v1498_v18, %v1452_v56  ;;  %v7594_v33 = vpop.f32.mrb[47].mxu0  ;;  %7931 = vmatprep.subr.bf16.mxu1 %v8387_v0 }
 0x1b2   : > { %v1546_v51 = vpop.f32.mrb[44].mxu1  ;;  %v9454_v33 = vld [vmem:[%s9883_s0 + $0x78] sm:$0xff]  }
 0x1b3   : > { %v1553_v52 = vadd.f32 %v1546_v51, %v1502_v21  ;;  %v7599_v20 = vpop.f32.mrb[45].mxu1  ;;  %7916 = vmatmul.mubr.msk.bf16.vlgmr.msra.gmra.mrb[152].mxu0 %vm229_vm2, %v9418_v14  ;;  %v8339_v21 = vld [vmem:[%s8431_s17 + $0x14] sm:$0xf] }
 0x1b4   : > { %v1549_v35 = vpop.f32.mrb[46].mxu1  ;;  %7926 = vmatpush3.bf16.msra.mxu0 %v4264_v50  ;;  %7927 = vmatprep.mubr.msk.bf16.mxu0 %vm8388_vm0, %v8387_v0  ;;  %v4426_v8 = vsel %vm233_vm1, %v8339_v21, 0 }
 0x1b5   : > { %v1554_v17 = vadd.f32 %v1549_v35, %v1503_v19  ;;  %v7600_v54 = vpop.f32.mrb[47].mxu1  ;;  %7937 = vmatprep.subr.bf16.mxu0 %v8387_v0 }
 0x1b6   : > { %v1594_v13 = vpop.f32.mrb[48].mxu0 }
 0x1b7   : > { %v1601_v32 = vadd.f32 %v1594_v13, %v1553_v52  ;;  %v7605_v55 = vpop.f32.mrb[49].mxu0  ;;  %7922 = vmatmul.mubr.msk.bf16.vlgmr.msra.gmra.mrb[152].mxu1 %vm229_vm2, %v9430_v2  ;;  %v4475_v52 = vsel %vm233_vm1, %v9142_v28, 0 }
 0x1b8   : > { %v1597_v44 = vpop.f32.mrb[50].mxu0  ;;  %7932 = vmatpush3.bf16.msra.mxu1 %v4315_v27  ;;  %7933 = vmatprep.mubr.msk.bf16.mxu1 %vm8388_vm0, %v8387_v0 }
 0x1b9   : > { %v1602_v38 = vadd.f32 %v1597_v44, %v1554_v17  ;;  %v7606_v45 = vpop.f32.mrb[51].mxu0  ;;  %7943 = vmatprep.subr.bf16.mxu1 %v8387_v0 }
 0x1ba   : > { %v1642_v16 = vpop.f32.mrb[48].mxu1 }
 0x1bb   : > { %v1649_v11 = vadd.f32 %v1642_v16, %v1601_v32  ;;  %v7611_v56 = vpop.f32.mrb[49].mxu1  ;;  %7928 = vmatmul.mubr.msk.bf16.vlgmr.msra.gmra.mrb[156].mxu0 %vm229_vm2, %v9442_v47  ;;  %v4526_v32 = vsel %vm233_vm1, %v9148_v12, 0  ;;  %v8341_v16 = vld [vmem:[%s8431_s17 + $0x5c] sm:$0xf] }
 0x1bc   : > { %v1645_v58 = vpop.f32.mrb[50].mxu1  ;;  %7938 = vmatpush3.bf16.msra.mxu0 %v4382_v5  ;;  %7939 = vmatprep.mubr.msk.bf16.mxu0 %vm8388_vm0, %v8387_v0  ;;  %v4573_v12 = vsel %vm233_vm1, %v8341_v16, 0  ;;  %v9518_v16 = vld [vmem:[%s9883_s0 + $0x28] sm:$0xff]  }
 0x1bd   : > { %v1650_v10 = vadd.f32 %v1645_v58, %v1602_v38  ;;  %v7612_v43 = vpop.f32.mrb[51].mxu1  ;;  %7949 = vmatprep.subr.bf16.mxu0 %v8387_v0 }
 0x1be   : > { %v1693_v18 = vpop.f32.mrb[52].mxu0 }
 0x1bf   : > { %v1700_v50 = vadd.f32 %v1693_v18, %v1649_v11  ;;  %v7617_v19 = vpop.f32.mrb[53].mxu0  ;;  %7934 = vmatmul.mubr.msk.bf16.vlgmr.msra.gmra.mrb[156].mxu1 %vm229_vm2, %v9454_v33 }
 0x1c0   : > { %v1696_v51 = vpop.f32.mrb[54].mxu0  ;;  %7944 = vmatpush3.bf16.msra.mxu1 %v4426_v8  ;;  %7945 = vmatprep.mubr.msk.bf16.mxu1 %vm8388_vm0, %v8387_v0  ;;  %v8343_v8 = vld [vmem:[%s8431_s17 + $0x80] sm:$0xf] }
 0x1c1   : > { %v1701_v20 = vadd.f32 %v1696_v51, %v1650_v10  ;;  %v7618_v35 = vpop.f32.mrb[55].mxu0  ;;  %7955 = vmatprep.subr.bf16.mxu1 %v8387_v0  ;;  %v4620_v18 = vsel %vm233_vm1, %v8343_v8, 0 }
 0x1c2   : > { %v1744_v27 = vpop.f32.mrb[52].mxu1  ;;  %v4671_v35 = vsel %vm233_vm1, %v9157_v57, 0  ;;  %v4722_v57 = vsel %vm233_vm1, %v9162_v31, 0 }
 0x1c3   : > { %v1751_v17 = vadd.f32 %v1744_v27, %v1700_v50  ;;  %v7623_v54 = vpop.f32.mrb[53].mxu1  ;;  %7940 = vmatmul.mubr.msk.bf16.vlgmr.msra.gmra.mrb[160].mxu0 %vm229_vm2, %v9117_v53 }
 0x1c4   : > { %v1747_v13 = vpop.f32.mrb[54].mxu1  ;;  %7950 = vmatpush3.bf16.msra.mxu0 %v4475_v52  ;;  %7951 = vmatprep.mubr.msk.bf16.mxu0 %vm8388_vm0, %v8387_v0  ;;  %v9492_v52 = vld [vmem:[%s9883_s0 + $0x18] sm:$0xff]  }
 0x1c5   : > { %v1752_v28 = vadd.f32 %v1747_v13, %v1701_v20  ;;  %v7624_v55 = vpop.f32.mrb[55].mxu1  ;;  %7961 = vmatprep.subr.bf16.mxu0 %v8387_v0 }
 0x1c6   : > { %v1792_v44 = vpop.f32.mrb[56].mxu0 }
 0x1c7   : > { %v1799_v38 = vadd.f32 %v1792_v44, %v1751_v17  ;;  %v7629_v45 = vpop.f32.mrb[57].mxu0  ;;  %7946 = vmatmul.mubr.msk.bf16.vlgmr.msra.gmra.mrb[160].mxu1 %vm229_vm2, %v9133_v6  ;;  %v9480_v6 = vld [vmem:[%s9883_s0 + $0x10] sm:$0xff]  }
 0x1c8   : > { %v1795_v53 = vpop.f32.mrb[58].mxu0  ;;  %7956 = vmatpush3.bf16.msra.mxu1 %v4526_v32  ;;  %7957 = vmatprep.mubr.msk.bf16.mxu1 %vm8388_vm0, %v8387_v0 }
 0x1c9   : > { %v1800_v60 = vadd.f32 %v1795_v53, %v1752_v28  ;;  %v7630_v5 = vpop.f32.mrb[59].mxu0  ;;  %7967 = vmatprep.subr.bf16.mxu1 %v8387_v0  ;;  %v9504_v28 = vld [vmem:[%s9883_s0 + $0x20] sm:$0xff]  }
 0x1ca   : > { %v1840_v11 = vpop.f32.mrb[56].mxu1 }
 0x1cb   : > { %v1847_v56 = vadd.f32 %v1840_v11, %v1799_v38  ;;  %v7635_v58 = vpop.f32.mrb[57].mxu1  ;;  %7952 = vmatmul.mubr.msk.bf16.vlgmr.msra.gmra.mrb[164].mxu0 %vm229_vm2, %v9480_v6 }
 0x1cc   : > { %v1843_v10 = vpop.f32.mrb[58].mxu1  ;;  %7962 = vmatpush3.bf16.msra.mxu0 %v4573_v12  ;;  %7963 = vmatprep.mubr.msk.bf16.mxu0 %vm8388_vm0, %v8387_v0 }
 0x1cd   : > { %v1848_v43 = vadd.f32 %v1843_v10, %v1800_v60  ;;  %v7636_v21 = vpop.f32.mrb[59].mxu1  ;;  %7973 = vmatprep.subr.bf16.mxu0 %v8387_v0  ;;  %v8347_v10 = vld [vmem:[%s8431_s17 + $0x18] sm:$0xf] }
 0x1ce   : > { %v1891_v50 = vpop.f32.mrb[60].mxu0 }
 0x1cf   : > { %v1898_v19 = vadd.f32 %v1891_v50, %v1847_v56  ;;  %v7641_v51 = vpop.f32.mrb[61].mxu0  ;;  %7958 = vmatmul.mubr.msk.bf16.vlgmr.msra.gmra.mrb[164].mxu1 %vm229_vm2, %v9492_v52 }
 0x1d0   : > { %v1894_v20 = vpop.f32.mrb[62].mxu0  ;;  %7968 = vmatpush3.bf16.msra.mxu1 %v4620_v18  ;;  %7969 = vmatprep.mubr.msk.bf16.mxu1 %vm8388_vm0, %v8387_v0 }
 0x1d1   : > { %v1899_v27 = vadd.f32 %v1894_v20, %v1848_v43  ;;  %v7642_v17 = vpop.f32.mrb[63].mxu0  ;;  %7979 = vmatprep.subr.bf16.mxu1 %v8387_v0  ;;  %v4770_v43 = vsel %vm233_vm1, %v8347_v10, 0 }
 0x1d2   : > { %v1942_v54 = vpop.f32.mrb[60].mxu1 }
 0x1d3   : > { %v1949_v13 = vadd.f32 %v1942_v54, %v1898_v19  ;;  %v7647_v32 = vpop.f32.mrb[61].mxu1  ;;  %7964 = vmatmul.mubr.msk.bf16.vlgmr.msra.gmra.mrb[168].mxu0 %vm229_vm2, %v9504_v28  ;;  %v9530_v19 = vld [vmem:[%s9883_s0 + $0x30] sm:$0xff]   ;;  %v8349_v54 = vld [vmem:[%s8431_s17 + $0x3c] sm:$0xf] }
 0x1d4   : > { %v1945_v55 = vpop.f32.mrb[62].mxu1  ;;  %7974 = vmatpush3.bf16.msra.mxu0 %v4671_v35  ;;  %7975 = vmatprep.mubr.msk.bf16.mxu0 %vm8388_vm0, %v8387_v0 }
 0x1d5   : > { %v1951_v44 = vadd.f32 %v1949_v13, %v9318_v15  ;;  %v1950_v38 = vadd.f32 %v1945_v55, %v1899_v27  ;;  %v7648_v45 = vpop.f32.mrb[63].mxu1  ;;  %7985 = vmatprep.subr.bf16.mxu0 %v8387_v0  ;;  %v4818_v13 = vsel %vm233_vm1, %v8349_v54, 0 }
 0x1d6   : > { %v2009_v53 = vpop.f32.mrb[64].mxu0 }
 0x1d7   : > { %vm1953_vm6 = vcmp.gt.f32.partialorder %v1951_v44, 0.0  ;;  %v1955_v60 = vmul.f32 0.2, %v1951_v44  ;;  %v1952_v5 = vadd.f32 %v1950_v38, %v9322_v22  ;;  %7970 = vmatmul.mubr.msk.bf16.vlgmr.msra.gmra.mrb[168].mxu1 %vm229_vm2, %v9518_v16  ;;  %v7653_v31 = vpop.f32.mrb[65].mxu0  ;;  %v4869_v38 = vsel %vm233_vm1, %v9171_v25, 0 }
 0x1d8   : > { %v2012_v12 = vpop.f32.mrb[66].mxu0  ;;  %7980 = vmatpush3.bf16.msra.mxu1 %v4722_v57  ;;  %7981 = vmatprep.mubr.msk.bf16.mxu1 %vm8388_vm0, %v8387_v0 }
 0x1d9   : > { %v1957_v11 = vsel %vm1953_vm6, %v1951_v44, %v1955_v60  ;;  %vm1954_vm7 = vcmp.gt.f32.partialorder %v1952_v5, 0.0  ;;  %v1956_v56 = vmul.f32 0.2, %v1952_v5  ;;  %v7654_v58 = vpop.f32.mrb[67].mxu0  ;;  %7991 = vmatprep.subr.bf16.mxu1 %v8387_v0 }
 0x1da   : > { %v7187_v21 = vpack.c.bf16 %v1957_v11, %v1957_v11  ;;  %v2053_v8 = vpop.f32.mrb[64].mxu1  ;;  %v4920_v11 = vsel %vm233_vm1, %v9177_v42, 0 }
 0x1db   : > { %v1958_v18 = vsel %vm1954_vm7, %v1952_v5, %v1956_v56  ;;  %v2054_v50 = vadd.f32 %v2053_v8, %v2009_v53  ;;  %7976 = vmatmul.mubr.msk.bf16.vlgmr.msra.gmra.mrb[172].mxu0 %vm229_vm2, %v9530_v19  ;;  %v7659_v51 = vpop.f32.mrb[65].mxu1 }
 0x1dc   : > { %6964 = vst.msk [vmem:[%s9339_s13 + $0x8] sm:$0xf] %vm1164_vm4, %v7187_v21  ;;  %v7188_v20 = vpack.c.bf16 %v1958_v18, %v1958_v18  ;;  %v2056_v35 = vpop.f32.mrb[66].mxu1  ;;  %7986 = vmatpush3.bf16.msra.mxu0 %v4770_v43  ;;  %7987 = vmatprep.mubr.msk.bf16.mxu0 %vm8388_vm0, %v8387_v0 }
 0x1dd   : > { %v2057_v27 = vadd.f32 %v2056_v35, %v2012_v12  ;;  %v7660_v17 = vpop.f32.mrb[67].mxu1  ;;  %7997 = vmatprep.subr.bf16.mxu0 %v8387_v0 }
 0x1de   : > { %6965 = vst.msk [vmem:[%s9339_s13 + $0xc] sm:$0xf] %vm1164_vm4, %v7188_v20  ;;  %v2102_v32 = vpop.f32.mrb[68].mxu0 }
 0x1df   : > { %v2109_v55 = vadd.f32 %v2102_v32, %v2054_v50  ;;  %v7665_v57 = vpop.f32.mrb[69].mxu0  ;;  %7982 = vmatmul.mubr.msk.bf16.vlgmr.msra.gmra.mrb[172].mxu1 %vm229_vm2, %v9358_v49  ;;  %v8350_v50 = vld [vmem:[%s8431_s17 + $0x60] sm:$0xf] }
 0x1e0   : > { %v2105_v44 = vpop.f32.mrb[70].mxu0  ;;  %7992 = vmatpush3.bf16.msra.mxu1 %v4818_v13  ;;  %7993 = vmatprep.mubr.msk.bf16.mxu1 %vm8388_vm0, %v8387_v0  ;;  %v4968_v42 = vsel %vm233_vm1, %v8350_v50, 0  ;;  %v8351_v13 = vld [vmem:[%s8431_s17 + $0x84] sm:$0xf]  ;;  %v8352_v50 = vld [vmem:[%s8431_s17 + $0x3c] sm:$0xf] }
 0x1e1   : > { %v2110_v45 = vadd.f32 %v2105_v44, %v2057_v27  ;;  %v7666_v53 = vpop.f32.mrb[71].mxu0  ;;  %8003 = vmatprep.subr.bf16.mxu1 %v8387_v0  ;;  %v5016_v32 = vsel %vm233_vm1, %v8351_v13, 0 }
 0x1e2   : > { %v2153_v60 = vpop.f32.mrb[68].mxu1 }
 0x1e3   : > { %v2160_v5 = vadd.f32 %v2153_v60, %v2109_v55  ;;  %v7671_v31 = vpop.f32.mrb[69].mxu1  ;;  %7988 = vmatmul.mubr.msk.bf16.vlgmr.msra.gmra.mrb[176].mxu0 %vm229_vm2, %v9370_v23 }
 0x1e4   : > { %v2156_v12 = vpop.f32.mrb[70].mxu1  ;;  %7998 = vmatpush3.bf16.msra.mxu0 %v4869_v38  ;;  %7999 = vmatprep.mubr.msk.bf16.mxu0 %vm8388_vm0, %v8387_v0 }
 0x1e5   : > { %v2161_v25 = vadd.f32 %v2156_v12, %v2110_v45  ;;  %v7672_v56 = vpop.f32.mrb[71].mxu1  ;;  %8009 = vmatprep.subr.bf16.mxu0 %v8387_v0  ;;  %v5067_v45 = vsel %vm233_vm1, %v9186_v26, 0 }
 0x1e6   : > { %v2200_v58 = vpop.f32.mrb[72].mxu0 }
 0x1e7   : > { %v2207_v10 = vadd.f32 %v2200_v58, %v2160_v5  ;;  %v7677_v43 = vpop.f32.mrb[73].mxu0  ;;  %7994 = vmatmul.mubr.msk.bf16.vlgmr.msra.gmra.mrb[176].mxu1 %vm229_vm2, %v9382_v39 }
 0x1e8   : > { %v2203_v21 = vpop.f32.mrb[74].mxu0  ;;  %8004 = vmatpush3.bf16.msra.mxu1 %v4920_v11  ;;  %8005 = vmatprep.mubr.msk.bf16.mxu1 %vm8388_vm0, %v8387_v0 }
 0x1e9   : > { %v2208_v8 = vadd.f32 %v2203_v21, %v2161_v25  ;;  %v7678_v18 = vpop.f32.mrb[75].mxu0  ;;  %8015 = vmatprep.subr.bf16.mxu1 %v8387_v0  ;;  %v5118_v25 = vsel %vm233_vm1, %v9191_v40, 0  ;;  %v5185_v40 = vsel %vm233_vm1, %v8352_v50, 0 }
 0x1ea   : > { %v2247_v51 = vpop.f32.mrb[72].mxu1 }
 0x1eb   : > { %v2254_v20 = vadd.f32 %v2247_v51, %v2207_v10  ;;  %v7683_v35 = vpop.f32.mrb[73].mxu1  ;;  %8000 = vmatmul.mubr.msk.bf16.vlgmr.msra.gmra.mrb[180].mxu0 %vm229_vm2, %v9394_v4 }
 0x1ec   : > { %v2250_v27 = vpop.f32.mrb[74].mxu1  ;;  %8010 = vmatpush3.bf16.msra.mxu0 %v4968_v42  ;;  %8011 = vmatprep.mubr.msk.bf16.mxu0 %vm8388_vm0, %v8387_v0 }
 0x1ed   : > { %v2255_v17 = vadd.f32 %v2250_v27, %v2208_v8  ;;  %v7684_v54 = vpop.f32.mrb[75].mxu1  ;;  %8021 = vmatprep.subr.bf16.mxu0 %v8387_v0 }
 0x1ee   : > { %v2298_v55 = vpop.f32.mrb[76].mxu0  ;;  %v8353_v54 = vld [vmem:[%s8431_s17 + $0x18] sm:$0xf] }
 0x1ef   : > { %v2305_v57 = vadd.f32 %v2298_v55, %v2254_v20  ;;  %v7689_v44 = vpop.f32.mrb[77].mxu0  ;;  %8006 = vmatmul.mubr.msk.bf16.vlgmr.msra.gmra.mrb[180].mxu1 %vm229_vm2, %v9406_v9  ;;  %v5229_v13 = vsel %vm233_vm1, %v8353_v54, 0 }
 0x1f0   : > { %v2301_v38 = vpop.f32.mrb[78].mxu0  ;;  %8016 = vmatpush3.bf16.msra.mxu1 %v5016_v32  ;;  %8017 = vmatprep.mubr.msk.bf16.mxu1 %vm8388_vm0, %v8387_v0 }
 0x1f1   : > { %v2306_v53 = vadd.f32 %v2301_v38, %v2255_v17  ;;  %v7690_v60 = vpop.f32.mrb[79].mxu0  ;;  %8027 = vmatprep.subr.bf16.mxu1 %v8387_v0  ;;  %v5278_v38 = vsel %vm233_vm1, %v9202_v46, 0  ;;  %v5329_v46 = vsel %vm233_vm1, %v9208_v62, 0 }
 0x1f2   : > { %v2349_v5 = vpop.f32.mrb[76].mxu1 }
 0x1f3   : > { %v2356_v31 = vadd.f32 %v2349_v5, %v2305_v57  ;;  %v7695_v12 = vpop.f32.mrb[77].mxu1  ;;  %8012 = vmatmul.mubr.msk.bf16.vlgmr.msra.gmra.mrb[184].mxu0 %vm229_vm2, %v9418_v14 }
 0x1f4   : > { %v2352_v11 = vpop.f32.mrb[78].mxu1  ;;  %8022 = vmatpush3.bf16.msra.mxu0 %v5067_v45  ;;  %8023 = vmatprep.mubr.msk.bf16.mxu0 %vm8388_vm0, %v8387_v0  ;;  %v9609_v12 = vld [vmem:[%s9883_s0 + $0x8] sm:$0xff]  }
 0x1f5   : > { %v2357_v26 = vadd.f32 %v2352_v11, %v2306_v53  ;;  %v7696_v56 = vpop.f32.mrb[79].mxu1  ;;  %8033 = vmatprep.subr.bf16.mxu0 %v8387_v0 }
 0x1f6   : > { %v2397_v58 = vpop.f32.mrb[80].mxu0 }
 0x1f7   : > { %v2404_v10 = vadd.f32 %v2397_v58, %v2356_v31  ;;  %v7701_v43 = vpop.f32.mrb[81].mxu0  ;;  %8018 = vmatmul.mubr.msk.bf16.vlgmr.msra.gmra.mrb[184].mxu1 %vm229_vm2, %v9430_v2 }
 0x1f8   : > { %v2400_v21 = vpop.f32.mrb[82].mxu0  ;;  %8028 = vmatpush3.bf16.msra.mxu1 %v5118_v25  ;;  %8029 = vmatprep.mubr.msk.bf16.mxu1 %vm8388_vm0, %v8387_v0  ;;  %v9621_v43 = vld [vmem:[%s9883_s0] sm:$0xff]  }
 0x1f9   : > { %v2405_v8 = vadd.f32 %v2400_v21, %v2357_v26  ;;  %v7702_v18 = vpop.f32.mrb[83].mxu0  ;;  %8039 = vmatprep.subr.bf16.mxu1 %v8387_v0 }
 0x1fa   : > { %v2445_v42 = vpop.f32.mrb[80].mxu1  ;;  %v8356_v18 = vld [vmem:[%s8431_s17 + $0x60] sm:$0xf] }
 0x1fb   : > { %v2452_v51 = vadd.f32 %v2445_v42, %v2404_v10  ;;  %v7707_v20 = vpop.f32.mrb[81].mxu1  ;;  %8024 = vmatmul.mubr.msk.bf16.vlgmr.msra.gmra.mrb[188].mxu0 %vm229_vm2, %v9442_v47  ;;  %v5376_v50 = vsel %vm233_vm1, %v8356_v18, 0  ;;  %v8358_v18 = vld [vmem:[%s8431_s17 + $0x1c] sm:$0xf] }
 0x1fc   : > { %v2448_v35 = vpop.f32.mrb[82].mxu1  ;;  %8034 = vmatpush3.bf16.msra.mxu0 %v5185_v40  ;;  %8035 = vmatprep.mubr.msk.bf16.mxu0 %vm8388_vm0, %v8387_v0 }
 0x1fd   : > { %v2453_v27 = vadd.f32 %v2448_v35, %v2405_v8  ;;  %v7708_v17 = vpop.f32.mrb[83].mxu1  ;;  %8045 = vmatprep.subr.bf16.mxu0 %v8387_v0 }
 0x1fe   : > { %v2496_v32 = vpop.f32.mrb[84].mxu0  ;;  %v8357_v17 = vld [vmem:[%s8431_s17 + $0x84] sm:$0xf] }
 0x1ff   : > { %v2503_v55 = vadd.f32 %v2496_v32, %v2452_v51  ;;  %v7713_v57 = vpop.f32.mrb[85].mxu0  ;;  %8030 = vmatmul.mubr.msk.bf16.vlgmr.msra.gmra.mrb[188].mxu1 %vm229_vm2, %v9454_v33  ;;  %v5423_v54 = vsel %vm233_vm1, %v8357_v17, 0 }
 0x200   : > { %v2499_v44 = vpop.f32.mrb[86].mxu0  ;;  %8040 = vmatpush3.bf16.msra.mxu1 %v5229_v13  ;;  %8041 = vmatprep.mubr.msk.bf16.mxu1 %vm8388_vm0, %v8387_v0 }
 0x201   : > { %v2504_v45 = vadd.f32 %v2499_v44, %v2453_v27  ;;  %v7714_v53 = vpop.f32.mrb[87].mxu0  ;;  %8051 = vmatprep.subr.bf16.mxu1 %v8387_v0  ;;  %v5474_v44 = vsel %vm233_vm1, %v9217_v24, 0 }
 0x202   : > { %v2547_v60 = vpop.f32.mrb[84].mxu1 }
 0x203   : > { %v2554_v5 = vadd.f32 %v2547_v60, %v2503_v55  ;;  %v7719_v31 = vpop.f32.mrb[85].mxu1  ;;  %8036 = vmatmul.mubr.msk.bf16.vlgmr.msra.gmra.mrb[192].mxu0 %vm229_vm2, %v9609_v12 }
 0x204   : > { %v2550_v11 = vpop.f32.mrb[86].mxu1  ;;  %8046 = vmatpush3.bf16.msra.mxu0 %v5278_v38  ;;  %8047 = vmatprep.mubr.msk.bf16.mxu0 %vm8388_vm0, %v8387_v0 }
 0x205   : > { %v2555_v25 = vadd.f32 %v2550_v11, %v2504_v45  ;;  %v7720_v26 = vpop.f32.mrb[87].mxu1  ;;  %8057 = vmatprep.subr.bf16.mxu0 %v8387_v0  ;;  %v5525_v11 = vsel %vm233_vm1, %v9222_v41, 0 }
 0x206   : > { %v2595_v56 = vpop.f32.mrb[88].mxu0 }
 0x207   : > { %v2602_v58 = vadd.f32 %v2595_v56, %v2554_v5  ;;  %v7725_v10 = vpop.f32.mrb[89].mxu0  ;;  %8042 = vmatmul.mubr.msk.bf16.vlgmr.msra.gmra.mrb[192].mxu1 %vm229_vm2, %v9621_v43 }
 0x208   : > { %v2598_v21 = vpop.f32.mrb[90].mxu0  ;;  %8052 = vmatpush3.bf16.msra.mxu1 %v5329_v46  ;;  %8053 = vmatprep.mubr.msk.bf16.mxu1 %vm8388_vm0, %v8387_v0 }
 0x209   : > { %v2603_v62 = vadd.f32 %v2598_v21, %v2555_v25  ;;  %v7726_v8 = vpop.f32.mrb[91].mxu0  ;;  %8063 = vmatprep.subr.bf16.mxu1 %v8387_v0 }
 0x20a   : > { %v2643_v40 = vpop.f32.mrb[88].mxu1 }
 0x20b   : > { %v2650_v42 = vadd.f32 %v2643_v40, %v2602_v58  ;;  %v7731_v51 = vpop.f32.mrb[89].mxu1  ;;  %8048 = vmatmul.mubr.msk.bf16.vlgmr.msra.gmra.mrb[196].mxu0 %vm229_vm2, %v9480_v6 }
 0x20c   : > { %v2646_v20 = vpop.f32.mrb[90].mxu1  ;;  %8058 = vmatpush3.bf16.msra.mxu0 %v5376_v50  ;;  %8059 = vmatprep.mubr.msk.bf16.mxu0 %vm8388_vm0, %v8387_v0  ;;  %v5573_v50 = vsel %vm233_vm1, %v8358_v18, 0 }
 0x20d   : > { %v2651_v35 = vadd.f32 %v2646_v20, %v2603_v62  ;;  %v7732_v27 = vpop.f32.mrb[91].mxu1  ;;  %8069 = vmatprep.subr.bf16.mxu0 %v8387_v0 }
 0x20e   : > { %v2694_v13 = vpop.f32.mrb[92].mxu0 }
 0x20f   : > { %v2701_v32 = vadd.f32 %v2694_v13, %v2650_v42  ;;  %v7737_v55 = vpop.f32.mrb[93].mxu0  ;;  %8054 = vmatmul.mubr.msk.bf16.vlgmr.msra.gmra.mrb[196].mxu1 %vm229_vm2, %v9492_v52 }
 0x210   : > { %v2697_v57 = vpop.f32.mrb[94].mxu0  ;;  %8064 = vmatpush3.bf16.msra.mxu1 %v5423_v54  ;;  %8065 = vmatprep.mubr.msk.bf16.mxu1 %vm8388_vm0, %v8387_v0 }
 0x211   : > { %v2702_v38 = vadd.f32 %v2697_v57, %v2651_v35  ;;  %v7738_v45 = vpop.f32.mrb[95].mxu0  ;;  %8075 = vmatprep.subr.bf16.mxu1 %v8387_v0 }
 0x212   : > { %v2745_v53 = vpop.f32.mrb[92].mxu1 }
 0x213   : > { %v2752_v60 = vadd.f32 %v2745_v53, %v2701_v32  ;;  %v7743_v5 = vpop.f32.mrb[93].mxu1  ;;  %8060 = vmatmul.mubr.msk.bf16.vlgmr.msra.gmra.mrb[200].mxu0 %vm229_vm2, %v9504_v28  ;;  %v8359_v32 = vld [vmem:[%s8431_s17 + $0x40] sm:$0xf]  ;;  %v5672_v53 = vsel %vm233_vm1, %v9231_v29, 0 }
 0x214   : > { %v2748_v31 = vpop.f32.mrb[94].mxu1  ;;  %8070 = vmatpush3.bf16.msra.mxu0 %v5474_v44  ;;  %8071 = vmatprep.mubr.msk.bf16.mxu0 %vm8388_vm0, %v8387_v0  ;;  %v5621_v55 = vsel %vm233_vm1, %v8359_v32, 0 }
 0x215   : > { %v2754_v24 = vadd.f32 %v2752_v60, %v9318_v15  ;;  %v2753_v46 = vadd.f32 %v2748_v31, %v2702_v38  ;;  %v7744_v25 = vpop.f32.mrb[95].mxu1  ;;  %8081 = vmatprep.subr.bf16.mxu0 %v8387_v0 }
 0x216   : > { %v2812_v26 = vpop.f32.mrb[96].mxu0 }
 0x217   : > { %vm2756_vm8 = vcmp.gt.f32.partialorder %v2754_v24, 0.0  ;;  %v2758_v56 = vmul.f32 0.2, %v2754_v24  ;;  %v2755_v58 = vadd.f32 %v2753_v46, %v9322_v22  ;;  %8066 = vmatmul.mubr.msk.bf16.vlgmr.msra.gmra.mrb[200].mxu1 %vm229_vm2, %v9518_v16  ;;  %v7749_v10 = vpop.f32.mrb[97].mxu0 }
 0x218   : > { %v2815_v21 = vpop.f32.mrb[98].mxu0  ;;  %8076 = vmatpush3.bf16.msra.mxu1 %v5525_v11  ;;  %8077 = vmatprep.mubr.msk.bf16.mxu1 %vm8388_vm0, %v8387_v0 }
 0x219   : > { %v2760_v41 = vsel %vm2756_vm8, %v2754_v24, %v2758_v56  ;;  %vm2757_vm9 = vcmp.gt.f32.partialorder %v2755_v58, 0.0  ;;  %v2759_v62 = vmul.f32 0.2, %v2755_v58  ;;  %v7750_v8 = vpop.f32.mrb[99].mxu0  ;;  %8087 = vmatprep.subr.bf16.mxu1 %v8387_v0 }
 0x21a   : > { %v7189_v40 = vpack.c.bf16 %v2760_v41, %v2760_v41  ;;  %v2856_v42 = vpop.f32.mrb[96].mxu1  ;;  %v8360_v41 = vld [vmem:[%s8431_s17 + $0x64] sm:$0xf] }
 0x21b   : > { %v2761_v51 = vsel %vm2757_vm9, %v2755_v58, %v2759_v62  ;;  %v2857_v20 = vadd.f32 %v2856_v42, %v2812_v26  ;;  %8072 = vmatmul.mubr.msk.bf16.vlgmr.msra.gmra.mrb[204].mxu0 %vm229_vm2, %v9530_v19  ;;  %v7755_v35 = vpop.f32.mrb[97].mxu1  ;;  %v8361_v42 = vld [vmem:[%s8431_s17 + $0x88] sm:$0xf] }
 0x21c   : > { %7000 = vst.msk [vmem:[%s9339_s13 + $0x10] sm:$0xf] %vm1164_vm4, %v7189_v40  ;;  %v7190_v27 = vpack.c.bf16 %v2761_v51, %v2761_v51  ;;  %v2859_v17 = vpop.f32.mrb[98].mxu1  ;;  %8082 = vmatpush3.bf16.msra.mxu0 %v5573_v50  ;;  %8083 = vmatprep.mubr.msk.bf16.mxu0 %vm8388_vm0, %v8387_v0  ;;  %v5819_v51 = vsel %vm233_vm1, %v8361_v42, 0 }
 0x21d   : > { %v2860_v54 = vadd.f32 %v2859_v17, %v2815_v21  ;;  %v7756_v13 = vpop.f32.mrb[99].mxu1  ;;  %8093 = vmatprep.subr.bf16.mxu0 %v8387_v0 }
 0x21e   : > { %7001 = vst.msk [vmem:[%s9339_s13 + $0x14] sm:$0xf] %vm1164_vm4, %v7190_v27  ;;  %v2905_v57 = vpop.f32.mrb[100].mxu0 }
 0x21f   : > { %v2912_v44 = vadd.f32 %v2905_v57, %v2857_v20  ;;  %v7761_v38 = vpop.f32.mrb[101].mxu0  ;;  %8078 = vmatmul.mubr.msk.bf16.vlgmr.msra.gmra.mrb[204].mxu1 %vm229_vm2, %v9358_v49  ;;  %v5723_v49 = vsel %vm233_vm1, %v9237_v63, 0  ;;  %v5771_v63 = vsel %vm233_vm1, %v8360_v41, 0 }
 0x220   : > { %v2908_v45 = vpop.f32.mrb[102].mxu0  ;;  %8088 = vmatpush3.bf16.msra.mxu1 %v5621_v55  ;;  %8089 = vmatprep.mubr.msk.bf16.mxu1 %vm8388_vm0, %v8387_v0 }
 0x221   : > { %v2913_v60 = vadd.f32 %v2908_v45, %v2860_v54  ;;  %v7762_v5 = vpop.f32.mrb[103].mxu0  ;;  %8099 = vmatprep.subr.bf16.mxu1 %v8387_v0 }
 0x222   : > { %v2956_v31 = vpop.f32.mrb[100].mxu1 }
 0x223   : > { %v2963_v11 = vadd.f32 %v2956_v31, %v2912_v44  ;;  %v7767_v24 = vpop.f32.mrb[101].mxu1  ;;  %8084 = vmatmul.mubr.msk.bf16.vlgmr.msra.gmra.mrb[208].mxu0 %vm229_vm2, %v9370_v23 }
 0x224   : > { %v2959_v46 = vpop.f32.mrb[102].mxu1  ;;  %8094 = vmatpush3.bf16.msra.mxu0 %v5672_v53  ;;  %8095 = vmatprep.mubr.msk.bf16.mxu0 %vm8388_vm0, %v8387_v0 }
 0x225   : > { %v2964_v29 = vadd.f32 %v2959_v46, %v2913_v60  ;;  %v7768_v25 = vpop.f32.mrb[103].mxu1  ;;  %8105 = vmatprep.subr.bf16.mxu0 %v8387_v0 }
 0x226   : > { %v3003_v26 = vpop.f32.mrb[104].mxu0 }
 0x227   : > { %v3010_v56 = vadd.f32 %v3003_v26, %v2963_v11  ;;  %v7773_v58 = vpop.f32.mrb[105].mxu0  ;;  %8090 = vmatmul.mubr.msk.bf16.vlgmr.msra.gmra.mrb[208].mxu1 %vm229_vm2, %v9382_v39  ;;  %v8362_v11 = vld [vmem:[%s8431_s17 + $0x40] sm:$0xf]  ;;  %v8363_v26 = vld [vmem:[%s8431_s17 + $0x1c] sm:$0xf] }
 0x228   : > { %v3006_v23 = vpop.f32.mrb[106].mxu0  ;;  %8100 = vmatpush3.bf16.msra.mxu1 %v5723_v49  ;;  %8101 = vmatprep.mubr.msk.bf16.mxu1 %vm8388_vm0, %v8387_v0 }
 0x229   : > { %v3011_v10 = vadd.f32 %v3006_v23, %v2964_v29  ;;  %v7774_v21 = vpop.f32.mrb[107].mxu0  ;;  %8111 = vmatprep.subr.bf16.mxu1 %v8387_v0 }
 0x22a   : > { %v3050_v62 = vpop.f32.mrb[104].mxu1 }
 0x22b   : > { %v3057_v8 = vadd.f32 %v3050_v62, %v3010_v56  ;;  %v7779_v18 = vpop.f32.mrb[105].mxu1  ;;  %8096 = vmatmul.mubr.msk.bf16.vlgmr.msra.gmra.mrb[212].mxu0 %vm229_vm2, %v9394_v4  ;;  %v5870_v4 = vsel %vm233_vm1, %v9246_v3, 0  ;;  %v6032_v56 = vsel %vm233_vm1, %v8363_v26, 0  ;;  %v8366_v26 = vld [vmem:[%s8431_s17 + $0x20] sm:$0xf] }
 0x22c   : > { %v3053_v39 = vpop.f32.mrb[106].mxu1  ;;  %8106 = vmatpush3.bf16.msra.mxu0 %v5771_v63  ;;  %8107 = vmatprep.mubr.msk.bf16.mxu0 %vm8388_vm0, %v8387_v0 }
 0x22d   : > { %v3058_v50 = vadd.f32 %v3053_v39, %v3011_v10  ;;  %v7780_v40 = vpop.f32.mrb[107].mxu1  ;;  %8117 = vmatprep.subr.bf16.mxu0 %v8387_v0 }
 0x22e   : > { %v3101_v20 = vpop.f32.mrb[108].mxu0 }
 0x22f   : > { %v3108_v35 = vadd.f32 %v3101_v20, %v3057_v8  ;;  %v7785_v27 = vpop.f32.mrb[109].mxu0  ;;  %8102 = vmatmul.mubr.msk.bf16.vlgmr.msra.gmra.mrb[212].mxu1 %vm229_vm2, %v9406_v9  ;;  %v5921_v9 = vsel %vm233_vm1, %v9251_v34, 0  ;;  %v5988_v34 = vsel %vm233_vm1, %v8362_v11, 0 }
 0x230   : > { %v3104_v17 = vpop.f32.mrb[110].mxu0  ;;  %8112 = vmatpush3.bf16.msra.mxu1 %v5819_v51  ;;  %8113 = vmatprep.mubr.msk.bf16.mxu1 %vm8388_vm0, %v8387_v0  ;;  %v8364_v27 = vld [vmem:[%s8431_s17 + $0x64] sm:$0xf] }
 0x231   : > { %v3109_v54 = vadd.f32 %v3104_v17, %v3058_v50  ;;  %v7786_v13 = vpop.f32.mrb[111].mxu0  ;;  %8123 = vmatprep.subr.bf16.mxu1 %v8387_v0 }
 0x232   : > { %v3152_v32 = vpop.f32.mrb[108].mxu1 }
 0x233   : > { %v3159_v55 = vadd.f32 %v3152_v32, %v3108_v35  ;;  %v7791_v57 = vpop.f32.mrb[109].mxu1  ;;  %8108 = vmatmul.mubr.msk.bf16.vlgmr.msra.gmra.mrb[216].mxu0 %vm229_vm2, %v9418_v14 }
 0x234   : > { %v3155_v44 = vpop.f32.mrb[110].mxu1  ;;  %8118 = vmatpush3.bf16.msra.mxu0 %v5870_v4  ;;  %8119 = vmatprep.mubr.msk.bf16.mxu0 %vm8388_vm0, %v8387_v0 }
 0x235   : > { %v3160_v3 = vadd.f32 %v3155_v44, %v3109_v54  ;;  %v7792_v38 = vpop.f32.mrb[111].mxu1  ;;  %8129 = vmatprep.subr.bf16.mxu0 %v8387_v0 }
 0x236   : > { %v3200_v45 = vpop.f32.mrb[112].mxu0 }
 0x237   : > { %v3207_v53 = vadd.f32 %v3200_v45, %v3159_v55  ;;  %v7797_v60 = vpop.f32.mrb[113].mxu0  ;;  %8114 = vmatmul.mubr.msk.bf16.vlgmr.msra.gmra.mrb[216].mxu1 %vm229_vm2, %v9430_v2  ;;  %v8365_v55 = vld [vmem:[%s8431_s17 + $0x88] sm:$0xf] }
 0x238   : > { %v3203_v14 = vpop.f32.mrb[114].mxu0  ;;  %8124 = vmatpush3.bf16.msra.mxu1 %v5921_v9  ;;  %8125 = vmatprep.mubr.msk.bf16.mxu1 %vm8388_vm0, %v8387_v0  ;;  %v6226_v57 = vsel %vm233_vm1, %v8365_v55, 0 }
 0x239   : > { %v3208_v5 = vadd.f32 %v3203_v14, %v3160_v3  ;;  %v7798_v31 = vpop.f32.mrb[115].mxu0  ;;  %8135 = vmatprep.subr.bf16.mxu1 %v8387_v0 }
 0x23a   : > { %v3248_v24 = vpop.f32.mrb[112].mxu1 }
 0x23b   : > { %v3255_v46 = vadd.f32 %v3248_v24, %v3207_v53  ;;  %v7803_v49 = vpop.f32.mrb[113].mxu1  ;;  %8120 = vmatmul.mubr.msk.bf16.vlgmr.msra.gmra.mrb[220].mxu0 %vm229_vm2, %v9442_v47  ;;  %v6081_v47 = vsel %vm233_vm1, %v9260_v59, 0 }
 0x23c   : > { %v3251_v2 = vpop.f32.mrb[114].mxu1  ;;  %8130 = vmatpush3.bf16.msra.mxu0 %v5988_v34  ;;  %8131 = vmatprep.mubr.msk.bf16.mxu0 %vm8388_vm0, %v8387_v0 }
 0x23d   : > { %v3256_v29 = vadd.f32 %v3251_v2, %v3208_v5  ;;  %v7804_v25 = vpop.f32.mrb[115].mxu1  ;;  %8141 = vmatprep.subr.bf16.mxu0 %v8387_v0 }
 0x23e   : > { %v3299_v58 = vpop.f32.mrb[116].mxu0 }
 0x23f   : > { %v3306_v23 = vadd.f32 %v3299_v58, %v3255_v46  ;;  %v7809_v10 = vpop.f32.mrb[117].mxu0  ;;  %8126 = vmatmul.mubr.msk.bf16.vlgmr.msra.gmra.mrb[220].mxu1 %vm229_vm2, %v9454_v33  ;;  %v6132_v33 = vsel %vm233_vm1, %v9266_v36, 0  ;;  %v6179_v36 = vsel %vm233_vm1, %v8364_v27, 0  ;;  %v8369_v27 = vld [vmem:[%s9883_s0 + $0x40] sm:$0xff]  }
 0x240   : > { %v3302_v21 = vpop.f32.mrb[118].mxu0  ;;  %8136 = vmatpush3.bf16.msra.mxu1 %v6032_v56  ;;  %8137 = vmatprep.mubr.msk.bf16.mxu1 %vm8388_vm0, %v8387_v0  ;;  %v6376_v56 = vsel %vm233_vm1, %v8366_v26, 0 }
 0x241   : > { %v3307_v41 = vadd.f32 %v3302_v21, %v3256_v29  ;;  %v7810_v63 = vpop.f32.mrb[119].mxu0  ;;  %8147 = vmatprep.subr.bf16.mxu1 %v8387_v0 }
 0x242   : > { %v3350_v62 = vpop.f32.mrb[116].mxu1 }
 0x243   : > { %v3357_v8 = vadd.f32 %v3350_v62, %v3306_v23  ;;  %v7815_v18 = vpop.f32.mrb[117].mxu1  ;;  %8132 = vmatmul.mubr.msk.bf16.vlgmr.msra.gmra.mrb[224].mxu0 %vm229_vm2, %v9609_v12 }
 0x244   : > { %v3353_v39 = vpop.f32.mrb[118].mxu1  ;;  %8142 = vmatpush3.bf16.msra.mxu0 %v6081_v47  ;;  %8143 = vmatprep.mubr.msk.bf16.mxu0 %vm8388_vm0, %v8387_v0 }
 0x245   : > { %v3358_v59 = vadd.f32 %v3353_v39, %v3307_v41  ;;  %v7816_v50 = vpop.f32.mrb[119].mxu1  ;;  %8153 = vmatprep.subr.bf16.mxu0 %v8387_v0 }
 0x246   : > { %v3398_v40 = vpop.f32.mrb[120].mxu0 }
 0x247   : > { %v3405_v42 = vadd.f32 %v3398_v40, %v3357_v8  ;;  %v7821_v51 = vpop.f32.mrb[121].mxu0  ;;  %8138 = vmatmul.mubr.msk.bf16.vlgmr.msra.gmra.mrb[224].mxu1 %vm229_vm2, %v9621_v43  ;;  %v8367_v8 = vld [vmem:[%s8431_s17 + $0x44] sm:$0xf]  ;;  %v6475_v40 = vsel %vm233_vm1, %v9289_v7, 0  ;;  %v6526_v7 = vsel %vm233_vm1, %v9293_v37, 0 }
 0x248   : > { %v3401_v12 = vpop.f32.mrb[122].mxu0  ;;  %8148 = vmatpush3.bf16.msra.mxu1 %v6132_v33  ;;  %8149 = vmatprep.mubr.msk.bf16.mxu1 %vm8388_vm0, %v8387_v0  ;;  %v6424_v18 = vsel %vm233_vm1, %v8367_v8, 0 }
 0x249   : > { %v3406_v20 = vadd.f32 %v3401_v12, %v3358_v59  ;;  %v7822_v35 = vpop.f32.mrb[123].mxu0  ;;  %8159 = vmatprep.subr.bf16.mxu1 %v8387_v0  ;;  %v8368_v59 = vld [vmem:[%s9883_s0 + $0x38] sm:$0xff]  }
 0x24a   : > { %v3446_v17 = vpop.f32.mrb[120].mxu1 }
 0x24b   : > { %v3453_v4 = vadd.f32 %v3446_v17, %v3405_v42  ;;  %v7827_v54 = vpop.f32.mrb[121].mxu1  ;;  %8144 = vmatmul.mubr.msk.bf16.vlgmr.msra.gmra.mrb[228].mxu0 %vm229_vm2, %v9480_v6  ;;  %v6277_v6 = vsel %vm233_vm1, %v9275_v30, 0 }
 0x24c   : > { %v3449_v43 = vpop.f32.mrb[122].mxu1  ;;  %8154 = vmatpush3.bf16.msra.mxu0 %v6179_v36  ;;  %8155 = vmatprep.mubr.msk.bf16.mxu0 %vm8388_vm0, %v8387_v0 }
 0x24d   : > { %v3454_v13 = vadd.f32 %v3449_v43, %v3406_v20  ;;  %v7828_v32 = vpop.f32.mrb[123].mxu1  ;;  %8165 = vmatprep.subr.bf16.mxu0 %v8387_v0 }
 0x24e   : > { %v3497_v44 = vpop.f32.mrb[124].mxu0  ;;  %v8370_v32 = vld [vmem:[%s9883_s0 + $0x48] sm:$0xff]  }
 0x24f   : > { %v3504_v9 = vadd.f32 %v3497_v44, %v3453_v4  ;;  %v7833_v3 = vpop.f32.mrb[125].mxu0  ;;  %8150 = vmatmul.mubr.msk.bf16.vlgmr.msra.gmra.mrb[228].mxu1 %vm229_vm2, %v9492_v52  ;;  %v6328_v52 = vsel %vm233_vm1, %v9280_v1, 0  ;;  %v8371_v44 = vld [vmem:[%s8431_s17 + $0x68] sm:$0xf] }
 0x250   : > { %v3500_v38 = vpop.f32.mrb[126].mxu0  ;;  %8160 = vmatpush3.bf16.msra.mxu1 %v6226_v57  ;;  %8161 = vmatprep.mubr.msk.bf16.mxu1 %vm8388_vm0, %v8387_v0 }
 0x251   : > { %v3505_v45 = vadd.f32 %v3500_v38, %v3454_v13  ;;  %v7834_v53 = vpop.f32.mrb[127].mxu0  ;;  %8171 = vmatprep.subr.bf16.mxu1 %v8387_v0 }
 0x252   : > { %v3548_v60 = vpop.f32.mrb[124].mxu1 }
 0x253   : > { %v3555_v14 = vadd.f32 %v3548_v60, %v3504_v9  ;;  %v7839_v5 = vpop.f32.mrb[125].mxu1  ;;  %8156 = vmatmul.mubr.msk.bf16.vlgmr.msra.gmra.mrb[232].mxu0 %vm229_vm2, %v9504_v28  ;;  %v6574_v9 = vsel %vm233_vm1, %v8371_v44, 0 }
 0x254   : > { %v3551_v31 = vpop.f32.mrb[126].mxu1  ;;  %8166 = vmatpush3.bf16.msra.mxu0 %v6277_v6  ;;  %8167 = vmatprep.mubr.msk.bf16.mxu0 %vm8388_vm0, %v8387_v0  ;;  %v8373_v5 = vld [vmem:[%s8431_s17 + $0x8c] sm:$0xf] }
 0x255   : > { %v3557_v30 = vadd.f32 %v3555_v14, %v9318_v15  ;;  %v3556_v11 = vadd.f32 %v3551_v31, %v3505_v45  ;;  %v7840_v34 = vpop.f32.mrb[127].mxu1  ;;  %8177 = vmatprep.subr.bf16.mxu0 %v8387_v0  ;;  %v8372_v45 = vld [vmem:[%s9883_s0 + $0x50] sm:$0xff]   ;;  %v6622_v31 = vsel %vm233_vm1, %v8373_v5, 0 }
 0x256   : > { %v3615_v24 = vpop.f32.mrb[128].mxu0  ;;  %v8374_v34 = vld [vmem:[%s9883_s0 + $0x58] sm:$0xff]  }
 0x257   : > { %vm3559_vm10 = vcmp.gt.f32.partialorder %v3557_v30, 0.0  ;;  %v3561_v46 = vmul.f32 0.2, %v3557_v30  ;;  %v3558_v28 = vadd.f32 %v3556_v11, %v9322_v22  ;;  %8162 = vmatmul.mubr.msk.bf16.vlgmr.msra.gmra.mrb[232].mxu1 %vm229_vm2, %v9518_v16  ;;  %v7845_v49 = vpop.f32.mrb[129].mxu0 }
 0x258   : > { %v3618_v2 = vpop.f32.mrb[130].mxu0  ;;  %8172 = vmatpush3.bf16.msra.mxu1 %v6328_v52  ;;  %8173 = vmatprep.mubr.msk.bf16.mxu1 %vm8388_vm0, %v8387_v0 }
 0x259   : > { %v3563_v1 = vsel %vm3559_vm10, %v3557_v30, %v3561_v46  ;;  %vm3560_vm11 = vcmp.gt.f32.partialorder %v3558_v28, 0.0  ;;  %v3562_v29 = vmul.f32 0.2, %v3558_v28  ;;  %v7846_v25 = vpop.f32.mrb[131].mxu0  ;;  %8183 = vmatprep.subr.bf16.mxu1 %v8387_v0  ;;  %v6673_v46 = vsel %vm233_vm1, %v9302_v61, 0 }
 0x25a   : > { %v7191_v58 = vpack.c.bf16 %v3563_v1, %v3563_v1  ;;  %v3659_v16 = vpop.f32.mrb[128].mxu1  ;;  %v8375_v25 = vld [vmem:[%s9883_s0 + $0x60] sm:$0xff]   ;;  %v6724_v61 = vsel %vm233_vm1, %v9309_v48, 0 }
 0x25b   : > { %v3564_v23 = vsel %vm3560_vm11, %v3558_v28, %v3562_v29  ;;  %v3660_v10 = vadd.f32 %v3659_v16, %v3615_v24  ;;  %8168 = vmatmul.mubr.msk.bf16.vlgmr.msra.gmra.mrb[236].mxu0 %vm229_vm2, %v9530_v19  ;;  %v7851_v21 = vpop.f32.mrb[129].mxu1 }
 0x25c   : > { %7036 = vst.msk [vmem:[%s9339_s13 + $0x18] sm:$0xf] %vm1164_vm4, %v7191_v58  ;;  %v7192_v47 = vpack.c.bf16 %v3564_v23, %v3564_v23  ;;  %v3662_v41 = vpop.f32.mrb[130].mxu1  ;;  %8178 = vmatpush3.bf16.msra.mxu0 %v6376_v56  ;;  %8179 = vmatprep.mubr.msk.bf16.mxu0 %vm8388_vm0, %v8387_v0  ;;  %v8376_v21 = vld [vmem:[%s9883_s0 + $0x68] sm:$0xff]  }
 0x25d   : > { %v3663_v63 = vadd.f32 %v3662_v41, %v3618_v2  ;;  %v7852_v62 = vpop.f32.mrb[131].mxu1  ;;  %8189 = vmatprep.subr.bf16.mxu0 %v8387_v0 }
 0x25e   : > { %7037 = vst.msk [vmem:[%s9339_s13 + $0x1c] sm:$0xf] %vm1164_vm4, %v7192_v47  ;;  %v3708_v39 = vpop.f32.mrb[132].mxu0 }
 0x25f   : > { %v3715_v19 = vadd.f32 %v3708_v39, %v3660_v10  ;;  %v7857_v33 = vpop.f32.mrb[133].mxu0  ;;  %8174 = vmatmul.mubr.msk.bf16.vlgmr.msra.gmra.mrb[236].mxu1 %vm229_vm2, %v8368_v59 }
 0x260   : > { %v3711_v50 = vpop.f32.mrb[134].mxu0  ;;  %8184 = vmatpush3.bf16.msra.mxu1 %v6424_v18  ;;  %8185 = vmatprep.mubr.msk.bf16.mxu1 %vm8388_vm0, %v8387_v0  ;;  %v8377_v18 = vld [vmem:[%s9883_s0 + $0x70] sm:$0xff]  }
 0x261   : > { %v3716_v42 = vadd.f32 %v3711_v50, %v3663_v63  ;;  %v7858_v51 = vpop.f32.mrb[135].mxu0  ;;  %8195 = vmatprep.subr.bf16.mxu1 %v8387_v0 }
 0x262   : > { %v3759_v12 = vpop.f32.mrb[132].mxu1 }
 0x263   : > { %v3766_v20 = vadd.f32 %v3759_v12, %v3715_v19  ;;  %v7863_v35 = vpop.f32.mrb[133].mxu1  ;;  %8180 = vmatmul.mubr.msk.bf16.vlgmr.msra.gmra.mrb[240].mxu0 %vm229_vm2, %v8369_v27 }
 0x264   : > { %v3762_v36 = vpop.f32.mrb[134].mxu1  ;;  %8190 = vmatpush3.bf16.msra.mxu0 %v6475_v40  ;;  %8191 = vmatprep.mubr.msk.bf16.mxu0 %vm8388_vm0, %v8387_v0 }
 0x265   : > { %v3767_v17 = vadd.f32 %v3762_v36, %v3716_v42  ;;  %v7864_v4 = vpop.f32.mrb[135].mxu1  ;;  %8201 = vmatprep.subr.bf16.mxu0 %v8387_v0 }
 0x266   : > { %v3806_v54 = vpop.f32.mrb[136].mxu0 }
 0x267   : > { %v3813_v43 = vadd.f32 %v3806_v54, %v3766_v20  ;;  %v7869_v13 = vpop.f32.mrb[137].mxu0  ;;  %8186 = vmatmul.mubr.msk.bf16.vlgmr.msra.gmra.mrb[240].mxu1 %vm229_vm2, %v8370_v32 }
 0x268   : > { %v3809_v55 = vpop.f32.mrb[138].mxu0  ;;  %8196 = vmatpush3.bf16.msra.mxu1 %v6526_v7  ;;  %8197 = vmatprep.mubr.msk.bf16.mxu1 %vm8388_vm0, %v8387_v0 }
 0x269   : > { %v3814_v37 = vadd.f32 %v3809_v55, %v3767_v17  ;;  %v7870_v57 = vpop.f32.mrb[139].mxu0  ;;  %8207 = vmatprep.subr.bf16.mxu1 %v8387_v0 }
 0x26a   : > { %v3853_v3 = vpop.f32.mrb[136].mxu1 }
 0x26b   : > { %v3860_v38 = vadd.f32 %v3853_v3, %v3813_v43  ;;  %v7875_v6 = vpop.f32.mrb[137].mxu1  ;;  %8192 = vmatmul.mubr.msk.bf16.vlgmr.msra.gmra.mrb[244].mxu0 %vm229_vm2, %v8372_v45 }
 0x26c   : > { %v3856_v53 = vpop.f32.mrb[138].mxu1  ;;  %8202 = vmatpush3.bf16.msra.mxu0 %v6574_v9  ;;  %8203 = vmatprep.mubr.msk.bf16.mxu0 %vm8388_vm0, %v8387_v0 }
 0x26d   : > { %v3861_v60 = vadd.f32 %v3856_v53, %v3814_v37  ;;  %v7876_v14 = vpop.f32.mrb[139].mxu1  ;;  %8213 = vmatprep.subr.bf16.mxu0 %v8387_v0 }
 0x26e   : > { %v3904_v52 = vpop.f32.mrb[140].mxu0 }
 0x26f   : > { %v3911_v30 = vadd.f32 %v3904_v52, %v3860_v38  ;;  %v7881_v11 = vpop.f32.mrb[141].mxu0  ;;  %8198 = vmatmul.mubr.msk.bf16.vlgmr.msra.gmra.mrb[244].mxu1 %vm229_vm2, %v8374_v34 }
 0x270   : > { %v3907_v24 = vpop.f32.mrb[142].mxu0  ;;  %8208 = vmatpush3.bf16.msra.mxu1 %v6622_v31  ;;  %8209 = vmatprep.mubr.msk.bf16.mxu1 %vm8388_vm0, %v8387_v0 }
 0x271   : > { %v3912_v28 = vadd.f32 %v3907_v24, %v3861_v60  ;;  %v7882_v49 = vpop.f32.mrb[143].mxu0  ;;  %8219 = vmatprep.subr.bf16.mxu1 %v8387_v0 }
 0x272   : > { %v3955_v2 = vpop.f32.mrb[140].mxu1 }
 0x273   : > { %v3962_v1 = vadd.f32 %v3955_v2, %v3911_v30  ;;  %v7887_v29 = vpop.f32.mrb[141].mxu1  ;;  %8204 = vmatmul.mubr.msk.bf16.vlgmr.msra.gmra.mrb[248].mxu0 %vm229_vm2, %v8375_v25 }
 0x274   : > { %v3958_v26 = vpop.f32.mrb[142].mxu1  ;;  %8214 = vmatpush3.bf16.msra.mxu0 %v6673_v46  ;;  %8215 = vmatprep.mubr.msk.bf16.mxu0 %vm8388_vm0, %v8387_v0 }
 0x275   : > { %v3963_v56 = vadd.f32 %v3958_v26, %v3912_v28  ;;  %v7888_v58 = vpop.f32.mrb[143].mxu1 }
 0x276   : > { %v4003_v16 = vpop.f32.mrb[144].mxu0 }
 0x277   : > { %v4010_v23 = vadd.f32 %v4003_v16, %v3962_v1  ;;  %v7893_v10 = vpop.f32.mrb[145].mxu0  ;;  %8210 = vmatmul.mubr.msk.bf16.vlgmr.msra.gmra.mrb[248].mxu1 %vm229_vm2, %v8376_v21 }
 0x278   : > { %v4006_v47 = vpop.f32.mrb[146].mxu0  ;;  %8220 = vmatpush3.bf16.msra.mxu1 %v6724_v61  ;;  %8221 = vmatprep.mubr.msk.bf16.mxu1 %vm8388_vm0, %v8387_v0  ;;  %v8378_v0 = vld [vmem:[%s9883_s0 + $0x78] sm:$0xff]  }
 0x279   : > { %v4011_v41 = vadd.f32 %v4006_v47, %v3963_v56  ;;  %v7894_v63 = vpop.f32.mrb[147].mxu0 }
 0x27a   : > { %v4051_v62 = vpop.f32.mrb[144].mxu1 }
 0x27b   : > { %v4058_v48 = vadd.f32 %v4051_v62, %v4010_v23  ;;  %v7899_v8 = vpop.f32.mrb[145].mxu1  ;;  %8216 = vmatmul.mubr.msk.bf16.vlgmr.msra.gmra.mrb[252].mxu0 %vm229_vm2, %v8377_v18 }
 0x27c   : > { %v4054_v39 = vpop.f32.mrb[146].mxu1 }
 0x27d   : > { %v4059_v19 = vadd.f32 %v4054_v39, %v4011_v41  ;;  %v7900_v33 = vpop.f32.mrb[147].mxu1 }
 0x27e   : > { %v4102_v59 = vpop.f32.mrb[148].mxu0 }
 0x27f   : > { %v4109_v50 = vadd.f32 %v4102_v59, %v4058_v48  ;;  %v7905_v40 = vpop.f32.mrb[149].mxu0  ;;  %8222 = vmatmul.mubr.msk.bf16.vlgmr.msra.gmra.mrb[252].mxu1 %vm229_vm2, %v8378_v0 }
 0x280   : > { %v4105_v42 = vpop.f32.mrb[150].mxu0 }
 0x281   : > { %v4110_v51 = vadd.f32 %v4105_v42, %v4059_v19  ;;  %v7906_v12 = vpop.f32.mrb[151].mxu0 }
 0x282   : > { %v4153_v20 = vpop.f32.mrb[148].mxu1 }
 0x283   : > { %v4160_v35 = vadd.f32 %v4153_v20, %v4109_v50  ;;  %v7911_v27 = vpop.f32.mrb[149].mxu1 }
 0x284   : > { %v4156_v36 = vpop.f32.mrb[150].mxu1 }
 0x285   : > { %v4161_v7 = vadd.f32 %v4156_v36, %v4110_v51  ;;  %v7912_v17 = vpop.f32.mrb[151].mxu1 }
 0x286   : > { %v4201_v4 = vpop.f32.mrb[152].mxu0 }
 0x287   : > { %v4208_v54 = vadd.f32 %v4201_v4, %v4160_v35  ;;  %v7917_v43 = vpop.f32.mrb[153].mxu0 }
 0x288   : > { %v4204_v13 = vpop.f32.mrb[154].mxu0 }
 0x289   : > { %v4209_v32 = vadd.f32 %v4204_v13, %v4161_v7  ;;  %v7918_v55 = vpop.f32.mrb[155].mxu0 }
 0x28a   : > { %v4249_v37 = vpop.f32.mrb[152].mxu1 }
 0x28b   : > { %v4256_v57 = vadd.f32 %v4249_v37, %v4208_v54  ;;  %v7923_v44 = vpop.f32.mrb[153].mxu1 }
 0x28c   : > { %v4252_v9 = vpop.f32.mrb[154].mxu1 }
 0x28d   : > { %v4257_v3 = vadd.f32 %v4252_v9, %v4209_v32  ;;  %v7924_v38 = vpop.f32.mrb[155].mxu1 }
 0x28e   : > { %v4300_v6 = vpop.f32.mrb[156].mxu0 }
 0x28f   : > { %v4307_v45 = vadd.f32 %v4300_v6, %v4256_v57  ;;  %v7929_v53 = vpop.f32.mrb[157].mxu0 }
 0x290   : > { %v4303_v60 = vpop.f32.mrb[158].mxu0 }
 0x291   : > { %v4308_v14 = vadd.f32 %v4303_v60, %v4257_v3  ;;  %v7930_v5 = vpop.f32.mrb[159].mxu0 }
 0x292   : > { %v4351_v31 = vpop.f32.mrb[156].mxu1 }
 0x293   : > { %v4358_v52 = vadd.f32 %v4351_v31, %v4307_v45  ;;  %v7935_v30 = vpop.f32.mrb[157].mxu1 }
 0x294   : > { %v4354_v11 = vpop.f32.mrb[158].mxu1 }
 0x295   : > { %v4360_v34 = vadd.f32 %v4358_v52, %v9318_v15  ;;  %v4359_v24 = vadd.f32 %v4354_v11, %v4308_v14  ;;  %v7936_v46 = vpop.f32.mrb[159].mxu1 }
 0x296   : > { %v4418_v28 = vpop.f32.mrb[160].mxu0 }
 0x297   : > { %vm4362_vm12 = vcmp.gt.f32.partialorder %v4360_v34, 0.0  ;;  %v4364_v49 = vmul.f32 0.2, %v4360_v34  ;;  %v4361_v2 = vadd.f32 %v4359_v24, %v9322_v22  ;;  %v7941_v1 = vpop.f32.mrb[161].mxu0 }
 0x298   : > { %v4421_v29 = vpop.f32.mrb[162].mxu0 }
 0x299   : > { %v4366_v25 = vsel %vm4362_vm12, %v4360_v34, %v4364_v49  ;;  %vm4363_vm13 = vcmp.gt.f32.partialorder %v4361_v2, 0.0  ;;  %v4365_v26 = vmul.f32 0.2, %v4361_v2  ;;  %v7942_v61 = vpop.f32.mrb[163].mxu0 }
 0x29a   : > { %v7193_v56 = vpack.c.bf16 %v4366_v25, %v4366_v25  ;;  %v4462_v58 = vpop.f32.mrb[160].mxu1 }
 0x29b   : > { %v4367_v16 = vsel %vm4363_vm13, %v4361_v2, %v4365_v26  ;;  %v4463_v23 = vadd.f32 %v4462_v58, %v4418_v28  ;;  %v7947_v10 = vpop.f32.mrb[161].mxu1 }
 0x29c   : > { %7072 = vst.msk [vmem:[%s9339_s13 + $0x20] sm:$0xf] %vm1164_vm4, %v7193_v56  ;;  %v7194_v21 = vpack.c.bf16 %v4367_v16, %v4367_v16  ;;  %v4465_v47 = vpop.f32.mrb[162].mxu1 }
 0x29d   : > { %v4466_v41 = vadd.f32 %v4465_v47, %v4421_v29  ;;  %v7948_v63 = vpop.f32.mrb[163].mxu1 }
 0x29e   : > { %7073 = vst.msk [vmem:[%s9339_s13 + $0x24] sm:$0xf] %vm1164_vm4, %v7194_v21  ;;  %v4511_v62 = vpop.f32.mrb[164].mxu0 }
 0x29f   : > { %v4518_v48 = vadd.f32 %v4511_v62, %v4463_v23  ;;  %v7953_v8 = vpop.f32.mrb[165].mxu0 }
 0x2a0   : > { %v4514_v18 = vpop.f32.mrb[166].mxu0 }
 0x2a1   : > { %v4519_v39 = vadd.f32 %v4514_v18, %v4466_v41  ;;  %v7954_v19 = vpop.f32.mrb[167].mxu0 }
 0x2a2   : > { %v4562_v33 = vpop.f32.mrb[164].mxu1 }
 0x2a3   : > { %v4569_v59 = vadd.f32 %v4562_v33, %v4518_v48  ;;  %v7959_v50 = vpop.f32.mrb[165].mxu1 }
 0x2a4   : > { %v4565_v40 = vpop.f32.mrb[166].mxu1 }
 0x2a5   : > { %v4570_v0 = vadd.f32 %v4565_v40, %v4519_v39  ;;  %v7960_v42 = vpop.f32.mrb[167].mxu1 }
 0x2a6   : > { %v4609_v51 = vpop.f32.mrb[168].mxu0 }
 0x2a7   : > { %v4616_v12 = vadd.f32 %v4609_v51, %v4569_v59  ;;  %v7965_v20 = vpop.f32.mrb[169].mxu0 }
 0x2a8   : > { %v4612_v35 = vpop.f32.mrb[170].mxu0 }
 0x2a9   : > { %v4617_v27 = vadd.f32 %v4612_v35, %v4570_v0  ;;  %v7966_v36 = vpop.f32.mrb[171].mxu0 }
 0x2aa   : > { %v4656_v7 = vpop.f32.mrb[168].mxu1 }
 0x2ab   : > { %v4663_v17 = vadd.f32 %v4656_v7, %v4616_v12  ;;  %v7971_v4 = vpop.f32.mrb[169].mxu1 }
 0x2ac   : > { %v4659_v54 = vpop.f32.mrb[170].mxu1 }
 0x2ad   : > { %v4664_v43 = vadd.f32 %v4659_v54, %v4617_v27  ;;  %v7972_v13 = vpop.f32.mrb[171].mxu1 }
 0x2ae   : > { %v4707_v32 = vpop.f32.mrb[172].mxu0 }
 0x2af   : > { %v4714_v55 = vadd.f32 %v4707_v32, %v4663_v17  ;;  %v7977_v37 = vpop.f32.mrb[173].mxu0 }
 0x2b0   : > { %v4710_v57 = vpop.f32.mrb[174].mxu0 }
 0x2b1   : > { %v4715_v44 = vadd.f32 %v4710_v57, %v4664_v43  ;;  %v7978_v9 = vpop.f32.mrb[175].mxu0 }
 0x2b2   : > { %v4758_v3 = vpop.f32.mrb[172].mxu1 }
 0x2b3   : > { %v4765_v38 = vadd.f32 %v4758_v3, %v4714_v55  ;;  %v7983_v6 = vpop.f32.mrb[173].mxu1 }
 0x2b4   : > { %v4761_v45 = vpop.f32.mrb[174].mxu1 }
 0x2b5   : > { %v4766_v53 = vadd.f32 %v4761_v45, %v4715_v44  ;;  %v7984_v60 = vpop.f32.mrb[175].mxu1 }
 0x2b6   : > { %v4806_v14 = vpop.f32.mrb[176].mxu0 }
 0x2b7   : > { %v4813_v5 = vadd.f32 %v4806_v14, %v4765_v38  ;;  %v7989_v31 = vpop.f32.mrb[177].mxu0 }
 0x2b8   : > { %v4809_v52 = vpop.f32.mrb[178].mxu0 }
 0x2b9   : > { %v4814_v30 = vadd.f32 %v4809_v52, %v4766_v53  ;;  %v7990_v11 = vpop.f32.mrb[179].mxu0 }
 0x2ba   : > { %v4854_v34 = vpop.f32.mrb[176].mxu1 }
 0x2bb   : > { %v4861_v24 = vadd.f32 %v4854_v34, %v4813_v5  ;;  %v7995_v46 = vpop.f32.mrb[177].mxu1 }
 0x2bc   : > { %v4857_v28 = vpop.f32.mrb[178].mxu1 }
 0x2bd   : > { %v4862_v49 = vadd.f32 %v4857_v28, %v4814_v30  ;;  %v7996_v2 = vpop.f32.mrb[179].mxu1 }
 0x2be   : > { %v4905_v1 = vpop.f32.mrb[180].mxu0 }
 0x2bf   : > { %v4912_v29 = vadd.f32 %v4905_v1, %v4861_v24  ;;  %v8001_v25 = vpop.f32.mrb[181].mxu0 }
 0x2c0   : > { %v4908_v26 = vpop.f32.mrb[182].mxu0 }
 0x2c1   : > { %v4913_v61 = vadd.f32 %v4908_v26, %v4862_v49  ;;  %v8002_v56 = vpop.f32.mrb[183].mxu0 }
 0x2c2   : > { %v4956_v58 = vpop.f32.mrb[180].mxu1 }
 0x2c3   : > { %v4963_v16 = vadd.f32 %v4956_v58, %v4912_v29  ;;  %v8007_v23 = vpop.f32.mrb[181].mxu1 }
 0x2c4   : > { %v4959_v10 = vpop.f32.mrb[182].mxu1 }
 0x2c5   : > { %v4964_v21 = vadd.f32 %v4959_v10, %v4913_v61  ;;  %v8008_v47 = vpop.f32.mrb[183].mxu1 }
 0x2c6   : > { %v5004_v41 = vpop.f32.mrb[184].mxu0 }
 0x2c7   : > { %v5011_v63 = vadd.f32 %v5004_v41, %v4963_v16  ;;  %v8013_v62 = vpop.f32.mrb[185].mxu0 }
 0x2c8   : > { %v5007_v48 = vpop.f32.mrb[186].mxu0 }
 0x2c9   : > { %v5012_v8 = vadd.f32 %v5007_v48, %v4964_v21  ;;  %v8014_v18 = vpop.f32.mrb[187].mxu0 }
 0x2ca   : > { %v5052_v39 = vpop.f32.mrb[184].mxu1 }
 0x2cb   : > { %v5059_v19 = vadd.f32 %v5052_v39, %v5011_v63  ;;  %v8019_v33 = vpop.f32.mrb[185].mxu1 }
 0x2cc   : > { %v5055_v59 = vpop.f32.mrb[186].mxu1 }
 0x2cd   : > { %v5060_v50 = vadd.f32 %v5055_v59, %v5012_v8  ;;  %v8020_v40 = vpop.f32.mrb[187].mxu1 }
 0x2ce   : > { %v5103_v0 = vpop.f32.mrb[188].mxu0 }
 0x2cf   : > { %v5110_v42 = vadd.f32 %v5103_v0, %v5059_v19  ;;  %v8025_v51 = vpop.f32.mrb[189].mxu0 }
 0x2d0   : > { %v5106_v12 = vpop.f32.mrb[190].mxu0 }
 0x2d1   : > { %v5111_v20 = vadd.f32 %v5106_v12, %v5060_v50  ;;  %v8026_v35 = vpop.f32.mrb[191].mxu0 }
 0x2d2   : > { %v5154_v27 = vpop.f32.mrb[188].mxu1 }
 0x2d3   : > { %v5161_v36 = vadd.f32 %v5154_v27, %v5110_v42  ;;  %v8031_v7 = vpop.f32.mrb[189].mxu1 }
 0x2d4   : > { %v5157_v17 = vpop.f32.mrb[190].mxu1 }
 0x2d5   : > { %v5163_v4 = vadd.f32 %v5161_v36, %v9318_v15  ;;  %v5162_v54 = vadd.f32 %v5157_v17, %v5111_v20  ;;  %v8032_v43 = vpop.f32.mrb[191].mxu1 }
 0x2d6   : > { %v5221_v13 = vpop.f32.mrb[192].mxu0 }
 0x2d7   : > { %vm5165_vm14 = vcmp.gt.f32.partialorder %v5163_v4, 0.0  ;;  %v5167_v32 = vmul.f32 0.2, %v5163_v4  ;;  %v5164_v55 = vadd.f32 %v5162_v54, %v9322_v22  ;;  %v8037_v37 = vpop.f32.mrb[193].mxu0 }
 0x2d8   : > { %v5224_v57 = vpop.f32.mrb[194].mxu0 }
 0x2d9   : > { %v5169_v44 = vsel %vm5165_vm14, %v5163_v4, %v5167_v32  ;;  %vm5166_vm15 = vcmp.gt.f32.partialorder %v5164_v55, 0.0  ;;  %v5168_v9 = vmul.f32 0.2, %v5164_v55  ;;  %v8038_v3 = vpop.f32.mrb[195].mxu0 }
 0x2da   : > { %v7195_v38 = vpack.c.bf16 %v5169_v44, %v5169_v44  ;;  %v5265_v6 = vpop.f32.mrb[192].mxu1 }
 0x2db   : > { %v5170_v45 = vsel %vm5166_vm15, %v5164_v55, %v5168_v9  ;;  %v5266_v53 = vadd.f32 %v5265_v6, %v5221_v13  ;;  %v8043_v60 = vpop.f32.mrb[193].mxu1 }
 0x2dc   : > { %7108 = vst.msk [vmem:[%s9339_s13 + $0x28] sm:$0xf] %vm1164_vm4, %v7195_v38  ;;  %v7196_v14 = vpack.c.bf16 %v5170_v45, %v5170_v45  ;;  %v5268_v5 = vpop.f32.mrb[194].mxu1 }
 0x2dd   : > { %v5269_v31 = vadd.f32 %v5268_v5, %v5224_v57  ;;  %v8044_v52 = vpop.f32.mrb[195].mxu1 }
 0x2de   : > { %7109 = vst.msk [vmem:[%s9339_s13 + $0x2c] sm:$0xf] %vm1164_vm4, %v7196_v14  ;;  %v5314_v30 = vpop.f32.mrb[196].mxu0 }
 0x2df   : > { %v5321_v11 = vadd.f32 %v5314_v30, %v5266_v53  ;;  %v8049_v34 = vpop.f32.mrb[197].mxu0 }
 0x2e0   : > { %v5317_v24 = vpop.f32.mrb[198].mxu0 }
 0x2e1   : > { %v5322_v46 = vadd.f32 %v5317_v24, %v5269_v31  ;;  %v8050_v28 = vpop.f32.mrb[199].mxu0 }
 0x2e2   : > { %v5365_v49 = vpop.f32.mrb[196].mxu1 }
 0x2e3   : > { %v5372_v2 = vadd.f32 %v5365_v49, %v5321_v11  ;;  %v8055_v1 = vpop.f32.mrb[197].mxu1 }
 0x2e4   : > { %v5368_v29 = vpop.f32.mrb[198].mxu1 }
 0x2e5   : > { %v5373_v25 = vadd.f32 %v5368_v29, %v5322_v46  ;;  %v8056_v26 = vpop.f32.mrb[199].mxu1 }
 0x2e6   : > { %v5412_v61 = vpop.f32.mrb[200].mxu0 }
 0x2e7   : > { %v5419_v56 = vadd.f32 %v5412_v61, %v5372_v2  ;;  %v8061_v58 = vpop.f32.mrb[201].mxu0 }
 0x2e8   : > { %v5415_v16 = vpop.f32.mrb[202].mxu0 }
 0x2e9   : > { %v5420_v23 = vadd.f32 %v5415_v16, %v5373_v25  ;;  %v8062_v10 = vpop.f32.mrb[203].mxu0 }
 0x2ea   : > { %v5459_v21 = vpop.f32.mrb[200].mxu1 }
 0x2eb   : > { %v5466_v47 = vadd.f32 %v5459_v21, %v5419_v56  ;;  %v8067_v41 = vpop.f32.mrb[201].mxu1 }
 0x2ec   : > { %v5462_v63 = vpop.f32.mrb[202].mxu1 }
 0x2ed   : > { %v5467_v62 = vadd.f32 %v5462_v63, %v5420_v23  ;;  %v8068_v48 = vpop.f32.mrb[203].mxu1 }
 0x2ee   : > { %v5510_v8 = vpop.f32.mrb[204].mxu0 }
 0x2ef   : > { %v5517_v18 = vadd.f32 %v5510_v8, %v5466_v47  ;;  %v8073_v39 = vpop.f32.mrb[205].mxu0 }
 0x2f0   : > { %v5513_v19 = vpop.f32.mrb[206].mxu0 }
 0x2f1   : > { %v5518_v33 = vadd.f32 %v5513_v19, %v5467_v62  ;;  %v8074_v59 = vpop.f32.mrb[207].mxu0 }
 0x2f2   : > { %v5561_v50 = vpop.f32.mrb[204].mxu1 }
 0x2f3   : > { %v5568_v40 = vadd.f32 %v5561_v50, %v5517_v18  ;;  %v8079_v0 = vpop.f32.mrb[205].mxu1 }
 0x2f4   : > { %v5564_v42 = vpop.f32.mrb[206].mxu1 }
 0x2f5   : > { %v5569_v51 = vadd.f32 %v5564_v42, %v5518_v33  ;;  %v8080_v12 = vpop.f32.mrb[207].mxu1 }
 0x2f6   : > { %v5609_v20 = vpop.f32.mrb[208].mxu0 }
 0x2f7   : > { %v5616_v35 = vadd.f32 %v5609_v20, %v5568_v40  ;;  %v8085_v27 = vpop.f32.mrb[209].mxu0 }
 0x2f8   : > { %v5612_v36 = vpop.f32.mrb[210].mxu0 }
 0x2f9   : > { %v5617_v7 = vadd.f32 %v5612_v36, %v5569_v51  ;;  %v8086_v17 = vpop.f32.mrb[211].mxu0 }
 0x2fa   : > { %v5657_v4 = vpop.f32.mrb[208].mxu1 }
 0x2fb   : > { %v5664_v54 = vadd.f32 %v5657_v4, %v5616_v35  ;;  %v8091_v43 = vpop.f32.mrb[209].mxu1 }
 0x2fc   : > { %v5660_v13 = vpop.f32.mrb[210].mxu1 }
 0x2fd   : > { %v5665_v32 = vadd.f32 %v5660_v13, %v5617_v7  ;;  %v8092_v55 = vpop.f32.mrb[211].mxu1 }
 0x2fe   : > { %v5708_v37 = vpop.f32.mrb[212].mxu0 }
 0x2ff   : > { %v5715_v57 = vadd.f32 %v5708_v37, %v5664_v54  ;;  %v8097_v44 = vpop.f32.mrb[213].mxu0 }
 0x300   : > { %v5711_v9 = vpop.f32.mrb[214].mxu0 }
 0x301   : > { %v5716_v3 = vadd.f32 %v5711_v9, %v5665_v32  ;;  %v8098_v38 = vpop.f32.mrb[215].mxu0 }
 0x302   : > { %v5759_v6 = vpop.f32.mrb[212].mxu1 }
 0x303   : > { %v5766_v45 = vadd.f32 %v5759_v6, %v5715_v57  ;;  %v8103_v53 = vpop.f32.mrb[213].mxu1 }
 0x304   : > { %v5762_v60 = vpop.f32.mrb[214].mxu1 }
 0x305   : > { %v5767_v14 = vadd.f32 %v5762_v60, %v5716_v3  ;;  %v8104_v5 = vpop.f32.mrb[215].mxu1 }
 0x306   : > { %v5807_v31 = vpop.f32.mrb[216].mxu0 }
 0x307   : > { %v5814_v52 = vadd.f32 %v5807_v31, %v5766_v45  ;;  %v8109_v30 = vpop.f32.mrb[217].mxu0 }
 0x308   : > { %v5810_v11 = vpop.f32.mrb[218].mxu0 }
 0x309   : > { %v5815_v34 = vadd.f32 %v5810_v11, %v5767_v14  ;;  %v8110_v24 = vpop.f32.mrb[219].mxu0 }
 0x30a   : > { %v5855_v46 = vpop.f32.mrb[216].mxu1 }
 0x30b   : > { %v5862_v28 = vadd.f32 %v5855_v46, %v5814_v52  ;;  %v8115_v49 = vpop.f32.mrb[217].mxu1 }
 0x30c   : > { %v5858_v2 = vpop.f32.mrb[218].mxu1 }
 0x30d   : > { %v5863_v1 = vadd.f32 %v5858_v2, %v5815_v34  ;;  %v8116_v29 = vpop.f32.mrb[219].mxu1 }
 0x30e   : > { %v5906_v25 = vpop.f32.mrb[220].mxu0 }
 0x30f   : > { %v5913_v26 = vadd.f32 %v5906_v25, %v5862_v28  ;;  %v8121_v61 = vpop.f32.mrb[221].mxu0 }
 0x310   : > { %v5909_v56 = vpop.f32.mrb[222].mxu0 }
 0x311   : > { %v5914_v58 = vadd.f32 %v5909_v56, %v5863_v1  ;;  %v8122_v16 = vpop.f32.mrb[223].mxu0 }
 0x312   : > { %v5957_v23 = vpop.f32.mrb[220].mxu1 }
 0x313   : > { %v5964_v10 = vadd.f32 %v5957_v23, %v5913_v26  ;;  %v8127_v21 = vpop.f32.mrb[221].mxu1 }
 0x314   : > { %v5960_v47 = vpop.f32.mrb[222].mxu1 }
 0x315   : > { %v5966_v41 = vadd.f32 %v5964_v10, %v9318_v15  ;;  %v5965_v63 = vadd.f32 %v5960_v47, %v5914_v58  ;;  %v8128_v62 = vpop.f32.mrb[223].mxu1 }
 0x316   : > { %v6024_v48 = vpop.f32.mrb[224].mxu0 }
 0x317   : > { %vm5968_vm0 = vcmp.gt.f32.partialorder %v5966_v41, 0.0  ;;  %v5970_v8 = vmul.f32 0.2, %v5966_v41  ;;  %v5967_v18 = vadd.f32 %v5965_v63, %v9322_v22  ;;  %v8133_v39 = vpop.f32.mrb[225].mxu0 }
 0x318   : > { %v6027_v19 = vpop.f32.mrb[226].mxu0 }
 0x319   : > { %v5972_v33 = vsel %vm5968_vm0, %v5966_v41, %v5970_v8  ;;  %vm5969_vm1 = vcmp.gt.f32.partialorder %v5967_v18, 0.0  ;;  %v5971_v59 = vmul.f32 0.2, %v5967_v18  ;;  %v8134_v50 = vpop.f32.mrb[227].mxu0 }
 0x31a   : > { %v7197_v40 = vpack.c.bf16 %v5972_v33, %v5972_v33  ;;  %v6068_v0 = vpop.f32.mrb[224].mxu1 }
 0x31b   : > { %v5973_v42 = vsel %vm5969_vm1, %v5967_v18, %v5971_v59  ;;  %v6069_v51 = vadd.f32 %v6068_v0, %v6024_v48  ;;  %v8139_v12 = vpop.f32.mrb[225].mxu1 }
 0x31c   : > { %7144 = vst.msk [vmem:[%s9339_s13 + $0x30] sm:$0xf] %vm1164_vm4, %v7197_v40  ;;  %v7198_v20 = vpack.c.bf16 %v5973_v42, %v5973_v42  ;;  %v6071_v35 = vpop.f32.mrb[226].mxu1 }
 0x31d   : > { %v6072_v27 = vadd.f32 %v6071_v35, %v6027_v19  ;;  %v8140_v36 = vpop.f32.mrb[227].mxu1 }
 0x31e   : > { %7145 = vst.msk [vmem:[%s9339_s13 + $0x34] sm:$0xf] %vm1164_vm4, %v7198_v20  ;;  %v6117_v7 = vpop.f32.mrb[228].mxu0 }
 0x31f   : > { %v6124_v17 = vadd.f32 %v6117_v7, %v6069_v51  ;;  %v8145_v4 = vpop.f32.mrb[229].mxu0 }
 0x320   : > { %v6120_v54 = vpop.f32.mrb[230].mxu0 }
 0x321   : > { %v6125_v43 = vadd.f32 %v6120_v54, %v6072_v27  ;;  %v8146_v13 = vpop.f32.mrb[231].mxu0 }
 0x322   : > { %v6168_v32 = vpop.f32.mrb[228].mxu1 }
 0x323   : > { %v6175_v55 = vadd.f32 %v6168_v32, %v6124_v17  ;;  %v8151_v37 = vpop.f32.mrb[229].mxu1 }
 0x324   : > { %v6171_v57 = vpop.f32.mrb[230].mxu1 }
 0x325   : > { %v6176_v44 = vadd.f32 %v6171_v57, %v6125_v43  ;;  %v8152_v9 = vpop.f32.mrb[231].mxu1 }
 0x326   : > { %v6215_v3 = vpop.f32.mrb[232].mxu0 }
 0x327   : > { %v6222_v38 = vadd.f32 %v6215_v3, %v6175_v55  ;;  %v8157_v6 = vpop.f32.mrb[233].mxu0 }
 0x328   : > { %v6218_v45 = vpop.f32.mrb[234].mxu0 }
 0x329   : > { %v6223_v53 = vadd.f32 %v6218_v45, %v6176_v44  ;;  %v8158_v60 = vpop.f32.mrb[235].mxu0 }
 0x32a   : > { %v6262_v14 = vpop.f32.mrb[232].mxu1 }
 0x32b   : > { %v6269_v5 = vadd.f32 %v6262_v14, %v6222_v38  ;;  %v8163_v31 = vpop.f32.mrb[233].mxu1 }
 0x32c   : > { %v6265_v52 = vpop.f32.mrb[234].mxu1 }
 0x32d   : > { %v6270_v30 = vadd.f32 %v6265_v52, %v6223_v53  ;;  %v8164_v11 = vpop.f32.mrb[235].mxu1 }
 0x32e   : > { %v6313_v34 = vpop.f32.mrb[236].mxu0 }
 0x32f   : > { %v6320_v24 = vadd.f32 %v6313_v34, %v6269_v5  ;;  %v8169_v46 = vpop.f32.mrb[237].mxu0 }
 0x330   : > { %v6316_v28 = vpop.f32.mrb[238].mxu0 }
 0x331   : > { %v6321_v49 = vadd.f32 %v6316_v28, %v6270_v30  ;;  %v8170_v2 = vpop.f32.mrb[239].mxu0 }
 0x332   : > { %v6364_v1 = vpop.f32.mrb[236].mxu1 }
 0x333   : > { %v6371_v29 = vadd.f32 %v6364_v1, %v6320_v24  ;;  %v8175_v25 = vpop.f32.mrb[237].mxu1 }
 0x334   : > { %v6367_v26 = vpop.f32.mrb[238].mxu1 }
 0x335   : > { %v6372_v61 = vadd.f32 %v6367_v26, %v6321_v49  ;;  %v8176_v56 = vpop.f32.mrb[239].mxu1 }
 0x336   : > { %v6412_v58 = vpop.f32.mrb[240].mxu0 }
 0x337   : > { %v6419_v16 = vadd.f32 %v6412_v58, %v6371_v29  ;;  %v8181_v23 = vpop.f32.mrb[241].mxu0 }
 0x338   : > { %v6415_v10 = vpop.f32.mrb[242].mxu0 }
 0x339   : > { %v6420_v21 = vadd.f32 %v6415_v10, %v6372_v61  ;;  %v8182_v47 = vpop.f32.mrb[243].mxu0 }
 0x33a   : > { %v6460_v41 = vpop.f32.mrb[240].mxu1 }
 0x33b   : > { %v6467_v63 = vadd.f32 %v6460_v41, %v6419_v16  ;;  %v8187_v62 = vpop.f32.mrb[241].mxu1 }
 0x33c   : > { %v6463_v48 = vpop.f32.mrb[242].mxu1 }
 0x33d   : > { %v6468_v8 = vadd.f32 %v6463_v48, %v6420_v21  ;;  %v8188_v18 = vpop.f32.mrb[243].mxu1 }
 0x33e   : > { %v6511_v39 = vpop.f32.mrb[244].mxu0 }
 0x33f   : > { %v6518_v19 = vadd.f32 %v6511_v39, %v6467_v63  ;;  %v8193_v33 = vpop.f32.mrb[245].mxu0 }
 0x340   : > { %v6514_v59 = vpop.f32.mrb[246].mxu0 }
 0x341   : > { %v6519_v50 = vadd.f32 %v6514_v59, %v6468_v8  ;;  %v8194_v40 = vpop.f32.mrb[247].mxu0 }
 0x342   : > { %v6562_v0 = vpop.f32.mrb[244].mxu1 }
 0x343   : > { %v6569_v42 = vadd.f32 %v6562_v0, %v6518_v19  ;;  %v8199_v51 = vpop.f32.mrb[245].mxu1 }
 0x344   : > { %v6565_v12 = vpop.f32.mrb[246].mxu1 }
 0x345   : > { %v6570_v20 = vadd.f32 %v6565_v12, %v6519_v50  ;;  %v8200_v35 = vpop.f32.mrb[247].mxu1 }
 0x346   : > { %v6610_v27 = vpop.f32.mrb[248].mxu0 }
 0x347   : > { %v6617_v36 = vadd.f32 %v6610_v27, %v6569_v42  ;;  %v8205_v7 = vpop.f32.mrb[249].mxu0 }
 0x348   : > { %v6613_v17 = vpop.f32.mrb[250].mxu0 }
 0x349   : > { %v6618_v4 = vadd.f32 %v6613_v17, %v6570_v20  ;;  %v8206_v54 = vpop.f32.mrb[251].mxu0 }
 0x34a   : > { %v6658_v43 = vpop.f32.mrb[248].mxu1 }
 0x34b   : > { %v6665_v13 = vadd.f32 %v6658_v43, %v6617_v36  ;;  %v8211_v32 = vpop.f32.mrb[249].mxu1 }
 0x34c   : > { %v6661_v55 = vpop.f32.mrb[250].mxu1 }
 0x34d   : > { %v6666_v37 = vadd.f32 %v6661_v55, %v6618_v4  ;;  %v8212_v57 = vpop.f32.mrb[251].mxu1 }
 0x34e   : > { %v6709_v44 = vpop.f32.mrb[252].mxu0 }
 0x34f   : > { %v6716_v9 = vadd.f32 %v6709_v44, %v6665_v13  ;;  %v8217_v3 = vpop.f32.mrb[253].mxu0 }
 0x350   : > { %v6712_v38 = vpop.f32.mrb[254].mxu0 }
 0x351   : > { %v6717_v6 = vadd.f32 %v6712_v38, %v6666_v37  ;;  %v8218_v45 = vpop.f32.mrb[255].mxu0 }
 0x352   : > { %v6760_v53 = vpop.f32.mrb[252].mxu1 }
 0x353   : > { %v6767_v60 = vadd.f32 %v6760_v53, %v6716_v9  ;;  %v8223_v14 = vpop.f32.mrb[253].mxu1 }
 0x354   : > { %v6763_v5 = vpop.f32.mrb[254].mxu1 }
 0x355   : > { %v6769_v31 = vadd.f32 %v6767_v60, %v9318_v15  ;;  %v6768_v52 = vadd.f32 %v6763_v5, %v6717_v6  ;;  %v8224_v30 = vpop.f32.mrb[255].mxu1 }
 0x357   : > { %vm6771_vm2 = vcmp.gt.f32.partialorder %v6769_v31, 0.0  ;;  %v6773_v11 = vmul.f32 0.2, %v6769_v31  ;;  %v6770_v34 = vadd.f32 %v6768_v52, %v9322_v22 }
 0x359   : > { %v6775_v24 = vsel %vm6771_vm2, %v6769_v31, %v6773_v11  ;;  %vm6772_vm3 = vcmp.gt.f32.partialorder %v6770_v34, 0.0  ;;  %v6774_v46 = vmul.f32 0.2, %v6770_v34 }
 0x35a   : > { %v7199_v28 = vpack.c.bf16 %v6775_v24, %v6775_v24 }
 0x35b   : > { %v6776_v49 = vsel %vm6772_vm3, %v6770_v34, %v6774_v46 }
 0x35c   : > { %7180 = vst.msk [vmem:[%s9339_s13 + $0x38] sm:$0xf] %vm1164_vm4, %v7199_v28  ;;  %v7200_v2 = vpack.c.bf16 %v6776_v49, %v6776_v49 }
 0x35e   : > { %7181 = vst.msk [vmem:[%s9339_s13 + $0x3c] sm:$0xf] %vm1164_vm4, %v7200_v2 }
 0x35f PF: > { %s13_s12 = sadd.s32 1, %s8385_s12  }
 0x360   : > { %p10_p4 = scmp.ge.s32.totalorder %s13_s12, 4  }
 0x362   :  { %12 = sbr.rel (!%p10_p4) target bundleno = 1 (0x1), region = 119 }

</bundles_post_ra>
